<compile_context>
chip_gen: v7x
topology: tpu7x:2x2x1
jax: 0.10.0
libtpu: 0.0.40
codegen_flags: <defaults>
</compile_context>

<pallas_src>
import jax
import jax.numpy as jnp
from jax import lax
from jax.experimental import pallas as pl
from jax.experimental.pallas import tpu as pltpu

# ---- small synthetic dims (consistent with the module's forward) ----
B = 2      # batch
T = 8      # number of video frames
F = 64     # video feature dim (stands in for 4096)
H = 32     # GRU hidden size
E = 32     # word-embedding dim
V = 48     # vocabulary size
VP = 128   # vocab padded to a full lane width (lane-dense logits / log-probs)
GP = 128   # per-gate lane block: each GRU gate / attn query owns its own 128 lanes
L = 8      # max decoded caption length
BOS = 1    # <BOS> token id
NEG = -1e30  # padding bias for the fake vocab lanes


def seq2seq_kernel(vf_ref,                        # (T, B, F)   f32
                   gi_w_ref, gi_b_ref,            # (F, 3H) bf16, (1, 3H) f32   fused frame-proj + enc input gates
                   e_whh_ref, e_bhh_ref,          # (H, 3GP) bf16, (1, 3GP) f32 per-gate padded
                   att_we_ref, att_v_ref,         # (H, H) bf16, (1, H) f32
                   emb_proj_ref,                  # (VP, 3GP) bf16  fused embedding + dec input gates (emb part)
                   d_wih_c_ref, d_bih_ref,        # (H, 3GP) bf16, (1, 3GP) f32 dec input gates (context part)
                   dec_hw_ref, dec_hb_ref,        # (H, 4GP) bf16, (1, 4GP) f32 [d_whh gates | att_wh]
                   out_w_ref, out_b_ref,          # (H, VP) bf16, (1, VP) f32 (pad lanes = NEG)
                   logp_ref, pred_ref):           # (L, B, VP) f32, (L, B) i32
    f32 = jnp.float32
    bf16 = jnp.bfloat16

    # ---------------- encoder ----------------
    # Frame projection + input gates fused into one batched matmul (off the recurrence chain).
    x = vf_ref[...].reshape(T * B, F).astype(bf16)
    gi = jnp.dot(x, gi_w_ref[...], preferred_element_type=f32) + gi_b_ref[...]   # (T*B, 3H)
    gi = gi.reshape(T, B, 3 * H)
    gi_r = gi[:, :, :H]          # pre-split once, off the serial loop
    gi_z = gi[:, :, H:2 * H]
    gi_n = gi[:, :, 2 * H:]

    e_whh = e_whh_ref[...]       # (H, 3GP) bf16
    e_bhh = e_bhh_ref[...]       # (1, 3GP) f32

    h = jnp.zeros((B, H), f32)
    hs = []
    for t in range(T):           # static trip count -> fully unrolled; only h @ e_whh is serial
        gh = jnp.dot(h.astype(bf16), e_whh, preferred_element_type=f32) + e_bhh  # (B, 3GP)
        r = jax.nn.sigmoid(gi_r[t] + gh[:, 0:H])
        z = jax.nn.sigmoid(gi_z[t] + gh[:, GP:GP + H])
        n = jnp.tanh(gi_n[t] + r * gh[:, 2 * GP:2 * GP + H])
        h = (1.0 - z) * n + z * h
        hs.append(h)
    h_enc = h

    enc_out = jnp.stack(hs, axis=1)                                      # (B, T, H) f32
    enc_bf = enc_out.astype(bf16).reshape(B * T, H)
    # Attention keys and the context-side decoder input-gate projection: one batched matmul each,
    # reused by every decode step (removes the per-step context matmul entirely).
    att_key = jnp.dot(enc_bf, att_we_ref[...],
                      preferred_element_type=f32).reshape(B, T, H)       # (B, T, H)
    enc_proj = jnp.dot(enc_bf, d_wih_c_ref[...],
                       preferred_element_type=f32).reshape(B, T, 3 * GP)  # (B, T, 3GP)

    # ---------------- decoder: greedy inference ----------------
    att_v = att_v_ref[...].reshape(1, 1, H)
    dec_hb = dec_hb_ref[...]                                             # (1, 4GP) f32
    d_bih = d_bih_ref[...]                                               # (1, 3GP) f32
    out_b = out_b_ref[...]                                               # (1, VP)  f32
    iota_v = lax.broadcasted_iota(jnp.int32, (B, VP), 1)

    h = h_enc
    prev = jnp.full((B, 1), BOS, jnp.int32)
    logps = []
    preds = []
    for t in range(L):                                                   # static -> unrolled
        onehot = (iota_v == prev).astype(bf16)                           # (B, VP)

        # fused h-side matmul: GRU hidden gates + attention query in one MXU push;
        # per-gate 128-lane padding -> all slices below are 128-aligned (no lane rotates)
        hq = (jnp.dot(h.astype(bf16), dec_hw_ref[...], preferred_element_type=f32)
              + dec_hb)                                                  # (B, 4GP)
        q = hq[:, 3 * GP:3 * GP + H]                                     # (B, H)

        # additive (Bahdanau) attention; approx reciprocal -> EUP slot
        e = jnp.tanh(att_key + q[:, None, :])                            # (B, T, H)
        scores = jnp.sum(e * att_v, axis=-1)                             # (B, T)
        sm = jnp.max(scores, axis=-1, keepdims=True)
        se = jnp.exp(scores - sm)
        alpha = se * pl.reciprocal(jnp.sum(se, axis=-1, keepdims=True), approx=True)

        # decoder GRU input gates: embedding part via onehot @ emb_proj, context part via
        # the attention-weighted sum of precomputed enc_proj (exact algebra, no concat)
        gix = (jnp.dot(onehot, emb_proj_ref[...], preferred_element_type=f32)
               + jnp.sum(alpha[:, :, None] * enc_proj, axis=1)
               + d_bih)                                                  # (B, 3GP)
        r = jax.nn.sigmoid(gix[:, 0:H] + hq[:, 0:H])
        z = jax.nn.sigmoid(gix[:, GP:GP + H] + hq[:, GP:GP + H])
        n = jnp.tanh(gix[:, 2 * GP:2 * GP + H] + r * hq[:, 2 * GP:2 * GP + H])
        h = (1.0 - z) * n + z * h                                        # (B, H)

        # output projection over the padded vocab (f32 accumulate; pad lanes -> NEG via out_b)
        logits = (jnp.dot(h.astype(bf16), out_w_ref[...], preferred_element_type=f32)
                  + out_b)                                               # (B, VP)
        mm = jnp.max(logits, axis=-1, keepdims=True)
        sh = logits - mm
        logp = sh - jnp.log(jnp.sum(jnp.exp(sh), axis=-1, keepdims=True))
        # greedy argmax (first-max, torch.argmax convention); reuses mm so only one extra
        # lane reduce sits on the serial idx -> next-onehot chain; pad lanes can never win
        idx = jnp.min(jnp.where(logits == mm, iota_v, VP), axis=-1)      # (B,) i32

        logps.append(logp)
        preds.append(idx.astype(jnp.int32))
        prev = idx[:, None].astype(jnp.int32)

    # single lane-dense store for each output instead of 2*L tiny per-step stores
    logp_ref[...] = jnp.stack(logps, axis=0)                             # (L, B, VP)
    pred_ref[...] = jnp.stack(preds, axis=0)                             # (L, B)


def make_params(key):
    ks = jax.random.split(key, 18)
    s = 0.1
    return {
        "enc_w":   jax.random.normal(ks[0], (F, H), jnp.float32) * s,
        "enc_b":   jax.random.normal(ks[1], (1, H), jnp.float32) * s,
        "e_wih":   jax.random.normal(ks[2], (H, 3 * H), jnp.float32) * s,
        "e_whh":   jax.random.normal(ks[3], (H, 3 * H), jnp.float32) * s,
        "e_bih":   jax.random.normal(ks[4], (1, 3 * H), jnp.float32) * s,
        "e_bhh":   jax.random.normal(ks[5], (1, 3 * H), jnp.float32) * s,
        "emb":     jax.random.normal(ks[6], (V, E), jnp.float32) * s,
        "att_wh":  jax.random.normal(ks[7], (H, H), jnp.float32) * s,
        "att_we":  jax.random.normal(ks[8], (H, H), jnp.float32) * s,
        "att_b":   jax.random.normal(ks[9], (1, H), jnp.float32) * s,
        "att_v":   jax.random.normal(ks[10], (1, H), jnp.float32) * s,
        "d_wih_e": jax.random.normal(ks[11], (E, 3 * H), jnp.float32) * s,
        "d_wih_c": jax.random.normal(ks[12], (H, 3 * H), jnp.float32) * s,
        "d_whh":   jax.random.normal(ks[13], (H, 3 * H), jnp.float32) * s,
        "d_bih":   jax.random.normal(ks[14], (1, 3 * H), jnp.float32) * s,
        "d_bhh":   jax.random.normal(ks[15], (1, 3 * H), jnp.float32) * s,
        "out_w":   jax.random.normal(ks[16], (H, V), jnp.float32) * s,
        "out_b":   jax.random.normal(ks[17], (1, V), jnp.float32) * s,
    }
    # NOTE: real PyTorch GRU weights are (3H, in) and must be transposed to (in, 3H).


def _pad_gates(w, n_gates):
    """(in, n_gates*H) -> (in, n_gates*GP): gate g's H columns placed at lane offset g*GP."""
    out = jnp.zeros((w.shape[0], n_gates * GP), w.dtype)
    for g in range(n_gates):
        out = out.at[:, g * GP:g * GP + H].set(w[:, g * H:(g + 1) * H])
    return out


def video_captioning_forward(video_features, params, mode="inference"):
    """video_features: (B, T, F) float32. Returns (log_probs (B,L,V), preds (B,L))."""
    assert mode == "inference"
    f32, bf16 = jnp.float32, jnp.bfloat16
    vf_tm = jnp.transpose(video_features, (1, 0, 2)).astype(f32)              # (T, B, F)

    # ---- one-time wrapper-side parameter fusion / lane padding (ordinary XLA ops) ----
    # frame projection folded into the encoder input gates:
    gi_w = params["enc_w"] @ params["e_wih"]                                  # (F, 3H)
    gi_b = params["enc_b"] @ params["e_wih"] + params["e_bih"]                # (1, 3H)
    # embedding lookup folded into the decoder input-gate (embedding part), vocab padded:
    emb_pad = jnp.zeros((VP, E), f32).at[:V].set(params["emb"])
    emb_proj = _pad_gates(emb_pad @ params["d_wih_e"], 3)                     # (VP, 3GP)
    d_wih_c = _pad_gates(params["d_wih_c"], 3)                                # (H, 3GP)
    d_bih = _pad_gates(params["d_bih"], 3)                                    # (1, 3GP)
    # hidden-side decoder GRU gates fused with the attention query projection:
    dec_hw = _pad_gates(jnp.concatenate([params["d_whh"], params["att_wh"]], axis=1), 4)  # (H, 4GP)
    dec_hb = _pad_gates(jnp.concatenate([params["d_bhh"], params["att_b"]], axis=1), 4)   # (1, 4GP)
    e_whh = _pad_gates(params["e_whh"], 3)                                    # (H, 3GP)
    e_bhh = _pad_gates(params["e_bhh"], 3)                                    # (1, 3GP)
    out_w = jnp.zeros((H, VP), f32).at[:, :V].set(params["out_w"])
    out_b = jnp.full((1, VP), NEG, f32).at[:, :V].set(params["out_b"])

    args = (vf_tm,
            gi_w.astype(bf16), gi_b,
            e_whh.astype(bf16), e_bhh,
            params["att_we"].astype(bf16), params["att_v"],
            emb_proj.astype(bf16),
            d_wih_c.astype(bf16), d_bih,
            dec_hw.astype(bf16), dec_hb,
            out_w.astype(bf16), out_b)

    vmem = pltpu.MemorySpace.VMEM
    out_shape = (jax.ShapeDtypeStruct((L, B, VP), jnp.float32),
                 jax.ShapeDtypeStruct((L, B), jnp.int32))

    logp_tm, pred_tm = pl.pallas_call(
        seq2seq_kernel,
        out_shape=out_shape,
        in_specs=[pl.BlockSpec(memory_space=vmem)] * len(args),
        out_specs=(pl.BlockSpec(memory_space=vmem),
                   pl.BlockSpec(memory_space=vmem)),
    )(*args)

    # Drop vocab padding, back to batch-major (PyTorch return convention).
    log_probs = jnp.transpose(logp_tm[:, :, :V], (1, 0, 2))                   # (B, L, V)
    preds = jnp.transpose(pred_tm, (1, 0))                                    # (B, L)
    return log_probs, preds


if __name__ == "__main__":
    key = jax.random.PRNGKey(0)
    k_feat, k_param = jax.random.split(key)
    video_features = jax.random.normal(k_feat, (B, T, F), jnp.float32)
    params = make_params(k_param)

    log_probs, preds = video_captioning_forward(video_features, params, mode="inference")
    jax.block_until_ready((log_probs, preds))

    assert log_probs.shape == (B, L, V) and preds.shape == (B, L)
    assert log_probs.dtype == jnp.float32 and preds.dtype == jnp.int32
    assert bool(jnp.all(preds >= 0)) and bool(jnp.all(preds < V))
    assert bool(jnp.all(jnp.isfinite(log_probs)))
    print("KERNEL_OK")
</pallas_src>

<mosaic_0001>
module attributes {stable_mosaic.version = 11 : i64} {
  func.func @seq2seq_kernel(%arg0: memref<8x2x64xf32, #tpu.memory_space<vmem>>, %arg1: memref<64x96xbf16, #tpu.memory_space<vmem>>, %arg2: memref<1x96xf32, #tpu.memory_space<vmem>>, %arg3: memref<32x384xbf16, #tpu.memory_space<vmem>>, %arg4: memref<1x384xf32, #tpu.memory_space<vmem>>, %arg5: memref<32x32xbf16, #tpu.memory_space<vmem>>, %arg6: memref<1x32xf32, #tpu.memory_space<vmem>>, %arg7: memref<128x384xbf16, #tpu.memory_space<vmem>>, %arg8: memref<32x384xbf16, #tpu.memory_space<vmem>>, %arg9: memref<1x384xf32, #tpu.memory_space<vmem>>, %arg10: memref<32x512xbf16, #tpu.memory_space<vmem>>, %arg11: memref<1x512xf32, #tpu.memory_space<vmem>>, %arg12: memref<32x128xbf16, #tpu.memory_space<vmem>>, %arg13: memref<1x128xf32, #tpu.memory_space<vmem>>, %arg14: memref<8x2x128xf32, #tpu.memory_space<vmem>>, %arg15: memref<8x2xi32, #tpu.memory_space<vmem>>) attributes {dimension_semantics = [], scalar_prefetch = 0 : i64, scratch_operands = 0 : i64, tpu.core_type = #tpu.core_type<tc>} {
    %c0 = arith.constant 0 : index
    %c0_0 = arith.constant 0 : index
    %c0_1 = arith.constant 0 : index
    %0 = vector.load %arg0[%c0, %c0_0, %c0_1] : memref<8x2x64xf32, #tpu.memory_space<vmem>>, vector<8x2x64xf32>
    %1 = vector.shape_cast %0 : vector<8x2x64xf32> to vector<16x64xf32>
    %2 = arith.truncf %1 : vector<16x64xf32> to vector<16x64xbf16>
    %c0_2 = arith.constant 0 : index
    %c0_3 = arith.constant 0 : index
    %3 = vector.load %arg1[%c0_2, %c0_3] : memref<64x96xbf16, #tpu.memory_space<vmem>>, vector<64x96xbf16>
    %cst = arith.constant dense<0.000000e+00> : vector<16x96xf32>
    %4 = tpu.matmul %2, %3, %cst {dimension_numbers = #tpu.dot_dimension_numbers<[1], [0], [0], [1], [0, 0, 1, 1], [], []>} : vector<16x64xbf16>, vector<64x96xbf16>, vector<16x96xf32> -> vector<16x96xf32>
    %c0_4 = arith.constant 0 : index
    %c0_5 = arith.constant 0 : index
    %5 = vector.load %arg2[%c0_4, %c0_5] : memref<1x96xf32, #tpu.memory_space<vmem>>, vector<1x96xf32>
    %6 = vector.broadcast %5 : vector<1x96xf32> to vector<16x96xf32>
    %7 = arith.addf %4, %6 : vector<16x96xf32>
    %8 = vector.shape_cast %7 : vector<16x96xf32> to vector<8x2x96xf32>
    %9 = vector.extract_strided_slice %8 {offsets = [0, 0, 0], sizes = [8, 2, 32], strides = [1, 1, 1]} : vector<8x2x96xf32> to vector<8x2x32xf32>
    %10 = vector.extract_strided_slice %8 {offsets = [0, 0, 32], sizes = [8, 2, 32], strides = [1, 1, 1]} : vector<8x2x96xf32> to vector<8x2x32xf32>
    %11 = vector.extract_strided_slice %8 {offsets = [0, 0, 64], sizes = [8, 2, 32], strides = [1, 1, 1]} : vector<8x2x96xf32> to vector<8x2x32xf32>
    %c0_6 = arith.constant 0 : index
    %c0_7 = arith.constant 0 : index
    %12 = vector.load %arg3[%c0_6, %c0_7] : memref<32x384xbf16, #tpu.memory_space<vmem>>, vector<32x384xbf16>
    %c0_8 = arith.constant 0 : index
    %c0_9 = arith.constant 0 : index
    %13 = vector.load %arg4[%c0_8, %c0_9] : memref<1x384xf32, #tpu.memory_space<vmem>>, vector<1x384xf32>
    %cst_10 = arith.constant 0.000000e+00 : f32
    %14 = vector.broadcast %cst_10 : f32 to vector<2x32xf32>
    %15 = arith.truncf %14 : vector<2x32xf32> to vector<2x32xbf16>
    %cst_11 = arith.constant dense<0.000000e+00> : vector<2x384xf32>
    %16 = tpu.matmul %15, %12, %cst_11 {dimension_numbers = #tpu.dot_dimension_numbers<[1], [0], [0], [1], [0, 0, 1, 1], [], []>} : vector<2x32xbf16>, vector<32x384xbf16>, vector<2x384xf32> -> vector<2x384xf32>
    %17 = vector.broadcast %13 : vector<1x384xf32> to vector<2x384xf32>
    %18 = arith.addf %16, %17 : vector<2x384xf32>
    %19 = vector.extract_strided_slice %9 {offsets = [0, 0, 0], sizes = [1, 2, 32], strides = [1, 1, 1]} : vector<8x2x32xf32> to vector<1x2x32xf32>
    %20 = vector.shape_cast %19 : vector<1x2x32xf32> to vector<2x32xf32>
    %21 = vector.extract_strided_slice %18 {offsets = [0, 0], sizes = [2, 32], strides = [1, 1]} : vector<2x384xf32> to vector<2x32xf32>
    %22 = arith.addf %20, %21 : vector<2x32xf32>
    %23 = arith.negf %22 : vector<2x32xf32>
    %24 = math.exp %23 : vector<2x32xf32>
    %cst_12 = arith.constant 1.000000e+00 : f32
    %25 = vector.broadcast %cst_12 : f32 to vector<2x32xf32>
    %26 = arith.addf %25, %24 : vector<2x32xf32>
    %27 = arith.divf %25, %26 : vector<2x32xf32>
    %28 = vector.extract_strided_slice %10 {offsets = [0, 0, 0], sizes = [1, 2, 32], strides = [1, 1, 1]} : vector<8x2x32xf32> to vector<1x2x32xf32>
    %29 = vector.shape_cast %28 : vector<1x2x32xf32> to vector<2x32xf32>
    %30 = vector.extract_strided_slice %18 {offsets = [0, 128], sizes = [2, 32], strides = [1, 1]} : vector<2x384xf32> to vector<2x32xf32>
    %31 = arith.addf %29, %30 : vector<2x32xf32>
    %32 = arith.negf %31 : vector<2x32xf32>
    %33 = math.exp %32 : vector<2x32xf32>
    %cst_13 = arith.constant 1.000000e+00 : f32
    %34 = vector.broadcast %cst_13 : f32 to vector<2x32xf32>
    %35 = arith.addf %34, %33 : vector<2x32xf32>
    %36 = arith.divf %34, %35 : vector<2x32xf32>
    %37 = vector.extract_strided_slice %11 {offsets = [0, 0, 0], sizes = [1, 2, 32], strides = [1, 1, 1]} : vector<8x2x32xf32> to vector<1x2x32xf32>
    %38 = vector.shape_cast %37 : vector<1x2x32xf32> to vector<2x32xf32>
    %39 = vector.extract_strided_slice %18 {offsets = [0, 256], sizes = [2, 32], strides = [1, 1]} : vector<2x384xf32> to vector<2x32xf32>
    %40 = arith.mulf %27, %39 : vector<2x32xf32>
    %41 = arith.addf %38, %40 : vector<2x32xf32>
    %42 = math.tanh %41 : vector<2x32xf32>
    %cst_14 = arith.constant 1.000000e+00 : f32
    %43 = vector.broadcast %cst_14 : f32 to vector<2x32xf32>
    %44 = arith.subf %43, %36 : vector<2x32xf32>
    %45 = arith.mulf %44, %42 : vector<2x32xf32>
    %46 = arith.mulf %36, %14 : vector<2x32xf32>
    %47 = arith.addf %45, %46 : vector<2x32xf32>
    %48 = arith.truncf %47 : vector<2x32xf32> to vector<2x32xbf16>
    %cst_15 = arith.constant dense<0.000000e+00> : vector<2x384xf32>
    %49 = tpu.matmul %48, %12, %cst_15 {dimension_numbers = #tpu.dot_dimension_numbers<[1], [0], [0], [1], [0, 0, 1, 1], [], []>} : vector<2x32xbf16>, vector<32x384xbf16>, vector<2x384xf32> -> vector<2x384xf32>
    %50 = vector.broadcast %13 : vector<1x384xf32> to vector<2x384xf32>
    %51 = arith.addf %49, %50 : vector<2x384xf32>
    %52 = vector.extract_strided_slice %9 {offsets = [1, 0, 0], sizes = [1, 2, 32], strides = [1, 1, 1]} : vector<8x2x32xf32> to vector<1x2x32xf32>
    %53 = vector.shape_cast %52 : vector<1x2x32xf32> to vector<2x32xf32>
    %54 = vector.extract_strided_slice %51 {offsets = [0, 0], sizes = [2, 32], strides = [1, 1]} : vector<2x384xf32> to vector<2x32xf32>
    %55 = arith.addf %53, %54 : vector<2x32xf32>
    %56 = arith.negf %55 : vector<2x32xf32>
    %57 = math.exp %56 : vector<2x32xf32>
    %cst_16 = arith.constant 1.000000e+00 : f32
    %58 = vector.broadcast %cst_16 : f32 to vector<2x32xf32>
    %59 = arith.addf %58, %57 : vector<2x32xf32>
    %60 = arith.divf %58, %59 : vector<2x32xf32>
    %61 = vector.extract_strided_slice %10 {offsets = [1, 0, 0], sizes = [1, 2, 32], strides = [1, 1, 1]} : vector<8x2x32xf32> to vector<1x2x32xf32>
    %62 = vector.shape_cast %61 : vector<1x2x32xf32> to vector<2x32xf32>
    %63 = vector.extract_strided_slice %51 {offsets = [0, 128], sizes = [2, 32], strides = [1, 1]} : vector<2x384xf32> to vector<2x32xf32>
    %64 = arith.addf %62, %63 : vector<2x32xf32>
    %65 = arith.negf %64 : vector<2x32xf32>
    %66 = math.exp %65 : vector<2x32xf32>
    %cst_17 = arith.constant 1.000000e+00 : f32
    %67 = vector.broadcast %cst_17 : f32 to vector<2x32xf32>
    %68 = arith.addf %67, %66 : vector<2x32xf32>
    %69 = arith.divf %67, %68 : vector<2x32xf32>
    %70 = vector.extract_strided_slice %11 {offsets = [1, 0, 0], sizes = [1, 2, 32], strides = [1, 1, 1]} : vector<8x2x32xf32> to vector<1x2x32xf32>
    %71 = vector.shape_cast %70 : vector<1x2x32xf32> to vector<2x32xf32>
    %72 = vector.extract_strided_slice %51 {offsets = [0, 256], sizes = [2, 32], strides = [1, 1]} : vector<2x384xf32> to vector<2x32xf32>
    %73 = arith.mulf %60, %72 : vector<2x32xf32>
    %74 = arith.addf %71, %73 : vector<2x32xf32>
    %75 = math.tanh %74 : vector<2x32xf32>
    %cst_18 = arith.constant 1.000000e+00 : f32
    %76 = vector.broadcast %cst_18 : f32 to vector<2x32xf32>
    %77 = arith.subf %76, %69 : vector<2x32xf32>
    %78 = arith.mulf %77, %75 : vector<2x32xf32>
    %79 = arith.mulf %69, %47 : vector<2x32xf32>
    %80 = arith.addf %78, %79 : vector<2x32xf32>
    %81 = arith.truncf %80 : vector<2x32xf32> to vector<2x32xbf16>
    %cst_19 = arith.constant dense<0.000000e+00> : vector<2x384xf32>
    %82 = tpu.matmul %81, %12, %cst_19 {dimension_numbers = #tpu.dot_dimension_numbers<[1], [0], [0], [1], [0, 0, 1, 1], [], []>} : vector<2x32xbf16>, vector<32x384xbf16>, vector<2x384xf32> -> vector<2x384xf32>
    %83 = vector.broadcast %13 : vector<1x384xf32> to vector<2x384xf32>
    %84 = arith.addf %82, %83 : vector<2x384xf32>
    %85 = vector.extract_strided_slice %9 {offsets = [2, 0, 0], sizes = [1, 2, 32], strides = [1, 1, 1]} : vector<8x2x32xf32> to vector<1x2x32xf32>
    %86 = vector.shape_cast %85 : vector<1x2x32xf32> to vector<2x32xf32>
    %87 = vector.extract_strided_slice %84 {offsets = [0, 0], sizes = [2, 32], strides = [1, 1]} : vector<2x384xf32> to vector<2x32xf32>
    %88 = arith.addf %86, %87 : vector<2x32xf32>
    %89 = arith.negf %88 : vector<2x32xf32>
    %90 = math.exp %89 : vector<2x32xf32>
    %cst_20 = arith.constant 1.000000e+00 : f32
    %91 = vector.broadcast %cst_20 : f32 to vector<2x32xf32>
    %92 = arith.addf %91, %90 : vector<2x32xf32>
    %93 = arith.divf %91, %92 : vector<2x32xf32>
    %94 = vector.extract_strided_slice %10 {offsets = [2, 0, 0], sizes = [1, 2, 32], strides = [1, 1, 1]} : vector<8x2x32xf32> to vector<1x2x32xf32>
    %95 = vector.shape_cast %94 : vector<1x2x32xf32> to vector<2x32xf32>
    %96 = vector.extract_strided_slice %84 {offsets = [0, 128], sizes = [2, 32], strides = [1, 1]} : vector<2x384xf32> to vector<2x32xf32>
    %97 = arith.addf %95, %96 : vector<2x32xf32>
    %98 = arith.negf %97 : vector<2x32xf32>
    %99 = math.exp %98 : vector<2x32xf32>
    %cst_21 = arith.constant 1.000000e+00 : f32
    %100 = vector.broadcast %cst_21 : f32 to vector<2x32xf32>
    %101 = arith.addf %100, %99 : vector<2x32xf32>
    %102 = arith.divf %100, %101 : vector<2x32xf32>
    %103 = vector.extract_strided_slice %11 {offsets = [2, 0, 0], sizes = [1, 2, 32], strides = [1, 1, 1]} : vector<8x2x32xf32> to vector<1x2x32xf32>
    %104 = vector.shape_cast %103 : vector<1x2x32xf32> to vector<2x32xf32>
    %105 = vector.extract_strided_slice %84 {offsets = [0, 256], sizes = [2, 32], strides = [1, 1]} : vector<2x384xf32> to vector<2x32xf32>
    %106 = arith.mulf %93, %105 : vector<2x32xf32>
    %107 = arith.addf %104, %106 : vector<2x32xf32>
    %108 = math.tanh %107 : vector<2x32xf32>
    %cst_22 = arith.constant 1.000000e+00 : f32
    %109 = vector.broadcast %cst_22 : f32 to vector<2x32xf32>
    %110 = arith.subf %109, %102 : vector<2x32xf32>
    %111 = arith.mulf %110, %108 : vector<2x32xf32>
    %112 = arith.mulf %102, %80 : vector<2x32xf32>
    %113 = arith.addf %111, %112 : vector<2x32xf32>
    %114 = arith.truncf %113 : vector<2x32xf32> to vector<2x32xbf16>
    %cst_23 = arith.constant dense<0.000000e+00> : vector<2x384xf32>
    %115 = tpu.matmul %114, %12, %cst_23 {dimension_numbers = #tpu.dot_dimension_numbers<[1], [0], [0], [1], [0, 0, 1, 1], [], []>} : vector<2x32xbf16>, vector<32x384xbf16>, vector<2x384xf32> -> vector<2x384xf32>
    %116 = vector.broadcast %13 : vector<1x384xf32> to vector<2x384xf32>
    %117 = arith.addf %115, %116 : vector<2x384xf32>
    %118 = vector.extract_strided_slice %9 {offsets = [3, 0, 0], sizes = [1, 2, 32], strides = [1, 1, 1]} : vector<8x2x32xf32> to vector<1x2x32xf32>
    %119 = vector.shape_cast %118 : vector<1x2x32xf32> to vector<2x32xf32>
    %120 = vector.extract_strided_slice %117 {offsets = [0, 0], sizes = [2, 32], strides = [1, 1]} : vector<2x384xf32> to vector<2x32xf32>
    %121 = arith.addf %119, %120 : vector<2x32xf32>
    %122 = arith.negf %121 : vector<2x32xf32>
    %123 = math.exp %122 : vector<2x32xf32>
    %cst_24 = arith.constant 1.000000e+00 : f32
    %124 = vector.broadcast %cst_24 : f32 to vector<2x32xf32>
    %125 = arith.addf %124, %123 : vector<2x32xf32>
    %126 = arith.divf %124, %125 : vector<2x32xf32>
    %127 = vector.extract_strided_slice %10 {offsets = [3, 0, 0], sizes = [1, 2, 32], strides = [1, 1, 1]} : vector<8x2x32xf32> to vector<1x2x32xf32>
    %128 = vector.shape_cast %127 : vector<1x2x32xf32> to vector<2x32xf32>
    %129 = vector.extract_strided_slice %117 {offsets = [0, 128], sizes = [2, 32], strides = [1, 1]} : vector<2x384xf32> to vector<2x32xf32>
    %130 = arith.addf %128, %129 : vector<2x32xf32>
    %131 = arith.negf %130 : vector<2x32xf32>
    %132 = math.exp %131 : vector<2x32xf32>
    %cst_25 = arith.constant 1.000000e+00 : f32
    %133 = vector.broadcast %cst_25 : f32 to vector<2x32xf32>
    %134 = arith.addf %133, %132 : vector<2x32xf32>
    %135 = arith.divf %133, %134 : vector<2x32xf32>
    %136 = vector.extract_strided_slice %11 {offsets = [3, 0, 0], sizes = [1, 2, 32], strides = [1, 1, 1]} : vector<8x2x32xf32> to vector<1x2x32xf32>
    %137 = vector.shape_cast %136 : vector<1x2x32xf32> to vector<2x32xf32>
    %138 = vector.extract_strided_slice %117 {offsets = [0, 256], sizes = [2, 32], strides = [1, 1]} : vector<2x384xf32> to vector<2x32xf32>
    %139 = arith.mulf %126, %138 : vector<2x32xf32>
    %140 = arith.addf %137, %139 : vector<2x32xf32>
    %141 = math.tanh %140 : vector<2x32xf32>
    %cst_26 = arith.constant 1.000000e+00 : f32
    %142 = vector.broadcast %cst_26 : f32 to vector<2x32xf32>
    %143 = arith.subf %142, %135 : vector<2x32xf32>
    %144 = arith.mulf %143, %141 : vector<2x32xf32>
    %145 = arith.mulf %135, %113 : vector<2x32xf32>
    %146 = arith.addf %144, %145 : vector<2x32xf32>
    %147 = arith.truncf %146 : vector<2x32xf32> to vector<2x32xbf16>
    %cst_27 = arith.constant dense<0.000000e+00> : vector<2x384xf32>
    %148 = tpu.matmul %147, %12, %cst_27 {dimension_numbers = #tpu.dot_dimension_numbers<[1], [0], [0], [1], [0, 0, 1, 1], [], []>} : vector<2x32xbf16>, vector<32x384xbf16>, vector<2x384xf32> -> vector<2x384xf32>
    %149 = vector.broadcast %13 : vector<1x384xf32> to vector<2x384xf32>
    %150 = arith.addf %148, %149 : vector<2x384xf32>
    %151 = vector.extract_strided_slice %9 {offsets = [4, 0, 0], sizes = [1, 2, 32], strides = [1, 1, 1]} : vector<8x2x32xf32> to vector<1x2x32xf32>
    %152 = vector.shape_cast %151 : vector<1x2x32xf32> to vector<2x32xf32>
    %153 = vector.extract_strided_slice %150 {offsets = [0, 0], sizes = [2, 32], strides = [1, 1]} : vector<2x384xf32> to vector<2x32xf32>
    %154 = arith.addf %152, %153 : vector<2x32xf32>
    %155 = arith.negf %154 : vector<2x32xf32>
    %156 = math.exp %155 : vector<2x32xf32>
    %cst_28 = arith.constant 1.000000e+00 : f32
    %157 = vector.broadcast %cst_28 : f32 to vector<2x32xf32>
    %158 = arith.addf %157, %156 : vector<2x32xf32>
    %159 = arith.divf %157, %158 : vector<2x32xf32>
    %160 = vector.extract_strided_slice %10 {offsets = [4, 0, 0], sizes = [1, 2, 32], strides = [1, 1, 1]} : vector<8x2x32xf32> to vector<1x2x32xf32>
    %161 = vector.shape_cast %160 : vector<1x2x32xf32> to vector<2x32xf32>
    %162 = vector.extract_strided_slice %150 {offsets = [0, 128], sizes = [2, 32], strides = [1, 1]} : vector<2x384xf32> to vector<2x32xf32>
    %163 = arith.addf %161, %162 : vector<2x32xf32>
    %164 = arith.negf %163 : vector<2x32xf32>
    %165 = math.exp %164 : vector<2x32xf32>
    %cst_29 = arith.constant 1.000000e+00 : f32
    %166 = vector.broadcast %cst_29 : f32 to vector<2x32xf32>
    %167 = arith.addf %166, %165 : vector<2x32xf32>
    %168 = arith.divf %166, %167 : vector<2x32xf32>
    %169 = vector.extract_strided_slice %11 {offsets = [4, 0, 0], sizes = [1, 2, 32], strides = [1, 1, 1]} : vector<8x2x32xf32> to vector<1x2x32xf32>
    %170 = vector.shape_cast %169 : vector<1x2x32xf32> to vector<2x32xf32>
    %171 = vector.extract_strided_slice %150 {offsets = [0, 256], sizes = [2, 32], strides = [1, 1]} : vector<2x384xf32> to vector<2x32xf32>
    %172 = arith.mulf %159, %171 : vector<2x32xf32>
    %173 = arith.addf %170, %172 : vector<2x32xf32>
    %174 = math.tanh %173 : vector<2x32xf32>
    %cst_30 = arith.constant 1.000000e+00 : f32
    %175 = vector.broadcast %cst_30 : f32 to vector<2x32xf32>
    %176 = arith.subf %175, %168 : vector<2x32xf32>
    %177 = arith.mulf %176, %174 : vector<2x32xf32>
    %178 = arith.mulf %168, %146 : vector<2x32xf32>
    %179 = arith.addf %177, %178 : vector<2x32xf32>
    %180 = arith.truncf %179 : vector<2x32xf32> to vector<2x32xbf16>
    %cst_31 = arith.constant dense<0.000000e+00> : vector<2x384xf32>
    %181 = tpu.matmul %180, %12, %cst_31 {dimension_numbers = #tpu.dot_dimension_numbers<[1], [0], [0], [1], [0, 0, 1, 1], [], []>} : vector<2x32xbf16>, vector<32x384xbf16>, vector<2x384xf32> -> vector<2x384xf32>
    %182 = vector.broadcast %13 : vector<1x384xf32> to vector<2x384xf32>
    %183 = arith.addf %181, %182 : vector<2x384xf32>
    %184 = vector.extract_strided_slice %9 {offsets = [5, 0, 0], sizes = [1, 2, 32], strides = [1, 1, 1]} : vector<8x2x32xf32> to vector<1x2x32xf32>
    %185 = vector.shape_cast %184 : vector<1x2x32xf32> to vector<2x32xf32>
    %186 = vector.extract_strided_slice %183 {offsets = [0, 0], sizes = [2, 32], strides = [1, 1]} : vector<2x384xf32> to vector<2x32xf32>
    %187 = arith.addf %185, %186 : vector<2x32xf32>
    %188 = arith.negf %187 : vector<2x32xf32>
    %189 = math.exp %188 : vector<2x32xf32>
    %cst_32 = arith.constant 1.000000e+00 : f32
    %190 = vector.broadcast %cst_32 : f32 to vector<2x32xf32>
    %191 = arith.addf %190, %189 : vector<2x32xf32>
    %192 = arith.divf %190, %191 : vector<2x32xf32>
    %193 = vector.extract_strided_slice %10 {offsets = [5, 0, 0], sizes = [1, 2, 32], strides = [1, 1, 1]} : vector<8x2x32xf32> to vector<1x2x32xf32>
    %194 = vector.shape_cast %193 : vector<1x2x32xf32> to vector<2x32xf32>
    %195 = vector.extract_strided_slice %183 {offsets = [0, 128], sizes = [2, 32], strides = [1, 1]} : vector<2x384xf32> to vector<2x32xf32>
    %196 = arith.addf %194, %195 : vector<2x32xf32>
    %197 = arith.negf %196 : vector<2x32xf32>
    %198 = math.exp %197 : vector<2x32xf32>
    %cst_33 = arith.constant 1.000000e+00 : f32
    %199 = vector.broadcast %cst_33 : f32 to vector<2x32xf32>
    %200 = arith.addf %199, %198 : vector<2x32xf32>
    %201 = arith.divf %199, %200 : vector<2x32xf32>
    %202 = vector.extract_strided_slice %11 {offsets = [5, 0, 0], sizes = [1, 2, 32], strides = [1, 1, 1]} : vector<8x2x32xf32> to vector<1x2x32xf32>
    %203 = vector.shape_cast %202 : vector<1x2x32xf32> to vector<2x32xf32>
    %204 = vector.extract_strided_slice %183 {offsets = [0, 256], sizes = [2, 32], strides = [1, 1]} : vector<2x384xf32> to vector<2x32xf32>
    %205 = arith.mulf %192, %204 : vector<2x32xf32>
    %206 = arith.addf %203, %205 : vector<2x32xf32>
    %207 = math.tanh %206 : vector<2x32xf32>
    %cst_34 = arith.constant 1.000000e+00 : f32
    %208 = vector.broadcast %cst_34 : f32 to vector<2x32xf32>
    %209 = arith.subf %208, %201 : vector<2x32xf32>
    %210 = arith.mulf %209, %207 : vector<2x32xf32>
    %211 = arith.mulf %201, %179 : vector<2x32xf32>
    %212 = arith.addf %210, %211 : vector<2x32xf32>
    %213 = arith.truncf %212 : vector<2x32xf32> to vector<2x32xbf16>
    %cst_35 = arith.constant dense<0.000000e+00> : vector<2x384xf32>
    %214 = tpu.matmul %213, %12, %cst_35 {dimension_numbers = #tpu.dot_dimension_numbers<[1], [0], [0], [1], [0, 0, 1, 1], [], []>} : vector<2x32xbf16>, vector<32x384xbf16>, vector<2x384xf32> -> vector<2x384xf32>
    %215 = vector.broadcast %13 : vector<1x384xf32> to vector<2x384xf32>
    %216 = arith.addf %214, %215 : vector<2x384xf32>
    %217 = vector.extract_strided_slice %9 {offsets = [6, 0, 0], sizes = [1, 2, 32], strides = [1, 1, 1]} : vector<8x2x32xf32> to vector<1x2x32xf32>
    %218 = vector.shape_cast %217 : vector<1x2x32xf32> to vector<2x32xf32>
    %219 = vector.extract_strided_slice %216 {offsets = [0, 0], sizes = [2, 32], strides = [1, 1]} : vector<2x384xf32> to vector<2x32xf32>
    %220 = arith.addf %218, %219 : vector<2x32xf32>
    %221 = arith.negf %220 : vector<2x32xf32>
    %222 = math.exp %221 : vector<2x32xf32>
    %cst_36 = arith.constant 1.000000e+00 : f32
    %223 = vector.broadcast %cst_36 : f32 to vector<2x32xf32>
    %224 = arith.addf %223, %222 : vector<2x32xf32>
    %225 = arith.divf %223, %224 : vector<2x32xf32>
    %226 = vector.extract_strided_slice %10 {offsets = [6, 0, 0], sizes = [1, 2, 32], strides = [1, 1, 1]} : vector<8x2x32xf32> to vector<1x2x32xf32>
    %227 = vector.shape_cast %226 : vector<1x2x32xf32> to vector<2x32xf32>
    %228 = vector.extract_strided_slice %216 {offsets = [0, 128], sizes = [2, 32], strides = [1, 1]} : vector<2x384xf32> to vector<2x32xf32>
    %229 = arith.addf %227, %228 : vector<2x32xf32>
    %230 = arith.negf %229 : vector<2x32xf32>
    %231 = math.exp %230 : vector<2x32xf32>
    %cst_37 = arith.constant 1.000000e+00 : f32
    %232 = vector.broadcast %cst_37 : f32 to vector<2x32xf32>
    %233 = arith.addf %232, %231 : vector<2x32xf32>
    %234 = arith.divf %232, %233 : vector<2x32xf32>
    %235 = vector.extract_strided_slice %11 {offsets = [6, 0, 0], sizes = [1, 2, 32], strides = [1, 1, 1]} : vector<8x2x32xf32> to vector<1x2x32xf32>
    %236 = vector.shape_cast %235 : vector<1x2x32xf32> to vector<2x32xf32>
    %237 = vector.extract_strided_slice %216 {offsets = [0, 256], sizes = [2, 32], strides = [1, 1]} : vector<2x384xf32> to vector<2x32xf32>
    %238 = arith.mulf %225, %237 : vector<2x32xf32>
    %239 = arith.addf %236, %238 : vector<2x32xf32>
    %240 = math.tanh %239 : vector<2x32xf32>
    %cst_38 = arith.constant 1.000000e+00 : f32
    %241 = vector.broadcast %cst_38 : f32 to vector<2x32xf32>
    %242 = arith.subf %241, %234 : vector<2x32xf32>
    %243 = arith.mulf %242, %240 : vector<2x32xf32>
    %244 = arith.mulf %234, %212 : vector<2x32xf32>
    %245 = arith.addf %243, %244 : vector<2x32xf32>
    %246 = arith.truncf %245 : vector<2x32xf32> to vector<2x32xbf16>
    %cst_39 = arith.constant dense<0.000000e+00> : vector<2x384xf32>
    %247 = tpu.matmul %246, %12, %cst_39 {dimension_numbers = #tpu.dot_dimension_numbers<[1], [0], [0], [1], [0, 0, 1, 1], [], []>} : vector<2x32xbf16>, vector<32x384xbf16>, vector<2x384xf32> -> vector<2x384xf32>
    %248 = vector.broadcast %13 : vector<1x384xf32> to vector<2x384xf32>
    %249 = arith.addf %247, %248 : vector<2x384xf32>
    %250 = vector.extract_strided_slice %9 {offsets = [7, 0, 0], sizes = [1, 2, 32], strides = [1, 1, 1]} : vector<8x2x32xf32> to vector<1x2x32xf32>
    %251 = vector.shape_cast %250 : vector<1x2x32xf32> to vector<2x32xf32>
    %252 = vector.extract_strided_slice %249 {offsets = [0, 0], sizes = [2, 32], strides = [1, 1]} : vector<2x384xf32> to vector<2x32xf32>
    %253 = arith.addf %251, %252 : vector<2x32xf32>
    %254 = arith.negf %253 : vector<2x32xf32>
    %255 = math.exp %254 : vector<2x32xf32>
    %cst_40 = arith.constant 1.000000e+00 : f32
    %256 = vector.broadcast %cst_40 : f32 to vector<2x32xf32>
    %257 = arith.addf %256, %255 : vector<2x32xf32>
    %258 = arith.divf %256, %257 : vector<2x32xf32>
    %259 = vector.extract_strided_slice %10 {offsets = [7, 0, 0], sizes = [1, 2, 32], strides = [1, 1, 1]} : vector<8x2x32xf32> to vector<1x2x32xf32>
    %260 = vector.shape_cast %259 : vector<1x2x32xf32> to vector<2x32xf32>
    %261 = vector.extract_strided_slice %249 {offsets = [0, 128], sizes = [2, 32], strides = [1, 1]} : vector<2x384xf32> to vector<2x32xf32>
    %262 = arith.addf %260, %261 : vector<2x32xf32>
    %263 = arith.negf %262 : vector<2x32xf32>
    %264 = math.exp %263 : vector<2x32xf32>
    %cst_41 = arith.constant 1.000000e+00 : f32
    %265 = vector.broadcast %cst_41 : f32 to vector<2x32xf32>
    %266 = arith.addf %265, %264 : vector<2x32xf32>
    %267 = arith.divf %265, %266 : vector<2x32xf32>
    %268 = vector.extract_strided_slice %11 {offsets = [7, 0, 0], sizes = [1, 2, 32], strides = [1, 1, 1]} : vector<8x2x32xf32> to vector<1x2x32xf32>
    %269 = vector.shape_cast %268 : vector<1x2x32xf32> to vector<2x32xf32>
    %270 = vector.extract_strided_slice %249 {offsets = [0, 256], sizes = [2, 32], strides = [1, 1]} : vector<2x384xf32> to vector<2x32xf32>
    %271 = arith.mulf %258, %270 : vector<2x32xf32>
    %272 = arith.addf %269, %271 : vector<2x32xf32>
    %273 = math.tanh %272 : vector<2x32xf32>
    %cst_42 = arith.constant 1.000000e+00 : f32
    %274 = vector.broadcast %cst_42 : f32 to vector<2x32xf32>
    %275 = arith.subf %274, %267 : vector<2x32xf32>
    %276 = arith.mulf %275, %273 : vector<2x32xf32>
    %277 = arith.mulf %267, %245 : vector<2x32xf32>
    %278 = arith.addf %276, %277 : vector<2x32xf32>
    %279 = vector.shape_cast %47 : vector<2x32xf32> to vector<2x1x32xf32>
    %280 = vector.shape_cast %80 : vector<2x32xf32> to vector<2x1x32xf32>
    %281 = vector.shape_cast %113 : vector<2x32xf32> to vector<2x1x32xf32>
    %282 = vector.shape_cast %146 : vector<2x32xf32> to vector<2x1x32xf32>
    %283 = vector.shape_cast %179 : vector<2x32xf32> to vector<2x1x32xf32>
    %284 = vector.shape_cast %212 : vector<2x32xf32> to vector<2x1x32xf32>
    %285 = vector.shape_cast %245 : vector<2x32xf32> to vector<2x1x32xf32>
    %286 = vector.shape_cast %278 : vector<2x32xf32> to vector<2x1x32xf32>
    %287 = tpu.concatenate %279, %280, %281, %282, %283, %284, %285, %286 in 1 : vector<2x1x32xf32>, vector<2x1x32xf32>, vector<2x1x32xf32>, vector<2x1x32xf32>, vector<2x1x32xf32>, vector<2x1x32xf32>, vector<2x1x32xf32>, vector<2x1x32xf32> -> vector<2x8x32xf32>
    %288 = arith.truncf %287 : vector<2x8x32xf32> to vector<2x8x32xbf16>
    %289 = vector.shape_cast %288 : vector<2x8x32xbf16> to vector<16x32xbf16>
    %c0_43 = arith.constant 0 : index
    %c0_44 = arith.constant 0 : index
    %290 = vector.load %arg5[%c0_43, %c0_44] : memref<32x32xbf16, #tpu.memory_space<vmem>>, vector<32x32xbf16>
    %cst_45 = arith.constant dense<0.000000e+00> : vector<16x32xf32>
    %291 = tpu.matmul %289, %290, %cst_45 {dimension_numbers = #tpu.dot_dimension_numbers<[1], [0], [0], [1], [0, 0, 1, 1], [], []>} : vector<16x32xbf16>, vector<32x32xbf16>, vector<16x32xf32> -> vector<16x32xf32>
    %292 = vector.shape_cast %291 : vector<16x32xf32> to vector<2x8x32xf32>
    %c0_46 = arith.constant 0 : index
    %c0_47 = arith.constant 0 : index
    %293 = vector.load %arg8[%c0_46, %c0_47] : memref<32x384xbf16, #tpu.memory_space<vmem>>, vector<32x384xbf16>
    %cst_48 = arith.constant dense<0.000000e+00> : vector<16x384xf32>
    %294 = tpu.matmul %289, %293, %cst_48 {dimension_numbers = #tpu.dot_dimension_numbers<[1], [0], [0], [1], [0, 0, 1, 1], [], []>} : vector<16x32xbf16>, vector<32x384xbf16>, vector<16x384xf32> -> vector<16x384xf32>
    %295 = vector.shape_cast %294 : vector<16x384xf32> to vector<2x8x384xf32>
    %c0_49 = arith.constant 0 : index
    %c0_50 = arith.constant 0 : index
    %296 = vector.load %arg6[%c0_49, %c0_50] : memref<1x32xf32, #tpu.memory_space<vmem>>, vector<1x32xf32>
    %297 = vector.shape_cast %296 : vector<1x32xf32> to vector<1x1x32xf32>
    %c0_51 = arith.constant 0 : index
    %c0_52 = arith.constant 0 : index
    %298 = vector.load %arg11[%c0_51, %c0_52] : memref<1x512xf32, #tpu.memory_space<vmem>>, vector<1x512xf32>
    %c0_53 = arith.constant 0 : index
    %c0_54 = arith.constant 0 : index
    %299 = vector.load %arg9[%c0_53, %c0_54] : memref<1x384xf32, #tpu.memory_space<vmem>>, vector<1x384xf32>
    %c0_55 = arith.constant 0 : index
    %c0_56 = arith.constant 0 : index
    %300 = vector.load %arg13[%c0_55, %c0_56] : memref<1x128xf32, #tpu.memory_space<vmem>>, vector<1x128xf32>
    %301 = tpu.iota {dimensions = array<i32: 1>} : vector<2x128xi32>
    %c1_i32 = arith.constant 1 : i32
    %302 = vector.broadcast %c1_i32 : i32 to vector<2x1xi32>
    %303 = vector.broadcast %302 : vector<2x1xi32> to vector<2x128xi32>
    %304 = arith.cmpi eq, %301, %303 : vector<2x128xi32>
    %305 = arith.extui %304 : vector<2x128xi1> to vector<2x128xi32>
    %306 = arith.sitofp %305 : vector<2x128xi32> to vector<2x128xf32>
    %307 = arith.truncf %306 : vector<2x128xf32> to vector<2x128xbf16>
    %308 = arith.truncf %278 : vector<2x32xf32> to vector<2x32xbf16>
    %c0_57 = arith.constant 0 : index
    %c0_58 = arith.constant 0 : index
    %309 = vector.load %arg10[%c0_57, %c0_58] : memref<32x512xbf16, #tpu.memory_space<vmem>>, vector<32x512xbf16>
    %cst_59 = arith.constant dense<0.000000e+00> : vector<2x512xf32>
    %310 = tpu.matmul %308, %309, %cst_59 {dimension_numbers = #tpu.dot_dimension_numbers<[1], [0], [0], [1], [0, 0, 1, 1], [], []>} : vector<2x32xbf16>, vector<32x512xbf16>, vector<2x512xf32> -> vector<2x512xf32>
    %311 = vector.broadcast %298 : vector<1x512xf32> to vector<2x512xf32>
    %312 = arith.addf %310, %311 : vector<2x512xf32>
    %313 = vector.extract_strided_slice %312 {offsets = [0, 384], sizes = [2, 32], strides = [1, 1]} : vector<2x512xf32> to vector<2x32xf32>
    %314 = vector.shape_cast %313 : vector<2x32xf32> to vector<2x1x32xf32>
    %315 = vector.broadcast %314 : vector<2x1x32xf32> to vector<2x8x32xf32>
    %316 = arith.addf %292, %315 : vector<2x8x32xf32>
    %317 = math.tanh %316 : vector<2x8x32xf32>
    %318 = vector.broadcast %297 : vector<1x1x32xf32> to vector<2x8x32xf32>
    %319 = arith.mulf %317, %318 : vector<2x8x32xf32>
    %cst_60 = arith.constant dense<0.000000e+00> : vector<2x8xf32>
    %320 = vector.multi_reduction <add>, %319, %cst_60 [2] : vector<2x8x32xf32> to vector<2x8xf32>
    %cst_61 = arith.constant dense<0xFF800000> : vector<2xf32>
    %321 = vector.multi_reduction <maximumf>, %320, %cst_61 [1] : vector<2x8xf32> to vector<2xf32>
    %322 = vector.shape_cast %321 : vector<2xf32> to vector<2x1xf32>
    %323 = vector.broadcast %322 : vector<2x1xf32> to vector<2x8xf32>
    %324 = arith.subf %320, %323 : vector<2x8xf32>
    %325 = math.exp %324 : vector<2x8xf32>
    %cst_62 = arith.constant dense<0.000000e+00> : vector<2xf32>
    %326 = vector.multi_reduction <add>, %325, %cst_62 [1] : vector<2x8xf32> to vector<2xf32>
    %327 = vector.shape_cast %326 : vector<2xf32> to vector<2x1xf32>
    %328 = tpu.reciprocal %327 {approx = true} : vector<2x1xf32> -> vector<2x1xf32>
    %329 = vector.broadcast %328 : vector<2x1xf32> to vector<2x8xf32>
    %330 = arith.mulf %325, %329 : vector<2x8xf32>
    %c0_63 = arith.constant 0 : index
    %c0_64 = arith.constant 0 : index
    %331 = vector.load %arg7[%c0_63, %c0_64] : memref<128x384xbf16, #tpu.memory_space<vmem>>, vector<128x384xbf16>
    %cst_65 = arith.constant dense<0.000000e+00> : vector<2x384xf32>
    %332 = tpu.matmul %307, %331, %cst_65 {dimension_numbers = #tpu.dot_dimension_numbers<[1], [0], [0], [1], [0, 0, 1, 1], [], []>} : vector<2x128xbf16>, vector<128x384xbf16>, vector<2x384xf32> -> vector<2x384xf32>
    %333 = vector.shape_cast %330 : vector<2x8xf32> to vector<2x8x1xf32>
    %334 = vector.broadcast %333 : vector<2x8x1xf32> to vector<2x8x384xf32>
    %335 = arith.mulf %334, %295 : vector<2x8x384xf32>
    %cst_66 = arith.constant dense<0.000000e+00> : vector<2x384xf32>
    %336 = vector.multi_reduction <add>, %335, %cst_66 [1] : vector<2x8x384xf32> to vector<2x384xf32>
    %337 = arith.addf %332, %336 : vector<2x384xf32>
    %338 = vector.broadcast %299 : vector<1x384xf32> to vector<2x384xf32>
    %339 = arith.addf %337, %338 : vector<2x384xf32>
    %340 = vector.extract_strided_slice %339 {offsets = [0, 0], sizes = [2, 32], strides = [1, 1]} : vector<2x384xf32> to vector<2x32xf32>
    %341 = vector.extract_strided_slice %312 {offsets = [0, 0], sizes = [2, 32], strides = [1, 1]} : vector<2x512xf32> to vector<2x32xf32>
    %342 = arith.addf %340, %341 : vector<2x32xf32>
    %343 = arith.negf %342 : vector<2x32xf32>
    %344 = math.exp %343 : vector<2x32xf32>
    %cst_67 = arith.constant 1.000000e+00 : f32
    %345 = vector.broadcast %cst_67 : f32 to vector<2x32xf32>
    %346 = arith.addf %345, %344 : vector<2x32xf32>
    %347 = arith.divf %345, %346 : vector<2x32xf32>
    %348 = vector.extract_strided_slice %339 {offsets = [0, 128], sizes = [2, 32], strides = [1, 1]} : vector<2x384xf32> to vector<2x32xf32>
    %349 = vector.extract_strided_slice %312 {offsets = [0, 128], sizes = [2, 32], strides = [1, 1]} : vector<2x512xf32> to vector<2x32xf32>
    %350 = arith.addf %348, %349 : vector<2x32xf32>
    %351 = arith.negf %350 : vector<2x32xf32>
    %352 = math.exp %351 : vector<2x32xf32>
    %cst_68 = arith.constant 1.000000e+00 : f32
    %353 = vector.broadcast %cst_68 : f32 to vector<2x32xf32>
    %354 = arith.addf %353, %352 : vector<2x32xf32>
    %355 = arith.divf %353, %354 : vector<2x32xf32>
    %356 = vector.extract_strided_slice %339 {offsets = [0, 256], sizes = [2, 32], strides = [1, 1]} : vector<2x384xf32> to vector<2x32xf32>
    %357 = vector.extract_strided_slice %312 {offsets = [0, 256], sizes = [2, 32], strides = [1, 1]} : vector<2x512xf32> to vector<2x32xf32>
    %358 = arith.mulf %347, %357 : vector<2x32xf32>
    %359 = arith.addf %356, %358 : vector<2x32xf32>
    %360 = math.tanh %359 : vector<2x32xf32>
    %cst_69 = arith.constant 1.000000e+00 : f32
    %361 = vector.broadcast %cst_69 : f32 to vector<2x32xf32>
    %362 = arith.subf %361, %355 : vector<2x32xf32>
    %363 = arith.mulf %362, %360 : vector<2x32xf32>
    %364 = arith.mulf %355, %278 : vector<2x32xf32>
    %365 = arith.addf %363, %364 : vector<2x32xf32>
    %366 = arith.truncf %365 : vector<2x32xf32> to vector<2x32xbf16>
    %c0_70 = arith.constant 0 : index
    %c0_71 = arith.constant 0 : index
    %367 = vector.load %arg12[%c0_70, %c0_71] : memref<32x128xbf16, #tpu.memory_space<vmem>>, vector<32x128xbf16>
    %cst_72 = arith.constant dense<0.000000e+00> : vector<2x128xf32>
    %368 = tpu.matmul %366, %367, %cst_72 {dimension_numbers = #tpu.dot_dimension_numbers<[1], [0], [0], [1], [0, 0, 1, 1], [], []>} : vector<2x32xbf16>, vector<32x128xbf16>, vector<2x128xf32> -> vector<2x128xf32>
    %369 = vector.broadcast %300 : vector<1x128xf32> to vector<2x128xf32>
    %370 = arith.addf %368, %369 : vector<2x128xf32>
    %cst_73 = arith.constant dense<0xFF800000> : vector<2xf32>
    %371 = vector.multi_reduction <maximumf>, %370, %cst_73 [1] : vector<2x128xf32> to vector<2xf32>
    %372 = vector.shape_cast %371 : vector<2xf32> to vector<2x1xf32>
    %373 = vector.broadcast %372 : vector<2x1xf32> to vector<2x128xf32>
    %374 = arith.subf %370, %373 : vector<2x128xf32>
    %375 = math.exp %374 : vector<2x128xf32>
    %cst_74 = arith.constant dense<0.000000e+00> : vector<2xf32>
    %376 = vector.multi_reduction <add>, %375, %cst_74 [1] : vector<2x128xf32> to vector<2xf32>
    %377 = vector.shape_cast %376 : vector<2xf32> to vector<2x1xf32>
    %378 = math.log %377 : vector<2x1xf32>
    %379 = vector.broadcast %378 : vector<2x1xf32> to vector<2x128xf32>
    %380 = arith.subf %374, %379 : vector<2x128xf32>
    %381 = vector.broadcast %372 : vector<2x1xf32> to vector<2x128xf32>
    %382 = arith.cmpf oeq, %370, %381 : vector<2x128xf32>
    %c128_i32 = arith.constant 128 : i32
    %383 = vector.broadcast %c128_i32 : i32 to vector<2x128xi32>
    %384 = arith.select %382, %301, %383 : vector<2x128xi1>, vector<2x128xi32>
    %cst_75 = arith.constant dense<2147483647> : vector<2xi32>
    %385 = vector.multi_reduction <minsi>, %384, %cst_75 [1] : vector<2x128xi32> to vector<2xi32>
    %386 = vector.shape_cast %385 : vector<2xi32> to vector<2x1xi32>
    %387 = vector.broadcast %386 : vector<2x1xi32> to vector<2x128xi32>
    %388 = arith.cmpi eq, %301, %387 : vector<2x128xi32>
    %389 = arith.extui %388 : vector<2x128xi1> to vector<2x128xi32>
    %390 = arith.sitofp %389 : vector<2x128xi32> to vector<2x128xf32>
    %391 = arith.truncf %390 : vector<2x128xf32> to vector<2x128xbf16>
    %392 = arith.truncf %365 : vector<2x32xf32> to vector<2x32xbf16>
    %c0_76 = arith.constant 0 : index
    %c0_77 = arith.constant 0 : index
    %393 = vector.load %arg10[%c0_76, %c0_77] : memref<32x512xbf16, #tpu.memory_space<vmem>>, vector<32x512xbf16>
    %cst_78 = arith.constant dense<0.000000e+00> : vector<2x512xf32>
    %394 = tpu.matmul %392, %393, %cst_78 {dimension_numbers = #tpu.dot_dimension_numbers<[1], [0], [0], [1], [0, 0, 1, 1], [], []>} : vector<2x32xbf16>, vector<32x512xbf16>, vector<2x512xf32> -> vector<2x512xf32>
    %395 = vector.broadcast %298 : vector<1x512xf32> to vector<2x512xf32>
    %396 = arith.addf %394, %395 : vector<2x512xf32>
    %397 = vector.extract_strided_slice %396 {offsets = [0, 384], sizes = [2, 32], strides = [1, 1]} : vector<2x512xf32> to vector<2x32xf32>
    %398 = vector.shape_cast %397 : vector<2x32xf32> to vector<2x1x32xf32>
    %399 = vector.broadcast %398 : vector<2x1x32xf32> to vector<2x8x32xf32>
    %400 = arith.addf %292, %399 : vector<2x8x32xf32>
    %401 = math.tanh %400 : vector<2x8x32xf32>
    %402 = vector.broadcast %297 : vector<1x1x32xf32> to vector<2x8x32xf32>
    %403 = arith.mulf %401, %402 : vector<2x8x32xf32>
    %cst_79 = arith.constant dense<0.000000e+00> : vector<2x8xf32>
    %404 = vector.multi_reduction <add>, %403, %cst_79 [2] : vector<2x8x32xf32> to vector<2x8xf32>
    %cst_80 = arith.constant dense<0xFF800000> : vector<2xf32>
    %405 = vector.multi_reduction <maximumf>, %404, %cst_80 [1] : vector<2x8xf32> to vector<2xf32>
    %406 = vector.shape_cast %405 : vector<2xf32> to vector<2x1xf32>
    %407 = vector.broadcast %406 : vector<2x1xf32> to vector<2x8xf32>
    %408 = arith.subf %404, %407 : vector<2x8xf32>
    %409 = math.exp %408 : vector<2x8xf32>
    %cst_81 = arith.constant dense<0.000000e+00> : vector<2xf32>
    %410 = vector.multi_reduction <add>, %409, %cst_81 [1] : vector<2x8xf32> to vector<2xf32>
    %411 = vector.shape_cast %410 : vector<2xf32> to vector<2x1xf32>
    %412 = tpu.reciprocal %411 {approx = true} : vector<2x1xf32> -> vector<2x1xf32>
    %413 = vector.broadcast %412 : vector<2x1xf32> to vector<2x8xf32>
    %414 = arith.mulf %409, %413 : vector<2x8xf32>
    %c0_82 = arith.constant 0 : index
    %c0_83 = arith.constant 0 : index
    %415 = vector.load %arg7[%c0_82, %c0_83] : memref<128x384xbf16, #tpu.memory_space<vmem>>, vector<128x384xbf16>
    %cst_84 = arith.constant dense<0.000000e+00> : vector<2x384xf32>
    %416 = tpu.matmul %391, %415, %cst_84 {dimension_numbers = #tpu.dot_dimension_numbers<[1], [0], [0], [1], [0, 0, 1, 1], [], []>} : vector<2x128xbf16>, vector<128x384xbf16>, vector<2x384xf32> -> vector<2x384xf32>
    %417 = vector.shape_cast %414 : vector<2x8xf32> to vector<2x8x1xf32>
    %418 = vector.broadcast %417 : vector<2x8x1xf32> to vector<2x8x384xf32>
    %419 = arith.mulf %418, %295 : vector<2x8x384xf32>
    %cst_85 = arith.constant dense<0.000000e+00> : vector<2x384xf32>
    %420 = vector.multi_reduction <add>, %419, %cst_85 [1] : vector<2x8x384xf32> to vector<2x384xf32>
    %421 = arith.addf %416, %420 : vector<2x384xf32>
    %422 = vector.broadcast %299 : vector<1x384xf32> to vector<2x384xf32>
    %423 = arith.addf %421, %422 : vector<2x384xf32>
    %424 = vector.extract_strided_slice %423 {offsets = [0, 0], sizes = [2, 32], strides = [1, 1]} : vector<2x384xf32> to vector<2x32xf32>
    %425 = vector.extract_strided_slice %396 {offsets = [0, 0], sizes = [2, 32], strides = [1, 1]} : vector<2x512xf32> to vector<2x32xf32>
    %426 = arith.addf %424, %425 : vector<2x32xf32>
    %427 = arith.negf %426 : vector<2x32xf32>
    %428 = math.exp %427 : vector<2x32xf32>
    %cst_86 = arith.constant 1.000000e+00 : f32
    %429 = vector.broadcast %cst_86 : f32 to vector<2x32xf32>
    %430 = arith.addf %429, %428 : vector<2x32xf32>
    %431 = arith.divf %429, %430 : vector<2x32xf32>
    %432 = vector.extract_strided_slice %423 {offsets = [0, 128], sizes = [2, 32], strides = [1, 1]} : vector<2x384xf32> to vector<2x32xf32>
    %433 = vector.extract_strided_slice %396 {offsets = [0, 128], sizes = [2, 32], strides = [1, 1]} : vector<2x512xf32> to vector<2x32xf32>
    %434 = arith.addf %432, %433 : vector<2x32xf32>
    %435 = arith.negf %434 : vector<2x32xf32>
    %436 = math.exp %435 : vector<2x32xf32>
    %cst_87 = arith.constant 1.000000e+00 : f32
    %437 = vector.broadcast %cst_87 : f32 to vector<2x32xf32>
    %438 = arith.addf %437, %436 : vector<2x32xf32>
    %439 = arith.divf %437, %438 : vector<2x32xf32>
    %440 = vector.extract_strided_slice %423 {offsets = [0, 256], sizes = [2, 32], strides = [1, 1]} : vector<2x384xf32> to vector<2x32xf32>
    %441 = vector.extract_strided_slice %396 {offsets = [0, 256], sizes = [2, 32], strides = [1, 1]} : vector<2x512xf32> to vector<2x32xf32>
    %442 = arith.mulf %431, %441 : vector<2x32xf32>
    %443 = arith.addf %440, %442 : vector<2x32xf32>
    %444 = math.tanh %443 : vector<2x32xf32>
    %cst_88 = arith.constant 1.000000e+00 : f32
    %445 = vector.broadcast %cst_88 : f32 to vector<2x32xf32>
    %446 = arith.subf %445, %439 : vector<2x32xf32>
    %447 = arith.mulf %446, %444 : vector<2x32xf32>
    %448 = arith.mulf %439, %365 : vector<2x32xf32>
    %449 = arith.addf %447, %448 : vector<2x32xf32>
    %450 = arith.truncf %449 : vector<2x32xf32> to vector<2x32xbf16>
    %c0_89 = arith.constant 0 : index
    %c0_90 = arith.constant 0 : index
    %451 = vector.load %arg12[%c0_89, %c0_90] : memref<32x128xbf16, #tpu.memory_space<vmem>>, vector<32x128xbf16>
    %cst_91 = arith.constant dense<0.000000e+00> : vector<2x128xf32>
    %452 = tpu.matmul %450, %451, %cst_91 {dimension_numbers = #tpu.dot_dimension_numbers<[1], [0], [0], [1], [0, 0, 1, 1], [], []>} : vector<2x32xbf16>, vector<32x128xbf16>, vector<2x128xf32> -> vector<2x128xf32>
    %453 = vector.broadcast %300 : vector<1x128xf32> to vector<2x128xf32>
    %454 = arith.addf %452, %453 : vector<2x128xf32>
    %cst_92 = arith.constant dense<0xFF800000> : vector<2xf32>
    %455 = vector.multi_reduction <maximumf>, %454, %cst_92 [1] : vector<2x128xf32> to vector<2xf32>
    %456 = vector.shape_cast %455 : vector<2xf32> to vector<2x1xf32>
    %457 = vector.broadcast %456 : vector<2x1xf32> to vector<2x128xf32>
    %458 = arith.subf %454, %457 : vector<2x128xf32>
    %459 = math.exp %458 : vector<2x128xf32>
    %cst_93 = arith.constant dense<0.000000e+00> : vector<2xf32>
    %460 = vector.multi_reduction <add>, %459, %cst_93 [1] : vector<2x128xf32> to vector<2xf32>
    %461 = vector.shape_cast %460 : vector<2xf32> to vector<2x1xf32>
    %462 = math.log %461 : vector<2x1xf32>
    %463 = vector.broadcast %462 : vector<2x1xf32> to vector<2x128xf32>
    %464 = arith.subf %458, %463 : vector<2x128xf32>
    %465 = vector.broadcast %456 : vector<2x1xf32> to vector<2x128xf32>
    %466 = arith.cmpf oeq, %454, %465 : vector<2x128xf32>
    %c128_i32_94 = arith.constant 128 : i32
    %467 = vector.broadcast %c128_i32_94 : i32 to vector<2x128xi32>
    %468 = arith.select %466, %301, %467 : vector<2x128xi1>, vector<2x128xi32>
    %cst_95 = arith.constant dense<2147483647> : vector<2xi32>
    %469 = vector.multi_reduction <minsi>, %468, %cst_95 [1] : vector<2x128xi32> to vector<2xi32>
    %470 = vector.shape_cast %469 : vector<2xi32> to vector<2x1xi32>
    %471 = vector.broadcast %470 : vector<2x1xi32> to vector<2x128xi32>
    %472 = arith.cmpi eq, %301, %471 : vector<2x128xi32>
    %473 = arith.extui %472 : vector<2x128xi1> to vector<2x128xi32>
    %474 = arith.sitofp %473 : vector<2x128xi32> to vector<2x128xf32>
    %475 = arith.truncf %474 : vector<2x128xf32> to vector<2x128xbf16>
    %476 = arith.truncf %449 : vector<2x32xf32> to vector<2x32xbf16>
    %c0_96 = arith.constant 0 : index
    %c0_97 = arith.constant 0 : index
    %477 = vector.load %arg10[%c0_96, %c0_97] : memref<32x512xbf16, #tpu.memory_space<vmem>>, vector<32x512xbf16>
    %cst_98 = arith.constant dense<0.000000e+00> : vector<2x512xf32>
    %478 = tpu.matmul %476, %477, %cst_98 {dimension_numbers = #tpu.dot_dimension_numbers<[1], [0], [0], [1], [0, 0, 1, 1], [], []>} : vector<2x32xbf16>, vector<32x512xbf16>, vector<2x512xf32> -> vector<2x512xf32>
    %479 = vector.broadcast %298 : vector<1x512xf32> to vector<2x512xf32>
    %480 = arith.addf %478, %479 : vector<2x512xf32>
    %481 = vector.extract_strided_slice %480 {offsets = [0, 384], sizes = [2, 32], strides = [1, 1]} : vector<2x512xf32> to vector<2x32xf32>
    %482 = vector.shape_cast %481 : vector<2x32xf32> to vector<2x1x32xf32>
    %483 = vector.broadcast %482 : vector<2x1x32xf32> to vector<2x8x32xf32>
    %484 = arith.addf %292, %483 : vector<2x8x32xf32>
    %485 = math.tanh %484 : vector<2x8x32xf32>
    %486 = vector.broadcast %297 : vector<1x1x32xf32> to vector<2x8x32xf32>
    %487 = arith.mulf %485, %486 : vector<2x8x32xf32>
    %cst_99 = arith.constant dense<0.000000e+00> : vector<2x8xf32>
    %488 = vector.multi_reduction <add>, %487, %cst_99 [2] : vector<2x8x32xf32> to vector<2x8xf32>
    %cst_100 = arith.constant dense<0xFF800000> : vector<2xf32>
    %489 = vector.multi_reduction <maximumf>, %488, %cst_100 [1] : vector<2x8xf32> to vector<2xf32>
    %490 = vector.shape_cast %489 : vector<2xf32> to vector<2x1xf32>
    %491 = vector.broadcast %490 : vector<2x1xf32> to vector<2x8xf32>
    %492 = arith.subf %488, %491 : vector<2x8xf32>
    %493 = math.exp %492 : vector<2x8xf32>
    %cst_101 = arith.constant dense<0.000000e+00> : vector<2xf32>
    %494 = vector.multi_reduction <add>, %493, %cst_101 [1] : vector<2x8xf32> to vector<2xf32>
    %495 = vector.shape_cast %494 : vector<2xf32> to vector<2x1xf32>
    %496 = tpu.reciprocal %495 {approx = true} : vector<2x1xf32> -> vector<2x1xf32>
    %497 = vector.broadcast %496 : vector<2x1xf32> to vector<2x8xf32>
    %498 = arith.mulf %493, %497 : vector<2x8xf32>
    %c0_102 = arith.constant 0 : index
    %c0_103 = arith.constant 0 : index
    %499 = vector.load %arg7[%c0_102, %c0_103] : memref<128x384xbf16, #tpu.memory_space<vmem>>, vector<128x384xbf16>
    %cst_104 = arith.constant dense<0.000000e+00> : vector<2x384xf32>
    %500 = tpu.matmul %475, %499, %cst_104 {dimension_numbers = #tpu.dot_dimension_numbers<[1], [0], [0], [1], [0, 0, 1, 1], [], []>} : vector<2x128xbf16>, vector<128x384xbf16>, vector<2x384xf32> -> vector<2x384xf32>
    %501 = vector.shape_cast %498 : vector<2x8xf32> to vector<2x8x1xf32>
    %502 = vector.broadcast %501 : vector<2x8x1xf32> to vector<2x8x384xf32>
    %503 = arith.mulf %502, %295 : vector<2x8x384xf32>
    %cst_105 = arith.constant dense<0.000000e+00> : vector<2x384xf32>
    %504 = vector.multi_reduction <add>, %503, %cst_105 [1] : vector<2x8x384xf32> to vector<2x384xf32>
    %505 = arith.addf %500, %504 : vector<2x384xf32>
    %506 = vector.broadcast %299 : vector<1x384xf32> to vector<2x384xf32>
    %507 = arith.addf %505, %506 : vector<2x384xf32>
    %508 = vector.extract_strided_slice %507 {offsets = [0, 0], sizes = [2, 32], strides = [1, 1]} : vector<2x384xf32> to vector<2x32xf32>
    %509 = vector.extract_strided_slice %480 {offsets = [0, 0], sizes = [2, 32], strides = [1, 1]} : vector<2x512xf32> to vector<2x32xf32>
    %510 = arith.addf %508, %509 : vector<2x32xf32>
    %511 = arith.negf %510 : vector<2x32xf32>
    %512 = math.exp %511 : vector<2x32xf32>
    %cst_106 = arith.constant 1.000000e+00 : f32
    %513 = vector.broadcast %cst_106 : f32 to vector<2x32xf32>
    %514 = arith.addf %513, %512 : vector<2x32xf32>
    %515 = arith.divf %513, %514 : vector<2x32xf32>
    %516 = vector.extract_strided_slice %507 {offsets = [0, 128], sizes = [2, 32], strides = [1, 1]} : vector<2x384xf32> to vector<2x32xf32>
    %517 = vector.extract_strided_slice %480 {offsets = [0, 128], sizes = [2, 32], strides = [1, 1]} : vector<2x512xf32> to vector<2x32xf32>
    %518 = arith.addf %516, %517 : vector<2x32xf32>
    %519 = arith.negf %518 : vector<2x32xf32>
    %520 = math.exp %519 : vector<2x32xf32>
    %cst_107 = arith.constant 1.000000e+00 : f32
    %521 = vector.broadcast %cst_107 : f32 to vector<2x32xf32>
    %522 = arith.addf %521, %520 : vector<2x32xf32>
    %523 = arith.divf %521, %522 : vector<2x32xf32>
    %524 = vector.extract_strided_slice %507 {offsets = [0, 256], sizes = [2, 32], strides = [1, 1]} : vector<2x384xf32> to vector<2x32xf32>
    %525 = vector.extract_strided_slice %480 {offsets = [0, 256], sizes = [2, 32], strides = [1, 1]} : vector<2x512xf32> to vector<2x32xf32>
    %526 = arith.mulf %515, %525 : vector<2x32xf32>
    %527 = arith.addf %524, %526 : vector<2x32xf32>
    %528 = math.tanh %527 : vector<2x32xf32>
    %cst_108 = arith.constant 1.000000e+00 : f32
    %529 = vector.broadcast %cst_108 : f32 to vector<2x32xf32>
    %530 = arith.subf %529, %523 : vector<2x32xf32>
    %531 = arith.mulf %530, %528 : vector<2x32xf32>
    %532 = arith.mulf %523, %449 : vector<2x32xf32>
    %533 = arith.addf %531, %532 : vector<2x32xf32>
    %534 = arith.truncf %533 : vector<2x32xf32> to vector<2x32xbf16>
    %c0_109 = arith.constant 0 : index
    %c0_110 = arith.constant 0 : index
    %535 = vector.load %arg12[%c0_109, %c0_110] : memref<32x128xbf16, #tpu.memory_space<vmem>>, vector<32x128xbf16>
    %cst_111 = arith.constant dense<0.000000e+00> : vector<2x128xf32>
    %536 = tpu.matmul %534, %535, %cst_111 {dimension_numbers = #tpu.dot_dimension_numbers<[1], [0], [0], [1], [0, 0, 1, 1], [], []>} : vector<2x32xbf16>, vector<32x128xbf16>, vector<2x128xf32> -> vector<2x128xf32>
    %537 = vector.broadcast %300 : vector<1x128xf32> to vector<2x128xf32>
    %538 = arith.addf %536, %537 : vector<2x128xf32>
    %cst_112 = arith.constant dense<0xFF800000> : vector<2xf32>
    %539 = vector.multi_reduction <maximumf>, %538, %cst_112 [1] : vector<2x128xf32> to vector<2xf32>
    %540 = vector.shape_cast %539 : vector<2xf32> to vector<2x1xf32>
    %541 = vector.broadcast %540 : vector<2x1xf32> to vector<2x128xf32>
    %542 = arith.subf %538, %541 : vector<2x128xf32>
    %543 = math.exp %542 : vector<2x128xf32>
    %cst_113 = arith.constant dense<0.000000e+00> : vector<2xf32>
    %544 = vector.multi_reduction <add>, %543, %cst_113 [1] : vector<2x128xf32> to vector<2xf32>
    %545 = vector.shape_cast %544 : vector<2xf32> to vector<2x1xf32>
    %546 = math.log %545 : vector<2x1xf32>
    %547 = vector.broadcast %546 : vector<2x1xf32> to vector<2x128xf32>
    %548 = arith.subf %542, %547 : vector<2x128xf32>
    %549 = vector.broadcast %540 : vector<2x1xf32> to vector<2x128xf32>
    %550 = arith.cmpf oeq, %538, %549 : vector<2x128xf32>
    %c128_i32_114 = arith.constant 128 : i32
    %551 = vector.broadcast %c128_i32_114 : i32 to vector<2x128xi32>
    %552 = arith.select %550, %301, %551 : vector<2x128xi1>, vector<2x128xi32>
    %cst_115 = arith.constant dense<2147483647> : vector<2xi32>
    %553 = vector.multi_reduction <minsi>, %552, %cst_115 [1] : vector<2x128xi32> to vector<2xi32>
    %554 = vector.shape_cast %553 : vector<2xi32> to vector<2x1xi32>
    %555 = vector.broadcast %554 : vector<2x1xi32> to vector<2x128xi32>
    %556 = arith.cmpi eq, %301, %555 : vector<2x128xi32>
    %557 = arith.extui %556 : vector<2x128xi1> to vector<2x128xi32>
    %558 = arith.sitofp %557 : vector<2x128xi32> to vector<2x128xf32>
    %559 = arith.truncf %558 : vector<2x128xf32> to vector<2x128xbf16>
    %560 = arith.truncf %533 : vector<2x32xf32> to vector<2x32xbf16>
    %c0_116 = arith.constant 0 : index
    %c0_117 = arith.constant 0 : index
    %561 = vector.load %arg10[%c0_116, %c0_117] : memref<32x512xbf16, #tpu.memory_space<vmem>>, vector<32x512xbf16>
    %cst_118 = arith.constant dense<0.000000e+00> : vector<2x512xf32>
    %562 = tpu.matmul %560, %561, %cst_118 {dimension_numbers = #tpu.dot_dimension_numbers<[1], [0], [0], [1], [0, 0, 1, 1], [], []>} : vector<2x32xbf16>, vector<32x512xbf16>, vector<2x512xf32> -> vector<2x512xf32>
    %563 = vector.broadcast %298 : vector<1x512xf32> to vector<2x512xf32>
    %564 = arith.addf %562, %563 : vector<2x512xf32>
    %565 = vector.extract_strided_slice %564 {offsets = [0, 384], sizes = [2, 32], strides = [1, 1]} : vector<2x512xf32> to vector<2x32xf32>
    %566 = vector.shape_cast %565 : vector<2x32xf32> to vector<2x1x32xf32>
    %567 = vector.broadcast %566 : vector<2x1x32xf32> to vector<2x8x32xf32>
    %568 = arith.addf %292, %567 : vector<2x8x32xf32>
    %569 = math.tanh %568 : vector<2x8x32xf32>
    %570 = vector.broadcast %297 : vector<1x1x32xf32> to vector<2x8x32xf32>
    %571 = arith.mulf %569, %570 : vector<2x8x32xf32>
    %cst_119 = arith.constant dense<0.000000e+00> : vector<2x8xf32>
    %572 = vector.multi_reduction <add>, %571, %cst_119 [2] : vector<2x8x32xf32> to vector<2x8xf32>
    %cst_120 = arith.constant dense<0xFF800000> : vector<2xf32>
    %573 = vector.multi_reduction <maximumf>, %572, %cst_120 [1] : vector<2x8xf32> to vector<2xf32>
    %574 = vector.shape_cast %573 : vector<2xf32> to vector<2x1xf32>
    %575 = vector.broadcast %574 : vector<2x1xf32> to vector<2x8xf32>
    %576 = arith.subf %572, %575 : vector<2x8xf32>
    %577 = math.exp %576 : vector<2x8xf32>
    %cst_121 = arith.constant dense<0.000000e+00> : vector<2xf32>
    %578 = vector.multi_reduction <add>, %577, %cst_121 [1] : vector<2x8xf32> to vector<2xf32>
    %579 = vector.shape_cast %578 : vector<2xf32> to vector<2x1xf32>
    %580 = tpu.reciprocal %579 {approx = true} : vector<2x1xf32> -> vector<2x1xf32>
    %581 = vector.broadcast %580 : vector<2x1xf32> to vector<2x8xf32>
    %582 = arith.mulf %577, %581 : vector<2x8xf32>
    %c0_122 = arith.constant 0 : index
    %c0_123 = arith.constant 0 : index
    %583 = vector.load %arg7[%c0_122, %c0_123] : memref<128x384xbf16, #tpu.memory_space<vmem>>, vector<128x384xbf16>
    %cst_124 = arith.constant dense<0.000000e+00> : vector<2x384xf32>
    %584 = tpu.matmul %559, %583, %cst_124 {dimension_numbers = #tpu.dot_dimension_numbers<[1], [0], [0], [1], [0, 0, 1, 1], [], []>} : vector<2x128xbf16>, vector<128x384xbf16>, vector<2x384xf32> -> vector<2x384xf32>
    %585 = vector.shape_cast %582 : vector<2x8xf32> to vector<2x8x1xf32>
    %586 = vector.broadcast %585 : vector<2x8x1xf32> to vector<2x8x384xf32>
    %587 = arith.mulf %586, %295 : vector<2x8x384xf32>
    %cst_125 = arith.constant dense<0.000000e+00> : vector<2x384xf32>
    %588 = vector.multi_reduction <add>, %587, %cst_125 [1] : vector<2x8x384xf32> to vector<2x384xf32>
    %589 = arith.addf %584, %588 : vector<2x384xf32>
    %590 = vector.broadcast %299 : vector<1x384xf32> to vector<2x384xf32>
    %591 = arith.addf %589, %590 : vector<2x384xf32>
    %592 = vector.extract_strided_slice %591 {offsets = [0, 0], sizes = [2, 32], strides = [1, 1]} : vector<2x384xf32> to vector<2x32xf32>
    %593 = vector.extract_strided_slice %564 {offsets = [0, 0], sizes = [2, 32], strides = [1, 1]} : vector<2x512xf32> to vector<2x32xf32>
    %594 = arith.addf %592, %593 : vector<2x32xf32>
    %595 = arith.negf %594 : vector<2x32xf32>
    %596 = math.exp %595 : vector<2x32xf32>
    %cst_126 = arith.constant 1.000000e+00 : f32
    %597 = vector.broadcast %cst_126 : f32 to vector<2x32xf32>
    %598 = arith.addf %597, %596 : vector<2x32xf32>
    %599 = arith.divf %597, %598 : vector<2x32xf32>
    %600 = vector.extract_strided_slice %591 {offsets = [0, 128], sizes = [2, 32], strides = [1, 1]} : vector<2x384xf32> to vector<2x32xf32>
    %601 = vector.extract_strided_slice %564 {offsets = [0, 128], sizes = [2, 32], strides = [1, 1]} : vector<2x512xf32> to vector<2x32xf32>
    %602 = arith.addf %600, %601 : vector<2x32xf32>
    %603 = arith.negf %602 : vector<2x32xf32>
    %604 = math.exp %603 : vector<2x32xf32>
    %cst_127 = arith.constant 1.000000e+00 : f32
    %605 = vector.broadcast %cst_127 : f32 to vector<2x32xf32>
    %606 = arith.addf %605, %604 : vector<2x32xf32>
    %607 = arith.divf %605, %606 : vector<2x32xf32>
    %608 = vector.extract_strided_slice %591 {offsets = [0, 256], sizes = [2, 32], strides = [1, 1]} : vector<2x384xf32> to vector<2x32xf32>
    %609 = vector.extract_strided_slice %564 {offsets = [0, 256], sizes = [2, 32], strides = [1, 1]} : vector<2x512xf32> to vector<2x32xf32>
    %610 = arith.mulf %599, %609 : vector<2x32xf32>
    %611 = arith.addf %608, %610 : vector<2x32xf32>
    %612 = math.tanh %611 : vector<2x32xf32>
    %cst_128 = arith.constant 1.000000e+00 : f32
    %613 = vector.broadcast %cst_128 : f32 to vector<2x32xf32>
    %614 = arith.subf %613, %607 : vector<2x32xf32>
    %615 = arith.mulf %614, %612 : vector<2x32xf32>
    %616 = arith.mulf %607, %533 : vector<2x32xf32>
    %617 = arith.addf %615, %616 : vector<2x32xf32>
    %618 = arith.truncf %617 : vector<2x32xf32> to vector<2x32xbf16>
    %c0_129 = arith.constant 0 : index
    %c0_130 = arith.constant 0 : index
    %619 = vector.load %arg12[%c0_129, %c0_130] : memref<32x128xbf16, #tpu.memory_space<vmem>>, vector<32x128xbf16>
    %cst_131 = arith.constant dense<0.000000e+00> : vector<2x128xf32>
    %620 = tpu.matmul %618, %619, %cst_131 {dimension_numbers = #tpu.dot_dimension_numbers<[1], [0], [0], [1], [0, 0, 1, 1], [], []>} : vector<2x32xbf16>, vector<32x128xbf16>, vector<2x128xf32> -> vector<2x128xf32>
    %621 = vector.broadcast %300 : vector<1x128xf32> to vector<2x128xf32>
    %622 = arith.addf %620, %621 : vector<2x128xf32>
    %cst_132 = arith.constant dense<0xFF800000> : vector<2xf32>
    %623 = vector.multi_reduction <maximumf>, %622, %cst_132 [1] : vector<2x128xf32> to vector<2xf32>
    %624 = vector.shape_cast %623 : vector<2xf32> to vector<2x1xf32>
    %625 = vector.broadcast %624 : vector<2x1xf32> to vector<2x128xf32>
    %626 = arith.subf %622, %625 : vector<2x128xf32>
    %627 = math.exp %626 : vector<2x128xf32>
    %cst_133 = arith.constant dense<0.000000e+00> : vector<2xf32>
    %628 = vector.multi_reduction <add>, %627, %cst_133 [1] : vector<2x128xf32> to vector<2xf32>
    %629 = vector.shape_cast %628 : vector<2xf32> to vector<2x1xf32>
    %630 = math.log %629 : vector<2x1xf32>
    %631 = vector.broadcast %630 : vector<2x1xf32> to vector<2x128xf32>
    %632 = arith.subf %626, %631 : vector<2x128xf32>
    %633 = vector.broadcast %624 : vector<2x1xf32> to vector<2x128xf32>
    %634 = arith.cmpf oeq, %622, %633 : vector<2x128xf32>
    %c128_i32_134 = arith.constant 128 : i32
    %635 = vector.broadcast %c128_i32_134 : i32 to vector<2x128xi32>
    %636 = arith.select %634, %301, %635 : vector<2x128xi1>, vector<2x128xi32>
    %cst_135 = arith.constant dense<2147483647> : vector<2xi32>
    %637 = vector.multi_reduction <minsi>, %636, %cst_135 [1] : vector<2x128xi32> to vector<2xi32>
    %638 = vector.shape_cast %637 : vector<2xi32> to vector<2x1xi32>
    %639 = vector.broadcast %638 : vector<2x1xi32> to vector<2x128xi32>
    %640 = arith.cmpi eq, %301, %639 : vector<2x128xi32>
    %641 = arith.extui %640 : vector<2x128xi1> to vector<2x128xi32>
    %642 = arith.sitofp %641 : vector<2x128xi32> to vector<2x128xf32>
    %643 = arith.truncf %642 : vector<2x128xf32> to vector<2x128xbf16>
    %644 = arith.truncf %617 : vector<2x32xf32> to vector<2x32xbf16>
    %c0_136 = arith.constant 0 : index
    %c0_137 = arith.constant 0 : index
    %645 = vector.load %arg10[%c0_136, %c0_137] : memref<32x512xbf16, #tpu.memory_space<vmem>>, vector<32x512xbf16>
    %cst_138 = arith.constant dense<0.000000e+00> : vector<2x512xf32>
    %646 = tpu.matmul %644, %645, %cst_138 {dimension_numbers = #tpu.dot_dimension_numbers<[1], [0], [0], [1], [0, 0, 1, 1], [], []>} : vector<2x32xbf16>, vector<32x512xbf16>, vector<2x512xf32> -> vector<2x512xf32>
    %647 = vector.broadcast %298 : vector<1x512xf32> to vector<2x512xf32>
    %648 = arith.addf %646, %647 : vector<2x512xf32>
    %649 = vector.extract_strided_slice %648 {offsets = [0, 384], sizes = [2, 32], strides = [1, 1]} : vector<2x512xf32> to vector<2x32xf32>
    %650 = vector.shape_cast %649 : vector<2x32xf32> to vector<2x1x32xf32>
    %651 = vector.broadcast %650 : vector<2x1x32xf32> to vector<2x8x32xf32>
    %652 = arith.addf %292, %651 : vector<2x8x32xf32>
    %653 = math.tanh %652 : vector<2x8x32xf32>
    %654 = vector.broadcast %297 : vector<1x1x32xf32> to vector<2x8x32xf32>
    %655 = arith.mulf %653, %654 : vector<2x8x32xf32>
    %cst_139 = arith.constant dense<0.000000e+00> : vector<2x8xf32>
    %656 = vector.multi_reduction <add>, %655, %cst_139 [2] : vector<2x8x32xf32> to vector<2x8xf32>
    %cst_140 = arith.constant dense<0xFF800000> : vector<2xf32>
    %657 = vector.multi_reduction <maximumf>, %656, %cst_140 [1] : vector<2x8xf32> to vector<2xf32>
    %658 = vector.shape_cast %657 : vector<2xf32> to vector<2x1xf32>
    %659 = vector.broadcast %658 : vector<2x1xf32> to vector<2x8xf32>
    %660 = arith.subf %656, %659 : vector<2x8xf32>
    %661 = math.exp %660 : vector<2x8xf32>
    %cst_141 = arith.constant dense<0.000000e+00> : vector<2xf32>
    %662 = vector.multi_reduction <add>, %661, %cst_141 [1] : vector<2x8xf32> to vector<2xf32>
    %663 = vector.shape_cast %662 : vector<2xf32> to vector<2x1xf32>
    %664 = tpu.reciprocal %663 {approx = true} : vector<2x1xf32> -> vector<2x1xf32>
    %665 = vector.broadcast %664 : vector<2x1xf32> to vector<2x8xf32>
    %666 = arith.mulf %661, %665 : vector<2x8xf32>
    %c0_142 = arith.constant 0 : index
    %c0_143 = arith.constant 0 : index
    %667 = vector.load %arg7[%c0_142, %c0_143] : memref<128x384xbf16, #tpu.memory_space<vmem>>, vector<128x384xbf16>
    %cst_144 = arith.constant dense<0.000000e+00> : vector<2x384xf32>
    %668 = tpu.matmul %643, %667, %cst_144 {dimension_numbers = #tpu.dot_dimension_numbers<[1], [0], [0], [1], [0, 0, 1, 1], [], []>} : vector<2x128xbf16>, vector<128x384xbf16>, vector<2x384xf32> -> vector<2x384xf32>
    %669 = vector.shape_cast %666 : vector<2x8xf32> to vector<2x8x1xf32>
    %670 = vector.broadcast %669 : vector<2x8x1xf32> to vector<2x8x384xf32>
    %671 = arith.mulf %670, %295 : vector<2x8x384xf32>
    %cst_145 = arith.constant dense<0.000000e+00> : vector<2x384xf32>
    %672 = vector.multi_reduction <add>, %671, %cst_145 [1] : vector<2x8x384xf32> to vector<2x384xf32>
    %673 = arith.addf %668, %672 : vector<2x384xf32>
    %674 = vector.broadcast %299 : vector<1x384xf32> to vector<2x384xf32>
    %675 = arith.addf %673, %674 : vector<2x384xf32>
    %676 = vector.extract_strided_slice %675 {offsets = [0, 0], sizes = [2, 32], strides = [1, 1]} : vector<2x384xf32> to vector<2x32xf32>
    %677 = vector.extract_strided_slice %648 {offsets = [0, 0], sizes = [2, 32], strides = [1, 1]} : vector<2x512xf32> to vector<2x32xf32>
    %678 = arith.addf %676, %677 : vector<2x32xf32>
    %679 = arith.negf %678 : vector<2x32xf32>
    %680 = math.exp %679 : vector<2x32xf32>
    %cst_146 = arith.constant 1.000000e+00 : f32
    %681 = vector.broadcast %cst_146 : f32 to vector<2x32xf32>
    %682 = arith.addf %681, %680 : vector<2x32xf32>
    %683 = arith.divf %681, %682 : vector<2x32xf32>
    %684 = vector.extract_strided_slice %675 {offsets = [0, 128], sizes = [2, 32], strides = [1, 1]} : vector<2x384xf32> to vector<2x32xf32>
    %685 = vector.extract_strided_slice %648 {offsets = [0, 128], sizes = [2, 32], strides = [1, 1]} : vector<2x512xf32> to vector<2x32xf32>
    %686 = arith.addf %684, %685 : vector<2x32xf32>
    %687 = arith.negf %686 : vector<2x32xf32>
    %688 = math.exp %687 : vector<2x32xf32>
    %cst_147 = arith.constant 1.000000e+00 : f32
    %689 = vector.broadcast %cst_147 : f32 to vector<2x32xf32>
    %690 = arith.addf %689, %688 : vector<2x32xf32>
    %691 = arith.divf %689, %690 : vector<2x32xf32>
    %692 = vector.extract_strided_slice %675 {offsets = [0, 256], sizes = [2, 32], strides = [1, 1]} : vector<2x384xf32> to vector<2x32xf32>
    %693 = vector.extract_strided_slice %648 {offsets = [0, 256], sizes = [2, 32], strides = [1, 1]} : vector<2x512xf32> to vector<2x32xf32>
    %694 = arith.mulf %683, %693 : vector<2x32xf32>
    %695 = arith.addf %692, %694 : vector<2x32xf32>
    %696 = math.tanh %695 : vector<2x32xf32>
    %cst_148 = arith.constant 1.000000e+00 : f32
    %697 = vector.broadcast %cst_148 : f32 to vector<2x32xf32>
    %698 = arith.subf %697, %691 : vector<2x32xf32>
    %699 = arith.mulf %698, %696 : vector<2x32xf32>
    %700 = arith.mulf %691, %617 : vector<2x32xf32>
    %701 = arith.addf %699, %700 : vector<2x32xf32>
    %702 = arith.truncf %701 : vector<2x32xf32> to vector<2x32xbf16>
    %c0_149 = arith.constant 0 : index
    %c0_150 = arith.constant 0 : index
    %703 = vector.load %arg12[%c0_149, %c0_150] : memref<32x128xbf16, #tpu.memory_space<vmem>>, vector<32x128xbf16>
    %cst_151 = arith.constant dense<0.000000e+00> : vector<2x128xf32>
    %704 = tpu.matmul %702, %703, %cst_151 {dimension_numbers = #tpu.dot_dimension_numbers<[1], [0], [0], [1], [0, 0, 1, 1], [], []>} : vector<2x32xbf16>, vector<32x128xbf16>, vector<2x128xf32> -> vector<2x128xf32>
    %705 = vector.broadcast %300 : vector<1x128xf32> to vector<2x128xf32>
    %706 = arith.addf %704, %705 : vector<2x128xf32>
    %cst_152 = arith.constant dense<0xFF800000> : vector<2xf32>
    %707 = vector.multi_reduction <maximumf>, %706, %cst_152 [1] : vector<2x128xf32> to vector<2xf32>
    %708 = vector.shape_cast %707 : vector<2xf32> to vector<2x1xf32>
    %709 = vector.broadcast %708 : vector<2x1xf32> to vector<2x128xf32>
    %710 = arith.subf %706, %709 : vector<2x128xf32>
    %711 = math.exp %710 : vector<2x128xf32>
    %cst_153 = arith.constant dense<0.000000e+00> : vector<2xf32>
    %712 = vector.multi_reduction <add>, %711, %cst_153 [1] : vector<2x128xf32> to vector<2xf32>
    %713 = vector.shape_cast %712 : vector<2xf32> to vector<2x1xf32>
    %714 = math.log %713 : vector<2x1xf32>
    %715 = vector.broadcast %714 : vector<2x1xf32> to vector<2x128xf32>
    %716 = arith.subf %710, %715 : vector<2x128xf32>
    %717 = vector.broadcast %708 : vector<2x1xf32> to vector<2x128xf32>
    %718 = arith.cmpf oeq, %706, %717 : vector<2x128xf32>
    %c128_i32_154 = arith.constant 128 : i32
    %719 = vector.broadcast %c128_i32_154 : i32 to vector<2x128xi32>
    %720 = arith.select %718, %301, %719 : vector<2x128xi1>, vector<2x128xi32>
    %cst_155 = arith.constant dense<2147483647> : vector<2xi32>
    %721 = vector.multi_reduction <minsi>, %720, %cst_155 [1] : vector<2x128xi32> to vector<2xi32>
    %722 = vector.shape_cast %721 : vector<2xi32> to vector<2x1xi32>
    %723 = vector.broadcast %722 : vector<2x1xi32> to vector<2x128xi32>
    %724 = arith.cmpi eq, %301, %723 : vector<2x128xi32>
    %725 = arith.extui %724 : vector<2x128xi1> to vector<2x128xi32>
    %726 = arith.sitofp %725 : vector<2x128xi32> to vector<2x128xf32>
    %727 = arith.truncf %726 : vector<2x128xf32> to vector<2x128xbf16>
    %728 = arith.truncf %701 : vector<2x32xf32> to vector<2x32xbf16>
    %c0_156 = arith.constant 0 : index
    %c0_157 = arith.constant 0 : index
    %729 = vector.load %arg10[%c0_156, %c0_157] : memref<32x512xbf16, #tpu.memory_space<vmem>>, vector<32x512xbf16>
    %cst_158 = arith.constant dense<0.000000e+00> : vector<2x512xf32>
    %730 = tpu.matmul %728, %729, %cst_158 {dimension_numbers = #tpu.dot_dimension_numbers<[1], [0], [0], [1], [0, 0, 1, 1], [], []>} : vector<2x32xbf16>, vector<32x512xbf16>, vector<2x512xf32> -> vector<2x512xf32>
    %731 = vector.broadcast %298 : vector<1x512xf32> to vector<2x512xf32>
    %732 = arith.addf %730, %731 : vector<2x512xf32>
    %733 = vector.extract_strided_slice %732 {offsets = [0, 384], sizes = [2, 32], strides = [1, 1]} : vector<2x512xf32> to vector<2x32xf32>
    %734 = vector.shape_cast %733 : vector<2x32xf32> to vector<2x1x32xf32>
    %735 = vector.broadcast %734 : vector<2x1x32xf32> to vector<2x8x32xf32>
    %736 = arith.addf %292, %735 : vector<2x8x32xf32>
    %737 = math.tanh %736 : vector<2x8x32xf32>
    %738 = vector.broadcast %297 : vector<1x1x32xf32> to vector<2x8x32xf32>
    %739 = arith.mulf %737, %738 : vector<2x8x32xf32>
    %cst_159 = arith.constant dense<0.000000e+00> : vector<2x8xf32>
    %740 = vector.multi_reduction <add>, %739, %cst_159 [2] : vector<2x8x32xf32> to vector<2x8xf32>
    %cst_160 = arith.constant dense<0xFF800000> : vector<2xf32>
    %741 = vector.multi_reduction <maximumf>, %740, %cst_160 [1] : vector<2x8xf32> to vector<2xf32>
    %742 = vector.shape_cast %741 : vector<2xf32> to vector<2x1xf32>
    %743 = vector.broadcast %742 : vector<2x1xf32> to vector<2x8xf32>
    %744 = arith.subf %740, %743 : vector<2x8xf32>
    %745 = math.exp %744 : vector<2x8xf32>
    %cst_161 = arith.constant dense<0.000000e+00> : vector<2xf32>
    %746 = vector.multi_reduction <add>, %745, %cst_161 [1] : vector<2x8xf32> to vector<2xf32>
    %747 = vector.shape_cast %746 : vector<2xf32> to vector<2x1xf32>
    %748 = tpu.reciprocal %747 {approx = true} : vector<2x1xf32> -> vector<2x1xf32>
    %749 = vector.broadcast %748 : vector<2x1xf32> to vector<2x8xf32>
    %750 = arith.mulf %745, %749 : vector<2x8xf32>
    %c0_162 = arith.constant 0 : index
    %c0_163 = arith.constant 0 : index
    %751 = vector.load %arg7[%c0_162, %c0_163] : memref<128x384xbf16, #tpu.memory_space<vmem>>, vector<128x384xbf16>
    %cst_164 = arith.constant dense<0.000000e+00> : vector<2x384xf32>
    %752 = tpu.matmul %727, %751, %cst_164 {dimension_numbers = #tpu.dot_dimension_numbers<[1], [0], [0], [1], [0, 0, 1, 1], [], []>} : vector<2x128xbf16>, vector<128x384xbf16>, vector<2x384xf32> -> vector<2x384xf32>
    %753 = vector.shape_cast %750 : vector<2x8xf32> to vector<2x8x1xf32>
    %754 = vector.broadcast %753 : vector<2x8x1xf32> to vector<2x8x384xf32>
    %755 = arith.mulf %754, %295 : vector<2x8x384xf32>
    %cst_165 = arith.constant dense<0.000000e+00> : vector<2x384xf32>
    %756 = vector.multi_reduction <add>, %755, %cst_165 [1] : vector<2x8x384xf32> to vector<2x384xf32>
    %757 = arith.addf %752, %756 : vector<2x384xf32>
    %758 = vector.broadcast %299 : vector<1x384xf32> to vector<2x384xf32>
    %759 = arith.addf %757, %758 : vector<2x384xf32>
    %760 = vector.extract_strided_slice %759 {offsets = [0, 0], sizes = [2, 32], strides = [1, 1]} : vector<2x384xf32> to vector<2x32xf32>
    %761 = vector.extract_strided_slice %732 {offsets = [0, 0], sizes = [2, 32], strides = [1, 1]} : vector<2x512xf32> to vector<2x32xf32>
    %762 = arith.addf %760, %761 : vector<2x32xf32>
    %763 = arith.negf %762 : vector<2x32xf32>
    %764 = math.exp %763 : vector<2x32xf32>
    %cst_166 = arith.constant 1.000000e+00 : f32
    %765 = vector.broadcast %cst_166 : f32 to vector<2x32xf32>
    %766 = arith.addf %765, %764 : vector<2x32xf32>
    %767 = arith.divf %765, %766 : vector<2x32xf32>
    %768 = vector.extract_strided_slice %759 {offsets = [0, 128], sizes = [2, 32], strides = [1, 1]} : vector<2x384xf32> to vector<2x32xf32>
    %769 = vector.extract_strided_slice %732 {offsets = [0, 128], sizes = [2, 32], strides = [1, 1]} : vector<2x512xf32> to vector<2x32xf32>
    %770 = arith.addf %768, %769 : vector<2x32xf32>
    %771 = arith.negf %770 : vector<2x32xf32>
    %772 = math.exp %771 : vector<2x32xf32>
    %cst_167 = arith.constant 1.000000e+00 : f32
    %773 = vector.broadcast %cst_167 : f32 to vector<2x32xf32>
    %774 = arith.addf %773, %772 : vector<2x32xf32>
    %775 = arith.divf %773, %774 : vector<2x32xf32>
    %776 = vector.extract_strided_slice %759 {offsets = [0, 256], sizes = [2, 32], strides = [1, 1]} : vector<2x384xf32> to vector<2x32xf32>
    %777 = vector.extract_strided_slice %732 {offsets = [0, 256], sizes = [2, 32], strides = [1, 1]} : vector<2x512xf32> to vector<2x32xf32>
    %778 = arith.mulf %767, %777 : vector<2x32xf32>
    %779 = arith.addf %776, %778 : vector<2x32xf32>
    %780 = math.tanh %779 : vector<2x32xf32>
    %cst_168 = arith.constant 1.000000e+00 : f32
    %781 = vector.broadcast %cst_168 : f32 to vector<2x32xf32>
    %782 = arith.subf %781, %775 : vector<2x32xf32>
    %783 = arith.mulf %782, %780 : vector<2x32xf32>
    %784 = arith.mulf %775, %701 : vector<2x32xf32>
    %785 = arith.addf %783, %784 : vector<2x32xf32>
    %786 = arith.truncf %785 : vector<2x32xf32> to vector<2x32xbf16>
    %c0_169 = arith.constant 0 : index
    %c0_170 = arith.constant 0 : index
    %787 = vector.load %arg12[%c0_169, %c0_170] : memref<32x128xbf16, #tpu.memory_space<vmem>>, vector<32x128xbf16>
    %cst_171 = arith.constant dense<0.000000e+00> : vector<2x128xf32>
    %788 = tpu.matmul %786, %787, %cst_171 {dimension_numbers = #tpu.dot_dimension_numbers<[1], [0], [0], [1], [0, 0, 1, 1], [], []>} : vector<2x32xbf16>, vector<32x128xbf16>, vector<2x128xf32> -> vector<2x128xf32>
    %789 = vector.broadcast %300 : vector<1x128xf32> to vector<2x128xf32>
    %790 = arith.addf %788, %789 : vector<2x128xf32>
    %cst_172 = arith.constant dense<0xFF800000> : vector<2xf32>
    %791 = vector.multi_reduction <maximumf>, %790, %cst_172 [1] : vector<2x128xf32> to vector<2xf32>
    %792 = vector.shape_cast %791 : vector<2xf32> to vector<2x1xf32>
    %793 = vector.broadcast %792 : vector<2x1xf32> to vector<2x128xf32>
    %794 = arith.subf %790, %793 : vector<2x128xf32>
    %795 = math.exp %794 : vector<2x128xf32>
    %cst_173 = arith.constant dense<0.000000e+00> : vector<2xf32>
    %796 = vector.multi_reduction <add>, %795, %cst_173 [1] : vector<2x128xf32> to vector<2xf32>
    %797 = vector.shape_cast %796 : vector<2xf32> to vector<2x1xf32>
    %798 = math.log %797 : vector<2x1xf32>
    %799 = vector.broadcast %798 : vector<2x1xf32> to vector<2x128xf32>
    %800 = arith.subf %794, %799 : vector<2x128xf32>
    %801 = vector.broadcast %792 : vector<2x1xf32> to vector<2x128xf32>
    %802 = arith.cmpf oeq, %790, %801 : vector<2x128xf32>
    %c128_i32_174 = arith.constant 128 : i32
    %803 = vector.broadcast %c128_i32_174 : i32 to vector<2x128xi32>
    %804 = arith.select %802, %301, %803 : vector<2x128xi1>, vector<2x128xi32>
    %cst_175 = arith.constant dense<2147483647> : vector<2xi32>
    %805 = vector.multi_reduction <minsi>, %804, %cst_175 [1] : vector<2x128xi32> to vector<2xi32>
    %806 = vector.shape_cast %805 : vector<2xi32> to vector<2x1xi32>
    %807 = vector.broadcast %806 : vector<2x1xi32> to vector<2x128xi32>
    %808 = arith.cmpi eq, %301, %807 : vector<2x128xi32>
    %809 = arith.extui %808 : vector<2x128xi1> to vector<2x128xi32>
    %810 = arith.sitofp %809 : vector<2x128xi32> to vector<2x128xf32>
    %811 = arith.truncf %810 : vector<2x128xf32> to vector<2x128xbf16>
    %812 = arith.truncf %785 : vector<2x32xf32> to vector<2x32xbf16>
    %c0_176 = arith.constant 0 : index
    %c0_177 = arith.constant 0 : index
    %813 = vector.load %arg10[%c0_176, %c0_177] : memref<32x512xbf16, #tpu.memory_space<vmem>>, vector<32x512xbf16>
    %cst_178 = arith.constant dense<0.000000e+00> : vector<2x512xf32>
    %814 = tpu.matmul %812, %813, %cst_178 {dimension_numbers = #tpu.dot_dimension_numbers<[1], [0], [0], [1], [0, 0, 1, 1], [], []>} : vector<2x32xbf16>, vector<32x512xbf16>, vector<2x512xf32> -> vector<2x512xf32>
    %815 = vector.broadcast %298 : vector<1x512xf32> to vector<2x512xf32>
    %816 = arith.addf %814, %815 : vector<2x512xf32>
    %817 = vector.extract_strided_slice %816 {offsets = [0, 384], sizes = [2, 32], strides = [1, 1]} : vector<2x512xf32> to vector<2x32xf32>
    %818 = vector.shape_cast %817 : vector<2x32xf32> to vector<2x1x32xf32>
    %819 = vector.broadcast %818 : vector<2x1x32xf32> to vector<2x8x32xf32>
    %820 = arith.addf %292, %819 : vector<2x8x32xf32>
    %821 = math.tanh %820 : vector<2x8x32xf32>
    %822 = vector.broadcast %297 : vector<1x1x32xf32> to vector<2x8x32xf32>
    %823 = arith.mulf %821, %822 : vector<2x8x32xf32>
    %cst_179 = arith.constant dense<0.000000e+00> : vector<2x8xf32>
    %824 = vector.multi_reduction <add>, %823, %cst_179 [2] : vector<2x8x32xf32> to vector<2x8xf32>
    %cst_180 = arith.constant dense<0xFF800000> : vector<2xf32>
    %825 = vector.multi_reduction <maximumf>, %824, %cst_180 [1] : vector<2x8xf32> to vector<2xf32>
    %826 = vector.shape_cast %825 : vector<2xf32> to vector<2x1xf32>
    %827 = vector.broadcast %826 : vector<2x1xf32> to vector<2x8xf32>
    %828 = arith.subf %824, %827 : vector<2x8xf32>
    %829 = math.exp %828 : vector<2x8xf32>
    %cst_181 = arith.constant dense<0.000000e+00> : vector<2xf32>
    %830 = vector.multi_reduction <add>, %829, %cst_181 [1] : vector<2x8xf32> to vector<2xf32>
    %831 = vector.shape_cast %830 : vector<2xf32> to vector<2x1xf32>
    %832 = tpu.reciprocal %831 {approx = true} : vector<2x1xf32> -> vector<2x1xf32>
    %833 = vector.broadcast %832 : vector<2x1xf32> to vector<2x8xf32>
    %834 = arith.mulf %829, %833 : vector<2x8xf32>
    %c0_182 = arith.constant 0 : index
    %c0_183 = arith.constant 0 : index
    %835 = vector.load %arg7[%c0_182, %c0_183] : memref<128x384xbf16, #tpu.memory_space<vmem>>, vector<128x384xbf16>
    %cst_184 = arith.constant dense<0.000000e+00> : vector<2x384xf32>
    %836 = tpu.matmul %811, %835, %cst_184 {dimension_numbers = #tpu.dot_dimension_numbers<[1], [0], [0], [1], [0, 0, 1, 1], [], []>} : vector<2x128xbf16>, vector<128x384xbf16>, vector<2x384xf32> -> vector<2x384xf32>
    %837 = vector.shape_cast %834 : vector<2x8xf32> to vector<2x8x1xf32>
    %838 = vector.broadcast %837 : vector<2x8x1xf32> to vector<2x8x384xf32>
    %839 = arith.mulf %838, %295 : vector<2x8x384xf32>
    %cst_185 = arith.constant dense<0.000000e+00> : vector<2x384xf32>
    %840 = vector.multi_reduction <add>, %839, %cst_185 [1] : vector<2x8x384xf32> to vector<2x384xf32>
    %841 = arith.addf %836, %840 : vector<2x384xf32>
    %842 = vector.broadcast %299 : vector<1x384xf32> to vector<2x384xf32>
    %843 = arith.addf %841, %842 : vector<2x384xf32>
    %844 = vector.extract_strided_slice %843 {offsets = [0, 0], sizes = [2, 32], strides = [1, 1]} : vector<2x384xf32> to vector<2x32xf32>
    %845 = vector.extract_strided_slice %816 {offsets = [0, 0], sizes = [2, 32], strides = [1, 1]} : vector<2x512xf32> to vector<2x32xf32>
    %846 = arith.addf %844, %845 : vector<2x32xf32>
    %847 = arith.negf %846 : vector<2x32xf32>
    %848 = math.exp %847 : vector<2x32xf32>
    %cst_186 = arith.constant 1.000000e+00 : f32
    %849 = vector.broadcast %cst_186 : f32 to vector<2x32xf32>
    %850 = arith.addf %849, %848 : vector<2x32xf32>
    %851 = arith.divf %849, %850 : vector<2x32xf32>
    %852 = vector.extract_strided_slice %843 {offsets = [0, 128], sizes = [2, 32], strides = [1, 1]} : vector<2x384xf32> to vector<2x32xf32>
    %853 = vector.extract_strided_slice %816 {offsets = [0, 128], sizes = [2, 32], strides = [1, 1]} : vector<2x512xf32> to vector<2x32xf32>
    %854 = arith.addf %852, %853 : vector<2x32xf32>
    %855 = arith.negf %854 : vector<2x32xf32>
    %856 = math.exp %855 : vector<2x32xf32>
    %cst_187 = arith.constant 1.000000e+00 : f32
    %857 = vector.broadcast %cst_187 : f32 to vector<2x32xf32>
    %858 = arith.addf %857, %856 : vector<2x32xf32>
    %859 = arith.divf %857, %858 : vector<2x32xf32>
    %860 = vector.extract_strided_slice %843 {offsets = [0, 256], sizes = [2, 32], strides = [1, 1]} : vector<2x384xf32> to vector<2x32xf32>
    %861 = vector.extract_strided_slice %816 {offsets = [0, 256], sizes = [2, 32], strides = [1, 1]} : vector<2x512xf32> to vector<2x32xf32>
    %862 = arith.mulf %851, %861 : vector<2x32xf32>
    %863 = arith.addf %860, %862 : vector<2x32xf32>
    %864 = math.tanh %863 : vector<2x32xf32>
    %cst_188 = arith.constant 1.000000e+00 : f32
    %865 = vector.broadcast %cst_188 : f32 to vector<2x32xf32>
    %866 = arith.subf %865, %859 : vector<2x32xf32>
    %867 = arith.mulf %866, %864 : vector<2x32xf32>
    %868 = arith.mulf %859, %785 : vector<2x32xf32>
    %869 = arith.addf %867, %868 : vector<2x32xf32>
    %870 = arith.truncf %869 : vector<2x32xf32> to vector<2x32xbf16>
    %c0_189 = arith.constant 0 : index
    %c0_190 = arith.constant 0 : index
    %871 = vector.load %arg12[%c0_189, %c0_190] : memref<32x128xbf16, #tpu.memory_space<vmem>>, vector<32x128xbf16>
    %cst_191 = arith.constant dense<0.000000e+00> : vector<2x128xf32>
    %872 = tpu.matmul %870, %871, %cst_191 {dimension_numbers = #tpu.dot_dimension_numbers<[1], [0], [0], [1], [0, 0, 1, 1], [], []>} : vector<2x32xbf16>, vector<32x128xbf16>, vector<2x128xf32> -> vector<2x128xf32>
    %873 = vector.broadcast %300 : vector<1x128xf32> to vector<2x128xf32>
    %874 = arith.addf %872, %873 : vector<2x128xf32>
    %cst_192 = arith.constant dense<0xFF800000> : vector<2xf32>
    %875 = vector.multi_reduction <maximumf>, %874, %cst_192 [1] : vector<2x128xf32> to vector<2xf32>
    %876 = vector.shape_cast %875 : vector<2xf32> to vector<2x1xf32>
    %877 = vector.broadcast %876 : vector<2x1xf32> to vector<2x128xf32>
    %878 = arith.subf %874, %877 : vector<2x128xf32>
    %879 = math.exp %878 : vector<2x128xf32>
    %cst_193 = arith.constant dense<0.000000e+00> : vector<2xf32>
    %880 = vector.multi_reduction <add>, %879, %cst_193 [1] : vector<2x128xf32> to vector<2xf32>
    %881 = vector.shape_cast %880 : vector<2xf32> to vector<2x1xf32>
    %882 = math.log %881 : vector<2x1xf32>
    %883 = vector.broadcast %882 : vector<2x1xf32> to vector<2x128xf32>
    %884 = arith.subf %878, %883 : vector<2x128xf32>
    %885 = vector.broadcast %876 : vector<2x1xf32> to vector<2x128xf32>
    %886 = arith.cmpf oeq, %874, %885 : vector<2x128xf32>
    %c128_i32_194 = arith.constant 128 : i32
    %887 = vector.broadcast %c128_i32_194 : i32 to vector<2x128xi32>
    %888 = arith.select %886, %301, %887 : vector<2x128xi1>, vector<2x128xi32>
    %cst_195 = arith.constant dense<2147483647> : vector<2xi32>
    %889 = vector.multi_reduction <minsi>, %888, %cst_195 [1] : vector<2x128xi32> to vector<2xi32>
    %890 = vector.shape_cast %889 : vector<2xi32> to vector<2x1xi32>
    %891 = vector.broadcast %890 : vector<2x1xi32> to vector<2x128xi32>
    %892 = arith.cmpi eq, %301, %891 : vector<2x128xi32>
    %893 = arith.extui %892 : vector<2x128xi1> to vector<2x128xi32>
    %894 = arith.sitofp %893 : vector<2x128xi32> to vector<2x128xf32>
    %895 = arith.truncf %894 : vector<2x128xf32> to vector<2x128xbf16>
    %896 = arith.truncf %869 : vector<2x32xf32> to vector<2x32xbf16>
    %c0_196 = arith.constant 0 : index
    %c0_197 = arith.constant 0 : index
    %897 = vector.load %arg10[%c0_196, %c0_197] : memref<32x512xbf16, #tpu.memory_space<vmem>>, vector<32x512xbf16>
    %cst_198 = arith.constant dense<0.000000e+00> : vector<2x512xf32>
    %898 = tpu.matmul %896, %897, %cst_198 {dimension_numbers = #tpu.dot_dimension_numbers<[1], [0], [0], [1], [0, 0, 1, 1], [], []>} : vector<2x32xbf16>, vector<32x512xbf16>, vector<2x512xf32> -> vector<2x512xf32>
    %899 = vector.broadcast %298 : vector<1x512xf32> to vector<2x512xf32>
    %900 = arith.addf %898, %899 : vector<2x512xf32>
    %901 = vector.extract_strided_slice %900 {offsets = [0, 384], sizes = [2, 32], strides = [1, 1]} : vector<2x512xf32> to vector<2x32xf32>
    %902 = vector.shape_cast %901 : vector<2x32xf32> to vector<2x1x32xf32>
    %903 = vector.broadcast %902 : vector<2x1x32xf32> to vector<2x8x32xf32>
    %904 = arith.addf %292, %903 : vector<2x8x32xf32>
    %905 = math.tanh %904 : vector<2x8x32xf32>
    %906 = vector.broadcast %297 : vector<1x1x32xf32> to vector<2x8x32xf32>
    %907 = arith.mulf %905, %906 : vector<2x8x32xf32>
    %cst_199 = arith.constant dense<0.000000e+00> : vector<2x8xf32>
    %908 = vector.multi_reduction <add>, %907, %cst_199 [2] : vector<2x8x32xf32> to vector<2x8xf32>
    %cst_200 = arith.constant dense<0xFF800000> : vector<2xf32>
    %909 = vector.multi_reduction <maximumf>, %908, %cst_200 [1] : vector<2x8xf32> to vector<2xf32>
    %910 = vector.shape_cast %909 : vector<2xf32> to vector<2x1xf32>
    %911 = vector.broadcast %910 : vector<2x1xf32> to vector<2x8xf32>
    %912 = arith.subf %908, %911 : vector<2x8xf32>
    %913 = math.exp %912 : vector<2x8xf32>
    %cst_201 = arith.constant dense<0.000000e+00> : vector<2xf32>
    %914 = vector.multi_reduction <add>, %913, %cst_201 [1] : vector<2x8xf32> to vector<2xf32>
    %915 = vector.shape_cast %914 : vector<2xf32> to vector<2x1xf32>
    %916 = tpu.reciprocal %915 {approx = true} : vector<2x1xf32> -> vector<2x1xf32>
    %917 = vector.broadcast %916 : vector<2x1xf32> to vector<2x8xf32>
    %918 = arith.mulf %913, %917 : vector<2x8xf32>
    %c0_202 = arith.constant 0 : index
    %c0_203 = arith.constant 0 : index
    %919 = vector.load %arg7[%c0_202, %c0_203] : memref<128x384xbf16, #tpu.memory_space<vmem>>, vector<128x384xbf16>
    %cst_204 = arith.constant dense<0.000000e+00> : vector<2x384xf32>
    %920 = tpu.matmul %895, %919, %cst_204 {dimension_numbers = #tpu.dot_dimension_numbers<[1], [0], [0], [1], [0, 0, 1, 1], [], []>} : vector<2x128xbf16>, vector<128x384xbf16>, vector<2x384xf32> -> vector<2x384xf32>
    %921 = vector.shape_cast %918 : vector<2x8xf32> to vector<2x8x1xf32>
    %922 = vector.broadcast %921 : vector<2x8x1xf32> to vector<2x8x384xf32>
    %923 = arith.mulf %922, %295 : vector<2x8x384xf32>
    %cst_205 = arith.constant dense<0.000000e+00> : vector<2x384xf32>
    %924 = vector.multi_reduction <add>, %923, %cst_205 [1] : vector<2x8x384xf32> to vector<2x384xf32>
    %925 = arith.addf %920, %924 : vector<2x384xf32>
    %926 = vector.broadcast %299 : vector<1x384xf32> to vector<2x384xf32>
    %927 = arith.addf %925, %926 : vector<2x384xf32>
    %928 = vector.extract_strided_slice %927 {offsets = [0, 0], sizes = [2, 32], strides = [1, 1]} : vector<2x384xf32> to vector<2x32xf32>
    %929 = vector.extract_strided_slice %900 {offsets = [0, 0], sizes = [2, 32], strides = [1, 1]} : vector<2x512xf32> to vector<2x32xf32>
    %930 = arith.addf %928, %929 : vector<2x32xf32>
    %931 = arith.negf %930 : vector<2x32xf32>
    %932 = math.exp %931 : vector<2x32xf32>
    %cst_206 = arith.constant 1.000000e+00 : f32
    %933 = vector.broadcast %cst_206 : f32 to vector<2x32xf32>
    %934 = arith.addf %933, %932 : vector<2x32xf32>
    %935 = arith.divf %933, %934 : vector<2x32xf32>
    %936 = vector.extract_strided_slice %927 {offsets = [0, 128], sizes = [2, 32], strides = [1, 1]} : vector<2x384xf32> to vector<2x32xf32>
    %937 = vector.extract_strided_slice %900 {offsets = [0, 128], sizes = [2, 32], strides = [1, 1]} : vector<2x512xf32> to vector<2x32xf32>
    %938 = arith.addf %936, %937 : vector<2x32xf32>
    %939 = arith.negf %938 : vector<2x32xf32>
    %940 = math.exp %939 : vector<2x32xf32>
    %cst_207 = arith.constant 1.000000e+00 : f32
    %941 = vector.broadcast %cst_207 : f32 to vector<2x32xf32>
    %942 = arith.addf %941, %940 : vector<2x32xf32>
    %943 = arith.divf %941, %942 : vector<2x32xf32>
    %944 = vector.extract_strided_slice %927 {offsets = [0, 256], sizes = [2, 32], strides = [1, 1]} : vector<2x384xf32> to vector<2x32xf32>
    %945 = vector.extract_strided_slice %900 {offsets = [0, 256], sizes = [2, 32], strides = [1, 1]} : vector<2x512xf32> to vector<2x32xf32>
    %946 = arith.mulf %935, %945 : vector<2x32xf32>
    %947 = arith.addf %944, %946 : vector<2x32xf32>
    %948 = math.tanh %947 : vector<2x32xf32>
    %cst_208 = arith.constant 1.000000e+00 : f32
    %949 = vector.broadcast %cst_208 : f32 to vector<2x32xf32>
    %950 = arith.subf %949, %943 : vector<2x32xf32>
    %951 = arith.mulf %950, %948 : vector<2x32xf32>
    %952 = arith.mulf %943, %869 : vector<2x32xf32>
    %953 = arith.addf %951, %952 : vector<2x32xf32>
    %954 = arith.truncf %953 : vector<2x32xf32> to vector<2x32xbf16>
    %c0_209 = arith.constant 0 : index
    %c0_210 = arith.constant 0 : index
    %955 = vector.load %arg12[%c0_209, %c0_210] : memref<32x128xbf16, #tpu.memory_space<vmem>>, vector<32x128xbf16>
    %cst_211 = arith.constant dense<0.000000e+00> : vector<2x128xf32>
    %956 = tpu.matmul %954, %955, %cst_211 {dimension_numbers = #tpu.dot_dimension_numbers<[1], [0], [0], [1], [0, 0, 1, 1], [], []>} : vector<2x32xbf16>, vector<32x128xbf16>, vector<2x128xf32> -> vector<2x128xf32>
    %957 = vector.broadcast %300 : vector<1x128xf32> to vector<2x128xf32>
    %958 = arith.addf %956, %957 : vector<2x128xf32>
    %cst_212 = arith.constant dense<0xFF800000> : vector<2xf32>
    %959 = vector.multi_reduction <maximumf>, %958, %cst_212 [1] : vector<2x128xf32> to vector<2xf32>
    %960 = vector.shape_cast %959 : vector<2xf32> to vector<2x1xf32>
    %961 = vector.broadcast %960 : vector<2x1xf32> to vector<2x128xf32>
    %962 = arith.subf %958, %961 : vector<2x128xf32>
    %963 = math.exp %962 : vector<2x128xf32>
    %cst_213 = arith.constant dense<0.000000e+00> : vector<2xf32>
    %964 = vector.multi_reduction <add>, %963, %cst_213 [1] : vector<2x128xf32> to vector<2xf32>
    %965 = vector.shape_cast %964 : vector<2xf32> to vector<2x1xf32>
    %966 = math.log %965 : vector<2x1xf32>
    %967 = vector.broadcast %966 : vector<2x1xf32> to vector<2x128xf32>
    %968 = arith.subf %962, %967 : vector<2x128xf32>
    %969 = vector.broadcast %960 : vector<2x1xf32> to vector<2x128xf32>
    %970 = arith.cmpf oeq, %958, %969 : vector<2x128xf32>
    %c128_i32_214 = arith.constant 128 : i32
    %971 = vector.broadcast %c128_i32_214 : i32 to vector<2x128xi32>
    %972 = arith.select %970, %301, %971 : vector<2x128xi1>, vector<2x128xi32>
    %cst_215 = arith.constant dense<2147483647> : vector<2xi32>
    %973 = vector.multi_reduction <minsi>, %972, %cst_215 [1] : vector<2x128xi32> to vector<2xi32>
    %974 = vector.shape_cast %380 : vector<2x128xf32> to vector<1x2x128xf32>
    %975 = vector.shape_cast %464 : vector<2x128xf32> to vector<1x2x128xf32>
    %976 = vector.shape_cast %548 : vector<2x128xf32> to vector<1x2x128xf32>
    %977 = vector.shape_cast %632 : vector<2x128xf32> to vector<1x2x128xf32>
    %978 = vector.shape_cast %716 : vector<2x128xf32> to vector<1x2x128xf32>
    %979 = vector.shape_cast %800 : vector<2x128xf32> to vector<1x2x128xf32>
    %980 = vector.shape_cast %884 : vector<2x128xf32> to vector<1x2x128xf32>
    %981 = vector.shape_cast %968 : vector<2x128xf32> to vector<1x2x128xf32>
    %982 = tpu.concatenate %974, %975, %976, %977, %978, %979, %980, %981 in 0 : vector<1x2x128xf32>, vector<1x2x128xf32>, vector<1x2x128xf32>, vector<1x2x128xf32>, vector<1x2x128xf32>, vector<1x2x128xf32>, vector<1x2x128xf32>, vector<1x2x128xf32> -> vector<8x2x128xf32>
    %c0_216 = arith.constant 0 : index
    %c0_217 = arith.constant 0 : index
    %c0_218 = arith.constant 0 : index
    %983 = vector.load %arg14[%c0_216, %c0_217, %c0_218] : memref<8x2x128xf32, #tpu.memory_space<vmem>>, vector<8x2x128xf32>
    tpu.vector_store %arg14[%c0_216, %c0_217, %c0_218], %982 {strides = array<i32>} : memref<8x2x128xf32, #tpu.memory_space<vmem>>, vector<8x2x128xf32>,
    %984 = vector.shape_cast %385 : vector<2xi32> to vector<1x2xi32>
    %985 = vector.shape_cast %469 : vector<2xi32> to vector<1x2xi32>
    %986 = vector.shape_cast %553 : vector<2xi32> to vector<1x2xi32>
    %987 = vector.shape_cast %637 : vector<2xi32> to vector<1x2xi32>
    %988 = vector.shape_cast %721 : vector<2xi32> to vector<1x2xi32>
    %989 = vector.shape_cast %805 : vector<2xi32> to vector<1x2xi32>
    %990 = vector.shape_cast %889 : vector<2xi32> to vector<1x2xi32>
    %991 = vector.shape_cast %973 : vector<2xi32> to vector<1x2xi32>
    %992 = tpu.concatenate %984, %985, %986, %987, %988, %989, %990, %991 in 0 : vector<1x2xi32>, vector<1x2xi32>, vector<1x2xi32>, vector<1x2xi32>, vector<1x2xi32>, vector<1x2xi32>, vector<1x2xi32>, vector<1x2xi32> -> vector<8x2xi32>
    %c0_219 = arith.constant 0 : index
    %c0_220 = arith.constant 0 : index
    %993 = vector.load %arg15[%c0_219, %c0_220] : memref<8x2xi32, #tpu.memory_space<vmem>>, vector<8x2xi32>
    tpu.vector_store %arg15[%c0_219, %c0_220], %992 {strides = array<i32>} : memref<8x2xi32, #tpu.memory_space<vmem>>, vector<8x2xi32>,
    return
  }
}

</mosaic_0001>

<bundles_post_ra>
// kernel: tpu_custom_call.1
= control target key start
LH: loop header
LB: loop body
LE: loop exit
PB: predicated region body
PF: predicated region fallthrough
CT: control target
= control target key end

     0   :  { %21 = vsyncpa [#allocation3], 0  ;;  %s8945_s0 = inlined_call_operand.hbm [shape: f32[8,2,64], index: 0, kind: input, shape index: {}]   ;;  %s8946_s1 = inlined_call_operand.hbm [shape: bf16[64,96], index: 1, kind: input, shape index: {}]   ;;  %s8947_s2 = inlined_call_operand.vmem [shape: f32[1,96], index: 2, kind: input, shape index: {}]   ;;  %s8948_s3 = inlined_call_operand.hbm [shape: bf16[32,384], index: 3, kind: input, shape index: {}]   ;;  %s8949_s4 = inlined_call_operand.hbm [shape: f32[1,384], index: 4, kind: input, shape index: {}]   ;;  %s8950_s5 = inlined_call_operand.vmem [shape: bf16[32,32], index: 5, kind: input, shape index: {}]   ;;  %s8951_s6 = inlined_call_operand.hbm [shape: f32[1,32], index: 6, kind: input, shape index: {}]   ;;  %s8952_s7 = inlined_call_operand.hbm [shape: bf16[128,384], index: 7, kind: input, shape index: {}]   ;;  %s8953_s8 = inlined_call_operand.hbm [shape: bf16[32,384], index: 8, kind: input, shape index: {}]   ;;  %s8954_s9 = inlined_call_operand.hbm [shape: f32[1,384], index: 9, kind: input, shape index: {}]   ;;  %s8955_s10 = inlined_call_operand.hbm [shape: bf16[32,512], index: 10, kind: input, shape index: {}]   ;;  %s8956_s11 = inlined_call_operand.vmem [shape: f32[1,512], index: 11, kind: input, shape index: {}]   ;;  %s8957_s12 = inlined_call_operand.vmem [shape: bf16[32,128], index: 12, kind: input, shape index: {}]   ;;  %s8958_s13 = inlined_call_operand.vmem [shape: f32[1,128], index: 13, kind: input, shape index: {}]   ;;  %s8959_s14 = inlined_call_operand.hbm [shape: f32[8,2,128], index: 14, kind: output, shape index: {0}]   ;;  %s8960_s15 = inlined_call_operand.vmem [shape: s32[8,2], index: 15, kind: output, shape index: {1}]  }
   0x1   :  { %22 = vsyncpa [#allocation6], 0 }
   0x2   :  { %23 = vsyncpa [#allocation9], 0 }
   0x3   :  { %24 = vsyncpa [#allocation12], 0 }
   0x4   :  { %25 = vsyncpa [#allocation15], 0 }
   0x5   :  { %26 = vsyncpa [#allocation4], 0  ;;  %s7045_s18 = smov [#allocation5]   ;;  %s6813_s22 = scalar_lea.hbm %s8946_s1, 512 }
   0x6   :  { %s44_s19 = sshll.u32 %s7045_s18, 4  ;;  %p6814_p0 = scmp.ne.s32.totalorder %s8946_s1, %s6813_s22  ;;  %s45_s19 = int_to_ptr.vmem [resolvable:$true] %s44_s19 }
   0x7   :  { %p6817_p1 = scmp.lt.u32.totalorder %s6813_s22, %s8946_s1 }
   0x9   :  { %p6819_p2 = pnand %p6817_p1, %p6814_p0 }
   0xb   :  { %6822 = shalt.err (!%p6819_p2)
}
   0xc   :  { %s6823_s27 = scalar_lea.vmem %s45_s19, 512  ;;  %p6828_p4 = scmp.lt.s32.totalorder %s45_s19, %s45_s19 }
   0xd   :  { %p6824_p3 = scmp.ne.s32.totalorder %s45_s19, %s6823_s27  ;;  %p6829_p5 = scmp.lt.s32.totalorder %s6823_s27, %s6823_s27 }
   0xf   :  { %p6830_p6 = por %p6829_p5, %p6828_p4 }
  0x11   :  { %p6831_p7 = pnand %p6830_p6, %p6824_p3 }
  0x13   :  { %6834 = shalt.err (!%p6831_p7)
}
  0x14   :  { %s7046_s28 = smov 64   ;;  %s7047_s29 = smov 4  }
  0x15   :  { %50 = dma.hbm_to_vmem [thread:$0]  %s8946_s1, 512, %s45_s19, [#allocation6], %s7046_s28, %s7046_s28, %s7047_s29  }
  0x16   :  { %s7048_s17 = smov [#allocation8]   ;;  %s6835_s22 = scalar_lea.hbm %s8949_s4, 48 }
  0x17   :  { %s71_s18 = sshll.u32 %s7048_s17, 4  ;;  %p6836_p8 = scmp.ne.s32.totalorder %s8949_s4, %s6835_s22  ;;  %s72_s18 = int_to_ptr.vmem [resolvable:$true] %s71_s18 }
  0x18   :  { %p6839_p9 = scmp.lt.u32.totalorder %s6835_s22, %s8949_s4 }
  0x1a   :  { %p6841_p10 = pnand %p6839_p9, %p6836_p8 }
  0x1c   :  { %6844 = shalt.err (!%p6841_p10)
}
  0x1d   :  { %s6845_s27 = scalar_lea.vmem %s72_s18, 48  ;;  %s6849_s1 = scalar_lea.vmem %s72_s18, 64 }
  0x1e   :  { %p6846_p11 = scmp.ne.s32.totalorder %s72_s18, %s6845_s27  ;;  %p6850_p12 = scmp.lt.s32.totalorder %s72_s18, %s72_s18 }
  0x1f   :  { %p6851_p13 = scmp.lt.s32.totalorder %s6849_s1, %s6845_s27 }
  0x21   :  { %p6852_p0 = por %p6851_p13, %p6850_p12 }
  0x23   :  { %p6853_p1 = pnand %p6852_p0, %p6846_p11 }
  0x25   :  { %6856 = shalt.err (!%p6853_p1)
}
  0x26   :  { %74 = dma.hbm_to_vmem [thread:$0]  %s8949_s4, 48, %s72_s18, [#allocation9]  }
  0x27   :  { %s7049_s30 = smov [#allocation11]   ;;  %s7050_s17 = smov [#allocation14]  }
  0x28   :  { %s92_s16 = sshll.u32 %s7049_s30, 4  ;;  %s117_s20 = sshll.u32 %s7050_s17, 4  ;;  %s93_s16 = int_to_ptr.vmem [resolvable:$true] %s92_s16  ;;  %s7176_s20 = int_to_ptr.vmem [resolvable:$true] %s117_s20 }
  0x29   :  { %s6857_s23 = scalar_lea.hbm %s8952_s7, 3072 }
  0x2a   :  { %p6858_p2 = scmp.ne.s32.totalorder %s8952_s7, %s6857_s23  ;;  %p6861_p3 = scmp.lt.u32.totalorder %s6857_s23, %s8952_s7 }
  0x2c   :  { %p6863_p4 = pnand %p6861_p3, %p6858_p2 }
  0x2e   :  { %6866 = shalt.err (!%p6863_p4)
}
  0x2f   :  { %s6867_s4 = scalar_lea.vmem %s93_s16, 3072  ;;  %p6872_p6 = scmp.lt.s32.totalorder %s93_s16, %s93_s16 }
  0x30   :  { %p6868_p5 = scmp.ne.s32.totalorder %s93_s16, %s6867_s4  ;;  %p6873_p7 = scmp.lt.s32.totalorder %s6867_s4, %s6867_s4 }
  0x32   :  { %p6874_p8 = por %p6873_p7, %p6872_p6 }
  0x34   :  { %p6875_p9 = pnand %p6874_p8, %p6868_p5 }
  0x36   :  { %6878 = shalt.err (!%p6875_p9)
}
  0x37   :  { %s7051_s18 = smov 192   ;;  %s7052_s1 = smov 12  }
  0x38   :  { %98 = dma.hbm_to_vmem [thread:$0]  %s8952_s7, 3072, %s93_s16, [#allocation12], %s7051_s18, %s7051_s18, %s7052_s1  }
  0x39   :  { %s6879_s21 = scalar_lea.hbm %s8954_s9, 48 }
  0x3a   :  { %p6880_p10 = scmp.ne.s32.totalorder %s8954_s9, %s6879_s21  ;;  %p6883_p11 = scmp.lt.u32.totalorder %s6879_s21, %s8954_s9 }
  0x3c   :  { %p6885_p12 = pnand %p6883_p11, %p6880_p10 }
  0x3e   :  { %6888 = shalt.err (!%p6885_p12)
}
  0x3f   :  { %s6889_s26 = scalar_lea.vmem %s7176_s20, 48  ;;  %s6893_s7 = scalar_lea.vmem %s7176_s20, 64 }
  0x40   :  { %p6890_p13 = scmp.ne.s32.totalorder %s7176_s20, %s6889_s26  ;;  %p6894_p0 = scmp.lt.s32.totalorder %s7176_s20, %s7176_s20 }
  0x41   :  { %p6895_p1 = scmp.lt.s32.totalorder %s6893_s7, %s6889_s26 }
  0x43   :  { %p6896_p2 = por %p6895_p1, %p6894_p0 }
  0x45   :  { %p6897_p3 = pnand %p6896_p2, %p6890_p13 }
  0x47   :  { %6900 = shalt.err (!%p6897_p3)
}
  0x48   :  { %120 = dma.hbm_to_vmem [thread:$0]  %s8954_s9, 48, %s7176_s20, [#allocation15]  }
  0x49   :  { %s7053_s4 = smov [#allocation2]   ;;  %s6901_s17 = scalar_lea.hbm %s8945_s0, 256 }
  0x4a   :  { %s32_s19 = sshll.u32 %s7053_s4, 4  ;;  %p6902_p4 = scmp.ne.s32.totalorder %s8945_s0, %s6901_s17  ;;  %s33_s19 = int_to_ptr.vmem [resolvable:$true] %s32_s19 }
  0x4b   :  { %p6905_p5 = scmp.lt.u32.totalorder %s6901_s17, %s8945_s0 }
  0x4d   :  { %p6907_p6 = pnand %p6905_p5, %p6902_p4 }
  0x4f   :  { %6910 = shalt.err (!%p6907_p6)
}
  0x50   :  { %s6911_s25 = scalar_lea.vmem %s33_s19, 256  ;;  %p6916_p8 = scmp.lt.s32.totalorder %s33_s19, %s33_s19 }
  0x51   :  { %p6912_p7 = scmp.ne.s32.totalorder %s33_s19, %s6911_s25  ;;  %p6917_p9 = scmp.lt.s32.totalorder %s6911_s25, %s6911_s25 }
  0x53   :  { %p6918_p10 = por %p6917_p9, %p6916_p8 }
  0x55   :  { %p6919_p11 = pnand %p6918_p10, %p6912_p7 }
  0x57   :  { %6922 = shalt.err (!%p6919_p11)
}
  0x58   :  { %s7054_s9 = smov 32   ;;  %s7055_s20 = smov 2  }
  0x59   :  { %38 = dma.hbm_to_vmem [thread:$0]  %s8945_s0, 256, %s33_s19, [#allocation3], %s7054_s9, %s7054_s9, %s7055_s20  }
  0x5a   :  { %s7056_s16 = smov [#allocation7]   ;;  %s7057_s4 = smov [#allocation10]  }
  0x5b   :  { %s58_s27 = sshll.u32 %s7056_s16, 4  ;;  %s83_s29 = sshll.u32 %s7057_s4, 4  ;;  %s59_s27 = int_to_ptr.vmem [resolvable:$true] %s58_s27  ;;  %s84_s29 = int_to_ptr.vmem [resolvable:$true] %s83_s29 }
  0x5c   :  { %s6923_s21 = scalar_lea.hbm %s8948_s3, 768 }
  0x5d   :  { %p6924_p12 = scmp.ne.s32.totalorder %s8948_s3, %s6923_s21  ;;  %p6927_p13 = scmp.lt.u32.totalorder %s6923_s21, %s8948_s3 }
  0x5f   :  { %p6929_p0 = pnand %p6927_p13, %p6924_p12 }
  0x61   :  { %6932 = shalt.err (!%p6929_p0)
}
  0x62   :  { %s6933_s0 = scalar_lea.vmem %s59_s27, 768  ;;  %p6938_p2 = scmp.lt.s32.totalorder %s59_s27, %s59_s27 }
  0x63   :  { %p6934_p1 = scmp.ne.s32.totalorder %s59_s27, %s6933_s0  ;;  %p6939_p3 = scmp.lt.s32.totalorder %s6933_s0, %s6933_s0 }
  0x65   :  { %p6940_p4 = por %p6939_p3, %p6938_p2 }
  0x67   :  { %p6941_p5 = pnand %p6940_p4, %p6934_p1 }
  0x69   :  { %6944 = shalt.err (!%p6941_p5)
}
  0x6a   :  { %64 = dma.hbm_to_vmem [thread:$0]  %s8948_s3, 768, %s59_s27, [#allocation6], %s7051_s18, %s7051_s18, %s7052_s1  }
  0x6b   :  { %s6945_s4 = scalar_lea.hbm %s8951_s6, 16 }
  0x6c   :  { %p6946_p6 = scmp.ne.s32.totalorder %s8951_s6, %s6945_s4  ;;  %p6949_p7 = scmp.lt.u32.totalorder %s6945_s4, %s8951_s6 }
  0x6e   :  { %p6951_p8 = pnand %p6949_p7, %p6946_p6 }
  0x70   :  { %6954 = shalt.err (!%p6951_p8)
}
  0x71   :  { %s6955_s23 = scalar_lea.vmem %s84_s29, 16  ;;  %s6959_s24 = scalar_lea.vmem %s84_s29, 32 }
  0x72   :  { %p6956_p9 = scmp.ne.s32.totalorder %s84_s29, %s6955_s23  ;;  %p6960_p10 = scmp.lt.s32.totalorder %s84_s29, %s84_s29 }
  0x73   :  { %p6961_p11 = scmp.lt.s32.totalorder %s6959_s24, %s6955_s23 }
  0x75   :  { %p6962_p12 = por %p6961_p11, %p6960_p10 }
  0x77   :  { %p6963_p13 = pnand %p6962_p12, %p6956_p9 }
  0x79   :  { %6966 = shalt.err (!%p6963_p13)
}
  0x7a   :  { %86 = dma.hbm_to_vmem [thread:$0]  %s8951_s6, 16, %s84_s29, [#allocation9]  }
  0x7b   :  { %s7058_s25 = smov [#allocation13]   ;;  %s7059_s19 = smov [#allocation16]  }
  0x7c   :  { %s104_s0 = sshll.u32 %s7058_s25, 4  ;;  %s126_s26 = sshll.u32 %s7059_s19, 4  ;;  %s105_s0 = int_to_ptr.vmem [resolvable:$true] %s104_s0  ;;  %s127_s26 = int_to_ptr.vmem [resolvable:$true] %s126_s26 }
  0x7d   :  { %s6967_s4 = scalar_lea.hbm %s8953_s8, 768 }
  0x7e   :  { %p6968_p0 = scmp.ne.s32.totalorder %s8953_s8, %s6967_s4  ;;  %p6971_p1 = scmp.lt.u32.totalorder %s6967_s4, %s8953_s8 }
  0x80   :  { %p6973_p2 = pnand %p6971_p1, %p6968_p0 }
  0x82   :  { %6976 = shalt.err (!%p6973_p2)
}
  0x83   :  { %s6977_s6 = scalar_lea.vmem %s105_s0, 768  ;;  %p6982_p4 = scmp.lt.s32.totalorder %s105_s0, %s105_s0 }
  0x84   :  { %p6978_p3 = scmp.ne.s32.totalorder %s105_s0, %s6977_s6  ;;  %p6983_p5 = scmp.lt.s32.totalorder %s6977_s6, %s6977_s6 }
  0x86   :  { %p6984_p6 = por %p6983_p5, %p6982_p4 }
  0x88   :  { %p6985_p7 = pnand %p6984_p6, %p6978_p3 }
  0x8a   :  { %6988 = shalt.err (!%p6985_p7)
}
  0x8b   :  { %110 = dma.hbm_to_vmem [thread:$0]  %s8953_s8, 768, %s105_s0, [#allocation12], %s7051_s18, %s7051_s18, %s7052_s1  }
  0x8c   :  { %s6989_s27 = scalar_lea.hbm %s8955_s10, 1024 }
  0x8d   :  { %p6990_p8 = scmp.ne.s32.totalorder %s8955_s10, %s6989_s27  ;;  %p6993_p9 = scmp.lt.u32.totalorder %s6989_s27, %s8955_s10 }
  0x8f   :  { %p6995_p10 = pnand %p6993_p9, %p6990_p8 }
  0x91   :  { %6998 = shalt.err (!%p6995_p10)
}
  0x92   :  { %s6999_s4 = scalar_lea.vmem %s127_s26, 1024  ;;  %p7004_p12 = scmp.lt.s32.totalorder %s127_s26, %s127_s26 }
  0x93   :  { %p7000_p11 = scmp.ne.s32.totalorder %s127_s26, %s6999_s4  ;;  %p7005_p13 = scmp.lt.s32.totalorder %s6999_s4, %s6999_s4 }
  0x95   :  { %p7006_p0 = por %p7005_p13, %p7004_p12 }
  0x97   :  { %p7007_p1 = pnand %p7006_p0, %p7000_p11 }
  0x99   :  { %7010 = shalt.err (!%p7007_p1)
}
  0x9a   :  { %s7060_s8 = smov 256   ;;  %s7061_s18 = smov 16  }
  0x9b   :  { %132 = dma.hbm_to_vmem [thread:$0]  %s8955_s10, 1024, %s127_s26, [#allocation15], %s7060_s8, %s7060_s8, %s7061_s18  }
  0x9c   :  { %7033 = dma.done.wait [#allocation3], 256  }
  0x9d   :  { %7034 = vsyncadd [#allocation3], 4294967040 }
  0x9e   :  { %7035 = dma.done.wait [#allocation6], 1280  }
  0x9f   :  { %7036 = vsyncadd [#allocation6], 4294966016 }
  0xa0   :  { %7037 = dma.done.wait [#allocation9], 64  }
  0xa1   :  { %7038 = vsyncadd [#allocation9], 4294967232 }
  0xa2   :  { %7039 = dma.done.wait [#allocation12], 3840  }
  0xa3   :  { %7040 = vsyncadd [#allocation12], 4294963456 }
  0xa4   :  { %7041 = dma.done.wait [#allocation15], 1072  }
  0xa5   :  { %7042 = vsyncadd [#allocation15], 4294966224  ;;  %v8965_v0 = vmov 0.0   ;;  %v8961_v1 = vmov 0   ;;  %vm7064_vm0 = vmmov 0   ;;  %v188_v4 = vlaneseq  ;;  %v6401_v5 = vld [vmem:[#allocation5] sm:$0xff]  }
  0xa6   :  { %5978 = vmatprep.subr.bf16.mxu0 %v8965_v0  ;;  %441 = vmatprep.mubr.bf16.mxu1 %v8961_v1  ;;  %v7065_v2 = vmov 1983009808   ;;  %v6402_v6 = vld [vmem:[#allocation5 + $0x8] sm:$0xff]   ;;  %v7286_v7 = vld [vmem:[#allocation7 + $0x4] ss:$12 sps:$4 sm:$0xff]   ;;  %v6410_v19 = vld [vmem:[#allocation5 + $0x18] sm:$0xff]  }
  0xa7   :  { %5986 = vmatprep.mubr.msk.bf16.mxu0 %vm7064_vm0, %v8965_v0  ;;  %6400 = vset.pattern.permute.xlu0 %v8961_v1  ;;  %v186_v3 = vunpack.c.l.s4 %v7065_v2  ;;  %v7289_v9 = vshrl.u32 %v188_v4, 7  ;;  %v7292_v10 = vld [vmem:[#allocation7] ss:$12 sps:$4 sm:$0xff]   ;;  %v7296_v11 = vld [vmem:[#allocation7 + $0x1c] ss:$12 sps:$4 sm:$0xff]   ;;  %v6406_v13 = vld [vmem:[#allocation5 + $0x10] sm:$0xff]  }
  0xa8   :  { %6399 = vset.pattern.permute.xlu1 %v8961_v1  ;;  %5979 = vmatpush3.bf16.msra.mxu0 %v6401_v5  ;;  %v7298_v12 = vld [vmem:[#allocation7 + $0x18] ss:$12 sps:$4 sm:$0xff]   ;;  %v167_v14 = vld [vmem:[#allocation2] sm:$0x3]  ;;  %v168_v16 = vld [vmem:[#allocation2 + $0x2] sm:$0x3] }
  0xa9   :  { %v187_v8 = vunpack.c.0.s8 %v186_v3  ;;  %5980 = vmatprep.subr.bf16.mxu0 %v8965_v0  ;;  %409 = vmatprep.subr.bf16.mxu1 %v7286_v7  ;;  %v169_v17 = vld [vmem:[#allocation2 + $0x4] sm:$0x3]  ;;  %v170_v18 = vld [vmem:[#allocation2 + $0x6] sm:$0x3]  ;;  %v171_v20 = vld [vmem:[#allocation2 + $0x8] sm:$0x3]  ;;  %v183_v23 = vcombine.low %v167_v14, %v168_v16 }
  0xaa   :  { %410 = vmatpush1.bf16.msra.mxu1 %v7292_v10  ;;  %v172_v21 = vld [vmem:[#allocation2 + $0xa] sm:$0x3]  ;;  %v173_v22 = vld [vmem:[#allocation2 + $0xc] sm:$0x3]  ;;  %v184_v24 = vcombine.low %v169_v17, %v170_v18  ;;  %v174_v25 = vld [vmem:[#allocation2 + $0xe] sm:$0x3] }
  0xab   :  { %v7301_v15 = vsub.s32 %v187_v8, %v7289_v9  ;;  %411 = vmatprep.subr.bf16.mxu1 %v7296_v11  ;;  %v200_v26 = vcombine.low %v171_v20, %v172_v21  ;;  %v201_v29 = vcombine.low %v173_v22, %v174_v25  ;;  %v7309_v30 = vld [vmem:[#allocation7 + $0x8] ss:$12 sps:$4 sm:$0xff]   ;;  %v7313_v32 = vld [vmem:[#allocation7 + $0x20] ss:$12 sps:$4 sm:$0xff]   ;;  %vm259_vm1 = vcmask 523264  }
  0xac   :  { %5981 = vmatpush3.bf16.msra.mxu0 %v6402_v6  ;;  %v7337_v37 = vsub.s32 0, %v7289_v9  ;;  %v356_v38 = vld [vmem:[#allocation8] sm:$0x7]  ;;  %v7353_v61 = vsub.s32 2, %v7289_v9  ;;  %v7356_v62 = vsub.s32 1, %v7289_v9  ;;  %vm405_vm2 = vcmask 261120  }
  0xad   :  { %5982 = vmatprep.subr.bf16.mxu0 %v8965_v0  ;;  %v191_v27 = vrot.slane %v183_v23, %v7301_v15  ;;  %v198_v28 = vrot.slane %v184_v24, %v7301_v15  ;;  %v208_v31 = vrot.slane %v200_v26, %v7301_v15  ;;  %v215_v34 = vrot.slane %v201_v29, %v7301_v15  ;;  %v5676_v44 = vld [vmem:[%s8947_s2] ss:$0 sm:$0xff]  ;;  %s7066_s2 = smov 96  }
  0xae   :  { %412 = vmatpush1.bf16.msra.mxu1 %v7298_v12  ;;  %9098 = vst [vmem:[#allocation24_spill] sm:$0xff] %v7337_v37  ;;  %v7340_v42 = vrot.slane %v356_v38, %v7337_v37  ;;  %9099 = vst [vmem:[#allocation25_spill] sm:$0xff] %v7356_v62  ;;  %v7359_v63 = vrot.slane %v356_v38, %v7353_v61  ;;  %v7362_v2 = vrot.slane %v356_v38, %v7356_v62  ;;  %vm1570_vm3 = vcmask 1040384  }
  0xaf   :  { %5990 = vmatprep.subr.bf16.mxu1 %v8965_v0  ;;  %v199_v33 = vcombine.low %v191_v27, %v198_v28  ;;  %v216_v35 = vcombine.low %v208_v31, %v215_v34  ;;  %vm1573_vm4 = vcmask 1041408   ;;  %vm1576_vm5 = vcmask 1042432  }
  0xb0   :  { %5983 = vmatpush3.bf16.msra.mxu0 %v6406_v13  ;;  %vm1579_vm6 = vcmask 1043456   ;;  %vm1582_vm7 = vcmask 1044480   ;;  %vm1585_vm8 = vcmask 1045504   ;;  %vm1588_vm9 = vcmask 1046528  }
  0xb1   :  { %5984 = vmatprep.subr.bf16.mxu0 %v8965_v0  ;;  %442 = vmatmul.mubr.bf16.vlgmr.msra.gmra.mrb[0].mxu1 %v8961_v1  ;;  %v219_v36 = vpack.c.bf16 %v216_v35, %v199_v33  ;;  %vm2013_vm12 = vcmask 1041409   ;;  %vm2016_vm13 = vcmask 58368  }
  0xb2   :  { %5991 = vmatpush3.bf16.msra.mxu1 %v7309_v30  ;;  %5994 = vmatprep.mubr.msk.bf16.mxu1 %vm7064_vm0, %v8965_v0 }
  0xb3   :  { %5992 = vmatprep.subr.bf16.mxu1 %v8965_v0 }
  0xb4   :  { %5985 = vmatpush3.bf16.msra.mxu0 %v6410_v19 }
  0xb5   :  { %537 = vmatprep.subr.bf16.mxu0 %v7286_v7 }
  0xb6   :  { %5993 = vmatpush3.bf16.msra.mxu1 %v7313_v32 }
  0xb7   :  { %5987 = vmatmul.mubr.msk.bf16.vlgmr.msra.gmra.mrb[0].mxu0 %vm259_vm1, %v219_v36  ;;  %5998 = vmatprep.subr.bf16.mxu1 %v8965_v0 }
  0xb8   :  { %538 = vmatpush1.bf16.msra.mxu0 %v7292_v10  ;;  %569 = vmatprep.mubr.bf16.mxu0 %v8961_v1 }
  0xb9   :  { %5995 = vmatmul.mubr.bf16.vlgmr.msra.gmra.mrb[4].mxu1 %v8961_v1  ;;  %539 = vmatprep.subr.bf16.mxu0 %v7296_v11 }
  0xba   :  { %5999 = vmatpush3.bf16.msra.mxu1 %v7309_v30  ;;  %6002 = vmatprep.mubr.msk.bf16.mxu1 %vm7064_vm0, %v8965_v0 }
  0xbb   :  { %6000 = vmatprep.subr.bf16.mxu1 %v8965_v0 }
  0xbc   :  { %540 = vmatpush1.bf16.msra.mxu0 %v7298_v12 }
  0xbd   :  { %665 = vmatprep.subr.bf16.mxu0 %v7286_v7 }
  0xbe   :  { %6001 = vmatpush3.bf16.msra.mxu1 %v7313_v32 }
  0xbf   :  { %6006 = vmatprep.subr.bf16.mxu1 %v8965_v0 }
 0x184   :  { %v443_v39 = vpop.f32.mrb[0].mxu1 }
 0x185   :  { %v445_v40 = vpop.f32.mrb[1].mxu1  ;;  %v444_v46 = vadd.f32 %v443_v39, %v7340_v42 }
 0x186   :  { %v447_v41 = vpop.f32.mrb[2].mxu1  ;;  %v446_v6 = vadd.f32 %v445_v40, %v7362_v2 }
 0x187   :  { %v448_v43 = vpop.f32.mrb[3].mxu1 }
 0x188   :  { %v504_v13 = vrot.slane %v446_v6, %v7301_v15 }
 0x18a   :  { %v297_v45 = vpop.f32.mrb[0].mxu0 }
 0x18b   :  { %v7346_v47 = vadd.f32 %v5676_v44, %v297_v45  ;;  %v5988_v48 = vpop.f32.mrb[1].mxu0 }
 0x18c   :  { %v300_v49 = vpop.f32.mrb[2].mxu0  ;;  %v484_v50 = vpop.f32.mrb[4].mxu1 }
 0x18d   :  { %v313_v51 = vrot.slane %v7346_v47, %v7301_v15  ;;  %v7350_v52 = vadd.f32 %v5676_v44, %v300_v49  ;;  %v5989_v53 = vpop.f32.mrb[3].mxu0  ;;  %v5996_v54 = vpop.f32.mrb[5].mxu1  ;;  %v485_v3 = vadd.f32 %v484_v50, %v7359_v63 }
 0x18e   :  { %v487_v55 = vpop.f32.mrb[6].mxu1 }
 0x18f   :  { %v490_v56 = vadd.f32 %v444_v46, %v313_v51  ;;  %v5997_v57 = vpop.f32.mrb[7].mxu1  ;;  %v321_v35 = vcombine.high %v313_v51, %v313_v51 }
 0x191   :  { %v5688_v58 = vmul.f32 -1.442695, %v490_v56 }
 0x193   :  { %6469 = vpow2.f32 %v5688_v58 }
 0x19d   :  { %v6470_v59 = vpop.eup %6469 }
 0x19e   :  { %v494_v60 = vadd.f32 1.0, %v6470_v59 }
 0x1a0   :  { %6471 = vrcp.f32 %v494_v60 }
 0x1aa   :  { %v6472_v5 = vpop.eup %6471 }
 0x1ab   :  { %v515_v8 = vmul.f32 %v6472_v5, %v485_v3 }
 0x1ad   :  { %517 = vrot.lane.b32.xlu0 %v515_v8, %s7046_s28 }
 0x1b1   :  { %505 = vrot.lane.b32.xlu0 %v504_v13, %s7054_s9 }
 0x21f   :  { %v518_v14 = vpop.permute.xlu0 %517 }
 0x220   :  { %v520_v16 = vadd.f32 %v518_v14, %v313_v51 }
 0x222   :  { %6473 = vtanh.f32 %v520_v16 }
 0x223   :  { %v506_v18 = vpop.permute.xlu0 %505 }
 0x224   :  { %v508_v19 = vadd.f32 %v506_v18, %v313_v51 }
 0x226   :  { %v5689_v20 = vmul.f32 -1.442695, %v508_v19 }
 0x228   :  { %6475 = vpow2.f32 %v5689_v20 }
 0x22c   :  { %v6474_v17 = vpop.eup %6473 }
 0x22d   :  { %524 = vrot.lane.b32.xlu1 %v6474_v17, %s7066_s2 }
 0x232   :  { %v6476_v21 = vpop.eup %6475 }
 0x233   :  { %v512_v22 = vadd.f32 1.0, %v6476_v21  ;;  %v306_v21 = vcombine.high %v7346_v47, %v7346_v47 }
 0x235   :  { %6477 = vrcp.f32 %v512_v22 }
 0x23f   :  { %v6478_v23 = vpop.eup %6477 }
 0x240   :  { %v522_v24 = vsub.f32 1.0, %v6478_v23  ;;  %v528_v27 = vmul.f32 0.0, %v6478_v23 }
 0x29f   :  { %v525_v25 = vpop.permute.xlu1 %524 }
 0x2a0   :  { %v527_v26 = vmul.f32 %v525_v25, %v522_v24  ;;  %v320_v24 = vrot.slane %v306_v21, %v7301_v15 }
 0x2a2   :  { %v7370_v28 = vadd.f32 %v528_v27, %v527_v26 }
 0x2a4   :  { %v530_v29 = vpack.c.bf16 %v7370_v28, %v7370_v28 }
 0x2a6   :  { %532 = vrot.lane.b32.xlu1 %v530_v29, %s7066_s2 }
 0x318   :  { %v533_v31 = vpop.permute.xlu1 %532 }
 0x319   :  { %5690 = vmatmul.mubr.msk.bf16.vlgmr.msra.gmra.mrb[4].mxu0 %vm405_vm2, %v533_v31  ;;  %6003 = vmatmul.mubr.msk.bf16.vlgmr.msra.gmra.mrb[8].mxu1 %vm405_vm2, %v533_v31 }
 0x31a   :  { %666 = vmatpush1.bf16.msra.mxu0 %v7292_v10  ;;  %6007 = vmatpush3.bf16.msra.mxu1 %v7309_v30 }
 0x31b   :  { %667 = vmatprep.subr.bf16.mxu0 %v7296_v11  ;;  %6008 = vmatprep.subr.bf16.mxu1 %v8965_v0 }
 0x31c   :  { %697 = vmatprep.mubr.bf16.mxu0 %v8961_v1  ;;  %6010 = vmatprep.mubr.msk.bf16.mxu1 %vm7064_vm0, %v8965_v0 }
 0x31e   :  { %668 = vmatpush1.bf16.msra.mxu0 %v7298_v12  ;;  %6009 = vmatpush3.bf16.msra.mxu1 %v7313_v32 }
 0x31f   :  { %793 = vmatprep.subr.bf16.mxu0 %v7286_v7  ;;  %6014 = vmatprep.subr.bf16.mxu1 %v8965_v0 }
 0x3ec   :  { %v571_v33 = vpop.f32.mrb[4].mxu0  ;;  %v612_v34 = vpop.f32.mrb[8].mxu1 }
 0x3ed   :  { %v572_v36 = vadd.f32 %v571_v33, %v7340_v42  ;;  %v573_v38 = vpop.f32.mrb[5].mxu0  ;;  %v6004_v39 = vpop.f32.mrb[9].mxu1  ;;  %v613_v51 = vadd.f32 %v612_v34, %v7359_v63 }
 0x3ee   :  { %v574_v40 = vadd.f32 %v573_v38, %v7362_v2  ;;  %v575_v41 = vpop.f32.mrb[6].mxu0  ;;  %v615_v43 = vpop.f32.mrb[10].mxu1 }
 0x3ef   :  { %v618_v44 = vadd.f32 %v572_v36, %v321_v35  ;;  %v576_v45 = vpop.f32.mrb[7].mxu0  ;;  %v6005_v46 = vpop.f32.mrb[11].mxu1 }
 0x3f0   :  { %v632_v48 = vrot.slane %v574_v40, %v7301_v15 }
 0x3f1   :  { %v5692_v49 = vmul.f32 -1.442695, %v618_v44 }
 0x3f2   :  { %633 = vrot.lane.b32.xlu1 %v632_v48, %s7054_s9 }
 0x3f3   :  { %6479 = vpow2.f32 %v5692_v49 }
 0x3fd   :  { %v6480_v50 = vpop.eup %6479 }
 0x3fe   :  { %v622_v53 = vadd.f32 1.0, %v6480_v50 }
 0x400   :  { %6481 = vrcp.f32 %v622_v53 }
 0x40a   :  { %v6482_v54 = vpop.eup %6481 }
 0x40b   :  { %v643_v55 = vmul.f32 %v6482_v54, %v613_v51 }
 0x40d   :  { %645 = vrot.lane.b32.xlu0 %v643_v55, %s7046_s28 }
 0x464   :  { %v634_v59 = vpop.permute.xlu1 %633 }
 0x465   :  { %v636_v60 = vadd.f32 %v634_v59, %v321_v35 }
 0x467   :  { %v5693_v3 = vmul.f32 -1.442695, %v636_v60 }
 0x47f   :  { %v646_v56 = vpop.permute.xlu0 %645 }
 0x480   :  { %v648_v57 = vadd.f32 %v646_v56, %v321_v35 }
 0x482   :  { %6483 = vtanh.f32 %v648_v57 }
 0x483   :  { %6485 = vpow2.f32 %v5693_v3 }
 0x48c   :  { %v6484_v58 = vpop.eup %6483 }
 0x48d   :  { %652 = vrot.lane.b32.xlu0 %v6484_v58, %s7066_s2  ;;  %v6486_v5 = vpop.eup %6485 }
 0x48e   :  { %v640_v6 = vadd.f32 1.0, %v6486_v5 }
 0x490   :  { %6487 = vrcp.f32 %v640_v6 }
 0x49a   :  { %v6488_v8 = vpop.eup %6487 }
 0x49b   :  { %v650_v13 = vsub.f32 1.0, %v6488_v8  ;;  %v656_v16 = vmul.f32 %v6488_v8, %v7370_v28 }
 0x4ff   :  { %v653_v14 = vpop.permute.xlu0 %652 }
 0x500   :  { %v655_v17 = vmul.f32 %v653_v14, %v650_v13  ;;  %v322_v13 = vcombine.high %v320_v24, %v320_v24 }
 0x502   :  { %v7396_v18 = vadd.f32 %v656_v16, %v655_v17 }
 0x504   :  { %v658_v19 = vpack.c.bf16 %v7396_v18, %v7396_v18 }
 0x506   :  { %660 = vrot.lane.b32.xlu1 %v658_v19, %s7066_s2 }
 0x578   :  { %v661_v20 = vpop.permute.xlu1 %660 }
 0x579   :  { %5694 = vmatmul.mubr.msk.bf16.vlgmr.msra.gmra.mrb[8].mxu0 %vm405_vm2, %v661_v20  ;;  %6011 = vmatmul.mubr.msk.bf16.vlgmr.msra.gmra.mrb[12].mxu1 %vm405_vm2, %v661_v20 }
 0x57a   :  { %794 = vmatpush1.bf16.msra.mxu0 %v7292_v10  ;;  %6015 = vmatpush3.bf16.msra.mxu1 %v7309_v30 }
 0x57b   :  { %795 = vmatprep.subr.bf16.mxu0 %v7296_v11  ;;  %6016 = vmatprep.subr.bf16.mxu1 %v8965_v0 }
 0x57c   :  { %825 = vmatprep.mubr.bf16.mxu0 %v8961_v1  ;;  %6018 = vmatprep.mubr.msk.bf16.mxu1 %vm7064_vm0, %v8965_v0 }
 0x57e   :  { %796 = vmatpush1.bf16.msra.mxu0 %v7298_v12  ;;  %6017 = vmatpush3.bf16.msra.mxu1 %v7313_v32 }
 0x57f   :  { %921 = vmatprep.subr.bf16.mxu0 %v7286_v7  ;;  %6022 = vmatprep.subr.bf16.mxu1 %v8965_v0 }
 0x64c   :  { %v699_v22 = vpop.f32.mrb[8].mxu0  ;;  %v740_v23 = vpop.f32.mrb[12].mxu1 }
 0x64d   :  { %v700_v25 = vadd.f32 %v699_v22, %v7340_v42  ;;  %v701_v26 = vpop.f32.mrb[9].mxu0  ;;  %v6012_v27 = vpop.f32.mrb[13].mxu1  ;;  %v741_v41 = vadd.f32 %v740_v23, %v7359_v63 }
 0x64e   :  { %v702_v29 = vadd.f32 %v701_v26, %v7362_v2  ;;  %v703_v31 = vpop.f32.mrb[10].mxu0  ;;  %v743_v33 = vpop.f32.mrb[14].mxu1 }
 0x64f   :  { %v746_v34 = vadd.f32 %v700_v25, %v320_v24  ;;  %v704_v35 = vpop.f32.mrb[11].mxu0  ;;  %v6013_v36 = vpop.f32.mrb[15].mxu1 }
 0x650   :  { %v760_v38 = vrot.slane %v702_v29, %v7301_v15 }
 0x651   :  { %v5696_v39 = vmul.f32 -1.442695, %v746_v34 }
 0x652   :  { %761 = vrot.lane.b32.xlu1 %v760_v38, %s7054_s9 }
 0x653   :  { %6489 = vpow2.f32 %v5696_v39 }
 0x65d   :  { %v6490_v47 = vpop.eup %6489 }
 0x65e   :  { %v750_v40 = vadd.f32 1.0, %v6490_v47 }
 0x660   :  { %6491 = vrcp.f32 %v750_v40 }
 0x66a   :  { %v6492_v43 = vpop.eup %6491 }
 0x66b   :  { %v771_v44 = vmul.f32 %v6492_v43, %v741_v41 }
 0x66d   :  { %773 = vrot.lane.b32.xlu0 %v771_v44, %s7046_s28 }
 0x6c4   :  { %v762_v49 = vpop.permute.xlu1 %761 }
 0x6c5   :  { %v764_v50 = vadd.f32 %v762_v49, %v320_v24 }
 0x6c7   :  { %v5697_v53 = vmul.f32 -1.442695, %v764_v50 }
 0x6df   :  { %v774_v45 = vpop.permute.xlu0 %773 }
 0x6e0   :  { %v776_v46 = vadd.f32 %v774_v45, %v320_v24 }
 0x6e2   :  { %6493 = vtanh.f32 %v776_v46 }
 0x6e3   :  { %6495 = vpow2.f32 %v5697_v53 }
 0x6ec   :  { %v6494_v48 = vpop.eup %6493 }
 0x6ed   :  { %780 = vrot.lane.b32.xlu0 %v6494_v48, %s7066_s2  ;;  %v6496_v51 = vpop.eup %6495 }
 0x6ee   :  { %v768_v54 = vadd.f32 1.0, %v6496_v51 }
 0x6f0   :  { %6497 = vrcp.f32 %v768_v54 }
 0x6fa   :  { %v6498_v55 = vpop.eup %6497 }
 0x6fb   :  { %v778_v56 = vsub.f32 1.0, %v6498_v55  ;;  %v784_v58 = vmul.f32 %v6498_v55, %v7396_v18 }
 0x75f   :  { %v781_v57 = vpop.permute.xlu0 %780 }
 0x760   :  { %v783_v59 = vmul.f32 %v781_v57, %v778_v56  ;;  %v330_v56 = vrot.slane %v7350_v52, %v7301_v15 }
 0x762   :  { %v7425_v60 = vadd.f32 %v784_v58, %v783_v59 }
 0x764   :  { %v786_v3 = vpack.c.bf16 %v7425_v60, %v7425_v60 }
 0x766   :  { %788 = vrot.lane.b32.xlu1 %v786_v3, %s7066_s2 }
 0x7d8   :  { %v789_v5 = vpop.permute.xlu1 %788 }
 0x7d9   :  { %5698 = vmatmul.mubr.msk.bf16.vlgmr.msra.gmra.mrb[12].mxu0 %vm405_vm2, %v789_v5  ;;  %6019 = vmatmul.mubr.msk.bf16.vlgmr.msra.gmra.mrb[16].mxu1 %vm405_vm2, %v789_v5 }
 0x7da   :  { %922 = vmatpush1.bf16.msra.mxu0 %v7292_v10  ;;  %6023 = vmatpush3.bf16.msra.mxu1 %v7309_v30 }
 0x7db   :  { %923 = vmatprep.subr.bf16.mxu0 %v7296_v11  ;;  %6024 = vmatprep.subr.bf16.mxu1 %v8965_v0 }
 0x7dc   :  { %953 = vmatprep.mubr.bf16.mxu0 %v8961_v1  ;;  %6026 = vmatprep.mubr.msk.bf16.mxu1 %vm7064_vm0, %v8965_v0 }
 0x7de   :  { %924 = vmatpush1.bf16.msra.mxu0 %v7298_v12  ;;  %6025 = vmatpush3.bf16.msra.mxu1 %v7313_v32 }
 0x7df   :  { %1049 = vmatprep.subr.bf16.mxu0 %v7286_v7  ;;  %6030 = vmatprep.subr.bf16.mxu1 %v8965_v0 }
 0x8ac   :  { %v827_v6 = vpop.f32.mrb[12].mxu0  ;;  %v868_v8 = vpop.f32.mrb[16].mxu1 }
 0x8ad   :  { %v828_v14 = vadd.f32 %v827_v6, %v7340_v42  ;;  %v829_v16 = vpop.f32.mrb[13].mxu0  ;;  %v6020_v17 = vpop.f32.mrb[17].mxu1  ;;  %v869_v24 = vadd.f32 %v868_v8, %v7359_v63 }
 0x8ae   :  { %v830_v19 = vadd.f32 %v829_v16, %v7362_v2  ;;  %v831_v20 = vpop.f32.mrb[14].mxu0  ;;  %v871_v21 = vpop.f32.mrb[18].mxu1 }
 0x8af   :  { %v874_v22 = vadd.f32 %v828_v14, %v322_v13  ;;  %v832_v23 = vpop.f32.mrb[15].mxu0  ;;  %v6021_v25 = vpop.f32.mrb[19].mxu1 }
 0x8b0   :  { %v888_v26 = vrot.slane %v830_v19, %v7301_v15 }
 0x8b1   :  { %v5700_v27 = vmul.f32 -1.442695, %v874_v22 }
 0x8b2   :  { %889 = vrot.lane.b32.xlu1 %v888_v26, %s7054_s9 }
 0x8b3   :  { %6499 = vpow2.f32 %v5700_v27 }
 0x8bd   :  { %v6500_v29 = vpop.eup %6499 }
 0x8be   :  { %v878_v31 = vadd.f32 1.0, %v6500_v29 }
 0x8c0   :  { %6501 = vrcp.f32 %v878_v31 }
 0x8ca   :  { %v6502_v33 = vpop.eup %6501 }
 0x8cb   :  { %v899_v34 = vmul.f32 %v6502_v33, %v869_v24 }
 0x8cd   :  { %901 = vrot.lane.b32.xlu0 %v899_v34, %s7046_s28 }
 0x924   :  { %v890_v39 = vpop.permute.xlu1 %889 }
 0x925   :  { %v892_v47 = vadd.f32 %v890_v39, %v322_v13 }
 0x927   :  { %v5701_v40 = vmul.f32 -1.442695, %v892_v47 }
 0x93f   :  { %v902_v35 = vpop.permute.xlu0 %901 }
 0x940   :  { %v904_v36 = vadd.f32 %v902_v35, %v322_v13 }
 0x942   :  { %6503 = vtanh.f32 %v904_v36 }
 0x943   :  { %6505 = vpow2.f32 %v5701_v40 }
 0x94c   :  { %v6504_v38 = vpop.eup %6503 }
 0x94d   :  { %908 = vrot.lane.b32.xlu0 %v6504_v38, %s7066_s2  ;;  %v6506_v41 = vpop.eup %6505 }
 0x94e   :  { %v896_v43 = vadd.f32 1.0, %v6506_v41 }
 0x950   :  { %6507 = vrcp.f32 %v896_v43 }
 0x95a   :  { %v6508_v44 = vpop.eup %6507 }
 0x95b   :  { %v906_v45 = vsub.f32 1.0, %v6508_v44  ;;  %v912_v48 = vmul.f32 %v6508_v44, %v7425_v60 }
 0x9bf   :  { %v909_v46 = vpop.permute.xlu0 %908 }
 0x9c0   :  { %v911_v49 = vmul.f32 %v909_v46, %v906_v45  ;;  %v338_v46 = vcombine.high %v330_v56, %v330_v56 }
 0x9c2   :  { %v7451_v50 = vadd.f32 %v912_v48, %v911_v49 }
 0x9c4   :  { %v914_v53 = vpack.c.bf16 %v7451_v50, %v7451_v50 }
 0x9c6   :  { %916 = vrot.lane.b32.xlu1 %v914_v53, %s7066_s2 }
 0xa38   :  { %v917_v51 = vpop.permute.xlu1 %916 }
 0xa39   :  { %5702 = vmatmul.mubr.msk.bf16.vlgmr.msra.gmra.mrb[16].mxu0 %vm405_vm2, %v917_v51  ;;  %6027 = vmatmul.mubr.msk.bf16.vlgmr.msra.gmra.mrb[20].mxu1 %vm405_vm2, %v917_v51 }
 0xa3a   :  { %1050 = vmatpush1.bf16.msra.mxu0 %v7292_v10  ;;  %6031 = vmatpush3.bf16.msra.mxu1 %v7309_v30 }
 0xa3b   :  { %1051 = vmatprep.subr.bf16.mxu0 %v7296_v11  ;;  %6032 = vmatprep.subr.bf16.mxu1 %v8965_v0 }
 0xa3c   :  { %1081 = vmatprep.mubr.bf16.mxu0 %v8961_v1  ;;  %6034 = vmatprep.mubr.msk.bf16.mxu1 %vm7064_vm0, %v8965_v0 }
 0xa3e   :  { %1052 = vmatpush1.bf16.msra.mxu0 %v7298_v12  ;;  %6033 = vmatpush3.bf16.msra.mxu1 %v7313_v32 }
 0xa3f   :  { %1177 = vmatprep.subr.bf16.mxu0 %v7286_v7  ;;  %6038 = vmatprep.subr.bf16.mxu1 %v8965_v0 }
 0xb0c   :  { %v955_v54 = vpop.f32.mrb[16].mxu0  ;;  %v996_v55 = vpop.f32.mrb[20].mxu1 }
 0xb0d   :  { %v956_v57 = vadd.f32 %v955_v54, %v7340_v42  ;;  %v957_v58 = vpop.f32.mrb[17].mxu0  ;;  %v6028_v59 = vpop.f32.mrb[21].mxu1  ;;  %v997_v21 = vadd.f32 %v996_v55, %v7359_v63 }
 0xb0e   :  { %v958_v3 = vadd.f32 %v957_v58, %v7362_v2  ;;  %v959_v5 = vpop.f32.mrb[18].mxu0  ;;  %v999_v6 = vpop.f32.mrb[22].mxu1 }
 0xb0f   :  { %v1002_v8 = vadd.f32 %v956_v57, %v330_v56  ;;  %v960_v13 = vpop.f32.mrb[19].mxu0  ;;  %v6029_v14 = vpop.f32.mrb[23].mxu1 }
 0xb10   :  { %v1016_v16 = vrot.slane %v958_v3, %v7301_v15 }
 0xb11   :  { %v5704_v17 = vmul.f32 -1.442695, %v1002_v8 }
 0xb12   :  { %1017 = vrot.lane.b32.xlu1 %v1016_v16, %s7054_s9 }
 0xb13   :  { %6509 = vpow2.f32 %v5704_v17 }
 0xb1d   :  { %v6510_v19 = vpop.eup %6509 }
 0xb1e   :  { %v1006_v20 = vadd.f32 1.0, %v6510_v19 }
 0xb20   :  { %6511 = vrcp.f32 %v1006_v20 }
 0xb2a   :  { %v6512_v22 = vpop.eup %6511 }
 0xb2b   :  { %v1027_v23 = vmul.f32 %v6512_v22, %v997_v21 }
 0xb2d   :  { %1029 = vrot.lane.b32.xlu0 %v1027_v23, %s7046_s28 }
 0xb84   :  { %v1018_v29 = vpop.permute.xlu1 %1017 }
 0xb85   :  { %v1020_v31 = vadd.f32 %v1018_v29, %v330_v56 }
 0xb87   :  { %v5705_v24 = vmul.f32 -1.442695, %v1020_v31 }
 0xb9f   :  { %v1030_v25 = vpop.permute.xlu0 %1029 }
 0xba0   :  { %v1032_v26 = vadd.f32 %v1030_v25, %v330_v56 }
 0xba2   :  { %6513 = vtanh.f32 %v1032_v26 }
 0xba3   :  { %6515 = vpow2.f32 %v5705_v24 }
 0xbac   :  { %v6514_v27 = vpop.eup %6513 }
 0xbad   :  { %1036 = vrot.lane.b32.xlu0 %v6514_v27, %s7066_s2  ;;  %v6516_v33 = vpop.eup %6515 }
 0xbae   :  { %v1024_v34 = vadd.f32 1.0, %v6516_v33 }
 0xbb0   :  { %6517 = vrcp.f32 %v1024_v34 }
 0xbba   :  { %v6518_v35 = vpop.eup %6517 }
 0xbbb   :  { %v1034_v36 = vsub.f32 1.0, %v6518_v35  ;;  %v1040_v39 = vmul.f32 %v6518_v35, %v7451_v50 }
 0xc1f   :  { %v1037_v38 = vpop.permute.xlu0 %1036 }
 0xc20   :  { %v1039_v47 = vmul.f32 %v1037_v38, %v1034_v36 }
 0xc22   :  { %v7479_v40 = vadd.f32 %v1040_v39, %v1039_v47 }
 0xc24   :  { %v1042_v41 = vpack.c.bf16 %v7479_v40, %v7479_v40 }
 0xc26   :  { %1044 = vrot.lane.b32.xlu1 %v1042_v41, %s7066_s2 }
 0xc98   :  { %v1045_v43 = vpop.permute.xlu1 %1044 }
 0xc99   :  { %5706 = vmatmul.mubr.msk.bf16.vlgmr.msra.gmra.mrb[20].mxu0 %vm405_vm2, %v1045_v43  ;;  %6035 = vmatmul.mubr.msk.bf16.vlgmr.msra.gmra.mrb[24].mxu1 %vm405_vm2, %v1045_v43 }
 0xc9a   :  { %1178 = vmatpush1.bf16.msra.mxu0 %v7292_v10  ;;  %6039 = vmatpush3.bf16.msra.mxu1 %v7309_v30 }
 0xc9b   :  { %1179 = vmatprep.subr.bf16.mxu0 %v7296_v11  ;;  %6040 = vmatprep.subr.bf16.mxu1 %v8965_v0 }
 0xc9c   :  { %1209 = vmatprep.mubr.bf16.mxu0 %v8961_v1  ;;  %6042 = vmatprep.mubr.msk.bf16.mxu1 %vm7064_vm0, %v8965_v0 }
 0xc9e   :  { %1180 = vmatpush1.bf16.msra.mxu0 %v7298_v12  ;;  %6041 = vmatpush3.bf16.msra.mxu1 %v7313_v32 }
 0xc9f   :  { %1305 = vmatprep.subr.bf16.mxu0 %v7286_v7  ;;  %6046 = vmatprep.subr.bf16.mxu1 %v8965_v0 }
 0xd6c   :  { %v1083_v44 = vpop.f32.mrb[20].mxu0  ;;  %v1124_v45 = vpop.f32.mrb[24].mxu1 }
 0xd6d   :  { %v1084_v48 = vadd.f32 %v1083_v44, %v7340_v42  ;;  %v1085_v49 = vpop.f32.mrb[21].mxu0  ;;  %v6036_v53 = vpop.f32.mrb[25].mxu1  ;;  %v1125_v56 = vadd.f32 %v1124_v45, %v7359_v63 }
 0xd6e   :  { %v1086_v51 = vadd.f32 %v1085_v49, %v7362_v2  ;;  %v1087_v54 = vpop.f32.mrb[22].mxu0  ;;  %v1127_v55 = vpop.f32.mrb[26].mxu1 }
 0xd6f   :  { %v1130_v57 = vadd.f32 %v1084_v48, %v338_v46  ;;  %v1088_v58 = vpop.f32.mrb[23].mxu0  ;;  %v6037_v59 = vpop.f32.mrb[27].mxu1 }
 0xd70   :  { %v1144_v3 = vrot.slane %v1086_v51, %v7301_v15 }
 0xd71   :  { %v5708_v5 = vmul.f32 -1.442695, %v1130_v57 }
 0xd72   :  { %1145 = vrot.lane.b32.xlu1 %v1144_v3, %s7054_s9 }
 0xd73   :  { %6519 = vpow2.f32 %v5708_v5 }
 0xd7d   :  { %v6520_v7 = vpop.eup %6519 }
 0xd7e   :  { %v1134_v6 = vadd.f32 1.0, %v6520_v7 }
 0xd80   :  { %6521 = vrcp.f32 %v1134_v6 }
 0xd8a   :  { %v6522_v8 = vpop.eup %6521 }
 0xd8b   :  { %v1155_v13 = vmul.f32 %v6522_v8, %v1125_v56 }
 0xd8d   :  { %1157 = vrot.lane.b32.xlu0 %v1155_v13, %s7046_s28 }
 0xde4   :  { %v1146_v19 = vpop.permute.xlu1 %1145 }
 0xde5   :  { %v1148_v20 = vadd.f32 %v1146_v19, %v338_v46 }
 0xde7   :  { %v5709_v21 = vmul.f32 -1.442695, %v1148_v20 }
 0xdff   :  { %v1158_v14 = vpop.permute.xlu0 %1157 }
 0xe00   :  { %v1160_v16 = vadd.f32 %v1158_v14, %v338_v46 }
 0xe02   :  { %6523 = vtanh.f32 %v1160_v16 }
 0xe03   :  { %6525 = vpow2.f32 %v5709_v21 }
 0xe0c   :  { %v6524_v17 = vpop.eup %6523 }
 0xe0d   :  { %1164 = vrot.lane.b32.xlu0 %v6524_v17, %s7066_s2  ;;  %v6526_v22 = vpop.eup %6525 }
 0xe0e   :  { %v1152_v23 = vadd.f32 1.0, %v6526_v22 }
 0xe10   :  { %6527 = vrcp.f32 %v1152_v23 }
 0xe1a   :  { %v6528_v25 = vpop.eup %6527 }
 0xe1b   :  { %v1162_v26 = vsub.f32 1.0, %v6528_v25  ;;  %v1168_v29 = vmul.f32 %v6528_v25, %v7479_v40 }
 0xe7f   :  { %v1165_v27 = vpop.permute.xlu0 %1164 }
 0xe80   :  { %v1167_v31 = vmul.f32 %v1165_v27, %v1162_v26 }
 0xe82   :  { %v7505_v24 = vadd.f32 %v1168_v29, %v1167_v31 }
 0xe84   :  { %v1170_v33 = vpack.c.bf16 %v7505_v24, %v7505_v24 }
 0xe86   :  { %1172 = vrot.lane.b32.xlu1 %v1170_v33, %s7066_s2 }
 0xef8   :  { %v1173_v34 = vpop.permute.xlu1 %1172 }
 0xef9   :  { %5710 = vmatmul.mubr.msk.bf16.vlgmr.msra.gmra.mrb[24].mxu0 %vm405_vm2, %v1173_v34  ;;  %6043 = vmatmul.mubr.msk.bf16.vlgmr.msra.gmra.mrb[28].mxu1 %vm405_vm2, %v1173_v34 }
 0xefa   :  { %1306 = vmatpush1.bf16.msra.mxu0 %v7292_v10  ;;  %6047 = vmatpush3.bf16.msra.mxu1 %v7309_v30  ;;  %v323_v10 = vcombine.high %v7350_v52, %v7350_v52 }
 0xefb   :  { %1307 = vmatprep.subr.bf16.mxu0 %v7296_v11  ;;  %6048 = vmatprep.subr.bf16.mxu1 %v8965_v0 }
 0xefc   :  { %1337 = vmatprep.mubr.bf16.mxu0 %v8961_v1  ;;  %6050 = vmatprep.mubr.msk.bf16.mxu1 %vm7064_vm0, %v8965_v0  ;;  %v337_v11 = vrot.slane %v323_v10, %v7301_v15 }
 0xefe   :  { %1308 = vmatpush1.bf16.msra.mxu0 %v7298_v12  ;;  %6049 = vmatpush3.bf16.msra.mxu1 %v7313_v32  ;;  %v339_v22 = vcombine.high %v337_v11, %v337_v11 }
 0xeff   :  { %6054 = vmatprep.subr.bf16.mxu0 %v8965_v0 }
 0xfcc   :  { %v1211_v35 = vpop.f32.mrb[24].mxu0  ;;  %v1252_v30 = vpop.f32.mrb[28].mxu1 }
 0xfcd   :  { %v1212_v36 = vadd.f32 %v1211_v35, %v7340_v42  ;;  %v1213_v38 = vpop.f32.mrb[25].mxu0  ;;  %v6044_v39 = vpop.f32.mrb[29].mxu1  ;;  %v1253_v49 = vadd.f32 %v1252_v30, %v7359_v63 }
 0xfce   :  { %v1214_v47 = vadd.f32 %v1213_v38, %v7362_v2  ;;  %v1215_v41 = vpop.f32.mrb[26].mxu0  ;;  %v1255_v43 = vpop.f32.mrb[30].mxu1 }
 0xfcf   :  { %v1258_v12 = vadd.f32 %v1212_v36, %v337_v11  ;;  %v1216_v44 = vpop.f32.mrb[27].mxu0  ;;  %v6045_v32 = vpop.f32.mrb[31].mxu1  ;;  %v6413_v43 = vld [vmem:[#allocation13] ss:$12 sps:$4 sm:$0xff]  }
 0xfd0   :  { %v1272_v45 = vrot.slane %v1214_v47, %v7301_v15  ;;  %v6416_v44 = vld [vmem:[%s8950_s5] sm:$0xff]  }
 0xfd1   :  { %v5712_v46 = vmul.f32 -1.442695, %v1258_v12  ;;  %v6415_v12 = vld [vmem:[#allocation13 + $0x4] ss:$12 sps:$4 sm:$0xff]  }
 0xfd2   :  { %1273 = vrot.lane.b32.xlu1 %v1272_v45, %s7054_s9  ;;  %1700 = vmatprep.subr.bf16.mxu1 %v6415_v12 }
 0xfd3   :  { %6529 = vpow2.f32 %v5712_v46 }
 0xfdd   :  { %v6530_v52 = vpop.eup %6529 }
 0xfde   :  { %v1262_v48 = vadd.f32 1.0, %v6530_v52  ;;  %v7067_v52 = vmov 1966171168  }
 0xfe0   :  { %6531 = vrcp.f32 %v1262_v48  ;;  %v1428_v48 = vunpack.c.l.s4 %v7067_v52 }
 0xfea   :  { %v6532_v53 = vpop.eup %6531 }
 0xfeb   :  { %v1283_v51 = vmul.f32 %v6532_v53, %v1253_v49  ;;  %v1429_v53 = vunpack.c.0.s8 %v1428_v48 }
 0xfed   :  { %1285 = vrot.lane.b32.xlu0 %v1283_v51, %s7046_s28  ;;  %v7555_v51 = vsub.s32 %v1429_v53, %v7289_v9 }
 0xfef   :  { %9100 = vst [vmem:[#allocation26_spill] sm:$0xff] %v7555_v51 }
0x1044   :  { %v1274_v58 = vpop.permute.xlu1 %1273 }
0x1045   :  { %v1276_v59 = vadd.f32 %v1274_v58, %v337_v11  ;;  %v6419_v58 = vld [vmem:[#allocation13 + $0x1c] ss:$12 sps:$4 sm:$0xff]  }
0x1047   :  { %v5713_v3 = vmul.f32 -1.442695, %v1276_v59  ;;  %v6420_v59 = vld [vmem:[%s8950_s5 + $0x8] sm:$0xff]  }
0x105f   :  { %v1286_v54 = vpop.permute.xlu0 %1285 }
0x1060   :  { %v1288_v55 = vadd.f32 %v1286_v54, %v337_v11  ;;  %v1444_v54 = vrot.slane %v7396_v18, %v7555_v51  ;;  %v1433_v18 = vrot.slane %v7370_v28, %v7555_v51 }
0x1062   :  { %6533 = vtanh.f32 %v1288_v55  ;;  %v1453_v55 = vrot.slane %v7425_v60, %v7555_v51  ;;  %v1471_v60 = vrot.slane %v7479_v40, %v7555_v51 }
0x1063   :  { %6535 = vpow2.f32 %v5713_v3  ;;  %v1445_v3 = vcombine.high %v1444_v54, %v1444_v54 }
0x1064   :  { %v1513_v28 = vrot.slane %v1453_v55, %v7337_v37 }
0x106c   :  { %v6534_v57 = vpop.eup %6533 }
0x106d   :  { %1292 = vrot.lane.b32.xlu0 %v6534_v57, %s7066_s2  ;;  %v6536_v5 = vpop.eup %6535  ;;  %v6417_v57 = vld [vmem:[#allocation13 + $0x18] ss:$12 sps:$4 sm:$0xff]  }
0x106e   :  { %v1280_v7 = vadd.f32 1.0, %v6536_v5  ;;  %v7564_v5 = vld [vmem:[#allocation16 + $0x4] ss:$16 sps:$4 sm:$0xff]  }
0x106f   :  { %9101 = vst [vmem:[#allocation27_spill] sm:$0xff] %v7564_v5 }
0x1070   :  { %6537 = vrcp.f32 %v1280_v7  ;;  %v1462_v7 = vrot.slane %v7451_v50, %v7555_v51  ;;  %v1503_v50 = vrot.slane %v1444_v54, %v7337_v37 }
0x107a   :  { %v6538_v6 = vpop.eup %6537 }
0x107b   :  { %v1290_v56 = vsub.f32 1.0, %v6538_v6  ;;  %v1296_v13 = vmul.f32 %v6538_v6, %v7505_v24 }
0x10df   :  { %v1293_v8 = vpop.permute.xlu0 %1292 }
0x10e0   :  { %v1295_v14 = vmul.f32 %v1293_v8, %v1290_v56  ;;  %v1454_v56 = vcombine.high %v1453_v55, %v1453_v55  ;;  %v1480_v8 = vrot.slane %v7505_v24, %v7555_v51  ;;  %v6423_v55 = vld [vmem:[#allocation13 + $0x8] ss:$12 sps:$4 sm:$0xff]  }
0x10e2   :  { %v7533_v16 = vadd.f32 %v1296_v13, %v1295_v14  ;;  %v1507_v13 = vrot.slane %v1445_v3, %v7337_v37  ;;  %v6427_v3 = vld [vmem:[#allocation13 + $0x20] ss:$12 sps:$4 sm:$0xff]  }
0x10e4   :  { %v1298_v17 = vpack.c.bf16 %v7533_v16, %v7533_v16  ;;  %v1489_v14 = vrot.slane %v7533_v16, %v7555_v51 }
0x10e6   :  { %1300 = vrot.lane.b32.xlu1 %v1298_v17, %s7066_s2  ;;  %v1463_v17 = vcombine.high %v1462_v7, %v1462_v7 }
0x1158   :  { %v1301_v19 = vpop.permute.xlu1 %1300 }
0x1159   :  { %5714 = vmatmul.mubr.msk.bf16.vlgmr.msra.gmra.mrb[28].mxu0 %vm405_vm2, %v1301_v19  ;;  %6051 = vmatmul.mubr.msk.bf16.vlgmr.msra.gmra.mrb[32].mxu1 %vm405_vm2, %v1301_v19  ;;  %v1434_v19 = vcombine.high %v1433_v18, %v1433_v18 }
0x115a   :  { %6058 = vmatprep.mubr.msk.bf16.mxu0 %vm7064_vm0, %v8965_v0  ;;  %1732 = vmatprep.mubr.bf16.mxu1 %v8961_v1 }
0x115b   :  { %6055 = vmatpush3.bf16.msra.mxu0 %v6416_v44  ;;  %1701 = vmatpush1.bf16.msra.mxu1 %v6413_v43 }
0x115c   :  { %6056 = vmatprep.subr.bf16.mxu0 %v8965_v0  ;;  %1702 = vmatprep.subr.bf16.mxu1 %v6419_v58  ;;  %v7617_v58 = vld [vmem:[#allocation16 + $0x24] ss:$16 sps:$4 sm:$0xff]  }
0x115d   :  { %9103 = vst [vmem:[#allocation29_spill] sm:$0xff] %v7617_v58 }
0x115f   :  { %6057 = vmatpush3.bf16.msra.mxu0 %v6420_v59  ;;  %1703 = vmatpush1.bf16.msra.mxu1 %v6417_v57  ;;  %v7615_v57 = vld [vmem:[#allocation16] ss:$16 sps:$4 sm:$0xff]  }
0x1160   :  { %6062 = vmatprep.subr.bf16.mxu0 %v8965_v0  ;;  %1870 = vmatprep.subr.bf16.mxu1 %v7564_v5  ;;  %9102 = vst [vmem:[#allocation28_spill] sm:$0xff] %v7615_v57 }
0x122c   :  { %v1339_v20 = vpop.f32.mrb[28].mxu0  ;;  %v1380_v21 = vpop.f32.mrb[32].mxu1 }
0x122d   :  { %v1340_v23 = vadd.f32 %v1339_v20, %v7340_v42  ;;  %v1341_v25 = vpop.f32.mrb[29].mxu0  ;;  %v6052_v26 = vpop.f32.mrb[33].mxu1  ;;  %v1381_v42 = vadd.f32 %v1380_v21, %v7359_v63  ;;  %v1517_v20 = vrot.slane %v1454_v56, %v7337_v37  ;;  %v1472_v21 = vcombine.high %v1471_v60, %v1471_v60  ;;  %v7634_v56 = vld [vmem:[#allocation16 + $0x8] ss:$16 sps:$4 sm:$0xff]  }
0x122e   :  { %v1342_v27 = vadd.f32 %v1341_v25, %v7362_v2  ;;  %v1343_v29 = vpop.f32.mrb[30].mxu0  ;;  %v1383_v31 = vpop.f32.mrb[34].mxu1  ;;  %v1571_v26 = vsel %vm1570_vm3, %v1433_v18, %v1503_v50  ;;  %v7628_v18 = vld [vmem:[#allocation11 + $0x4] ss:$12 sps:$4 sm:$0xff]   ;;  %v7642_v50 = vld [vmem:[#allocation11 + $0x1c] ss:$12 sps:$4 sm:$0xff]  }
0x122f   :  { %v1386_v33 = vadd.f32 %v1340_v23, %v339_v22  ;;  %v1344_v34 = vpop.f32.mrb[31].mxu0  ;;  %v6053_v10 = vpop.f32.mrb[35].mxu1  ;;  %v1523_v29 = vrot.slane %v1462_v7, %v7337_v37  ;;  %v1490_v31 = vcombine.high %v1489_v14, %v1489_v14  ;;  %v7622_v7 = vld [vmem:[#allocation16 + $0x20] ss:$16 sps:$4 sm:$0xff]   ;;  %9106 = vst [vmem:[#allocation32_spill] sm:$0xff] %v7628_v18 }
0x1230   :  { %v1400_v35 = vrot.slane %v1342_v27, %v7301_v15  ;;  %v1572_v27 = vsel %vm1570_vm3, %v1434_v19, %v1507_v13  ;;  %v1527_v34 = vrot.slane %v1463_v17, %v7337_v37  ;;  %9104 = vst [vmem:[#allocation30_spill] sm:$0xff] %v7622_v7  ;;  %v7654_v17 = vld [vmem:[#allocation11 + $0x34] ss:$12 sps:$4 sm:$0xff]   ;;  %v7663_v19 = vld [vmem:[#allocation11 + $0x4c] ss:$12 sps:$4 sm:$0xff]  }
0x1231   :  { %v5716_v30 = vmul.f32 -1.442695, %v1386_v33  ;;  %v1574_v33 = vsel %vm1573_vm4, %v1571_v26, %v1513_v28  ;;  %v7650_v28 = vld [vmem:[#allocation11 + $0x18] ss:$12 sps:$4 sm:$0xff]   ;;  %v7688_v26 = vld [vmem:[#allocation11 + $0x90] ss:$12 sps:$4 sm:$0xff]  }
0x1232   :  { %1401 = vrot.lane.b32.xlu1 %v1400_v35, %s7054_s9  ;;  %v1533_v35 = vrot.slane %v1471_v60, %v7337_v37  ;;  %v7636_v60 = vld [vmem:[#allocation11] ss:$12 sps:$4 sm:$0xff]  }
0x1233   :  { %6539 = vpow2.f32 %v5716_v30  ;;  %v1537_v30 = vrot.slane %v1472_v21, %v7337_v37  ;;  %v7673_v21 = vld [vmem:[#allocation11 + $0x64] ss:$12 sps:$4 sm:$0xff]  }
0x123d   :  { %v6540_v36 = vpop.eup %6539 }
0x123e   :  { %v1390_v38 = vadd.f32 1.0, %v6540_v36  ;;  %v1543_v36 = vrot.slane %v1480_v8, %v7337_v37 }
0x1240   :  { %6541 = vrcp.f32 %v1390_v38 }
0x124a   :  { %v6542_v11 = vpop.eup %6541 }
0x124b   :  { %v1411_v39 = vmul.f32 %v6542_v11, %v1381_v42 }
0x124d   :  { %1413 = vrot.lane.b32.xlu0 %v1411_v39, %s7046_s28  ;;  %v1553_v39 = vrot.slane %v1489_v14, %v7337_v37  ;;  %v7648_v14 = vld [vmem:[#allocation16 + $0x28] ss:$16 sps:$4 sm:$0xff]  }
0x12a4   :  { %v1402_v63 = vpop.permute.xlu1 %1401 }
0x12a5   :  { %v1404_v32 = vadd.f32 %v1402_v63, %v339_v22 }
0x12a7   :  { %v5717_v45 = vmul.f32 -1.442695, %v1404_v32 }
0x12bf   :  { %v1414_v2 = vpop.permute.xlu0 %1413 }
0x12c0   :  { %v1416_v47 = vadd.f32 %v1414_v2, %v339_v22  ;;  %v1481_v22 = vcombine.high %v1480_v8, %v1480_v8  ;;  %v1557_v2 = vrot.slane %v1490_v31, %v7337_v37  ;;  %v7640_v8 = vld [vmem:[#allocation16 + $0x2c] ss:$16 sps:$4 sm:$0xff]   ;;  %v7697_v31 = vld [vmem:[#allocation11 + $0xa8] ss:$12 sps:$4 sm:$0xff]  }
0x12c1   :  { %9108 = vst [vmem:[#allocation34_spill] sm:$0xff] %v7697_v31 }
0x12c2   :  { %6543 = vtanh.f32 %v1416_v47  ;;  %v1547_v38 = vrot.slane %v1481_v22, %v7337_v37  ;;  %v1577_v47 = vsel %vm1576_vm5, %v1574_v33, %v1523_v29  ;;  %v7679_v22 = vld [vmem:[#allocation11 + $0x7c] ss:$12 sps:$4 sm:$0xff]   ;;  %v7694_v29 = vld [vmem:[#allocation11 + $0xac] ss:$12 sps:$4 sm:$0xff]  }
0x12c3   :  { %6545 = vpow2.f32 %v5717_v45  ;;  %v1580_v44 = vsel %vm1579_vm6, %v1577_v47, %v1533_v35 }
0x12c4   :  { %v1583_v45 = vsel %vm1582_vm7, %v1580_v44, %v1543_v36 }
0x12c5   :  { %v1586_v52 = vsel %vm1585_vm8, %v1583_v45, %v1553_v39 }
0x12cc   :  { %v6544_v41 = vpop.eup %6543 }
0x12cd   :  { %1420 = vrot.lane.b32.xlu0 %v6544_v41, %s7066_s2  ;;  %v6546_v46 = vpop.eup %6545 }
0x12ce   :  { %v1408_v49 = vadd.f32 1.0, %v6546_v46 }
0x12d0   :  { %6547 = vrcp.f32 %v1408_v49 }
0x12da   :  { %v6548_v6 = vpop.eup %6547 }
0x12db   :  { %v1418_v40 = vsub.f32 1.0, %v6548_v6  ;;  %v1424_v23 = vmul.f32 %v6548_v6, %v7533_v16  ;;  %v1575_v16 = vsel %vm1573_vm4, %v1572_v27, %v1517_v20  ;;  %v7626_v6 = vld [vmem:[#allocation16 + $0xc] ss:$16 sps:$4 sm:$0xff]   ;;  %v7668_v20 = vld [vmem:[#allocation11 + $0x48] ss:$12 sps:$4 sm:$0xff]   ;;  %v7691_v27 = vand.u32 127, %v188_v4 }
0x12dc   :  { %v1578_v12 = vsel %vm1576_vm5, %v1575_v16, %v1527_v34  ;;  %9105 = vst [vmem:[#allocation31_spill] sm:$0xff] %v7626_v6  ;;  %v8963_v4 = vmov 1.0|1.0  }
0x12dd   :  { %v1581_v63 = vsel %vm1579_vm6, %v1578_v12, %v1537_v30  ;;  %9107 = vst [vmem:[#allocation33_spill] sm:$0xff] %v7691_v27  ;;  %vm1790_vm10 = vcmp.eq.s32.totalorder %v7691_v27, 1  ;;  %v7732_v12 = vld [vmem:[%s8956_s11] sm:$0xf] }
0x12de   :  { %v1584_v46 = vsel %vm1582_vm7, %v1581_v63, %v1547_v38  ;;  %vm7702_vm11 = vmpackc.low %vm1790_vm10, %vm1790_vm10 }
0x12df   :  { %v1587_v48 = vsel %vm1585_vm8, %v1584_v46, %v1557_v2 }
0x133f   :  { %v1421_v24 = vpop.permute.xlu0 %1420 }
0x1340   :  { %v1423_v25 = vmul.f32 %v1421_v24, %v1418_v40  ;;  %v7660_v40 = vld [vmem:[#allocation11 + $0x30] ss:$12 sps:$4 sm:$0xff]   ;;  %v7676_v24 = vld [vmem:[#allocation11 + $0x60] ss:$12 sps:$4 sm:$0xff]  }
0x1342   :  { %v7588_v10 = vadd.f32 %v1424_v23, %v1423_v25  ;;  %v7682_v23 = vld [vmem:[#allocation11 + $0x78] ss:$12 sps:$4 sm:$0xff]   ;;  %v7685_v25 = vld [vmem:[#allocation11 + $0x94] ss:$12 sps:$4 sm:$0xff]  }
0x1344   :  { %v1498_v42 = vrot.slane %v7588_v10, %v7555_v51  ;;  %v1794_v11 = vpack.c.bf16 %v7588_v10, %v7588_v10 }
0x1346   :  { %v1499_v41 = vcombine.high %v1498_v42, %v1498_v42  ;;  %1825 = vrot.lane.b32.xlu0 %v1794_v11, %s7066_s2  ;;  %v1563_v43 = vrot.slane %v1498_v42, %v7337_v37 }
0x1348   :  { %v1567_v32 = vrot.slane %v1499_v41, %v7337_v37  ;;  %v1589_v49 = vsel %vm1588_vm9, %v1586_v52, %v1563_v43  ;;  %v1818_v41 = vsub.s32 3, %v7289_v9 }
0x134a   :  { %v1590_v53 = vsel %vm1588_vm9, %v1587_v48, %v1567_v32  ;;  %v7735_v44 = vrot.slane %v7732_v12, %v1818_v41 }
0x134b   :  { %v5846_v54 = vpack.c.bf16 %v1590_v53, %v1589_v49 }
0x134c   :  { %9119 = vst [vmem:[#allocation43_spill] sm:$0xff] %v7735_v44 }
0x134d   :  { %1602 = vrot.lane.b32.xlu1 %v5846_v54, %s7066_s2 }
0x13b8   :  { %v1826_v13 = vpop.permute.xlu0 %1825 }
0x13bf   :  { %v1603_v59 = vpop.permute.xlu1 %1602 }
0x13c0   :  { %6059 = vmatmul.mubr.msk.bf16.vlgmr.msra.gmra.mrb[32].mxu0 %vm405_vm2, %v1603_v59  ;;  %5728 = vmatmul.mubr.msk.bf16.vlgmr.msra.gmra.mrb[36].mxu1 %vm405_vm2, %v1603_v59 }
0x13c1   :  { %6063 = vmatpush3.bf16.msra.mxu0 %v6423_v55  ;;  %1871 = vmatpush1.bf16.msra.mxu1 %v7615_v57 }
0x13c2   :  { %6064 = vmatprep.subr.bf16.mxu0 %v8965_v0  ;;  %1872 = vmatprep.subr.bf16.mxu1 %v7617_v58 }
0x13c3   :  { %6066 = vmatprep.mubr.msk.bf16.mxu0 %vm7064_vm0, %v8965_v0  ;;  %1902 = vmatprep.mubr.bf16.mxu1 %v8961_v1 }
0x13c5   :  { %6065 = vmatpush3.bf16.msra.mxu0 %v6427_v3  ;;  %1873 = vmatpush1.bf16.msra.mxu1 %v7622_v7 }
0x13c6   :  { %1911 = vmatprep.subr.bf16.mxu0 %v7626_v6  ;;  %2296 = vmatprep.subr.bf16.mxu1 %v7628_v18 }
0x13c8   :  { %6067 = vmatmul.mubr.msk.bf16.vlgmr.msra.gmra.mrb[36].mxu0 %vm405_vm2, %v1603_v59  ;;  %5739 = vmatmul.mubr.msk.bf16.vlgmr.msra.gmra.mrb[40].mxu1 %vm405_vm2, %v1826_v13 }
0x13c9   :  { %1912 = vmatpush1.bf16.msra.mxu0 %v7634_v56  ;;  %2297 = vmatpush1.bf16.msra.mxu1 %v7636_v60 }
0x13ca   :  { %1913 = vmatprep.subr.bf16.mxu0 %v7640_v8  ;;  %2298 = vmatprep.subr.bf16.mxu1 %v7642_v50 }
0x13cb   :  { %1943 = vmatprep.mubr.bf16.mxu0 %v8961_v1  ;;  %2328 = vmatprep.mubr.bf16.mxu1 %v8961_v1 }
0x13cd   :  { %1914 = vmatpush1.bf16.msra.mxu0 %v7648_v14  ;;  %2299 = vmatpush1.bf16.msra.mxu1 %v7650_v28 }
0x13ce   :  { %2300 = vmatprep.subr.bf16.mxu1 %v7654_v17  ;;  %6070 = vmatprep.subr.bf16.mxu0 %v8965_v0 }
0x13d0   :  { %5740 = vmatmul.mubr.msk.bf16.vlgmr.msra.gmra.mrb[40].mxu0 %vm405_vm2, %v1826_v13 }
0x13d1   :  { %2301 = vmatpush1.bf16.msra.mxu1 %v7660_v40  ;;  %6086 = vmatprep.mubr.msk.bf16.mxu0 %vm7064_vm0, %v8965_v0 }
0x13d2   :  { %2302 = vmatprep.subr.bf16.mxu1 %v7663_v19 }
0x13d5   :  { %2303 = vmatpush1.bf16.msra.mxu1 %v7668_v20 }
0x13d6   :  { %2304 = vmatprep.subr.bf16.mxu1 %v7673_v21 }
0x13d9   :  { %2305 = vmatpush1.bf16.msra.mxu1 %v7676_v24 }
0x13da   :  { %2306 = vmatprep.subr.bf16.mxu1 %v7679_v22 }
0x13dd   :  { %2307 = vmatpush1.bf16.msra.mxu1 %v7682_v23 }
0x13de   :  { %2308 = vmatprep.subr.bf16.mxu1 %v7685_v25 }
0x13e1   :  { %2309 = vmatpush1.bf16.msra.mxu1 %v7688_v26 }
0x13e2   :  { %2310 = vmatprep.subr.bf16.mxu1 %v7694_v29 }
0x13e5   :  { %2311 = vmatpush1.bf16.msra.mxu1 %v7697_v31 }
0x13e6   :  { %6090 = vmatprep.subr.bf16.mxu1 %v8965_v0 }
0x13e8   :  { %5767 = vmatmul.mubr.msk.bf16.vlgmr.msra.gmra.mrb[40].mxu1 %vm7702_vm11, %v8963_v4  ;;  %v7767_v4 = vld [vmem:[#allocation11 + $0x8] ss:$12 sps:$4 sm:$0xff]  }
0x13e9   :  { %6094 = vmatprep.mubr.msk.bf16.mxu1 %vm7064_vm0, %v8965_v0  ;;  %6071 = vmatpush3.bf16.msra.mxu0 %v7767_v4 }
0x13ea   :  { %6072 = vmatprep.subr.bf16.mxu0 %v8965_v0 }
0x1493   :  { %v7712_v34 = vpop.f32.mrb[32].mxu0  ;;  %v7714_v35 = vpop.f32.mrb[36].mxu1 }
0x1494   :  { %9111 = vst [vmem:[#allocation35_spill] sm:$0xff] %v7712_v34  ;;  %9112 = vst [vmem:[#allocation36_spill] sm:$0xff] %v7714_v35  ;;  %v6060_v30 = vpop.f32.mrb[33].mxu0  ;;  %v7716_v16 = vpop.f32.mrb[37].mxu1 }
0x1495   :  { %9113 = vst [vmem:[#allocation37_spill] sm:$0xff] %v7716_v16  ;;  %v7718_v36 = vpop.f32.mrb[34].mxu0  ;;  %v7720_v38 = vpop.f32.mrb[38].mxu1  ;;  %v7747_v30 = vld [vmem:[#allocation10] ss:$0 sm:$0xff] }
0x1496   :  { %9114 = vst [vmem:[#allocation38_spill] sm:$0xff] %v7718_v36  ;;  %9115 = vst [vmem:[#allocation39_spill] sm:$0xff] %v7720_v38  ;;  %v6061_v42 = vpop.f32.mrb[35].mxu0  ;;  %v7722_v11 = vpop.f32.mrb[39].mxu1 }
0x1497   :  { %9116 = vst [vmem:[#allocation40_spill] sm:$0xff] %v7722_v11  ;;  %9120 = vst [vmem:[#allocation44_spill] sm:$0xff] %v7747_v30 }
0x149b   :  { %v7724_v39 = vpop.f32.mrb[36].mxu0 }
0x149c   :  { %9117 = vst [vmem:[#allocation41_spill] sm:$0xff] %v7724_v39  ;;  %v6068_v2 = vpop.f32.mrb[37].mxu0 }
0x149d   :  { %v7726_v47 = vpop.f32.mrb[38].mxu0 }
0x149e   :  { %9118 = vst [vmem:[#allocation42_spill] sm:$0xff] %v7726_v47  ;;  %v6069_v43 = vpop.f32.mrb[39].mxu0 }
0x14a3   :  { %v7737_v63 = vpop.f32.mrb[40].mxu0 }
0x14a4   :  { %v1947_v32 = vpop.f32.mrb[41].mxu0 }
0x14a5   :  { %v1948_v45 = vadd.f32 %v1947_v32, %v7735_v44  ;;  %v1949_v46 = vpop.f32.mrb[42].mxu0 }
0x14a6   :  { %v1950_v52 = vpop.f32.mrb[43].mxu0 }
0x14a7   :  { %v1959_v48 = vrot.slane %v1948_v45, %v7555_v51 }
0x14a9   :  { %v1960_v49 = vcombine.high %v1959_v48, %v1959_v48  ;;  %v1967_v53 = vrot.slane %v1959_v48, %v7555_v51 }
0x14ab   :  { %v1974_v54 = vrot.slane %v1960_v49, %v7555_v51  ;;  %v1978_v55 = vrot.slane %v1967_v53, %v7337_v37  ;;  %v7759_v53 = vsub.s32 %v7691_v27, %v7289_v9 }
0x14ad   :  { %v1982_v59 = vrot.slane %v1974_v54, %v7337_v37  ;;  %v1985_v3 = vadd.f32 %v1978_v55, %v7712_v34  ;;  %9121 = vst [vmem:[#allocation45_spill] sm:$0xff] %v7759_v53 }
0x14af   :  { %v1986_v13 = vadd.f32 %v1982_v59, %v7718_v36  ;;  %6549 = vtanh.f32 %v1985_v3 }
0x14b1   :  { %6551 = vtanh.f32 %v1986_v13 }
0x14b9   :  { %v6550_v42 = vpop.eup %6549 }
0x14ba   :  { %v1995_v2 = vmul.f32 %v6550_v42, %v7747_v30 }
0x14bb   :  { %v6552_v41 = vpop.eup %6551  ;;  %v7750_v43 = vpop.f32.mrb[40].mxu1 }
0x14bc   :  { %v7752_v32 = vpop.f32.mrb[41].mxu1  ;;  %v1997_v45 = vsel %vm405_vm2, %v1995_v2, 0.0  ;;  %v1996_v46 = vmul.f32 %v6552_v41, %v7747_v30 }
0x14bd   :  { %v2334_v52 = vpop.f32.mrb[42].mxu1  ;;  %1998 = vadd.xlane.f32.xlu1 %v1997_v45 }
0x14be   :  { %v2335_v48 = vpop.f32.mrb[43].mxu1  ;;  %v2000_v49 = vsel %vm405_vm2, %v1996_v46, 0.0 }
0x14bf   :  { %2001 = vadd.xlane.f32.xlu0 %v2000_v49 }
0x154a   :  { %v1999_v54 = vpop.xlane.xlu1 %1998 }
0x154b   :  { %v2008_v59 = vrot.slane %v1999_v54, %v7759_v53 }
0x154c   :  { %v2002_v55 = vpop.xlane.xlu0 %2001 }
0x154d   :  { %v2012_v3 = vrot.slane %v2002_v55, %v7759_v53 }
0x154f   :  { %v2014_v13 = vsel %vm2013_vm12, %v2012_v3, %v2008_v59  ;;  %v7770_v59 = vld [vmem:[#allocation11 + $0x20] ss:$12 sps:$4 sm:$0xff]   ;;  %v7782_v3 = vld [vmem:[#allocation11 + $0x68] ss:$12 sps:$4 sm:$0xff]  }
0x1550   :  { %v2017_v42 = vsel %vm2016_vm13, %v2014_v13, -inf  ;;  %6073 = vmatpush3.bf16.msra.mxu0 %v7770_v59  ;;  %v7786_v13 = vld [vmem:[#allocation11 + $0x80] ss:$12 sps:$4 sm:$0xff]  }
0x1551   :  { %2018 = vmax.xlane.f32.xlu0 %v2017_v42  ;;  %6074 = vmatprep.subr.bf16.mxu0 %v8965_v0  ;;  %9122 = vst [vmem:[#allocation46_spill] sm:$0xff] %v7786_v13  ;;  %v7790_v42 = vld [vmem:[#allocation11 + $0x98] ss:$12 sps:$4 sm:$0xff]  }
0x1552   :  { %9123 = vst [vmem:[#allocation47_spill] sm:$0xff] %v7790_v42 }
0x15de   :  { %v2019_v2 = vpop.xlane.xlu0 %2018 }
0x15df   :  { %v2024_v41 = vrot.slane %v2019_v2, %v7337_v37  ;;  %v2028_v45 = vrot.slane %v2019_v2, %v7356_v62  ;;  %v7794_v2 = vld [vmem:[#allocation11 + $0xb0] ss:$12 sps:$4 sm:$0xff]  }
0x15e0   :  { %9124 = vst [vmem:[#allocation48_spill] sm:$0xff] %v7794_v2 }
0x15e1   :  { %v2031_v9 = vsub.f32 %v1999_v54, %v2024_v41  ;;  %v2032_v46 = vsub.f32 %v2002_v55, %v2028_v45  ;;  %v7774_v54 = vld [vmem:[#allocation11 + $0x38] ss:$12 sps:$4 sm:$0xff]   ;;  %v7778_v55 = vld [vmem:[#allocation11 + $0x50] ss:$12 sps:$4 sm:$0xff]   ;;  %v9125_v41 = vmov 1.0|1.0  }
0x15e2   :  { %6075 = vmatpush3.bf16.msra.mxu0 %v7774_v54  ;;  %v9126_v45 = vmov 0  }
0x15e3   :  { %v2033_v52 = vmul.f32 1.442695, %v2031_v9  ;;  %v2035_v48 = vmul.f32 1.442695, %v2032_v46  ;;  %6076 = vmatprep.subr.bf16.mxu0 %v8965_v0 }
0x15e5   :  { %6553 = vpow2.f32 %v2033_v52 }
0x15e6   :  { %6555 = vpow2.f32 %v2035_v48  ;;  %6077 = vmatpush3.bf16.msra.mxu0 %v7778_v55 }
0x15e7   :  { %6078 = vmatprep.subr.bf16.mxu0 %v8965_v0 }
0x15ea   :  { %6079 = vmatpush3.bf16.msra.mxu0 %v7782_v3 }
0x15eb   :  { %6080 = vmatprep.subr.bf16.mxu0 %v8965_v0 }
0x15ee   :  { %6081 = vmatpush3.bf16.msra.mxu0 %v7786_v13 }
0x15ef   :  { %v6554_v49 = vpop.eup %6553  ;;  %6082 = vmatprep.subr.bf16.mxu0 %v8965_v0 }
0x15f0   :  { %v6556_v1 = vpop.eup %6555  ;;  %2040 = vperm.xlu1 %6399, %v6554_v49  }
0x15f1   :  { %2043 = vperm.xlu0 %6400, %v6556_v1  }
0x15f2   :  { %6083 = vmatpush3.bf16.msra.mxu0 %v7790_v42 }
0x15f3   :  { %6084 = vmatprep.subr.bf16.mxu0 %v8965_v0 }
0x15f6   :  { %6085 = vmatpush3.bf16.msra.mxu0 %v7794_v2  ;;  %v7840_v2 = vrot.slane %v7732_v12, %v7337_v37 }
0x15f7   :  { %2526 = vmatprep.subr.bf16.mxu0 %v7564_v5 }
0x15f9   :  { %6087 = vmatmul.mubr.msk.bf16.vlgmr.msra.gmra.mrb[44].mxu0 %vm7702_vm11, %v9125_v41 }
0x15fa   :  { %2527 = vmatpush1.bf16.msra.mxu0 %v7615_v57  ;;  %2558 = vmatprep.mubr.bf16.mxu0 %v9126_v45  ;;  %v2421_v57 = vrot.slane %v7588_v10, %v7301_v15  ;;  %v7821_v15 = vld [vmem:[%s8957_s12] sm:$0xff]   ;;  %v7827_v10 = vld [vmem:[%s8957_s12 + $0x8] sm:$0xff]  }
0x15fb   :  { %2528 = vmatprep.subr.bf16.mxu0 %v7617_v58  ;;  %9127 = vst [vmem:[#allocation49_spill] sm:$0xff] %v7821_v15  ;;  %6091 = vmatpush3.bf16.msra.mxu1 %v7821_v15  ;;  %9128 = vst [vmem:[#allocation50_spill] sm:$0xff] %v7827_v10 }
0x15fe   :  { %2529 = vmatpush1.bf16.msra.mxu0 %v7622_v7 }
0x15ff   :  { %2784 = vmatprep.subr.bf16.mxu0 %v7628_v18 }
0x166f   :  { %v2041_v9 = vpop.permute.xlu1 %2040 }
0x1670   :  { %v2044_v46 = vpop.permute.xlu0 %2043  ;;  %v2048_v52 = vrot.slane %v2041_v9, %v7759_v53 }
0x1671   :  { %v2052_v48 = vrot.slane %v2044_v46, %v7759_v53 }
0x1673   :  { %v2053_v0 = vsel %vm2013_vm12, %v2052_v48, %v2048_v52 }
0x1674   :  { %v2055_v33 = vsel %vm2016_vm13, %v2053_v0, 0.0 }
0x1675   :  { %2056 = vadd.xlane.f32.xlu1 %v2055_v33 }
0x1686   :  { %2422 = vrot.lane.b32.xlu1 %v2421_v57, %s7066_s2  ;;  %v9129_v57 = vmov 0.0  }
0x1687   :  { %6092 = vmatprep.subr.bf16.mxu1 %v9129_v57 }
0x1688   :  { %6093 = vmatpush3.bf16.msra.mxu1 %v7827_v10 }
0x1689   :  { %2567 = vmatprep.subr.bf16.mxu1 %v7626_v6 }
0x16cc   :  { %v7816_v52 = vpop.f32.mrb[44].mxu0 }
0x16cd   :  { %v6088_v0 = vpop.f32.mrb[45].mxu0 }
0x16ce   :  { %v2374_v48 = vpop.f32.mrb[46].mxu0 }
0x16cf   :  { %v6089_v33 = vpop.f32.mrb[47].mxu0 }
0x1702   :  { %v2057_v58 = vpop.xlane.xlu1 %2056 }
0x1703   :  { %6557 = vrcp.f32 %v2057_v58 }
0x170d   :  { %v6558_v7 = vpop.eup %6557 }
0x170e   :  { %v2063_v18 = vrot.slane %v6558_v7, %v7337_v37  ;;  %v2067_v9 = vrot.slane %v6558_v7, %v7356_v62 }
0x1710   :  { %v2070_v41 = vmul.f32 %v6554_v49, %v2063_v18  ;;  %v2071_v46 = vmul.f32 %v6556_v1, %v2067_v9 }
0x1712   :  { %2106 = vperm.xlu0 %6400, %v2070_v41  }
0x1716   :  { %2111 = vperm.xlu0 %6400, %v2071_v46  }
0x1791   :  { %v2107_v1 = vpop.permute.xlu0 %2106 }
0x1792   :  { %v2114_v58 = vmul.f32 %v2107_v1, %v7714_v35  ;;  %v2115_v7 = vmul.f32 %v2107_v1, %v7716_v16  ;;  %v2116_v18 = vmul.f32 %v2107_v1, %v7724_v39 }
0x1794   :  { %v2120_v49 = vrot.slane %v2114_v58, 4  ;;  %v2126_v41 = vrot.slane %v2115_v7, 4  ;;  %v2132_v9 = vrot.slane %v2116_v18, 4 }
0x1795   :  { %v2112_v46 = vpop.permute.xlu0 %2111 }
0x1796   :  { %v2121_v0 = vadd.f32 %v2120_v49, %v2114_v58  ;;  %v2127_v48 = vadd.f32 %v2126_v41, %v2115_v7  ;;  %v2133_v33 = vadd.f32 %v2132_v9, %v2116_v18  ;;  %v2117_v15 = vmul.f32 %v2112_v46, %v7720_v38 }
0x1797   :  { %v2118_v10 = vmul.f32 %v2112_v46, %v7722_v11  ;;  %v2119_v6 = vmul.f32 %v2112_v46, %v7726_v47 }
0x1798   :  { %v2122_v53 = vrot.slane %v2121_v0, 2  ;;  %v2128_v27 = vrot.slane %v2127_v48, 2  ;;  %v2134_v35 = vrot.slane %v2133_v33, 2  ;;  %v2138_v30 = vrot.slane %v2117_v15, 4 }
0x1799   :  { %v2144_v16 = vrot.slane %v2118_v10, 4  ;;  %v2150_v36 = vrot.slane %v2119_v6, 4 }
0x179a   :  { %v2123_v1 = vadd.f32 %v2122_v53, %v2121_v0  ;;  %v2139_v39 = vadd.f32 %v2138_v30, %v2117_v15  ;;  %v2129_v34 = vadd.f32 %v2128_v27, %v2127_v48  ;;  %v2135_v51 = vadd.f32 %v2134_v35, %v2133_v33 }
0x179b   :  { %v2145_v44 = vadd.f32 %v2144_v16, %v2118_v10  ;;  %v2151_v58 = vadd.f32 %v2150_v36, %v2119_v6  ;;  %v7844_v6 = vrot.slane %v7732_v12, %v7356_v62 }
0x179c   :  { %v2140_v7 = vrot.slane %v2139_v39, 2  ;;  %v2124_v41 = vrot.slane %v2123_v1, 1  ;;  %v2130_v11 = vrot.slane %v2129_v34, 1  ;;  %v2136_v47 = vrot.slane %v2135_v51, 1 }
0x179d   :  { %v2146_v18 = vrot.slane %v2145_v44, 2  ;;  %v2152_v49 = vrot.slane %v2151_v58, 2 }
0x179e   :  { %v2141_v9 = vadd.f32 %v2140_v7, %v2139_v39  ;;  %v2125_v27 = vadd.f32 %v2124_v41, %v2123_v1  ;;  %v2131_v16 = vadd.f32 %v2130_v11, %v2129_v34  ;;  %v2137_v39 = vadd.f32 %v2136_v47, %v2135_v51 }
0x179f   :  { %v2147_v38 = vadd.f32 %v2146_v18, %v2145_v44  ;;  %v2153_v46 = vadd.f32 %v2152_v49, %v2151_v58  ;;  %v1786_v44 = vld [vmem:[#allocation14] sm:$0x7] }
0x17a0   :  { %v2142_v5 = vrot.slane %v2141_v9, 1  ;;  %v7848_v0 = vrot.slane %v1786_v44, %v7337_v37  ;;  %v7857_v51 = vrot.slane %v1786_v44, %v7356_v62 }
0x17a1   :  { %v2148_v53 = vrot.slane %v2147_v38, 1  ;;  %v2154_v30 = vrot.slane %v2153_v46, 1 }
0x17a2   :  { %v2143_v35 = vadd.f32 %v2142_v5, %v2141_v9 }
0x17a3   :  { %v2149_v36 = vadd.f32 %v2148_v53, %v2147_v38  ;;  %v2155_v15 = vadd.f32 %v2154_v30, %v2153_v46 }
0x17a4   :  { %v2290_v10 = vsel %vm2013_vm12, %v2143_v35, %v2125_v27 }
0x17a5   :  { %v2291_v48 = vsel %vm2013_vm12, %v2149_v36, %v2131_v16  ;;  %v6294_v33 = vadd.f32 %v2290_v10, %v7840_v2  ;;  %v2292_v1 = vsel %vm2013_vm12, %v2155_v15, %v2137_v39  ;;  %v2423_v15 = vpop.permute.xlu1 %2422 }
0x17a6   :  { %v6297_v58 = vadd.f32 %v2291_v48, %v7844_v6  ;;  %v2372_v5 = vadd.f32 %v7816_v52, %v2292_v1  ;;  %v7867_v52 = vrot.slane %v1786_v44, %v7353_v61  ;;  %v9131_v44 = vld [vmem:[#allocation27_spill] sm:$0xff] }
0x17a7   :  { %v6295_v34 = vadd.f32 %v6294_v33, %v7750_v43  ;;  %v7864_v43 = vrot.slane %v7732_v12, %v7353_v61  ;;  %v7922_v33 = vld [vmem:[%s8958_s13] ss:$0 sm:$0xff] }
0x17a8   :  { %v6298_v38 = vadd.f32 %v6297_v58, %v7752_v32  ;;  %v2395_v30 = vadd.f32 %v7867_v52, %v2372_v5  ;;  %9132 = vst [vmem:[#allocation27_spill] sm:$0xff] %v7922_v33 }
0x17a9   :  { %v6296_v11 = vadd.f32 %v6295_v34, %v7848_v0  ;;  %v1946_v46 = vadd.f32 %v7737_v63, %v7864_v43  ;;  %v9130_v63 = vld [vmem:[#allocation48_spill] sm:$0xff] }
0x17aa   :  { %v6299_v7 = vadd.f32 %v6298_v38, %v7857_v51 }
0x17ab   :  { %v5770_v47 = vmul.f32 -1.442695, %v6296_v11 }
0x17ac   :  { %v5771_v18 = vmul.f32 -1.442695, %v6299_v7 }
0x17ad   :  { %6559 = vpow2.f32 %v5770_v47 }
0x17ae   :  { %6561 = vpow2.f32 %v5771_v18  ;;  %v9134_v18 = vld [vmem:[#allocation43_spill] sm:$0xff] }
0x17b7   :  { %v6560_v49 = vpop.eup %6559 }
0x17b8   :  { %v2400_v41 = vadd.f32 1.0, %v6560_v49  ;;  %v6562_v9 = vpop.eup %6561 }
0x17b9   :  { %v2407_v32 = vadd.f32 1.0, %v6562_v9 }
0x17ba   :  { %6563 = vrcp.f32 %v2400_v41 }
0x17bb   :  { %6565 = vrcp.f32 %v2407_v32  ;;  %v9135_v32 = vld [vmem:[#allocation26_spill] sm:$0xff] }
0x17c4   :  { %v6564_v53 = vpop.eup %6563 }
0x17c5   :  { %v2410_v27 = vmul.f32 %v6564_v53, %v1946_v46  ;;  %v6566_v16 = vpop.eup %6565 }
0x17c6   :  { %v2413_v36 = vsub.f32 1.0, %v6566_v16  ;;  %v2425_v10 = vmul.f32 %v6566_v16, %v2423_v15  ;;  %v9137_v15 = vld [vmem:[#allocation38_spill] sm:$0xff] }
0x17c7   :  { %v2411_v35 = vadd.f32 %v2410_v27, %v2395_v30 }
0x17c9   :  { %6567 = vtanh.f32 %v2411_v35 }
0x17d3   :  { %v6568_v39 = vpop.eup %6567 }
0x17d4   :  { %v2414_v12 = vmul.f32 %v6568_v39, %v2413_v36  ;;  %v9136_v36 = vld [vmem:[#allocation35_spill] sm:$0xff] }
0x17d6   :  { %v7872_v48 = vadd.f32 %v2425_v10, %v2414_v12 }
0x17d8   :  { %v2427_v61 = vpack.c.bf16 %v7872_v48, %v7872_v48 }
0x17da   :  { %6095 = vmatmul.mubr.msk.bf16.vlgmr.msra.gmra.mrb[44].mxu1 %vm405_vm2, %v2427_v61  ;;  %5777 = vmatmul.mubr.msk.bf16.vlgmr.msra.gmra.mrb[48].mxu0 %vm405_vm2, %v2427_v61 }
0x17db   :  { %2568 = vmatpush1.bf16.msra.mxu1 %v7634_v56  ;;  %2599 = vmatprep.mubr.bf16.mxu1 %v9126_v45 }
0x17dc   :  { %2569 = vmatprep.subr.bf16.mxu1 %v7640_v8  ;;  %2785 = vmatpush1.bf16.msra.mxu0 %v7636_v60 }
0x17dd   :  { %2786 = vmatprep.subr.bf16.mxu0 %v7642_v50  ;;  %2816 = vmatprep.mubr.bf16.mxu0 %v9126_v45 }
0x17df   :  { %2570 = vmatpush1.bf16.msra.mxu1 %v7648_v14 }
0x17e0   :  { %6098 = vmatprep.subr.bf16.mxu1 %v9129_v57  ;;  %2787 = vmatpush1.bf16.msra.mxu0 %v7650_v28 }
0x17e1   :  { %2788 = vmatprep.subr.bf16.mxu0 %v7654_v17 }
0x17e2   :  { %5778 = vmatmul.mubr.msk.bf16.vlgmr.msra.gmra.mrb[48].mxu1 %vm405_vm2, %v2427_v61  ;;  %v9138_v61 = vld [vmem:[#allocation44_spill] sm:$0xff] }
0x17e3   :  { %6099 = vmatpush3.bf16.msra.mxu1 %v7767_v4  ;;  %6114 = vmatprep.mubr.msk.bf16.mxu1 %vm7064_vm0, %v9129_v57 }
0x17e4   :  { %6100 = vmatprep.subr.bf16.mxu1 %v9129_v57  ;;  %2789 = vmatpush1.bf16.msra.mxu0 %v7660_v40 }
0x17e5   :  { %2790 = vmatprep.subr.bf16.mxu0 %v7663_v19 }
0x17e7   :  { %6101 = vmatpush3.bf16.msra.mxu1 %v7770_v59 }
0x17e8   :  { %6102 = vmatprep.subr.bf16.mxu1 %v9129_v57  ;;  %2791 = vmatpush1.bf16.msra.mxu0 %v7668_v20 }
0x17e9   :  { %2792 = vmatprep.subr.bf16.mxu0 %v7673_v21 }
0x17eb   :  { %6103 = vmatpush3.bf16.msra.mxu1 %v7774_v54 }
0x17ec   :  { %6104 = vmatprep.subr.bf16.mxu1 %v9129_v57  ;;  %2793 = vmatpush1.bf16.msra.mxu0 %v7676_v24 }
0x17ed   :  { %2794 = vmatprep.subr.bf16.mxu0 %v7679_v22 }
0x17ef   :  { %6105 = vmatpush3.bf16.msra.mxu1 %v7778_v55 }
0x17f0   :  { %6106 = vmatprep.subr.bf16.mxu1 %v9129_v57  ;;  %2795 = vmatpush1.bf16.msra.mxu0 %v7682_v23 }
0x17f1   :  { %2796 = vmatprep.subr.bf16.mxu0 %v7685_v25 }
0x17f3   :  { %6107 = vmatpush3.bf16.msra.mxu1 %v7782_v3 }
0x17f4   :  { %6108 = vmatprep.subr.bf16.mxu1 %v9129_v57  ;;  %2797 = vmatpush1.bf16.msra.mxu0 %v7688_v26 }
0x17f5   :  { %2798 = vmatprep.subr.bf16.mxu0 %v7694_v29 }
0x17f7   :  { %6109 = vmatpush3.bf16.msra.mxu1 %v7786_v13  ;;  %v7986_v13 = vadd.f32 %v7848_v0, %v7840_v2 }
0x17f8   :  { %6110 = vmatprep.subr.bf16.mxu1 %v9129_v57  ;;  %2799 = vmatpush1.bf16.msra.mxu0 %v7697_v31 }
0x17f9   :  { %6118 = vmatprep.subr.bf16.mxu0 %v9129_v57 }
0x17fb   :  { %6111 = vmatpush3.bf16.msra.mxu1 %v7790_v42 }
0x17fc   :  { %6112 = vmatprep.subr.bf16.mxu1 %v9129_v57 }
0x17ff   :  { %6113 = vmatpush3.bf16.msra.mxu1 %v9130_v63 }
0x1800   :  { %2966 = vmatprep.subr.bf16.mxu1 %v9131_v44 }
0x18ad   :  { %v2487_v1 = vpop.f32.mrb[44].mxu1 }
0x18ae   :  { %v7925_v58 = vadd.f32 %v7922_v33, %v2487_v1  ;;  %v6096_v5 = vpop.f32.mrb[45].mxu1 }
0x18af   :  { %v2490_v34 = vpop.f32.mrb[46].mxu1 }
0x18b0   :  { %9133 = vst [vmem:[#allocation51_spill] sm:$0xff] %v7925_v58  ;;  %v6097_v38 = vpop.f32.mrb[47].mxu1  ;;  %v2493_v11 = vsel %vm1573_vm4, %v7925_v58, -inf }
0x18b1   :  { %2494 = vmax.xlane.f32.xlu0 %v2493_v11 }
0x18b5   :  { %v7929_v47 = vpop.f32.mrb[48].mxu1 }
0x18b6   :  { %v2603_v7 = vpop.f32.mrb[49].mxu1 }
0x18b7   :  { %v2604_v49 = vadd.f32 %v2603_v7, %v9134_v18  ;;  %v2605_v41 = vpop.f32.mrb[50].mxu1  ;;  %v9140_v7 = vld [vmem:[#allocation33_spill] sm:$0xff] }
0x18b8   :  { %v2606_v9 = vpop.f32.mrb[51].mxu1 }
0x18b9   :  { %v2615_v46 = vrot.slane %v2604_v49, %v9135_v32 }
0x18bb   :  { %v2616_v53 = vcombine.high %v2615_v46, %v2615_v46  ;;  %v2623_v30 = vrot.slane %v2615_v46, %v9135_v32 }
0x18bd   :  { %v2630_v27 = vrot.slane %v2616_v53, %v9135_v32  ;;  %v2634_v35 = vrot.slane %v2623_v30, %v7337_v37 }
0x18bf   :  { %v2638_v16 = vrot.slane %v2630_v27, %v7337_v37  ;;  %v2641_v39 = vadd.f32 %v2634_v35, %v9136_v36  ;;  %v9141_v27 = vld [vmem:[#allocation45_spill] sm:$0xff] }
0x18c1   :  { %v2642_v12 = vadd.f32 %v2638_v16, %v9137_v15  ;;  %6569 = vtanh.f32 %v2641_v39  ;;  %v9154_v15 = vld [vmem:[#allocation39_spill] sm:$0xff] }
0x18c3   :  { %6571 = vtanh.f32 %v2642_v12 }
0x18cb   :  { %v6570_v10 = vpop.eup %6569 }
0x18cc   :  { %v2645_v44 = vmul.f32 %v6570_v10, %v9138_v61 }
0x18cd   :  { %v6572_v1 = vpop.eup %6571 }
0x18ce   :  { %v2647_v5 = vsel %vm405_vm2, %v2645_v44, 0.0  ;;  %v2646_v34 = vmul.f32 %v6572_v1, %v9138_v61 }
0x18cf   :  { %2648 = vadd.xlane.f32.xlu1 %v2647_v5 }
0x18d0   :  { %v2650_v38 = vsel %vm405_vm2, %v2646_v34, 0.0 }
0x18d1   :  { %2651 = vadd.xlane.f32.xlu0 %v2650_v38 }
0x193e   :  { %v7943_v11 = vpop.xlane.xlu0 %2494 }
0x193f   :  { %9139 = vst [vmem:[#allocation52_spill] sm:$0xff] %v7943_v11  ;;  %vm2505_vm14 = vcmp.eq.f32.partialorder %v7925_v58, %v7943_v11 }
0x1940   :  { %v2506_v49 = vsel %vm2505_vm14, %v9140_v7, 128 }
0x1941   :  { %v2507_v41 = vsel %vm1573_vm4, %v2506_v49, 2147483647 }
0x1942   :  { %v2509_v9 = vshra.s32 %v2507_v41, 16  ;;  %v2508_v10 = vand.u32 65535, %v2507_v41 }
0x1944   :  { %v2511_v46 = vcvt.s32.f32 %v2509_v9  ;;  %v2510_v1 = vcvt.s32.f32 %v2508_v10 }
0x1946   :  { %2512 = vmin.xlane.f32.xlu0 %v2511_v46 }
0x195c   :  { %v2649_v53 = vpop.xlane.xlu1 %2648 }
0x195d   :  { %v2658_v35 = vrot.slane %v2649_v53, %v9141_v27 }
0x195e   :  { %v2652_v30 = vpop.xlane.xlu0 %2651 }
0x195f   :  { %v2662_v16 = vrot.slane %v2652_v30, %v9141_v27 }
0x1961   :  { %v2663_v39 = vsel %vm2013_vm12, %v2662_v16, %v2658_v35 }
0x1962   :  { %v2665_v12 = vsel %vm2016_vm13, %v2663_v39, -inf }
0x1963   :  { %2666 = vmax.xlane.f32.xlu0 %v2665_v12 }
0x19d3   :  { %v2513_v44 = vpop.xlane.xlu0 %2512 }
0x19d4   :  { %vm2514_vm15 = vcmp.eq.f32.partialorder %v2511_v46, %v2513_v44  ;;  %v2519_v41 = vcvt.f32.s32 %v2513_v44  ;;  %v9148_v44 = vld [vmem:[#allocation30_spill] sm:$0xff] }
0x19d5   :  { %v2515_v5 = vsel %vm2514_vm15, %v2510_v1, inf  ;;  %v9149_v1 = vld [vmem:[#allocation31_spill] sm:$0xff] }
0x19d6   :  { %2516 = vmin.xlane.f32.xlu0 %v2515_v5  ;;  %v2520_v46 = vshll.u32 %v2519_v41, 16  ;;  %v9150_v5 = vld [vmem:[#allocation32_spill] sm:$0xff] }
0x19f0   :  { %v2667_v34 = vpop.xlane.xlu0 %2666 }
0x19f1   :  { %v2672_v38 = vrot.slane %v2667_v34, %v7337_v37  ;;  %v2676_v49 = vrot.slane %v2667_v34, %v7356_v62 }
0x19f3   :  { %v2679_v9 = vsub.f32 %v2649_v53, %v2672_v38  ;;  %v2680_v58 = vsub.f32 %v2652_v30, %v2676_v49  ;;  %v9143_v53 = vmov 1.0|1.0   ;;  %v9147_v30 = vld [vmem:[#allocation50_spill] sm:$0xff] }
0x19f5   :  { %v2681_v11 = vmul.f32 1.442695, %v2679_v9  ;;  %v2683_v61 = vmul.f32 1.442695, %v2680_v58  ;;  %v9144_v58 = vld [vmem:[#allocation49_spill] sm:$0xff] }
0x19f7   :  { %6573 = vpow2.f32 %v2681_v11  ;;  %v9146_v11 = vld [vmem:[#allocation29_spill] sm:$0xff] }
0x19f8   :  { %6575 = vpow2.f32 %v2683_v61  ;;  %v9145_v61 = vld [vmem:[#allocation28_spill] sm:$0xff] }
0x1a01   :  { %v6574_v35 = vpop.eup %6573 }
0x1a02   :  { %v6576_v16 = vpop.eup %6575  ;;  %2688 = vperm.xlu0 %6400, %v6574_v35  }
0x1a03   :  { %2691 = vperm.xlu1 %6399, %v6576_v16  }
0x1a63   :  { %v2517_v39 = vpop.xlane.xlu0 %2516 }
0x1a64   :  { %v2518_v12 = vcvt.f32.s32 %v2517_v39 }
0x1a66   :  { %v7955_v10 = vadd.s32 %v2520_v46, %v2518_v12 }
0x1a68   :  { %9142 = vst [vmem:[#allocation53_spill] sm:$0xff] %v7955_v10  ;;  %vm2522_vm1 = vcmp.eq.s32.totalorder %v9140_v7, %v7955_v10  ;;  %v9152_v10 = vld [vmem:[#allocation37_spill] sm:$0xff] }
0x1a69   :  { %vm5779_vm10 = vmpackc.low %vm2522_vm1, %vm2522_vm1  ;;  %v9153_v7 = vld [vmem:[#allocation41_spill] sm:$0xff] }
0x1a6a   :  { %5780 = vmatmul.mubr.msk.bf16.vlgmr.msra.gmra.mrb[48].mxu0 %vm5779_vm10, %v9143_v53  ;;  %6115 = vmatmul.mubr.msk.bf16.vlgmr.msra.gmra.mrb[52].mxu1 %vm5779_vm10, %v9143_v53  ;;  %v9151_v53 = vld [vmem:[#allocation36_spill] sm:$0xff] }
0x1a6b   :  { %6119 = vmatpush3.bf16.msra.mxu0 %v9144_v58  ;;  %2967 = vmatpush1.bf16.msra.mxu1 %v9145_v61 }
0x1a6c   :  { %6120 = vmatprep.subr.bf16.mxu0 %v9129_v57  ;;  %2968 = vmatprep.subr.bf16.mxu1 %v9146_v11 }
0x1a6d   :  { %6122 = vmatprep.mubr.msk.bf16.mxu0 %vm7064_vm0, %v9129_v57  ;;  %2998 = vmatprep.mubr.bf16.mxu1 %v9126_v45 }
0x1a6f   :  { %6121 = vmatpush3.bf16.msra.mxu0 %v9147_v30  ;;  %2969 = vmatpush1.bf16.msra.mxu1 %v9148_v44 }
0x1a70   :  { %3007 = vmatprep.subr.bf16.mxu0 %v9149_v1  ;;  %3224 = vmatprep.subr.bf16.mxu1 %v9150_v5 }
0x1a81   :  { %v2689_v34 = vpop.permute.xlu0 %2688 }
0x1a82   :  { %v2692_v38 = vpop.permute.xlu1 %2691  ;;  %v2696_v49 = vrot.slane %v2689_v34, %v9141_v27 }
0x1a83   :  { %v2700_v9 = vrot.slane %v2692_v38, %v9141_v27 }
0x1a85   :  { %v2701_v41 = vsel %vm2013_vm12, %v2700_v9, %v2696_v49 }
0x1a86   :  { %v2703_v39 = vsel %vm2016_vm13, %v2701_v41, 0.0 }
0x1a87   :  { %2704 = vadd.xlane.f32.xlu1 %v2703_v39 }
0x1b14   :  { %v2705_v46 = vpop.xlane.xlu1 %2704 }
0x1b15   :  { %6577 = vrcp.f32 %v2705_v46 }
0x1b1f   :  { %v6578_v12 = vpop.eup %6577 }
0x1b20   :  { %v2711_v61 = vrot.slane %v6578_v12, %v7337_v37  ;;  %v2715_v44 = vrot.slane %v6578_v12, %v7356_v62 }
0x1b22   :  { %v2718_v11 = vmul.f32 %v6574_v35, %v2711_v61  ;;  %v2719_v1 = vmul.f32 %v6576_v16, %v2715_v44 }
0x1b24   :  { %2722 = vperm.xlu0 %6400, %v2718_v11  }
0x1b28   :  { %2727 = vperm.xlu0 %6400, %v2719_v1  }
0x1b3d   :  { %v2818_v5 = vpop.f32.mrb[48].mxu0  ;;  %v2859_v34 = vpop.f32.mrb[52].mxu1 }
0x1b3e   :  { %v2820_v30 = vpop.f32.mrb[49].mxu0  ;;  %v6116_v38 = vpop.f32.mrb[53].mxu1 }
0x1b3f   :  { %v2822_v58 = vpop.f32.mrb[50].mxu0  ;;  %v2862_v49 = vpop.f32.mrb[54].mxu1 }
0x1b40   :  { %v2823_v9 = vpop.f32.mrb[51].mxu0  ;;  %v6117_v41 = vpop.f32.mrb[55].mxu1  ;;  %v9155_v58 = vld [vmem:[#allocation40_spill] sm:$0xff] }
0x1b41   :  { %v9156_v9 = vld [vmem:[#allocation42_spill] sm:$0xff] }
0x1ba3   :  { %v2723_v39 = vpop.permute.xlu0 %2722 }
0x1ba4   :  { %v2730_v46 = vmul.f32 %v2723_v39, %v9151_v53  ;;  %v2731_v27 = vmul.f32 %v2723_v39, %v9152_v10  ;;  %v2732_v35 = vmul.f32 %v2723_v39, %v9153_v7 }
0x1ba6   :  { %v2736_v61 = vrot.slane %v2730_v46, 4  ;;  %v2742_v12 = vrot.slane %v2731_v27, 4  ;;  %v2748_v11 = vrot.slane %v2732_v35, 4 }
0x1ba7   :  { %v2728_v16 = vpop.permute.xlu0 %2727 }
0x1ba8   :  { %v2737_v44 = vadd.f32 %v2736_v61, %v2730_v46  ;;  %v2743_v1 = vadd.f32 %v2742_v12, %v2731_v27  ;;  %v2749_v62 = vadd.f32 %v2748_v11, %v2732_v35  ;;  %v2733_v38 = vmul.f32 %v2728_v16, %v9154_v15 }
0x1ba9   :  { %v2734_v49 = vmul.f32 %v2728_v16, %v9155_v58  ;;  %v2735_v41 = vmul.f32 %v2728_v16, %v9156_v9 }
0x1baa   :  { %v2738_v36 = vrot.slane %v2737_v44, 2  ;;  %v2744_v37 = vrot.slane %v2743_v1, 2  ;;  %v2750_v53 = vrot.slane %v2749_v62, 2  ;;  %v2754_v32 = vrot.slane %v2733_v38, 4 }
0x1bab   :  { %v2760_v10 = vrot.slane %v2734_v49, 4  ;;  %v2766_v18 = vrot.slane %v2735_v41, 4 }
0x1bac   :  { %v2739_v39 = vadd.f32 %v2738_v36, %v2737_v44  ;;  %v2755_v7 = vadd.f32 %v2754_v32, %v2733_v38  ;;  %v2745_v33 = vadd.f32 %v2744_v37, %v2743_v1  ;;  %v2751_v63 = vadd.f32 %v2750_v53, %v2749_v62 }
0x1bad   :  { %v2761_v42 = vadd.f32 %v2760_v10, %v2734_v49  ;;  %v2767_v46 = vadd.f32 %v2766_v18, %v2735_v41  ;;  %v7990_v37 = vadd.f32 %v7857_v51, %v7844_v6 }
0x1bae   :  { %v2756_v27 = vrot.slane %v2755_v7, 2  ;;  %v2740_v12 = vrot.slane %v2739_v39, 1  ;;  %v2746_v58 = vrot.slane %v2745_v33, 1  ;;  %v2752_v15 = vrot.slane %v2751_v63, 1 }
0x1baf   :  { %v2762_v35 = vrot.slane %v2761_v42, 2  ;;  %v2768_v61 = vrot.slane %v2767_v46, 2 }
0x1bb0   :  { %v2757_v11 = vadd.f32 %v2756_v27, %v2755_v7  ;;  %v2741_v62 = vadd.f32 %v2740_v12, %v2739_v39  ;;  %v2747_v10 = vadd.f32 %v2746_v58, %v2745_v33  ;;  %v2753_v53 = vadd.f32 %v2752_v15, %v2751_v63 }
0x1bb1   :  { %v2763_v16 = vadd.f32 %v2762_v35, %v2761_v42  ;;  %v2769_v9 = vadd.f32 %v2768_v61, %v2767_v46 }
0x1bb2   :  { %v2758_v31 = vrot.slane %v2757_v11, 1 }
0x1bb3   :  { %v2764_v36 = vrot.slane %v2763_v16, 1  ;;  %v2770_v32 = vrot.slane %v2769_v9, 1 }
0x1bb4   :  { %v2759_v18 = vadd.f32 %v2758_v31, %v2757_v11 }
0x1bb5   :  { %v2765_v7 = vadd.f32 %v2764_v36, %v2763_v16  ;;  %v2771_v44 = vadd.f32 %v2770_v32, %v2769_v9  ;;  %v2602_v9 = vadd.f32 %v7929_v47, %v7864_v43  ;;  %v9166_v47 = vld [vmem:[#allocation24_spill] sm:$0xff] }
0x1bb6   :  { %v2778_v42 = vsel %vm2013_vm12, %v2759_v18, %v2741_v62  ;;  %v9167_v62 = vld [vmem:[#allocation35_spill] sm:$0xff] }
0x1bb7   :  { %v2779_v1 = vsel %vm2013_vm12, %v2765_v7, %v2747_v10  ;;  %v2780_v38 = vsel %vm2013_vm12, %v2771_v44, %v2753_v53  ;;  %v6301_v2 = vadd.f32 %v7986_v13, %v2778_v42  ;;  %v9168_v10 = vld [vmem:[#allocation38_spill] sm:$0xff]  ;;  %v9169_v44 = vld [vmem:[#allocation44_spill] sm:$0xff] }
0x1bb8   :  { %v2860_v0 = vadd.f32 %v2859_v34, %v2780_v38  ;;  %v6304_v49 = vadd.f32 %v7990_v37, %v2779_v1 }
0x1bb9   :  { %v6302_v41 = vadd.f32 %v6301_v2, %v2818_v5 }
0x1bba   :  { %v6305_v6 = vadd.f32 %v6304_v49, %v2820_v30  ;;  %v2867_v46 = vadd.f32 %v2860_v0, %v7867_v52 }
0x1bbb   :  { %v5783_v51 = vmul.f32 -1.442695, %v6302_v41  ;;  %v9171_v41 = vld [vmem:[#allocation33_spill] sm:$0xff] }
0x1bbc   :  { %v5784_v31 = vmul.f32 -1.442695, %v6305_v6 }
0x1bbd   :  { %6579 = vpow2.f32 %v5783_v51 }
0x1bbe   :  { %6581 = vpow2.f32 %v5784_v31 }
0x1bc7   :  { %v6580_v63 = vpop.eup %6579 }
0x1bc8   :  { %v2872_v33 = vadd.f32 1.0, %v6580_v63  ;;  %v6582_v15 = vpop.eup %6581 }
0x1bc9   :  { %v2879_v58 = vadd.f32 1.0, %v6582_v15 }
0x1bca   :  { %6583 = vrcp.f32 %v2872_v33 }
0x1bcb   :  { %6585 = vrcp.f32 %v2879_v58  ;;  %v9172_v58 = vld [vmem:[#allocation45_spill] sm:$0xff] }
0x1bd4   :  { %v6584_v39 = vpop.eup %6583 }
0x1bd5   :  { %v2882_v34 = vmul.f32 %v6584_v39, %v2602_v9  ;;  %v6586_v30 = vpop.eup %6585 }
0x1bd6   :  { %v2885_v5 = vsub.f32 1.0, %v6586_v30  ;;  %v2887_v12 = vmul.f32 %v6586_v30, %v7872_v48 }
0x1bd7   :  { %v2883_v27 = vadd.f32 %v2882_v34, %v2867_v46 }
0x1bd9   :  { %6587 = vtanh.f32 %v2883_v27 }
0x1be3   :  { %v6588_v35 = vpop.eup %6587 }
0x1be4   :  { %v2886_v61 = vmul.f32 %v6588_v35, %v2885_v5 }
0x1be6   :  { %v8001_v11 = vadd.f32 %v2887_v12, %v2886_v61 }
0x1be8   :  { %v2889_v16 = vpack.c.bf16 %v8001_v11, %v8001_v11 }
0x1bea   :  { %6123 = vmatmul.mubr.msk.bf16.vlgmr.msra.gmra.mrb[52].mxu0 %vm405_vm2, %v2889_v16  ;;  %5787 = vmatmul.mubr.msk.bf16.vlgmr.msra.gmra.mrb[56].mxu1 %vm405_vm2, %v2889_v16 }
0x1beb   :  { %3008 = vmatpush1.bf16.msra.mxu0 %v7634_v56  ;;  %3039 = vmatprep.mubr.bf16.mxu0 %v9126_v45  ;;  %v9157_v56 = vld [vmem:[#allocation46_spill] sm:$0xff] }
0x1bec   :  { %3009 = vmatprep.subr.bf16.mxu0 %v7640_v8  ;;  %3225 = vmatpush1.bf16.msra.mxu1 %v7636_v60  ;;  %v9158_v60 = vld [vmem:[#allocation34_spill] sm:$0xff]  ;;  %v9159_v8 = vld [vmem:[#allocation47_spill] sm:$0xff] }
0x1bed   :  { %3226 = vmatprep.subr.bf16.mxu1 %v7642_v50  ;;  %3256 = vmatprep.mubr.bf16.mxu1 %v9126_v45  ;;  %v9160_v50 = vld [vmem:[#allocation48_spill] sm:$0xff] }
0x1bef   :  { %3010 = vmatpush1.bf16.msra.mxu0 %v7648_v14  ;;  %v8047_v14 = vld [vmem:[#allocation16 + $0x4] ss:$16 sps:$4 sm:$0xff]  }
0x1bf0   :  { %6126 = vmatprep.subr.bf16.mxu0 %v9129_v57  ;;  %3227 = vmatpush1.bf16.msra.mxu1 %v7650_v28  ;;  %9161 = vst [vmem:[#allocation28_spill] sm:$0xff] %v8047_v14 }
0x1bf1   :  { %3228 = vmatprep.subr.bf16.mxu1 %v7654_v17  ;;  %v9162_v17 = vld [vmem:[#allocation27_spill] sm:$0xff] }
0x1bf2   :  { %5788 = vmatmul.mubr.msk.bf16.vlgmr.msra.gmra.mrb[56].mxu0 %vm405_vm2, %v2889_v16  ;;  %v9173_v16 = vld [vmem:[#allocation25_spill] sm:$0xff] }
0x1bf3   :  { %6127 = vmatpush3.bf16.msra.mxu0 %v7767_v4  ;;  %6142 = vmatprep.mubr.msk.bf16.mxu0 %vm7064_vm0, %v9129_v57 }
0x1bf4   :  { %6128 = vmatprep.subr.bf16.mxu0 %v9129_v57  ;;  %3229 = vmatpush1.bf16.msra.mxu1 %v7660_v40 }
0x1bf5   :  { %3230 = vmatprep.subr.bf16.mxu1 %v7663_v19 }
0x1bf7   :  { %6129 = vmatpush3.bf16.msra.mxu0 %v7770_v59  ;;  %v9165_v59 = vld [vmem:[#allocation26_spill] sm:$0xff] }
0x1bf8   :  { %6130 = vmatprep.subr.bf16.mxu0 %v9129_v57  ;;  %3231 = vmatpush1.bf16.msra.mxu1 %v7668_v20 }
0x1bf9   :  { %3232 = vmatprep.subr.bf16.mxu1 %v7673_v21 }
0x1bfb   :  { %6131 = vmatpush3.bf16.msra.mxu0 %v7774_v54 }
0x1bfc   :  { %6132 = vmatprep.subr.bf16.mxu0 %v9129_v57  ;;  %3233 = vmatpush1.bf16.msra.mxu1 %v7676_v24 }
0x1bfd   :  { %3234 = vmatprep.subr.bf16.mxu1 %v7679_v22 }
0x1bff   :  { %6133 = vmatpush3.bf16.msra.mxu0 %v7778_v55 }
0x1c00   :  { %6134 = vmatprep.subr.bf16.mxu0 %v9129_v57  ;;  %3235 = vmatpush1.bf16.msra.mxu1 %v7682_v23 }
0x1c01   :  { %3236 = vmatprep.subr.bf16.mxu1 %v7685_v25  ;;  %v9164_v25 = vld [vmem:[#allocation43_spill] sm:$0xff] }
0x1c03   :  { %6135 = vmatpush3.bf16.msra.mxu0 %v7782_v3 }
0x1c04   :  { %6136 = vmatprep.subr.bf16.mxu0 %v9129_v57  ;;  %3237 = vmatpush1.bf16.msra.mxu1 %v7688_v26 }
0x1c05   :  { %3238 = vmatprep.subr.bf16.mxu1 %v7694_v29 }
0x1c07   :  { %6137 = vmatpush3.bf16.msra.mxu0 %v9157_v56 }
0x1c08   :  { %6138 = vmatprep.subr.bf16.mxu0 %v9129_v57  ;;  %3239 = vmatpush1.bf16.msra.mxu1 %v9158_v60 }
0x1c09   :  { %6146 = vmatprep.subr.bf16.mxu1 %v9129_v57 }
0x1c0b   :  { %6139 = vmatpush3.bf16.msra.mxu0 %v9159_v8 }
0x1c0c   :  { %6140 = vmatprep.subr.bf16.mxu0 %v9129_v57 }
0x1c0f   :  { %6141 = vmatpush3.bf16.msra.mxu0 %v9160_v50 }
0x1c10   :  { %3406 = vmatprep.subr.bf16.mxu0 %v8047_v14 }
0x1cbd   :  { %v2927_v28 = vpop.f32.mrb[52].mxu0 }
0x1cbe   :  { %v8051_v40 = vadd.f32 %v9162_v17, %v2927_v28  ;;  %v6124_v19 = vpop.f32.mrb[53].mxu0 }
0x1cbf   :  { %v2930_v20 = vpop.f32.mrb[54].mxu0 }
0x1cc0   :  { %9163 = vst [vmem:[#allocation29_spill] sm:$0xff] %v8051_v40  ;;  %v6125_v21 = vpop.f32.mrb[55].mxu0  ;;  %v2933_v24 = vsel %vm1573_vm4, %v8051_v40, -inf }
0x1cc1   :  { %2934 = vmax.xlane.f32.xlu0 %v2933_v24 }
0x1cc5   :  { %v8055_v22 = vpop.f32.mrb[56].mxu0 }
0x1cc6   :  { %v3043_v23 = vpop.f32.mrb[57].mxu0 }
0x1cc7   :  { %v3044_v26 = vadd.f32 %v3043_v23, %v9164_v25  ;;  %v3045_v29 = vpop.f32.mrb[58].mxu0 }
0x1cc8   :  { %v3046_v4 = vpop.f32.mrb[59].mxu0 }
0x1cc9   :  { %v3055_v54 = vrot.slane %v3044_v26, %v9165_v59  ;;  %v9174_v4 = vld [vmem:[#allocation53_spill] sm:$0xff] }
0x1ccb   :  { %v3056_v55 = vcombine.high %v3055_v54, %v3055_v54  ;;  %v3063_v3 = vrot.slane %v3055_v54, %v9165_v59  ;;  %v5613_v54 = vrot.slane %v9174_v4, %v9172_v58 }
0x1ccd   :  { %v3070_v48 = vrot.slane %v3056_v55, %v9165_v59  ;;  %v3074_v36 = vrot.slane %v3063_v3, %v9166_v47 }
0x1ccf   :  { %v3078_v32 = vrot.slane %v3070_v48, %v9166_v47  ;;  %v3081_v18 = vadd.f32 %v3074_v36, %v9167_v62  ;;  %v9175_v48 = vmov 1.0|1.0   ;;  %v9176_v36 = vld [vmem:[#allocation49_spill] sm:$0xff] }
0x1cd1   :  { %v3082_v53 = vadd.f32 %v3078_v32, %v9168_v10  ;;  %6589 = vtanh.f32 %v3081_v18  ;;  %v8091_v32 = vld [vmem:[#allocation16] ss:$16 sps:$4 sm:$0xff]   ;;  %v8095_v18 = vld [vmem:[#allocation16 + $0x24] ss:$16 sps:$4 sm:$0xff]  }
0x1cd2   :  { %9177 = vst [vmem:[#allocation31_spill] sm:$0xff] %v8091_v32  ;;  %9178 = vst [vmem:[#allocation32_spill] sm:$0xff] %v8095_v18 }
0x1cd3   :  { %6591 = vtanh.f32 %v3082_v53  ;;  %v9179_v53 = vld [vmem:[#allocation50_spill] sm:$0xff] }
0x1cdb   :  { %v6590_v7 = vpop.eup %6589 }
0x1cdc   :  { %v3085_v42 = vmul.f32 %v6590_v7, %v9169_v44  ;;  %v8102_v7 = vld [vmem:[#allocation16 + $0x20] ss:$16 sps:$4 sm:$0xff]  }
0x1cdd   :  { %v6592_v1 = vpop.eup %6591  ;;  %9180 = vst [vmem:[#allocation46_spill] sm:$0xff] %v8102_v7 }
0x1cde   :  { %v3087_v38 = vsel %vm405_vm2, %v3085_v42, 0.0  ;;  %v3086_v2 = vmul.f32 %v6592_v1, %v9169_v44  ;;  %v8105_v44 = vld [vmem:[#allocation16 + $0xc] ss:$16 sps:$4 sm:$0xff]  }
0x1cdf   :  { %3088 = vadd.xlane.f32.xlu1 %v3087_v38  ;;  %9181 = vst [vmem:[#allocation34_spill] sm:$0xff] %v8105_v44  ;;  %v8108_v42 = vld [vmem:[#allocation11 + $0x4] ss:$12 sps:$4 sm:$0xff]  }
0x1ce0   :  { %v3090_v0 = vsel %vm405_vm2, %v3086_v2, 0.0  ;;  %9182 = vst [vmem:[#allocation47_spill] sm:$0xff] %v8108_v42 }
0x1ce1   :  { %3091 = vadd.xlane.f32.xlu0 %v3090_v0 }
0x1d4e   :  { %v8069_v49 = vpop.xlane.xlu0 %2934 }
0x1d4f   :  { %9170 = vst [vmem:[#allocation30_spill] sm:$0xff] %v8069_v49  ;;  %vm2945_vm11 = vcmp.eq.f32.partialorder %v8051_v40, %v8069_v49 }
0x1d50   :  { %v2946_v6 = vsel %vm2945_vm11, %v9171_v41, 128 }
0x1d51   :  { %v2947_v51 = vsel %vm1573_vm4, %v2946_v6, 2147483647 }
0x1d52   :  { %v2949_v31 = vshra.s32 %v2947_v51, 16  ;;  %v2948_v27 = vand.u32 65535, %v2947_v51 }
0x1d54   :  { %v2951_v63 = vcvt.s32.f32 %v2949_v31  ;;  %v2950_v5 = vcvt.s32.f32 %v2948_v27 }
0x1d56   :  { %2952 = vmin.xlane.f32.xlu1 %v2951_v63 }
0x1d6c   :  { %v3089_v33 = vpop.xlane.xlu1 %3088 }
0x1d6d   :  { %v3098_v9 = vrot.slane %v3089_v33, %v9172_v58 }
0x1d6e   :  { %v3092_v15 = vpop.xlane.xlu0 %3091 }
0x1d6f   :  { %v3102_v39 = vrot.slane %v3092_v15, %v9172_v58 }
0x1d71   :  { %v3103_v46 = vsel %vm2013_vm12, %v3102_v39, %v3098_v9 }
0x1d72   :  { %v3105_v34 = vsel %vm2016_vm13, %v3103_v46, -inf }
0x1d73   :  { %3106 = vmax.xlane.f32.xlu0 %v3105_v34 }
0x1de3   :  { %v2953_v30 = vpop.xlane.xlu1 %2952 }
0x1de4   :  { %vm2954_vm14 = vcmp.eq.f32.partialorder %v2951_v63, %v2953_v30  ;;  %v2959_v21 = vcvt.f32.s32 %v2953_v30 }
0x1de5   :  { %v2955_v35 = vsel %vm2954_vm14, %v2950_v5, inf }
0x1de6   :  { %2956 = vmin.xlane.f32.xlu1 %v2955_v35  ;;  %v2960_v23 = vshll.u32 %v2959_v21, 16  ;;  %v9185_v21 = vld [vmem:[#allocation41_spill] sm:$0xff] }
0x1e00   :  { %v3107_v61 = vpop.xlane.xlu0 %3106 }
0x1e01   :  { %v3112_v12 = vrot.slane %v3107_v61, %v9166_v47  ;;  %v3116_v56 = vrot.slane %v3107_v61, %v9173_v16 }
0x1e03   :  { %v3119_v60 = vsub.f32 %v3089_v33, %v3112_v12  ;;  %v3120_v8 = vsub.f32 %v3092_v15, %v3116_v56 }
0x1e05   :  { %v3121_v50 = vmul.f32 1.442695, %v3119_v60  ;;  %v3123_v28 = vmul.f32 1.442695, %v3120_v8  ;;  %v9183_v60 = vld [vmem:[#allocation36_spill] sm:$0xff] }
0x1e07   :  { %6593 = vpow2.f32 %v3121_v50  ;;  %v9184_v50 = vld [vmem:[#allocation37_spill] sm:$0xff] }
0x1e08   :  { %6595 = vpow2.f32 %v3123_v28 }
0x1e11   :  { %v6594_v19 = vpop.eup %6593 }
0x1e12   :  { %v6596_v20 = vpop.eup %6595  ;;  %3128 = vperm.xlu0 %6400, %v6594_v19  }
0x1e13   :  { %3131 = vperm.xlu1 %6399, %v6596_v20  }
0x1e73   :  { %v2957_v24 = vpop.xlane.xlu1 %2956 }
0x1e74   :  { %v2958_v26 = vcvt.f32.s32 %v2957_v24 }
0x1e76   :  { %v2961_v29 = vadd.s32 %v2960_v23, %v2958_v26 }
0x1e78   :  { %vm2962_vm15 = vcmp.eq.s32.totalorder %v9171_v41, %v2961_v29  ;;  %v5617_v55 = vrot.slane %v2961_v29, %v9172_v58 }
0x1e79   :  { %vm5789_vm1 = vmpackc.low %vm2962_vm15, %vm2962_vm15 }
0x1e7a   :  { %v8086_v3 = vsel %vm1570_vm3, %v5613_v54, %v5617_v55  ;;  %5790 = vmatmul.mubr.msk.bf16.vlgmr.msra.gmra.mrb[56].mxu1 %vm5789_vm1, %v9175_v48  ;;  %6143 = vmatmul.mubr.msk.bf16.vlgmr.msra.gmra.mrb[60].mxu0 %vm5789_vm1, %v9175_v48  ;;  %v9186_v55 = vld [vmem:[#allocation39_spill] sm:$0xff] }
0x1e7b   :  { %6147 = vmatpush3.bf16.msra.mxu1 %v9176_v36  ;;  %3407 = vmatpush1.bf16.msra.mxu0 %v8091_v32 }
0x1e7c   :  { %6148 = vmatprep.subr.bf16.mxu1 %v9129_v57  ;;  %3408 = vmatprep.subr.bf16.mxu0 %v8095_v18 }
0x1e7d   :  { %6150 = vmatprep.mubr.msk.bf16.mxu1 %vm7064_vm0, %v9129_v57  ;;  %3438 = vmatprep.mubr.bf16.mxu0 %v9126_v45 }
0x1e7f   :  { %6149 = vmatpush3.bf16.msra.mxu1 %v9179_v53  ;;  %3409 = vmatpush1.bf16.msra.mxu0 %v8102_v7  ;;  %v9187_v53 = vld [vmem:[#allocation40_spill] sm:$0xff] }
0x1e80   :  { %3447 = vmatprep.subr.bf16.mxu1 %v8105_v44  ;;  %3664 = vmatprep.subr.bf16.mxu0 %v8108_v42 }
0x1e91   :  { %v3129_v1 = vpop.permute.xlu0 %3128 }
0x1e92   :  { %v3132_v38 = vpop.permute.xlu1 %3131  ;;  %v3136_v2 = vrot.slane %v3129_v1, %v9172_v58 }
0x1e93   :  { %v3140_v0 = vrot.slane %v3132_v38, %v9172_v58  ;;  %v9188_v38 = vld [vmem:[#allocation42_spill] sm:$0xff] }
0x1e95   :  { %v3141_v6 = vsel %vm2013_vm12, %v3140_v0, %v3136_v2 }
0x1e96   :  { %v3143_v51 = vsel %vm2016_vm13, %v3141_v6, 0.0 }
0x1e97   :  { %3144 = vadd.xlane.f32.xlu1 %v3143_v51 }
0x1f24   :  { %v3145_v31 = vpop.xlane.xlu1 %3144 }
0x1f25   :  { %6597 = vrcp.f32 %v3145_v31 }
0x1f2f   :  { %v6598_v63 = vpop.eup %6597 }
0x1f30   :  { %v3151_v33 = vrot.slane %v6598_v63, %v9166_v47  ;;  %v3155_v9 = vrot.slane %v6598_v63, %v9173_v16 }
0x1f32   :  { %v3158_v15 = vmul.f32 %v6594_v19, %v3151_v33  ;;  %v3159_v39 = vmul.f32 %v6596_v20, %v3155_v9 }
0x1f34   :  { %3162 = vperm.xlu0 %6400, %v3158_v15  }
0x1f38   :  { %3167 = vperm.xlu0 %6400, %v3159_v39  }
0x1f4d   :  { %v3258_v46 = vpop.f32.mrb[56].mxu1  ;;  %v3299_v34 = vpop.f32.mrb[60].mxu0 }
0x1f4e   :  { %v3260_v27 = vpop.f32.mrb[57].mxu1  ;;  %v6144_v30 = vpop.f32.mrb[61].mxu0 }
0x1f4f   :  { %v3262_v5 = vpop.f32.mrb[58].mxu1  ;;  %v3302_v35 = vpop.f32.mrb[62].mxu0 }
0x1f50   :  { %v3263_v61 = vpop.f32.mrb[59].mxu1  ;;  %v6145_v12 = vpop.f32.mrb[63].mxu0 }
0x1fb3   :  { %v3163_v56 = vpop.permute.xlu0 %3162 }
0x1fb4   :  { %v3170_v8 = vmul.f32 %v3163_v56, %v9183_v60  ;;  %v3171_v28 = vmul.f32 %v3163_v56, %v9184_v50  ;;  %v3172_v19 = vmul.f32 %v3163_v56, %v9185_v21 }
0x1fb6   :  { %v3176_v24 = vrot.slane %v3170_v8, 4  ;;  %v3182_v23 = vrot.slane %v3171_v28, 4  ;;  %v3188_v26 = vrot.slane %v3172_v19, 4 }
0x1fb7   :  { %v3168_v20 = vpop.permute.xlu0 %3167 }
0x1fb8   :  { %v3177_v29 = vadd.f32 %v3176_v24, %v3170_v8  ;;  %v3183_v4 = vadd.f32 %v3182_v23, %v3171_v28  ;;  %v3189_v54 = vadd.f32 %v3188_v26, %v3172_v19  ;;  %v3173_v36 = vmul.f32 %v3168_v20, %v9186_v55 }
0x1fb9   :  { %v3174_v1 = vmul.f32 %v3168_v20, %v9187_v53  ;;  %v3175_v2 = vmul.f32 %v3168_v20, %v9188_v38 }
0x1fba   :  { %v3178_v0 = vrot.slane %v3177_v29, 2  ;;  %v3184_v6 = vrot.slane %v3183_v4, 2  ;;  %v3190_v51 = vrot.slane %v3189_v54, 2  ;;  %v3194_v31 = vrot.slane %v3173_v36, 4 }
0x1fbb   :  { %v3200_v63 = vrot.slane %v3174_v1, 4  ;;  %v3206_v33 = vrot.slane %v3175_v2, 4 }
0x1fbc   :  { %v3179_v15 = vadd.f32 %v3178_v0, %v3177_v29  ;;  %v3195_v9 = vadd.f32 %v3194_v31, %v3173_v36  ;;  %v3185_v39 = vadd.f32 %v3184_v6, %v3183_v4  ;;  %v3191_v30 = vadd.f32 %v3190_v51, %v3189_v54 }
0x1fbd   :  { %v3201_v5 = vadd.f32 %v3200_v63, %v3174_v1  ;;  %v3207_v35 = vadd.f32 %v3206_v33, %v3175_v2 }
0x1fbe   :  { %v3196_v61 = vrot.slane %v3195_v9, 2  ;;  %v3180_v8 = vrot.slane %v3179_v15, 1  ;;  %v3186_v19 = vrot.slane %v3185_v39, 1  ;;  %v3192_v24 = vrot.slane %v3191_v30, 1 }
0x1fbf   :  { %v3202_v12 = vrot.slane %v3201_v5, 2  ;;  %v3208_v56 = vrot.slane %v3207_v35, 2 }
0x1fc0   :  { %v3197_v28 = vadd.f32 %v3196_v61, %v3195_v9  ;;  %v3181_v38 = vadd.f32 %v3180_v8, %v3179_v15  ;;  %v3187_v29 = vadd.f32 %v3186_v19, %v3185_v39  ;;  %v3193_v36 = vadd.f32 %v3192_v24, %v3191_v30  ;;  %v8142_v19 = vld [vmem:[#allocation16 + $0x2c] ss:$16 sps:$4 sm:$0xff]   ;;  %v8148_v24 = vld [vmem:[#allocation11 + $0x1c] ss:$12 sps:$4 sm:$0xff]  }
0x1fc1   :  { %v3203_v23 = vadd.f32 %v3202_v12, %v3201_v5  ;;  %v3209_v26 = vadd.f32 %v3208_v56, %v3207_v35 }
0x1fc2   :  { %v3198_v20 = vrot.slane %v3197_v28, 1 }
0x1fc3   :  { %v3204_v40 = vrot.slane %v3203_v23, 1  ;;  %v3210_v49 = vrot.slane %v3209_v26, 1 }
0x1fc4   :  { %v3199_v53 = vadd.f32 %v3198_v20, %v3197_v28  ;;  %v8159_v20 = vld [vmem:[#allocation11 + $0x34] ss:$12 sps:$4 sm:$0xff]  }
0x1fc5   :  { %v3205_v4 = vadd.f32 %v3204_v40, %v3203_v23  ;;  %v3211_v54 = vadd.f32 %v3210_v49, %v3209_v26  ;;  %v8152_v23 = vld [vmem:[#allocation16 + $0x28] ss:$16 sps:$4 sm:$0xff]   ;;  %v8156_v26 = vld [vmem:[#allocation11 + $0x18] ss:$12 sps:$4 sm:$0xff]  }
0x1fc6   :  { %v3218_v1 = vsel %vm2013_vm12, %v3199_v53, %v3181_v38  ;;  %v3042_v38 = vadd.f32 %v8055_v22, %v7864_v43  ;;  %v8138_v22 = vld [vmem:[#allocation16 + $0x8] ss:$16 sps:$4 sm:$0xff]  }
0x1fc7   :  { %v3219_v2 = vsel %vm2013_vm12, %v3205_v4, %v3187_v29  ;;  %v3220_v0 = vsel %vm2013_vm12, %v3211_v54, %v3193_v36  ;;  %v6307_v6 = vadd.f32 %v7986_v13, %v3218_v1  ;;  %v8163_v29 = vld [vmem:[#allocation11 + $0x8] ss:$12 sps:$4 sm:$0xff]   ;;  %v8169_v36 = vld [vmem:[#allocation11 + $0x30] ss:$12 sps:$4 sm:$0xff]   ;;  %v8172_v4 = vld [vmem:[#allocation11 + $0x4c] ss:$12 sps:$4 sm:$0xff]  }
0x1fc8   :  { %v3300_v51 = vadd.f32 %v3299_v34, %v3220_v0  ;;  %v6310_v31 = vadd.f32 %v7990_v37, %v3219_v2  ;;  %v8175_v54 = vld [vmem:[#allocation11 + $0x20] ss:$12 sps:$4 sm:$0xff]   ;;  %v8179_v1 = vld [vmem:[#allocation11 + $0x48] ss:$12 sps:$4 sm:$0xff]   ;;  %v8182_v2 = vld [vmem:[#allocation11 + $0x64] ss:$12 sps:$4 sm:$0xff]  }
0x1fc9   :  { %v6308_v63 = vadd.f32 %v6307_v6, %v3258_v46  ;;  %v8185_v0 = vld [vmem:[#allocation11 + $0x38] ss:$12 sps:$4 sm:$0xff]   ;;  %v8189_v6 = vld [vmem:[#allocation11 + $0x60] ss:$12 sps:$4 sm:$0xff]  }
0x1fca   :  { %v6311_v33 = vadd.f32 %v6310_v31, %v3260_v27  ;;  %v3307_v5 = vadd.f32 %v3300_v51, %v7867_v52  ;;  %v8192_v51 = vld [vmem:[#allocation11 + $0x7c] ss:$12 sps:$4 sm:$0xff]  }
0x1fcb   :  { %v5793_v9 = vmul.f32 -1.442695, %v6308_v63  ;;  %v8195_v31 = vld [vmem:[#allocation11 + $0x50] ss:$12 sps:$4 sm:$0xff]   ;;  %v8199_v63 = vld [vmem:[#allocation11 + $0x78] ss:$12 sps:$4 sm:$0xff]  }
0x1fcc   :  { %v5794_v15 = vmul.f32 -1.442695, %v6311_v33  ;;  %v8202_v33 = vld [vmem:[#allocation11 + $0x94] ss:$12 sps:$4 sm:$0xff]  }
0x1fcd   :  { %6599 = vpow2.f32 %v5793_v9  ;;  %v8205_v9 = vld [vmem:[#allocation11 + $0x68] ss:$12 sps:$4 sm:$0xff]  }
0x1fce   :  { %6601 = vpow2.f32 %v5794_v15  ;;  %v8209_v15 = vld [vmem:[#allocation11 + $0x90] ss:$12 sps:$4 sm:$0xff]  }
0x1fd7   :  { %v6600_v39 = vpop.eup %6599 }
0x1fd8   :  { %v3312_v40 = vadd.f32 1.0, %v6600_v39  ;;  %v6602_v49 = vpop.eup %6601  ;;  %v8212_v39 = vld [vmem:[#allocation11 + $0xac] ss:$12 sps:$4 sm:$0xff]  }
0x1fd9   :  { %v3319_v53 = vadd.f32 1.0, %v6602_v49  ;;  %9189 = vst [vmem:[#allocation48_spill] sm:$0xff] %v8212_v39  ;;  %v8219_v49 = vld [vmem:[#allocation11 + $0xa8] ss:$12 sps:$4 sm:$0xff]  }
0x1fda   :  { %6603 = vrcp.f32 %v3312_v40  ;;  %v8215_v40 = vld [vmem:[#allocation11 + $0x80] ss:$12 sps:$4 sm:$0xff]   ;;  %9191 = vst [vmem:[#allocation44_spill] sm:$0xff] %v8219_v49 }
0x1fdb   :  { %6605 = vrcp.f32 %v3319_v53  ;;  %9190 = vst [vmem:[#allocation27_spill] sm:$0xff] %v8215_v40  ;;  %v8223_v53 = vld [vmem:[#allocation11 + $0x98] ss:$12 sps:$4 sm:$0xff]  }
0x1fdc   :  { %9192 = vst [vmem:[#allocation53_spill] sm:$0xff] %v8223_v53 }
0x1fe4   :  { %v6604_v30 = vpop.eup %6603 }
0x1fe5   :  { %v3322_v34 = vmul.f32 %v6604_v30, %v3042_v38  ;;  %v6606_v46 = vpop.eup %6605  ;;  %v8227_v38 = vld [vmem:[#allocation11 + $0xb0] ss:$12 sps:$4 sm:$0xff]  }
0x1fe6   :  { %v3325_v27 = vsub.f32 1.0, %v6606_v46  ;;  %v3327_v56 = vmul.f32 %v6606_v46, %v8001_v11  ;;  %v8145_v11 = vld [vmem:[#allocation11] ss:$12 sps:$4 sm:$0xff]   ;;  %9193 = vst [vmem:[#allocation49_spill] sm:$0xff] %v8227_v38 }
0x1fe7   :  { %v3323_v35 = vadd.f32 %v3322_v34, %v3307_v5 }
0x1fe9   :  { %6607 = vtanh.f32 %v3323_v35 }
0x1ff3   :  { %v6608_v61 = vpop.eup %6607 }
0x1ff4   :  { %v3326_v12 = vmul.f32 %v6608_v61, %v3325_v27 }
0x1ff6   :  { %v8132_v8 = vadd.f32 %v3327_v56, %v3326_v12 }
0x1ff8   :  { %v3329_v28 = vpack.c.bf16 %v8132_v8, %v8132_v8 }
0x1ffa   :  { %6151 = vmatmul.mubr.msk.bf16.vlgmr.msra.gmra.mrb[60].mxu1 %vm405_vm2, %v3329_v28  ;;  %5797 = vmatmul.mubr.msk.bf16.vlgmr.msra.gmra.mrb[64].mxu0 %vm405_vm2, %v3329_v28 }
0x1ffb   :  { %3448 = vmatpush1.bf16.msra.mxu1 %v8138_v22  ;;  %3479 = vmatprep.mubr.bf16.mxu1 %v9126_v45 }
0x1ffc   :  { %3449 = vmatprep.subr.bf16.mxu1 %v8142_v19  ;;  %3665 = vmatpush1.bf16.msra.mxu0 %v8145_v11 }
0x1ffd   :  { %3666 = vmatprep.subr.bf16.mxu0 %v8148_v24  ;;  %3696 = vmatprep.mubr.bf16.mxu0 %v9126_v45 }
0x1fff   :  { %3450 = vmatpush1.bf16.msra.mxu1 %v8152_v23 }
0x2000   :  { %6154 = vmatprep.subr.bf16.mxu1 %v9129_v57  ;;  %3667 = vmatpush1.bf16.msra.mxu0 %v8156_v26 }
0x2001   :  { %3668 = vmatprep.subr.bf16.mxu0 %v8159_v20 }
0x2002   :  { %5798 = vmatmul.mubr.msk.bf16.vlgmr.msra.gmra.mrb[64].mxu1 %vm405_vm2, %v3329_v28 }
0x2003   :  { %6155 = vmatpush3.bf16.msra.mxu1 %v8163_v29  ;;  %6170 = vmatprep.mubr.msk.bf16.mxu1 %vm7064_vm0, %v9129_v57 }
0x2004   :  { %6156 = vmatprep.subr.bf16.mxu1 %v9129_v57  ;;  %3669 = vmatpush1.bf16.msra.mxu0 %v8169_v36 }
0x2005   :  { %3670 = vmatprep.subr.bf16.mxu0 %v8172_v4 }
0x2007   :  { %6157 = vmatpush3.bf16.msra.mxu1 %v8175_v54 }
0x2008   :  { %6158 = vmatprep.subr.bf16.mxu1 %v9129_v57  ;;  %3671 = vmatpush1.bf16.msra.mxu0 %v8179_v1 }
0x2009   :  { %3672 = vmatprep.subr.bf16.mxu0 %v8182_v2 }
0x200b   :  { %6159 = vmatpush3.bf16.msra.mxu1 %v8185_v0 }
0x200c   :  { %6160 = vmatprep.subr.bf16.mxu1 %v9129_v57  ;;  %3673 = vmatpush1.bf16.msra.mxu0 %v8189_v6 }
0x200d   :  { %3674 = vmatprep.subr.bf16.mxu0 %v8192_v51 }
0x200f   :  { %6161 = vmatpush3.bf16.msra.mxu1 %v8195_v31 }
0x2010   :  { %6162 = vmatprep.subr.bf16.mxu1 %v9129_v57  ;;  %3675 = vmatpush1.bf16.msra.mxu0 %v8199_v63 }
0x2011   :  { %3676 = vmatprep.subr.bf16.mxu0 %v8202_v33 }
0x2013   :  { %6163 = vmatpush3.bf16.msra.mxu1 %v8205_v9 }
0x2014   :  { %6164 = vmatprep.subr.bf16.mxu1 %v9129_v57  ;;  %3677 = vmatpush1.bf16.msra.mxu0 %v8209_v15 }
0x2015   :  { %3678 = vmatprep.subr.bf16.mxu0 %v8212_v39 }
0x2017   :  { %6165 = vmatpush3.bf16.msra.mxu1 %v8215_v40 }
0x2018   :  { %6166 = vmatprep.subr.bf16.mxu1 %v9129_v57  ;;  %3679 = vmatpush1.bf16.msra.mxu0 %v8219_v49 }
0x2019   :  { %6174 = vmatprep.subr.bf16.mxu0 %v9129_v57 }
0x201b   :  { %6167 = vmatpush3.bf16.msra.mxu1 %v8223_v53 }
0x201c   :  { %6168 = vmatprep.subr.bf16.mxu1 %v9129_v57 }
0x201f   :  { %6169 = vmatpush3.bf16.msra.mxu1 %v8227_v38 }
0x2020   :  { %3846 = vmatprep.subr.bf16.mxu1 %v8047_v14 }
0x20cd   :  { %v3367_v30 = vpop.f32.mrb[60].mxu1 }
0x20ce   :  { %v8232_v5 = vadd.f32 %v9162_v17, %v3367_v30  ;;  %v6152_v34 = vpop.f32.mrb[61].mxu1 }
0x20cf   :  { %v3370_v35 = vpop.f32.mrb[62].mxu1 }
0x20d0   :  { %9194 = vst [vmem:[#allocation50_spill] sm:$0xff] %v8232_v5  ;;  %v6153_v46 = vpop.f32.mrb[63].mxu1  ;;  %v3373_v27 = vsel %vm1573_vm4, %v8232_v5, -inf }
0x20d1   :  { %3374 = vmax.xlane.f32.xlu0 %v3373_v27 }
0x20d5   :  { %v8236_v61 = vpop.f32.mrb[64].mxu1 }
0x20d6   :  { %v3483_v12 = vpop.f32.mrb[65].mxu1 }
0x20d7   :  { %v3484_v56 = vadd.f32 %v3483_v12, %v9164_v25  ;;  %v3485_v28 = vpop.f32.mrb[66].mxu1 }
0x20d8   :  { %v3486_v38 = vpop.f32.mrb[67].mxu1  ;;  %v8246_v28 = vld [vmem:[#allocation10] ss:$0 sm:$0xff] }
0x20d9   :  { %v3495_v14 = vrot.slane %v3484_v56, %v9165_v59  ;;  %9195 = vst [vmem:[#allocation54_spill] sm:$0xff] %v8246_v28 }
0x20db   :  { %v3496_v53 = vcombine.high %v3495_v14, %v3495_v14  ;;  %v3503_v17 = vrot.slane %v3495_v14, %v9165_v59 }
0x20dd   :  { %v3510_v30 = vrot.slane %v3496_v53, %v9165_v59  ;;  %v3514_v34 = vrot.slane %v3503_v17, %v9166_v47 }
0x20df   :  { %v3518_v35 = vrot.slane %v3510_v30, %v9166_v47  ;;  %v3521_v46 = vadd.f32 %v3514_v34, %v9167_v62 }
0x20e1   :  { %v3522_v27 = vadd.f32 %v3518_v35, %v9168_v10  ;;  %6609 = vtanh.f32 %v3521_v46 }
0x20e3   :  { %6611 = vtanh.f32 %v3522_v27 }
0x20eb   :  { %v6610_v12 = vpop.eup %6609 }
0x20ec   :  { %v3525_v38 = vmul.f32 %v8246_v28, %v6610_v12 }
0x20ed   :  { %v6612_v56 = vpop.eup %6611 }
0x20ee   :  { %v3527_v14 = vsel %vm405_vm2, %v3525_v38, 0.0  ;;  %v3526_v53 = vmul.f32 %v8246_v28, %v6612_v56 }
0x20ef   :  { %3528 = vadd.xlane.f32.xlu1 %v3527_v14 }
0x20f0   :  { %v3530_v17 = vsel %vm405_vm2, %v3526_v53, 0.0 }
0x20f3   :  { %3531 = vadd.xlane.f32.xlu1 %v3530_v17 }
0x215e   :  { %v8252_v30 = vpop.xlane.xlu0 %3374 }
0x215f   :  { %9196 = vst [vmem:[#allocation55_spill] sm:$0xff] %v8252_v30  ;;  %vm3385_vm3 = vcmp.eq.f32.partialorder %v8232_v5, %v8252_v30 }
0x2160   :  { %v3386_v34 = vsel %vm3385_vm3, %v9171_v41, 128 }
0x2161   :  { %v3387_v35 = vsel %vm1573_vm4, %v3386_v34, 2147483647 }
0x2162   :  { %v3389_v46 = vshra.s32 %v3387_v35, 16  ;;  %v3388_v28 = vand.u32 65535, %v3387_v35 }
0x2164   :  { %v3391_v27 = vcvt.s32.f32 %v3389_v46  ;;  %v3390_v30 = vcvt.s32.f32 %v3388_v28 }
0x2166   :  { %3392 = vmin.xlane.f32.xlu0 %v3391_v27 }
0x217c   :  { %v3529_v12 = vpop.xlane.xlu1 %3528 }
0x217d   :  { %v3538_v56 = vrot.slane %v3529_v12, %v9172_v58 }
0x2180   :  { %v3532_v38 = vpop.xlane.xlu1 %3531 }
0x2181   :  { %v3542_v14 = vrot.slane %v3532_v38, %v9172_v58 }
0x2183   :  { %v3543_v53 = vsel %vm2013_vm12, %v3542_v14, %v3538_v56 }
0x2184   :  { %v3545_v17 = vsel %vm2016_vm13, %v3543_v53, -inf }
0x2185   :  { %3546 = vmax.xlane.f32.xlu1 %v3545_v17 }
0x21f3   :  { %v3393_v5 = vpop.xlane.xlu0 %3392 }
0x21f4   :  { %vm3394_vm10 = vcmp.eq.f32.partialorder %v3391_v27, %v3393_v5  ;;  %v3399_v35 = vcvt.f32.s32 %v3393_v5 }
0x21f5   :  { %v3395_v10 = vsel %vm3394_vm10, %v3390_v30, inf }
0x21f6   :  { %3396 = vmin.xlane.f32.xlu0 %v3395_v10  ;;  %v3400_v27 = vshll.u32 %v3399_v35, 16 }
0x2212   :  { %v3547_v34 = vpop.xlane.xlu1 %3546 }
0x2213   :  { %v3552_v46 = vrot.slane %v3547_v34, %v9166_v47  ;;  %v3556_v62 = vrot.slane %v3547_v34, %v9173_v16 }
0x2215   :  { %v3559_v59 = vsub.f32 %v3529_v12, %v3552_v46  ;;  %v3560_v25 = vsub.f32 %v3532_v38, %v3556_v62  ;;  %v8287_v62 = vld [vmem:[%s8957_s12 + $0x8] sm:$0xff]  }
0x2216   :  { %9199 = vst [vmem:[#allocation58_spill] sm:$0xff] %v8287_v62 }
0x2217   :  { %v3561_v49 = vmul.f32 1.442695, %v3559_v59  ;;  %v3563_v40 = vmul.f32 1.442695, %v3560_v25  ;;  %v8275_v25 = vld [vmem:[%s8957_s12] sm:$0xff]  }
0x2218   :  { %9198 = vst [vmem:[#allocation57_spill] sm:$0xff] %v8275_v25 }
0x2219   :  { %6613 = vpow2.f32 %v3561_v49 }
0x221a   :  { %6615 = vpow2.f32 %v3563_v40 }
0x2223   :  { %v6614_v56 = vpop.eup %6613 }
0x2224   :  { %v6616_v14 = vpop.eup %6615  ;;  %3568 = vperm.xlu1 %6399, %v6614_v56  }
0x2225   :  { %3571 = vperm.xlu0 %6400, %v6616_v14  }
0x2283   :  { %v3397_v28 = vpop.xlane.xlu0 %3396 }
0x2284   :  { %v3398_v30 = vcvt.f32.s32 %v3397_v28 }
0x2286   :  { %v3401_v10 = vadd.s32 %v3400_v27, %v3398_v30 }
0x2288   :  { %vm3402_vm11 = vcmp.eq.s32.totalorder %v9171_v41, %v3401_v10  ;;  %v5621_v53 = vrot.slane %v3401_v10, %v9172_v58 }
0x2289   :  { %vm5799_vm14 = vmpackc.low %vm3402_vm11, %vm3402_vm11 }
0x228a   :  { %v8268_v59 = vsel %vm1573_vm4, %v8086_v3, %v5621_v53  ;;  %5800 = vmatmul.mubr.msk.bf16.vlgmr.msra.gmra.mrb[64].mxu0 %vm5799_vm14, %v9175_v48  ;;  %6171 = vmatmul.mubr.msk.bf16.vlgmr.msra.gmra.mrb[68].mxu1 %vm5799_vm14, %v9175_v48 }
0x228b   :  { %9197 = vst [vmem:[#allocation56_spill] sm:$0xff] %v8268_v59  ;;  %6175 = vmatpush3.bf16.msra.mxu0 %v8275_v25  ;;  %3847 = vmatpush1.bf16.msra.mxu1 %v8091_v32 }
0x228c   :  { %6176 = vmatprep.subr.bf16.mxu0 %v9129_v57  ;;  %3848 = vmatprep.subr.bf16.mxu1 %v8095_v18 }
0x228d   :  { %6178 = vmatprep.mubr.msk.bf16.mxu0 %vm7064_vm0, %v9129_v57  ;;  %3878 = vmatprep.mubr.bf16.mxu1 %v9126_v45 }
0x228f   :  { %6177 = vmatpush3.bf16.msra.mxu0 %v8287_v62  ;;  %3849 = vmatpush1.bf16.msra.mxu1 %v8102_v7 }
0x2290   :  { %3887 = vmatprep.subr.bf16.mxu0 %v8105_v44  ;;  %4104 = vmatprep.subr.bf16.mxu1 %v8108_v42 }
0x22a3   :  { %v3569_v3 = vpop.permute.xlu1 %3568 }
0x22a4   :  { %v3572_v40 = vpop.permute.xlu0 %3571  ;;  %v3576_v49 = vrot.slane %v3569_v3, %v9172_v58 }
0x22a5   :  { %v3580_v5 = vrot.slane %v3572_v40, %v9172_v58 }
0x22a7   :  { %v3581_v12 = vsel %vm2013_vm12, %v3580_v5, %v3576_v49 }
0x22a8   :  { %v3583_v38 = vsel %vm2016_vm13, %v3581_v12, 0.0 }
0x22a9   :  { %3584 = vadd.xlane.f32.xlu1 %v3583_v38 }
0x2336   :  { %v3585_v17 = vpop.xlane.xlu1 %3584 }
0x2337   :  { %6617 = vrcp.f32 %v3585_v17 }
0x2341   :  { %v6618_v34 = vpop.eup %6617 }
0x2342   :  { %v3591_v46 = vrot.slane %v6618_v34, %v9166_v47  ;;  %v3595_v28 = vrot.slane %v6618_v34, %v9173_v16 }
0x2344   :  { %v3598_v35 = vmul.f32 %v6614_v56, %v3591_v46  ;;  %v3599_v27 = vmul.f32 %v6616_v14, %v3595_v28 }
0x2346   :  { %3602 = vperm.xlu0 %6400, %v3598_v35  }
0x234a   :  { %3607 = vperm.xlu0 %6400, %v3599_v27  }
0x235d   :  { %v3698_v30 = vpop.f32.mrb[64].mxu0  ;;  %v3739_v10 = vpop.f32.mrb[68].mxu1 }
0x235e   :  { %v3700_v53 = vpop.f32.mrb[65].mxu0  ;;  %v6172_v3 = vpop.f32.mrb[69].mxu1 }
0x235f   :  { %v3702_v40 = vpop.f32.mrb[66].mxu0  ;;  %v3742_v49 = vpop.f32.mrb[70].mxu1 }
0x2360   :  { %v3703_v5 = vpop.f32.mrb[67].mxu0  ;;  %v6173_v12 = vpop.f32.mrb[71].mxu1  ;;  %v9200_v40 = vld [vmem:[#allocation40_spill] sm:$0xff] }
0x2361   :  { %v9201_v5 = vld [vmem:[#allocation42_spill] sm:$0xff] }
0x23c5   :  { %v3603_v38 = vpop.permute.xlu0 %3602 }
0x23c6   :  { %v3610_v17 = vmul.f32 %v3603_v38, %v9183_v60  ;;  %v3611_v42 = vmul.f32 %v3603_v38, %v9184_v50  ;;  %v3612_v56 = vmul.f32 %v3603_v38, %v9185_v21 }
0x23c8   :  { %v3616_v46 = vrot.slane %v3610_v17, 4  ;;  %v3622_v34 = vrot.slane %v3611_v42, 4  ;;  %v3628_v35 = vrot.slane %v3612_v56, 4 }
0x23c9   :  { %v3608_v14 = vpop.permute.xlu0 %3607 }
0x23ca   :  { %v3617_v28 = vadd.f32 %v3616_v46, %v3610_v17  ;;  %v3623_v27 = vadd.f32 %v3622_v34, %v3611_v42  ;;  %v3629_v44 = vadd.f32 %v3628_v35, %v3612_v56  ;;  %v3613_v3 = vmul.f32 %v3608_v14, %v9186_v55 }
0x23cb   :  { %v3614_v49 = vmul.f32 %v3608_v14, %v9200_v40  ;;  %v3615_v12 = vmul.f32 %v3608_v14, %v9201_v5 }
0x23cc   :  { %v3618_v7 = vrot.slane %v3617_v28, 2  ;;  %v3624_v62 = vrot.slane %v3623_v27, 2  ;;  %v3630_v60 = vrot.slane %v3629_v44, 2  ;;  %v3634_v18 = vrot.slane %v3613_v3, 4 }
0x23cd   :  { %v3640_v50 = vrot.slane %v3614_v49, 4  ;;  %v3646_v32 = vrot.slane %v3615_v12, 4 }
0x23ce   :  { %v3619_v38 = vadd.f32 %v3618_v7, %v3617_v28  ;;  %v3635_v21 = vadd.f32 %v3634_v18, %v3613_v3  ;;  %v3625_v25 = vadd.f32 %v3624_v62, %v3623_v27  ;;  %v3631_v48 = vadd.f32 %v3630_v60, %v3629_v44 }
0x23cf   :  { %v3641_v59 = vadd.f32 %v3640_v50, %v3614_v49  ;;  %v3647_v17 = vadd.f32 %v3646_v32, %v3615_v12 }
0x23d0   :  { %v3636_v42 = vrot.slane %v3635_v21, 2  ;;  %v3620_v34 = vrot.slane %v3619_v38, 1  ;;  %v3626_v40 = vrot.slane %v3625_v25, 1  ;;  %v3632_v55 = vrot.slane %v3631_v48, 1 }
0x23d1   :  { %v3642_v56 = vrot.slane %v3641_v59, 2  ;;  %v3648_v46 = vrot.slane %v3647_v17, 2 }
0x23d2   :  { %v3637_v35 = vadd.f32 %v3636_v42, %v3635_v21  ;;  %v3621_v47 = vadd.f32 %v3620_v34, %v3619_v38  ;;  %v3627_v7 = vadd.f32 %v3626_v40, %v3625_v25  ;;  %v3633_v18 = vadd.f32 %v3632_v55, %v3631_v48  ;;  %v9206_v34 = vld [vmem:[#allocation49_spill] sm:$0xff] }
0x23d3   :  { %v3643_v14 = vadd.f32 %v3642_v56, %v3641_v59  ;;  %v3649_v5 = vadd.f32 %v3648_v46, %v3647_v17  ;;  %v3482_v55 = vadd.f32 %v8236_v61, %v7864_v43  ;;  %v9203_v61 = vld [vmem:[#allocation27_spill] sm:$0xff]  ;;  %v9204_v56 = vld [vmem:[#allocation44_spill] sm:$0xff]  ;;  %v9205_v46 = vld [vmem:[#allocation53_spill] sm:$0xff] }
0x23d4   :  { %v3638_v16 = vrot.slane %v3637_v35, 1 }
0x23d5   :  { %v3644_v58 = vrot.slane %v3643_v14, 1  ;;  %v3650_v41 = vrot.slane %v3649_v5, 1 }
0x23d6   :  { %v3639_v39 = vadd.f32 %v3638_v16, %v3637_v35  ;;  %v9207_v35 = vld [vmem:[#allocation28_spill] sm:$0xff] }
0x23d7   :  { %v3645_v62 = vadd.f32 %v3644_v58, %v3643_v14  ;;  %v3651_v44 = vadd.f32 %v3650_v41, %v3649_v5 }
0x23d8   :  { %v3658_v32 = vsel %vm2013_vm12, %v3639_v39, %v3621_v47 }
0x23d9   :  { %v3659_v60 = vsel %vm2013_vm12, %v3645_v62, %v3627_v7  ;;  %v3660_v50 = vsel %vm2013_vm12, %v3651_v44, %v3633_v18  ;;  %v6313_v21 = vadd.f32 %v7986_v13, %v3658_v32  ;;  %v8364_v7 = vld [vmem:[%s8958_s13] ss:$0 sm:$0xff] }
0x23da   :  { %v3740_v28 = vadd.f32 %v3739_v10, %v3660_v50  ;;  %v6316_v59 = vadd.f32 %v7990_v37, %v3659_v60  ;;  %9208 = vst [vmem:[#allocation28_spill] sm:$0xff] %v8364_v7 }
0x23db   :  { %v6314_v27 = vadd.f32 %v6313_v21, %v3698_v30 }
0x23dc   :  { %v6317_v3 = vadd.f32 %v6316_v59, %v3700_v53  ;;  %v3747_v25 = vadd.f32 %v3740_v28, %v7867_v52  ;;  %v9210_v28 = vld [vmem:[#allocation43_spill] sm:$0xff] }
0x23dd   :  { %v5803_v49 = vmul.f32 -1.442695, %v6314_v27 }
0x23de   :  { %v5804_v16 = vmul.f32 -1.442695, %v6317_v3 }
0x23df   :  { %6619 = vpow2.f32 %v5803_v49  ;;  %v9211_v49 = vld [vmem:[#allocation26_spill] sm:$0xff] }
0x23e0   :  { %6621 = vpow2.f32 %v5804_v16 }
0x23e9   :  { %v6620_v48 = vpop.eup %6619 }
0x23ea   :  { %v3752_v58 = vadd.f32 1.0, %v6620_v48  ;;  %v6622_v41 = vpop.eup %6621 }
0x23eb   :  { %v3759_v47 = vadd.f32 1.0, %v6622_v41 }
0x23ec   :  { %6623 = vrcp.f32 %v3752_v58 }
0x23ed   :  { %6625 = vrcp.f32 %v3759_v47  ;;  %v9212_v47 = vld [vmem:[#allocation24_spill] sm:$0xff] }
0x23f6   :  { %v6624_v39 = vpop.eup %6623 }
0x23f7   :  { %v3762_v10 = vmul.f32 %v6624_v39, %v3482_v55  ;;  %v6626_v30 = vpop.eup %6625 }
0x23f8   :  { %v3765_v53 = vsub.f32 1.0, %v6626_v30  ;;  %v3767_v38 = vmul.f32 %v6626_v30, %v8132_v8  ;;  %v9202_v8 = vld [vmem:[#allocation48_spill] sm:$0xff] }
0x23f9   :  { %v3763_v40 = vadd.f32 %v3762_v10, %v3747_v25  ;;  %v9213_v25 = vld [vmem:[#allocation35_spill] sm:$0xff] }
0x23fb   :  { %6627 = vtanh.f32 %v3763_v40  ;;  %v9214_v40 = vld [vmem:[#allocation38_spill] sm:$0xff] }
0x2405   :  { %v6628_v5 = vpop.eup %6627 }
0x2406   :  { %v3766_v12 = vmul.f32 %v6628_v5, %v3765_v53  ;;  %v9215_v5 = vld [vmem:[#allocation54_spill] sm:$0xff] }
0x2408   :  { %v8314_v17 = vadd.f32 %v3767_v38, %v3766_v12 }
0x240a   :  { %v3769_v42 = vpack.c.bf16 %v8314_v17, %v8314_v17 }
0x240c   :  { %6179 = vmatmul.mubr.msk.bf16.vlgmr.msra.gmra.mrb[68].mxu0 %vm405_vm2, %v3769_v42  ;;  %5807 = vmatmul.mubr.msk.bf16.vlgmr.msra.gmra.mrb[72].mxu1 %vm405_vm2, %v3769_v42 }
0x240d   :  { %3888 = vmatpush1.bf16.msra.mxu0 %v8138_v22  ;;  %3919 = vmatprep.mubr.bf16.mxu0 %v9126_v45 }
0x240e   :  { %3889 = vmatprep.subr.bf16.mxu0 %v8142_v19  ;;  %4105 = vmatpush1.bf16.msra.mxu1 %v8145_v11 }
0x240f   :  { %4106 = vmatprep.subr.bf16.mxu1 %v8148_v24  ;;  %4136 = vmatprep.mubr.bf16.mxu1 %v9126_v45 }
0x2411   :  { %3890 = vmatpush1.bf16.msra.mxu0 %v8152_v23 }
0x2412   :  { %6182 = vmatprep.subr.bf16.mxu0 %v9129_v57  ;;  %4107 = vmatpush1.bf16.msra.mxu1 %v8156_v26 }
0x2413   :  { %4108 = vmatprep.subr.bf16.mxu1 %v8159_v20 }
0x2414   :  { %5808 = vmatmul.mubr.msk.bf16.vlgmr.msra.gmra.mrb[72].mxu0 %vm405_vm2, %v3769_v42 }
0x2415   :  { %6183 = vmatpush3.bf16.msra.mxu0 %v8163_v29  ;;  %6198 = vmatprep.mubr.msk.bf16.mxu0 %vm7064_vm0, %v9129_v57 }
0x2416   :  { %6184 = vmatprep.subr.bf16.mxu0 %v9129_v57  ;;  %4109 = vmatpush1.bf16.msra.mxu1 %v8169_v36 }
0x2417   :  { %4110 = vmatprep.subr.bf16.mxu1 %v8172_v4 }
0x2419   :  { %6185 = vmatpush3.bf16.msra.mxu0 %v8175_v54 }
0x241a   :  { %6186 = vmatprep.subr.bf16.mxu0 %v9129_v57  ;;  %4111 = vmatpush1.bf16.msra.mxu1 %v8179_v1 }
0x241b   :  { %4112 = vmatprep.subr.bf16.mxu1 %v8182_v2 }
0x241d   :  { %6187 = vmatpush3.bf16.msra.mxu0 %v8185_v0 }
0x241e   :  { %6188 = vmatprep.subr.bf16.mxu0 %v9129_v57  ;;  %4113 = vmatpush1.bf16.msra.mxu1 %v8189_v6 }
0x241f   :  { %4114 = vmatprep.subr.bf16.mxu1 %v8192_v51 }
0x2421   :  { %6189 = vmatpush3.bf16.msra.mxu0 %v8195_v31 }
0x2422   :  { %6190 = vmatprep.subr.bf16.mxu0 %v9129_v57  ;;  %4115 = vmatpush1.bf16.msra.mxu1 %v8199_v63 }
0x2423   :  { %4116 = vmatprep.subr.bf16.mxu1 %v8202_v33 }
0x2425   :  { %6191 = vmatpush3.bf16.msra.mxu0 %v8205_v9 }
0x2426   :  { %6192 = vmatprep.subr.bf16.mxu0 %v9129_v57  ;;  %4117 = vmatpush1.bf16.msra.mxu1 %v8209_v15 }
0x2427   :  { %4118 = vmatprep.subr.bf16.mxu1 %v9202_v8 }
0x2429   :  { %6193 = vmatpush3.bf16.msra.mxu0 %v9203_v61 }
0x242a   :  { %6194 = vmatprep.subr.bf16.mxu0 %v9129_v57  ;;  %4119 = vmatpush1.bf16.msra.mxu1 %v9204_v56 }
0x242b   :  { %6202 = vmatprep.subr.bf16.mxu1 %v9129_v57 }
0x242d   :  { %6195 = vmatpush3.bf16.msra.mxu0 %v9205_v46 }
0x242e   :  { %6196 = vmatprep.subr.bf16.mxu0 %v9129_v57 }
0x2431   :  { %6197 = vmatpush3.bf16.msra.mxu0 %v9206_v34 }
0x2432   :  { %4286 = vmatprep.subr.bf16.mxu0 %v9207_v35 }
0x24df   :  { %v3807_v14 = vpop.f32.mrb[68].mxu0 }
0x24e0   :  { %v8367_v18 = vadd.f32 %v8364_v7, %v3807_v14  ;;  %v6180_v62 = vpop.f32.mrb[69].mxu0 }
0x24e1   :  { %v3810_v44 = vpop.f32.mrb[70].mxu0 }
0x24e2   :  { %9209 = vst [vmem:[#allocation59_spill] sm:$0xff] %v8367_v18  ;;  %v6181_v32 = vpop.f32.mrb[71].mxu0  ;;  %v3813_v60 = vsel %vm1573_vm4, %v8367_v18, -inf  ;;  %v9217_v44 = vld [vmem:[#allocation33_spill] sm:$0xff] }
0x24e3   :  { %3814 = vmax.xlane.f32.xlu0 %v3813_v60 }
0x24e7   :  { %v8371_v50 = vpop.f32.mrb[72].mxu0 }
0x24e8   :  { %v3923_v21 = vpop.f32.mrb[73].mxu0 }
0x24e9   :  { %v3924_v59 = vadd.f32 %v3923_v21, %v9210_v28  ;;  %v3925_v27 = vpop.f32.mrb[74].mxu0 }
0x24ea   :  { %v3926_v3 = vpop.f32.mrb[75].mxu0 }
0x24eb   :  { %v3935_v16 = vrot.slane %v3924_v59, %v9211_v49 }
0x24ed   :  { %v3936_v48 = vcombine.high %v3935_v16, %v3935_v16  ;;  %v3943_v58 = vrot.slane %v3935_v16, %v9211_v49  ;;  %v9218_v16 = vld [vmem:[#allocation45_spill] sm:$0xff] }
0x24ef   :  { %v3950_v41 = vrot.slane %v3936_v48, %v9211_v49  ;;  %v3954_v55 = vrot.slane %v3943_v58, %v9212_v47 }
0x24f1   :  { %v3958_v39 = vrot.slane %v3950_v41, %v9212_v47  ;;  %v3961_v10 = vadd.f32 %v3954_v55, %v9213_v25 }
0x24f3   :  { %v3962_v30 = vadd.f32 %v3958_v39, %v9214_v40  ;;  %6629 = vtanh.f32 %v3961_v10 }
0x24f5   :  { %6631 = vtanh.f32 %v3962_v30 }
0x24fd   :  { %v6630_v53 = vpop.eup %6629 }
0x24fe   :  { %v3965_v12 = vmul.f32 %v9215_v5, %v6630_v53 }
0x24ff   :  { %v6632_v38 = vpop.eup %6631 }
0x2500   :  { %v3967_v42 = vsel %vm405_vm2, %v3965_v12, 0.0  ;;  %v3966_v35 = vmul.f32 %v9215_v5, %v6632_v38 }
0x2501   :  { %3968 = vadd.xlane.f32.xlu1 %v3967_v42  ;;  %v9219_v42 = vld [vmem:[#allocation25_spill] sm:$0xff] }
0x2502   :  { %v3970_v14 = vsel %vm405_vm2, %v3966_v35, 0.0 }
0x2505   :  { %3971 = vadd.xlane.f32.xlu1 %v3970_v14 }
0x2570   :  { %v8385_v62 = vpop.xlane.xlu0 %3814 }
0x2571   :  { %9216 = vst [vmem:[#allocation60_spill] sm:$0xff] %v8385_v62  ;;  %vm3825_vm15 = vcmp.eq.f32.partialorder %v8367_v18, %v8385_v62 }
0x2572   :  { %v3826_v32 = vsel %vm3825_vm15, %v9217_v44, 128 }
0x2573   :  { %v3827_v60 = vsel %vm1573_vm4, %v3826_v32, 2147483647 }
0x2574   :  { %v3829_v21 = vshra.s32 %v3827_v60, 16  ;;  %v3828_v39 = vand.u32 65535, %v3827_v60 }
0x2576   :  { %v3831_v59 = vcvt.s32.f32 %v3829_v21  ;;  %v3830_v30 = vcvt.s32.f32 %v3828_v39 }
0x2578   :  { %3832 = vmin.xlane.f32.xlu1 %v3831_v59 }
0x258e   :  { %v3969_v27 = vpop.xlane.xlu1 %3968 }
0x258f   :  { %v3978_v48 = vrot.slane %v3969_v27, %v9218_v16 }
0x2592   :  { %v3972_v3 = vpop.xlane.xlu1 %3971 }
0x2593   :  { %v3982_v58 = vrot.slane %v3972_v3, %v9218_v16 }
0x2595   :  { %v3983_v41 = vsel %vm2013_vm12, %v3982_v58, %v3978_v48 }
0x2596   :  { %v3985_v55 = vsel %vm2016_vm13, %v3983_v41, -inf }
0x2597   :  { %3986 = vmax.xlane.f32.xlu0 %v3985_v55 }
0x2605   :  { %v3833_v10 = vpop.xlane.xlu1 %3832 }
0x2606   :  { %vm3834_vm1 = vcmp.eq.f32.partialorder %v3831_v59, %v3833_v10  ;;  %v3839_v60 = vcvt.f32.s32 %v3833_v10  ;;  %v9224_v10 = vld [vmem:[#allocation31_spill] sm:$0xff] }
0x2607   :  { %v3835_v53 = vsel %vm3834_vm1, %v3830_v30, inf }
0x2608   :  { %3836 = vmin.xlane.f32.xlu1 %v3835_v53  ;;  %v3840_v59 = vshll.u32 %v3839_v60, 16  ;;  %v9222_v53 = vmov 1.0|1.0  }
0x2624   :  { %v3987_v12 = vpop.xlane.xlu0 %3986 }
0x2625   :  { %v3992_v38 = vrot.slane %v3987_v12, %v9212_v47  ;;  %v3996_v35 = vrot.slane %v3987_v12, %v9219_v42  ;;  %v9225_v12 = vld [vmem:[#allocation32_spill] sm:$0xff] }
0x2627   :  { %v3999_v14 = vsub.f32 %v3969_v27, %v3992_v38  ;;  %v4000_v32 = vsub.f32 %v3972_v3, %v3996_v35  ;;  %v9220_v27 = vld [vmem:[#allocation56_spill] sm:$0xff]  ;;  %v9226_v38 = vld [vmem:[#allocation58_spill] sm:$0xff] }
0x2628   :  { %v9227_v35 = vld [vmem:[#allocation46_spill] sm:$0xff] }
0x2629   :  { %v4001_v21 = vmul.f32 1.442695, %v3999_v14  ;;  %v4003_v18 = vmul.f32 1.442695, %v4000_v32  ;;  %v9228_v14 = vld [vmem:[#allocation34_spill] sm:$0xff]  ;;  %v9229_v32 = vld [vmem:[#allocation47_spill] sm:$0xff] }
0x262b   :  { %6633 = vpow2.f32 %v4001_v21 }
0x262c   :  { %6635 = vpow2.f32 %v4003_v18  ;;  %v9223_v18 = vld [vmem:[#allocation57_spill] sm:$0xff] }
0x2635   :  { %v6634_v48 = vpop.eup %6633 }
0x2636   :  { %v6636_v58 = vpop.eup %6635  ;;  %4008 = vperm.xlu0 %6400, %v6634_v48  }
0x2637   :  { %4011 = vperm.xlu1 %6399, %v6636_v58  }
0x2695   :  { %v3837_v41 = vpop.xlane.xlu1 %3836 }
0x2696   :  { %v3838_v55 = vcvt.f32.s32 %v3837_v41 }
0x2698   :  { %v3841_v39 = vadd.s32 %v3840_v59, %v3838_v55 }
0x269a   :  { %vm3842_vm3 = vcmp.eq.s32.totalorder %v9217_v44, %v3841_v39  ;;  %v5625_v30 = vrot.slane %v3841_v39, %v9218_v16  ;;  %v9233_v44 = vld [vmem:[#allocation39_spill] sm:$0xff] }
0x269b   :  { %vm5809_vm10 = vmpackc.low %vm3842_vm3, %vm3842_vm3 }
0x269c   :  { %v8401_v3 = vsel %vm1576_vm5, %v9220_v27, %v5625_v30  ;;  %5810 = vmatmul.mubr.msk.bf16.vlgmr.msra.gmra.mrb[72].mxu1 %vm5809_vm10, %v9222_v53  ;;  %6199 = vmatmul.mubr.msk.bf16.vlgmr.msra.gmra.mrb[76].mxu0 %vm5809_vm10, %v9222_v53  ;;  %v9231_v53 = vld [vmem:[#allocation37_spill] sm:$0xff] }
0x269d   :  { %9221 = vst [vmem:[#allocation56_spill] sm:$0xff] %v8401_v3  ;;  %6203 = vmatpush3.bf16.msra.mxu1 %v9223_v18  ;;  %4287 = vmatpush1.bf16.msra.mxu0 %v9224_v10  ;;  %v9230_v18 = vld [vmem:[#allocation36_spill] sm:$0xff] }
0x269e   :  { %6204 = vmatprep.subr.bf16.mxu1 %v9129_v57  ;;  %4288 = vmatprep.subr.bf16.mxu0 %v9225_v12 }
0x269f   :  { %6206 = vmatprep.mubr.msk.bf16.mxu1 %vm7064_vm0, %v9129_v57  ;;  %4318 = vmatprep.mubr.bf16.mxu0 %v9126_v45 }
0x26a1   :  { %6205 = vmatpush3.bf16.msra.mxu1 %v9226_v38  ;;  %4289 = vmatpush1.bf16.msra.mxu0 %v9227_v35 }
0x26a2   :  { %4327 = vmatprep.subr.bf16.mxu1 %v9228_v14  ;;  %4544 = vmatprep.subr.bf16.mxu0 %v9229_v32 }
0x26b5   :  { %v4009_v21 = vpop.permute.xlu0 %4008 }
0x26b6   :  { %v4016_v60 = vrot.slane %v4009_v21, %v9218_v16  ;;  %v4012_v41 = vpop.permute.xlu1 %4011 }
0x26b7   :  { %v4020_v59 = vrot.slane %v4012_v41, %v9218_v16  ;;  %v9232_v16 = vld [vmem:[#allocation41_spill] sm:$0xff] }
0x26b9   :  { %v4021_v55 = vsel %vm2013_vm12, %v4020_v59, %v4016_v60 }
0x26ba   :  { %v4023_v39 = vsel %vm2016_vm13, %v4021_v55, 0.0 }
0x26bb   :  { %4024 = vadd.xlane.f32.xlu1 %v4023_v39 }
0x2748   :  { %v4025_v30 = vpop.xlane.xlu1 %4024 }
0x2749   :  { %6637 = vrcp.f32 %v4025_v30 }
0x2753   :  { %v6638_v27 = vpop.eup %6637 }
0x2754   :  { %v4031_v10 = vrot.slane %v6638_v27, %v9212_v47  ;;  %v4035_v35 = vrot.slane %v6638_v27, %v9219_v42 }
0x2756   :  { %v4038_v12 = vmul.f32 %v6634_v48, %v4031_v10  ;;  %v4039_v14 = vmul.f32 %v6636_v58, %v4035_v35 }
0x2758   :  { %4042 = vperm.xlu0 %6400, %v4038_v12  }
0x275c   :  { %4047 = vperm.xlu0 %6400, %v4039_v14  }
0x276f   :  { %v4138_v32 = vpop.f32.mrb[72].mxu1  ;;  %v4179_v21 = vpop.f32.mrb[76].mxu0 }
0x2770   :  { %v4140_v62 = vpop.f32.mrb[73].mxu1  ;;  %v6200_v41 = vpop.f32.mrb[77].mxu0 }
0x2771   :  { %v4142_v38 = vpop.f32.mrb[74].mxu1  ;;  %v4182_v60 = vpop.f32.mrb[78].mxu0 }
0x2772   :  { %v4143_v59 = vpop.f32.mrb[75].mxu1  ;;  %v6201_v55 = vpop.f32.mrb[79].mxu0  ;;  %v9234_v38 = vld [vmem:[#allocation40_spill] sm:$0xff] }
0x2773   :  { %v9235_v59 = vld [vmem:[#allocation42_spill] sm:$0xff] }
0x27d7   :  { %v4043_v39 = vpop.permute.xlu0 %4042 }
0x27d8   :  { %v4050_v30 = vmul.f32 %v4043_v39, %v9230_v18  ;;  %v4051_v3 = vmul.f32 %v4043_v39, %v9231_v53  ;;  %v4052_v48 = vmul.f32 %v4043_v39, %v9232_v16 }
0x27da   :  { %v4056_v10 = vrot.slane %v4050_v30, 4  ;;  %v4062_v27 = vrot.slane %v4051_v3, 4  ;;  %v4068_v12 = vrot.slane %v4052_v48, 4 }
0x27db   :  { %v4048_v58 = vpop.permute.xlu0 %4047 }
0x27dc   :  { %v4057_v35 = vadd.f32 %v4056_v10, %v4050_v30  ;;  %v4063_v14 = vadd.f32 %v4062_v27, %v4051_v3  ;;  %v4069_v42 = vadd.f32 %v4068_v12, %v4052_v48  ;;  %v4053_v41 = vmul.f32 %v4048_v58, %v9233_v44 }
0x27dd   :  { %v4054_v60 = vmul.f32 %v4048_v58, %v9234_v38  ;;  %v4055_v55 = vmul.f32 %v4048_v58, %v9235_v59 }
0x27de   :  { %v4058_v5 = vrot.slane %v4057_v35, 2  ;;  %v4064_v40 = vrot.slane %v4063_v14, 2  ;;  %v4070_v18 = vrot.slane %v4069_v42, 2  ;;  %v4074_v25 = vrot.slane %v4053_v41, 4 }
0x27df   :  { %v4080_v53 = vrot.slane %v4054_v60, 4  ;;  %v4086_v47 = vrot.slane %v4055_v55, 4 }
0x27e0   :  { %v4059_v39 = vadd.f32 %v4058_v5, %v4057_v35  ;;  %v4075_v16 = vadd.f32 %v4074_v25, %v4053_v41  ;;  %v4065_v49 = vadd.f32 %v4064_v40, %v4063_v14  ;;  %v4071_v28 = vadd.f32 %v4070_v18, %v4069_v42 }
0x27e1   :  { %v4081_v7 = vadd.f32 %v4080_v53, %v4054_v60  ;;  %v4087_v30 = vadd.f32 %v4086_v47, %v4055_v55 }
0x27e2   :  { %v4076_v3 = vrot.slane %v4075_v16, 2  ;;  %v4060_v27 = vrot.slane %v4059_v39, 1  ;;  %v4066_v38 = vrot.slane %v4065_v49, 1  ;;  %v4072_v44 = vrot.slane %v4071_v28, 1 }
0x27e3   :  { %v4082_v48 = vrot.slane %v4081_v7, 2  ;;  %v4088_v10 = vrot.slane %v4087_v30, 2 }
0x27e4   :  { %v4077_v12 = vadd.f32 %v4076_v3, %v4075_v16  ;;  %v4061_v61 = vadd.f32 %v4060_v27, %v4059_v39  ;;  %v4067_v5 = vadd.f32 %v4066_v38, %v4065_v49  ;;  %v4073_v25 = vadd.f32 %v4072_v44, %v4071_v28 }
0x27e5   :  { %v4083_v58 = vadd.f32 %v4082_v48, %v4081_v7  ;;  %v4089_v59 = vadd.f32 %v4088_v10, %v4087_v30  ;;  %v9245_v10 = vld [vmem:[#allocation24_spill] sm:$0xff] }
0x27e6   :  { %v4078_v34 = vrot.slane %v4077_v12, 1 }
0x27e7   :  { %v4084_v46 = vrot.slane %v4083_v58, 1  ;;  %v4090_v56 = vrot.slane %v4089_v59, 1 }
0x27e8   :  { %v4079_v8 = vadd.f32 %v4078_v34, %v4077_v12 }
0x27e9   :  { %v4085_v40 = vadd.f32 %v4084_v46, %v4083_v58  ;;  %v4091_v42 = vadd.f32 %v4090_v56, %v4089_v59  ;;  %v9246_v58 = vld [vmem:[#allocation35_spill] sm:$0xff] }
0x27ea   :  { %v4098_v47 = vsel %vm2013_vm12, %v4079_v8, %v4061_v61  ;;  %v3922_v61 = vadd.f32 %v8371_v50, %v7864_v43 }
0x27eb   :  { %v4099_v53 = vsel %vm2013_vm12, %v4085_v40, %v4067_v5  ;;  %v4100_v18 = vsel %vm2013_vm12, %v4091_v42, %v4073_v25  ;;  %v6319_v16 = vadd.f32 %v7986_v13, %v4098_v47  ;;  %v9247_v25 = vld [vmem:[#allocation38_spill] sm:$0xff] }
0x27ec   :  { %v4180_v35 = vadd.f32 %v4179_v21, %v4100_v18  ;;  %v6322_v7 = vadd.f32 %v7990_v37, %v4099_v53  ;;  %v9248_v47 = vld [vmem:[#allocation54_spill] sm:$0xff] }
0x27ed   :  { %v6320_v14 = vadd.f32 %v6319_v16, %v4138_v32 }
0x27ee   :  { %v6323_v41 = vadd.f32 %v6322_v7, %v4140_v62  ;;  %v4187_v44 = vadd.f32 %v4180_v35, %v7867_v52 }
0x27ef   :  { %v5813_v60 = vmul.f32 -1.442695, %v6320_v14 }
0x27f0   :  { %v5814_v34 = vmul.f32 -1.442695, %v6323_v41  ;;  %v9250_v41 = vld [vmem:[#allocation33_spill] sm:$0xff] }
0x27f1   :  { %6639 = vpow2.f32 %v5813_v60 }
0x27f2   :  { %6641 = vpow2.f32 %v5814_v34 }
0x27fb   :  { %v6640_v28 = vpop.eup %6639 }
0x27fc   :  { %v4192_v46 = vadd.f32 1.0, %v6640_v28  ;;  %v6642_v56 = vpop.eup %6641 }
0x27fd   :  { %v4199_v8 = vadd.f32 1.0, %v6642_v56 }
0x27fe   :  { %6643 = vrcp.f32 %v4192_v46 }
0x27ff   :  { %6645 = vrcp.f32 %v4199_v8 }
0x2808   :  { %v6644_v49 = vpop.eup %6643 }
0x2809   :  { %v4202_v21 = vmul.f32 %v6644_v49, %v3922_v61  ;;  %v6646_v62 = vpop.eup %6645  ;;  %v9251_v61 = vld [vmem:[#allocation45_spill] sm:$0xff] }
0x280a   :  { %v4205_v32 = vsub.f32 1.0, %v6646_v62  ;;  %v4207_v39 = vmul.f32 %v6646_v62, %v8314_v17 }
0x280b   :  { %v4203_v38 = vadd.f32 %v4202_v21, %v4187_v44 }
0x280d   :  { %6647 = vtanh.f32 %v4203_v38 }
0x2817   :  { %v6648_v59 = vpop.eup %6647 }
0x2818   :  { %v4206_v55 = vmul.f32 %v6648_v59, %v4205_v32 }
0x281a   :  { %v8437_v30 = vadd.f32 %v4207_v39, %v4206_v55 }
0x281c   :  { %v4209_v3 = vpack.c.bf16 %v8437_v30, %v8437_v30 }
0x281e   :  { %6207 = vmatmul.mubr.msk.bf16.vlgmr.msra.gmra.mrb[76].mxu1 %vm405_vm2, %v4209_v3  ;;  %5817 = vmatmul.mubr.msk.bf16.vlgmr.msra.gmra.mrb[80].mxu0 %vm405_vm2, %v4209_v3 }
0x281f   :  { %4328 = vmatpush1.bf16.msra.mxu1 %v8138_v22  ;;  %4359 = vmatprep.mubr.bf16.mxu1 %v9126_v45  ;;  %v9236_v22 = vld [vmem:[#allocation48_spill] sm:$0xff] }
0x2820   :  { %4329 = vmatprep.subr.bf16.mxu1 %v8142_v19  ;;  %4545 = vmatpush1.bf16.msra.mxu0 %v8145_v11  ;;  %v9237_v19 = vld [vmem:[#allocation27_spill] sm:$0xff]  ;;  %v9238_v11 = vld [vmem:[#allocation44_spill] sm:$0xff] }
0x2821   :  { %4546 = vmatprep.subr.bf16.mxu0 %v8148_v24  ;;  %4576 = vmatprep.mubr.bf16.mxu0 %v9126_v45  ;;  %v9239_v24 = vld [vmem:[#allocation53_spill] sm:$0xff] }
0x2823   :  { %4330 = vmatpush1.bf16.msra.mxu1 %v8152_v23  ;;  %v9240_v23 = vld [vmem:[#allocation49_spill] sm:$0xff] }
0x2824   :  { %6210 = vmatprep.subr.bf16.mxu1 %v9129_v57  ;;  %4547 = vmatpush1.bf16.msra.mxu0 %v8156_v26  ;;  %v8483_v26 = vld [vmem:[#allocation16 + $0x4] ss:$16 sps:$4 sm:$0xff]  }
0x2825   :  { %4548 = vmatprep.subr.bf16.mxu0 %v8159_v20 }
0x2826   :  { %5818 = vmatmul.mubr.msk.bf16.vlgmr.msra.gmra.mrb[80].mxu1 %vm405_vm2, %v4209_v3 }
0x2827   :  { %6211 = vmatpush3.bf16.msra.mxu1 %v8163_v29  ;;  %6226 = vmatprep.mubr.msk.bf16.mxu1 %vm7064_vm0, %v9129_v57  ;;  %v9241_v29 = vld [vmem:[#allocation28_spill] sm:$0xff] }
0x2828   :  { %6212 = vmatprep.subr.bf16.mxu1 %v9129_v57  ;;  %4549 = vmatpush1.bf16.msra.mxu0 %v8169_v36 }
0x2829   :  { %4550 = vmatprep.subr.bf16.mxu0 %v8172_v4 }
0x282b   :  { %6213 = vmatpush3.bf16.msra.mxu1 %v8175_v54 }
0x282c   :  { %6214 = vmatprep.subr.bf16.mxu1 %v9129_v57  ;;  %4551 = vmatpush1.bf16.msra.mxu0 %v8179_v1 }
0x282d   :  { %4552 = vmatprep.subr.bf16.mxu0 %v8182_v2 }
0x282f   :  { %6215 = vmatpush3.bf16.msra.mxu1 %v8185_v0 }
0x2830   :  { %6216 = vmatprep.subr.bf16.mxu1 %v9129_v57  ;;  %4553 = vmatpush1.bf16.msra.mxu0 %v8189_v6 }
0x2831   :  { %4554 = vmatprep.subr.bf16.mxu0 %v8192_v51  ;;  %v9243_v51 = vld [vmem:[#allocation43_spill] sm:$0xff] }
0x2833   :  { %6217 = vmatpush3.bf16.msra.mxu1 %v8195_v31 }
0x2834   :  { %6218 = vmatprep.subr.bf16.mxu1 %v9129_v57  ;;  %4555 = vmatpush1.bf16.msra.mxu0 %v8199_v63 }
0x2835   :  { %4556 = vmatprep.subr.bf16.mxu0 %v8202_v33 }
0x2837   :  { %6219 = vmatpush3.bf16.msra.mxu1 %v8205_v9  ;;  %v9244_v9 = vld [vmem:[#allocation26_spill] sm:$0xff] }
0x2838   :  { %6220 = vmatprep.subr.bf16.mxu1 %v9129_v57  ;;  %4557 = vmatpush1.bf16.msra.mxu0 %v8209_v15 }
0x2839   :  { %4558 = vmatprep.subr.bf16.mxu0 %v9236_v22  ;;  %v9252_v22 = vld [vmem:[#allocation25_spill] sm:$0xff] }
0x283b   :  { %6221 = vmatpush3.bf16.msra.mxu1 %v9237_v19 }
0x283c   :  { %6222 = vmatprep.subr.bf16.mxu1 %v9129_v57  ;;  %4559 = vmatpush1.bf16.msra.mxu0 %v9238_v11 }
0x283d   :  { %6230 = vmatprep.subr.bf16.mxu0 %v9129_v57 }
0x283f   :  { %6223 = vmatpush3.bf16.msra.mxu1 %v9239_v24 }
0x2840   :  { %6224 = vmatprep.subr.bf16.mxu1 %v9129_v57 }
0x2843   :  { %6225 = vmatpush3.bf16.msra.mxu1 %v9240_v23 }
0x2844   :  { %4726 = vmatprep.subr.bf16.mxu1 %v8483_v26 }
0x28f1   :  { %v4247_v20 = vpop.f32.mrb[76].mxu1 }
0x28f2   :  { %v8487_v36 = vadd.f32 %v9241_v29, %v4247_v20  ;;  %v6208_v4 = vpop.f32.mrb[77].mxu1 }
0x28f3   :  { %v4250_v54 = vpop.f32.mrb[78].mxu1 }
0x28f4   :  { %9242 = vst [vmem:[#allocation31_spill] sm:$0xff] %v8487_v36  ;;  %v6209_v1 = vpop.f32.mrb[79].mxu1  ;;  %v4253_v2 = vsel %vm1573_vm4, %v8487_v36, -inf }
0x28f5   :  { %4254 = vmax.xlane.f32.xlu0 %v4253_v2 }
0x28f9   :  { %v8491_v0 = vpop.f32.mrb[80].mxu1 }
0x28fa   :  { %v4363_v6 = vpop.f32.mrb[81].mxu1 }
0x28fb   :  { %v4364_v31 = vadd.f32 %v4363_v6, %v9243_v51  ;;  %v4365_v63 = vpop.f32.mrb[82].mxu1 }
0x28fc   :  { %v4366_v33 = vpop.f32.mrb[83].mxu1 }
0x28fd   :  { %v4375_v15 = vrot.slane %v4364_v31, %v9244_v9 }
0x28ff   :  { %v4376_v17 = vcombine.high %v4375_v15, %v4375_v15  ;;  %v4383_v50 = vrot.slane %v4375_v15, %v9244_v9  ;;  %v9253_v15 = vld [vmem:[#allocation56_spill] sm:$0xff] }
0x2901   :  { %v4390_v48 = vrot.slane %v4376_v17, %v9244_v9  ;;  %v4394_v27 = vrot.slane %v4383_v50, %v9245_v10  ;;  %v9254_v50 = vmov 1.0|1.0  }
0x2903   :  { %v4398_v12 = vrot.slane %v4390_v48, %v9245_v10  ;;  %v4401_v5 = vadd.f32 %v4394_v27, %v9246_v58  ;;  %v9255_v48 = vld [vmem:[#allocation57_spill] sm:$0xff]  ;;  %v8526_v27 = vld [vmem:[#allocation16] ss:$16 sps:$4 sm:$0xff]  }
0x2905   :  { %v4402_v40 = vadd.f32 %v4398_v12, %v9247_v25  ;;  %6649 = vtanh.f32 %v4401_v5  ;;  %v8530_v12 = vld [vmem:[#allocation16 + $0x24] ss:$16 sps:$4 sm:$0xff]  }
0x2906   :  { %v9256_v5 = vld [vmem:[#allocation58_spill] sm:$0xff] }
0x2907   :  { %6651 = vtanh.f32 %v4402_v40  ;;  %v8537_v40 = vld [vmem:[#allocation16 + $0x20] ss:$16 sps:$4 sm:$0xff]  }
0x290f   :  { %v6650_v42 = vpop.eup %6649 }
0x2910   :  { %v4405_v53 = vmul.f32 %v9248_v47, %v6650_v42  ;;  %v8540_v42 = vld [vmem:[#allocation16 + $0xc] ss:$16 sps:$4 sm:$0xff]  }
0x2911   :  { %v6652_v18 = vpop.eup %6651 }
0x2912   :  { %v4407_v16 = vsel %vm405_vm2, %v4405_v53, 0.0  ;;  %v4406_v35 = vmul.f32 %v9248_v47, %v6652_v18  ;;  %v8543_v47 = vld [vmem:[#allocation11 + $0x4] ss:$12 sps:$4 sm:$0xff]  }
0x2913   :  { %4408 = vadd.xlane.f32.xlu1 %v4407_v16 }
0x2914   :  { %v4410_v7 = vsel %vm405_vm2, %v4406_v35, 0.0 }
0x2917   :  { %4411 = vadd.xlane.f32.xlu1 %v4410_v7 }
0x2982   :  { %v8505_v14 = vpop.xlane.xlu0 %4254 }
0x2983   :  { %9249 = vst [vmem:[#allocation32_spill] sm:$0xff] %v8505_v14  ;;  %vm4265_vm5 = vcmp.eq.f32.partialorder %v8487_v36, %v8505_v14 }
0x2984   :  { %v4266_v60 = vsel %vm4265_vm5, %v9250_v41, 128 }
0x2985   :  { %v4267_v34 = vsel %vm1573_vm4, %v4266_v60, 2147483647 }
0x2986   :  { %v4269_v28 = vshra.s32 %v4267_v34, 16  ;;  %v4268_v62 = vand.u32 65535, %v4267_v34 }
0x2988   :  { %v4271_v46 = vcvt.s32.f32 %v4269_v28  ;;  %v4270_v59 = vcvt.s32.f32 %v4268_v62 }
0x298a   :  { %4272 = vmin.xlane.f32.xlu0 %v4271_v46 }
0x29a0   :  { %v4409_v56 = vpop.xlane.xlu1 %4408 }
0x29a1   :  { %v4418_v49 = vrot.slane %v4409_v56, %v9251_v61 }
0x29a4   :  { %v4412_v8 = vpop.xlane.xlu1 %4411 }
0x29a5   :  { %v4422_v44 = vrot.slane %v4412_v8, %v9251_v61 }
0x29a7   :  { %v4423_v21 = vsel %vm2013_vm12, %v4422_v44, %v4418_v49 }
0x29a8   :  { %v4425_v38 = vsel %vm2016_vm13, %v4423_v21, -inf }
0x29a9   :  { %4426 = vmax.xlane.f32.xlu1 %v4425_v38 }
0x2a17   :  { %v4273_v32 = vpop.xlane.xlu0 %4272 }
0x2a18   :  { %vm4274_vm11 = vcmp.eq.f32.partialorder %v4271_v46, %v4273_v32  ;;  %v4279_v1 = vcvt.f32.s32 %v4273_v32 }
0x2a19   :  { %v4275_v55 = vsel %vm4274_vm11, %v4270_v59, inf }
0x2a1a   :  { %4276 = vmin.xlane.f32.xlu0 %v4275_v55  ;;  %v4280_v6 = vshll.u32 %v4279_v1, 16 }
0x2a36   :  { %v4427_v39 = vpop.xlane.xlu1 %4426 }
0x2a37   :  { %v4432_v3 = vrot.slane %v4427_v39, %v9245_v10  ;;  %v4436_v19 = vrot.slane %v4427_v39, %v9252_v22 }
0x2a39   :  { %v4439_v11 = vsub.f32 %v4409_v56, %v4432_v3  ;;  %v4440_v24 = vsub.f32 %v4412_v8, %v4436_v19  ;;  %v9257_v19 = vld [vmem:[#allocation36_spill] sm:$0xff] }
0x2a3b   :  { %v4441_v23 = vmul.f32 1.442695, %v4439_v11  ;;  %v4443_v20 = vmul.f32 1.442695, %v4440_v24  ;;  %v9258_v24 = vld [vmem:[#allocation37_spill] sm:$0xff] }
0x2a3d   :  { %6653 = vpow2.f32 %v4441_v23 }
0x2a3e   :  { %6655 = vpow2.f32 %v4443_v20  ;;  %v9259_v20 = vld [vmem:[#allocation41_spill] sm:$0xff] }
0x2a47   :  { %v6654_v4 = vpop.eup %6653 }
0x2a48   :  { %v6656_v54 = vpop.eup %6655  ;;  %4448 = vperm.xlu1 %6399, %v6654_v4  }
0x2a49   :  { %4451 = vperm.xlu0 %6400, %v6656_v54  }
0x2aa7   :  { %v4277_v2 = vpop.xlane.xlu0 %4276 }
0x2aa8   :  { %v4278_v31 = vcvt.f32.s32 %v4277_v2 }
0x2aaa   :  { %v4281_v63 = vadd.s32 %v4280_v6, %v4278_v31 }
0x2aac   :  { %vm4282_vm14 = vcmp.eq.s32.totalorder %v9250_v41, %v4281_v63  ;;  %v5629_v33 = vrot.slane %v4281_v63, %v9251_v61 }
0x2aad   :  { %vm5819_vm15 = vmpackc.low %vm4282_vm14, %vm4282_vm14 }
0x2aae   :  { %v8521_v17 = vsel %vm1579_vm6, %v9253_v15, %v5629_v33  ;;  %5820 = vmatmul.mubr.msk.bf16.vlgmr.msra.gmra.mrb[80].mxu0 %vm5819_vm15, %v9254_v50  ;;  %6227 = vmatmul.mubr.msk.bf16.vlgmr.msra.gmra.mrb[84].mxu1 %vm5819_vm15, %v9254_v50  ;;  %v9260_v15 = vld [vmem:[#allocation39_spill] sm:$0xff] }
0x2aaf   :  { %6231 = vmatpush3.bf16.msra.mxu0 %v9255_v48  ;;  %4727 = vmatpush1.bf16.msra.mxu1 %v8526_v27 }
0x2ab0   :  { %6232 = vmatprep.subr.bf16.mxu0 %v9129_v57  ;;  %4728 = vmatprep.subr.bf16.mxu1 %v8530_v12 }
0x2ab1   :  { %6234 = vmatprep.mubr.msk.bf16.mxu0 %vm7064_vm0, %v9129_v57  ;;  %4758 = vmatprep.mubr.bf16.mxu1 %v9126_v45 }
0x2ab3   :  { %6233 = vmatpush3.bf16.msra.mxu0 %v9256_v5  ;;  %4729 = vmatpush1.bf16.msra.mxu1 %v8537_v40  ;;  %v9261_v5 = vld [vmem:[#allocation40_spill] sm:$0xff] }
0x2ab4   :  { %4767 = vmatprep.subr.bf16.mxu0 %v8540_v42  ;;  %4984 = vmatprep.subr.bf16.mxu1 %v8543_v47 }
0x2ac7   :  { %v4449_v53 = vpop.permute.xlu1 %4448 }
0x2ac8   :  { %v4452_v18 = vpop.permute.xlu0 %4451  ;;  %v4456_v16 = vrot.slane %v4449_v53, %v9251_v61 }
0x2ac9   :  { %v4460_v35 = vrot.slane %v4452_v18, %v9251_v61  ;;  %v9262_v18 = vld [vmem:[#allocation42_spill] sm:$0xff] }
0x2acb   :  { %v4461_v7 = vsel %vm2013_vm12, %v4460_v35, %v4456_v16 }
0x2acc   :  { %v4463_v60 = vsel %vm2016_vm13, %v4461_v7, 0.0 }
0x2acd   :  { %4464 = vadd.xlane.f32.xlu1 %v4463_v60 }
0x2b5a   :  { %v4465_v34 = vpop.xlane.xlu1 %4464 }
0x2b5b   :  { %6657 = vrcp.f32 %v4465_v34 }
0x2b65   :  { %v6658_v28 = vpop.eup %6657 }
0x2b66   :  { %v4471_v46 = vrot.slane %v6658_v28, %v9245_v10  ;;  %v4475_v8 = vrot.slane %v6658_v28, %v9252_v22 }
0x2b68   :  { %v4478_v56 = vmul.f32 %v6654_v4, %v4471_v46  ;;  %v4479_v49 = vmul.f32 %v6656_v54, %v4475_v8 }
0x2b6a   :  { %4482 = vperm.xlu0 %6400, %v4478_v56  }
0x2b6e   :  { %4487 = vperm.xlu0 %6400, %v4479_v49  }
0x2b81   :  { %v4578_v44 = vpop.f32.mrb[80].mxu0  ;;  %v4619_v21 = vpop.f32.mrb[84].mxu1 }
0x2b82   :  { %v4580_v38 = vpop.f32.mrb[81].mxu0  ;;  %v6228_v62 = vpop.f32.mrb[85].mxu1 }
0x2b83   :  { %v4582_v32 = vpop.f32.mrb[82].mxu0  ;;  %v4622_v59 = vpop.f32.mrb[86].mxu1 }
0x2b84   :  { %v4583_v55 = vpop.f32.mrb[83].mxu0  ;;  %v6229_v39 = vpop.f32.mrb[87].mxu1 }
0x2be9   :  { %v4483_v3 = vpop.permute.xlu0 %4482 }
0x2bea   :  { %v4490_v11 = vmul.f32 %v4483_v3, %v9257_v19  ;;  %v4491_v23 = vmul.f32 %v4483_v3, %v9258_v24  ;;  %v4492_v4 = vmul.f32 %v4483_v3, %v9259_v20 }
0x2bec   :  { %v4496_v1 = vrot.slane %v4490_v11, 4  ;;  %v4502_v2 = vrot.slane %v4491_v23, 4  ;;  %v4508_v6 = vrot.slane %v4492_v4, 4 }
0x2bed   :  { %v4488_v54 = vpop.permute.xlu0 %4487 }
0x2bee   :  { %v4497_v31 = vadd.f32 %v4496_v1, %v4490_v11  ;;  %v4503_v63 = vadd.f32 %v4502_v2, %v4491_v23  ;;  %v4509_v33 = vadd.f32 %v4508_v6, %v4492_v4  ;;  %v4493_v48 = vmul.f32 %v4488_v54, %v9260_v15 }
0x2bef   :  { %v4494_v53 = vmul.f32 %v4488_v54, %v9261_v5  ;;  %v4495_v16 = vmul.f32 %v4488_v54, %v9262_v18 }
0x2bf0   :  { %v4498_v35 = vrot.slane %v4497_v31, 2  ;;  %v4504_v7 = vrot.slane %v4503_v63, 2  ;;  %v4510_v60 = vrot.slane %v4509_v33, 2  ;;  %v4514_v34 = vrot.slane %v4493_v48, 4 }
0x2bf1   :  { %v4520_v28 = vrot.slane %v4494_v53, 4  ;;  %v4526_v46 = vrot.slane %v4495_v16, 4 }
0x2bf2   :  { %v4499_v56 = vadd.f32 %v4498_v35, %v4497_v31  ;;  %v4515_v8 = vadd.f32 %v4514_v34, %v4493_v48  ;;  %v4505_v49 = vadd.f32 %v4504_v7, %v4503_v63  ;;  %v4511_v62 = vadd.f32 %v4510_v60, %v4509_v33 }
0x2bf3   :  { %v4521_v32 = vadd.f32 %v4520_v28, %v4494_v53  ;;  %v4527_v59 = vadd.f32 %v4526_v46, %v4495_v16 }
0x2bf4   :  { %v4516_v55 = vrot.slane %v4515_v8, 2  ;;  %v4500_v11 = vrot.slane %v4499_v56, 1  ;;  %v4506_v4 = vrot.slane %v4505_v49, 1  ;;  %v4512_v1 = vrot.slane %v4511_v62, 1 }
0x2bf5   :  { %v4522_v39 = vrot.slane %v4521_v32, 2  ;;  %v4528_v3 = vrot.slane %v4527_v59, 2 }
0x2bf6   :  { %v4517_v23 = vadd.f32 %v4516_v55, %v4515_v8  ;;  %v4501_v18 = vadd.f32 %v4500_v11, %v4499_v56  ;;  %v4507_v31 = vadd.f32 %v4506_v4, %v4505_v49  ;;  %v4513_v48 = vadd.f32 %v4512_v1, %v4511_v62  ;;  %v8577_v4 = vld [vmem:[#allocation16 + $0x2c] ss:$16 sps:$4 sm:$0xff]   ;;  %v8583_v1 = vld [vmem:[#allocation11 + $0x1c] ss:$12 sps:$4 sm:$0xff]  }
0x2bf7   :  { %v4523_v2 = vadd.f32 %v4522_v39, %v4521_v32  ;;  %v4529_v6 = vadd.f32 %v4528_v3, %v4527_v59 }
0x2bf8   :  { %v4518_v54 = vrot.slane %v4517_v23, 1 }
0x2bf9   :  { %v4524_v36 = vrot.slane %v4523_v2, 1  ;;  %v4530_v14 = vrot.slane %v4529_v6, 1 }
0x2bfa   :  { %v4519_v5 = vadd.f32 %v4518_v54, %v4517_v23  ;;  %v8594_v54 = vld [vmem:[#allocation11 + $0x34] ss:$12 sps:$4 sm:$0xff]  }
0x2bfb   :  { %v4525_v63 = vadd.f32 %v4524_v36, %v4523_v2  ;;  %v4531_v33 = vadd.f32 %v4530_v14, %v4529_v6  ;;  %v8587_v2 = vld [vmem:[#allocation16 + $0x28] ss:$16 sps:$4 sm:$0xff]   ;;  %v8591_v6 = vld [vmem:[#allocation11 + $0x18] ss:$12 sps:$4 sm:$0xff]  }
0x2bfc   :  { %v4538_v53 = vsel %vm2013_vm12, %v4519_v5, %v4501_v18  ;;  %v4362_v18 = vadd.f32 %v8491_v0, %v7864_v43  ;;  %v8573_v0 = vld [vmem:[#allocation16 + $0x8] ss:$16 sps:$4 sm:$0xff]  }
0x2bfd   :  { %v4539_v16 = vsel %vm2013_vm12, %v4525_v63, %v4507_v31  ;;  %v4540_v35 = vsel %vm2013_vm12, %v4531_v33, %v4513_v48  ;;  %v6325_v7 = vadd.f32 %v7986_v13, %v4538_v53  ;;  %v8598_v31 = vld [vmem:[#allocation11 + $0x8] ss:$12 sps:$4 sm:$0xff]   ;;  %v8604_v48 = vld [vmem:[#allocation11 + $0x30] ss:$12 sps:$4 sm:$0xff]   ;;  %v8607_v63 = vld [vmem:[#allocation11 + $0x4c] ss:$12 sps:$4 sm:$0xff]  }
0x2bfe   :  { %v4620_v60 = vadd.f32 %v4619_v21, %v4540_v35  ;;  %v6328_v34 = vadd.f32 %v7990_v37, %v4539_v16  ;;  %v8610_v33 = vld [vmem:[#allocation11 + $0x20] ss:$12 sps:$4 sm:$0xff]   ;;  %v8614_v53 = vld [vmem:[#allocation11 + $0x48] ss:$12 sps:$4 sm:$0xff]   ;;  %v8617_v16 = vld [vmem:[#allocation11 + $0x64] ss:$12 sps:$4 sm:$0xff]  }
0x2bff   :  { %v6326_v28 = vadd.f32 %v6325_v7, %v4578_v44  ;;  %v8620_v35 = vld [vmem:[#allocation11 + $0x38] ss:$12 sps:$4 sm:$0xff]   ;;  %v8624_v7 = vld [vmem:[#allocation11 + $0x60] ss:$12 sps:$4 sm:$0xff]  }
0x2c00   :  { %v6329_v46 = vadd.f32 %v6328_v34, %v4580_v38  ;;  %v4627_v32 = vadd.f32 %v4620_v60, %v7867_v52  ;;  %v8627_v60 = vld [vmem:[#allocation11 + $0x7c] ss:$12 sps:$4 sm:$0xff]  }
0x2c01   :  { %v5823_v8 = vmul.f32 -1.442695, %v6326_v28  ;;  %v8630_v34 = vld [vmem:[#allocation11 + $0x50] ss:$12 sps:$4 sm:$0xff]   ;;  %v8634_v28 = vld [vmem:[#allocation11 + $0x78] ss:$12 sps:$4 sm:$0xff]  }
0x2c02   :  { %v5824_v56 = vmul.f32 -1.442695, %v6329_v46  ;;  %v8637_v46 = vld [vmem:[#allocation11 + $0x94] ss:$12 sps:$4 sm:$0xff]  }
0x2c03   :  { %6659 = vpow2.f32 %v5823_v8  ;;  %v8640_v8 = vld [vmem:[#allocation11 + $0x68] ss:$12 sps:$4 sm:$0xff]  }
0x2c04   :  { %6661 = vpow2.f32 %v5824_v56  ;;  %v8644_v56 = vld [vmem:[#allocation11 + $0x90] ss:$12 sps:$4 sm:$0xff]  }
0x2c0d   :  { %v6660_v49 = vpop.eup %6659 }
0x2c0e   :  { %v4632_v36 = vadd.f32 1.0, %v6660_v49  ;;  %v6662_v14 = vpop.eup %6661  ;;  %v8647_v49 = vld [vmem:[#allocation11 + $0xac] ss:$12 sps:$4 sm:$0xff]  }
0x2c0f   :  { %v4639_v5 = vadd.f32 1.0, %v6662_v14  ;;  %9263 = vst [vmem:[#allocation46_spill] sm:$0xff] %v8647_v49  ;;  %v8654_v14 = vld [vmem:[#allocation11 + $0xa8] ss:$12 sps:$4 sm:$0xff]  }
0x2c10   :  { %6663 = vrcp.f32 %v4632_v36  ;;  %v8650_v36 = vld [vmem:[#allocation11 + $0x80] ss:$12 sps:$4 sm:$0xff]   ;;  %9265 = vst [vmem:[#allocation47_spill] sm:$0xff] %v8654_v14 }
0x2c11   :  { %6665 = vrcp.f32 %v4639_v5  ;;  %9264 = vst [vmem:[#allocation34_spill] sm:$0xff] %v8650_v36  ;;  %v8658_v5 = vld [vmem:[#allocation11 + $0x98] ss:$12 sps:$4 sm:$0xff]  }
0x2c12   :  { %9266 = vst [vmem:[#allocation48_spill] sm:$0xff] %v8658_v5 }
0x2c1a   :  { %v6664_v62 = vpop.eup %6663 }
0x2c1b   :  { %v4642_v21 = vmul.f32 %v6664_v62, %v4362_v18  ;;  %v6666_v44 = vpop.eup %6665  ;;  %v8662_v18 = vld [vmem:[#allocation11 + $0xb0] ss:$12 sps:$4 sm:$0xff]  }
0x2c1c   :  { %v4645_v38 = vsub.f32 1.0, %v6666_v44  ;;  %v4647_v3 = vmul.f32 %v6666_v44, %v8437_v30  ;;  %v8580_v30 = vld [vmem:[#allocation11] ss:$12 sps:$4 sm:$0xff]   ;;  %9267 = vst [vmem:[#allocation27_spill] sm:$0xff] %v8662_v18 }
0x2c1d   :  { %v4643_v59 = vadd.f32 %v4642_v21, %v4627_v32 }
0x2c1f   :  { %6667 = vtanh.f32 %v4643_v59 }
0x2c29   :  { %v6668_v55 = vpop.eup %6667 }
0x2c2a   :  { %v4646_v39 = vmul.f32 %v6668_v55, %v4645_v38 }
0x2c2c   :  { %v8567_v11 = vadd.f32 %v4647_v3, %v4646_v39 }
0x2c2e   :  { %v4649_v23 = vpack.c.bf16 %v8567_v11, %v8567_v11 }
0x2c30   :  { %6235 = vmatmul.mubr.msk.bf16.vlgmr.msra.gmra.mrb[84].mxu0 %vm405_vm2, %v4649_v23  ;;  %5827 = vmatmul.mubr.msk.bf16.vlgmr.msra.gmra.mrb[88].mxu1 %vm405_vm2, %v4649_v23 }
0x2c31   :  { %4768 = vmatpush1.bf16.msra.mxu0 %v8573_v0  ;;  %4799 = vmatprep.mubr.bf16.mxu0 %v9126_v45 }
0x2c32   :  { %4769 = vmatprep.subr.bf16.mxu0 %v8577_v4  ;;  %4985 = vmatpush1.bf16.msra.mxu1 %v8580_v30 }
0x2c33   :  { %4986 = vmatprep.subr.bf16.mxu1 %v8583_v1  ;;  %5016 = vmatprep.mubr.bf16.mxu1 %v9126_v45 }
0x2c35   :  { %4770 = vmatpush1.bf16.msra.mxu0 %v8587_v2 }
0x2c36   :  { %6238 = vmatprep.subr.bf16.mxu0 %v9129_v57  ;;  %4987 = vmatpush1.bf16.msra.mxu1 %v8591_v6 }
0x2c37   :  { %4988 = vmatprep.subr.bf16.mxu1 %v8594_v54 }
0x2c38   :  { %5828 = vmatmul.mubr.msk.bf16.vlgmr.msra.gmra.mrb[88].mxu0 %vm405_vm2, %v4649_v23 }
0x2c39   :  { %6239 = vmatpush3.bf16.msra.mxu0 %v8598_v31  ;;  %6254 = vmatprep.mubr.msk.bf16.mxu0 %vm7064_vm0, %v9129_v57 }
0x2c3a   :  { %6240 = vmatprep.subr.bf16.mxu0 %v9129_v57  ;;  %4989 = vmatpush1.bf16.msra.mxu1 %v8604_v48 }
0x2c3b   :  { %4990 = vmatprep.subr.bf16.mxu1 %v8607_v63 }
0x2c3d   :  { %6241 = vmatpush3.bf16.msra.mxu0 %v8610_v33 }
0x2c3e   :  { %6242 = vmatprep.subr.bf16.mxu0 %v9129_v57  ;;  %4991 = vmatpush1.bf16.msra.mxu1 %v8614_v53 }
0x2c3f   :  { %4992 = vmatprep.subr.bf16.mxu1 %v8617_v16 }
0x2c41   :  { %6243 = vmatpush3.bf16.msra.mxu0 %v8620_v35 }
0x2c42   :  { %6244 = vmatprep.subr.bf16.mxu0 %v9129_v57  ;;  %4993 = vmatpush1.bf16.msra.mxu1 %v8624_v7 }
0x2c43   :  { %4994 = vmatprep.subr.bf16.mxu1 %v8627_v60 }
0x2c45   :  { %6245 = vmatpush3.bf16.msra.mxu0 %v8630_v34 }
0x2c46   :  { %6246 = vmatprep.subr.bf16.mxu0 %v9129_v57  ;;  %4995 = vmatpush1.bf16.msra.mxu1 %v8634_v28 }
0x2c47   :  { %4996 = vmatprep.subr.bf16.mxu1 %v8637_v46 }
0x2c49   :  { %6247 = vmatpush3.bf16.msra.mxu0 %v8640_v8 }
0x2c4a   :  { %6248 = vmatprep.subr.bf16.mxu0 %v9129_v57  ;;  %4997 = vmatpush1.bf16.msra.mxu1 %v8644_v56 }
0x2c4b   :  { %4998 = vmatprep.subr.bf16.mxu1 %v8647_v49 }
0x2c4d   :  { %6249 = vmatpush3.bf16.msra.mxu0 %v8650_v36 }
0x2c4e   :  { %6250 = vmatprep.subr.bf16.mxu0 %v9129_v57  ;;  %4999 = vmatpush1.bf16.msra.mxu1 %v8654_v14 }
0x2c4f   :  { %6258 = vmatprep.subr.bf16.mxu1 %v9129_v57 }
0x2c51   :  { %6251 = vmatpush3.bf16.msra.mxu0 %v8658_v5 }
0x2c52   :  { %6252 = vmatprep.subr.bf16.mxu0 %v9129_v57 }
0x2c55   :  { %6253 = vmatpush3.bf16.msra.mxu0 %v8662_v18 }
0x2c56   :  { %5166 = vmatprep.subr.bf16.mxu0 %v8483_v26 }
0x2d03   :  { %v4687_v62 = vpop.f32.mrb[84].mxu0 }
0x2d04   :  { %v8667_v32 = vadd.f32 %v9241_v29, %v4687_v62  ;;  %v6236_v21 = vpop.f32.mrb[85].mxu0 }
0x2d05   :  { %v4690_v59 = vpop.f32.mrb[86].mxu0 }
0x2d06   :  { %9268 = vst [vmem:[#allocation44_spill] sm:$0xff] %v8667_v32  ;;  %v6237_v44 = vpop.f32.mrb[87].mxu0  ;;  %v4693_v38 = vsel %vm1573_vm4, %v8667_v32, -inf }
0x2d07   :  { %4694 = vmax.xlane.f32.xlu0 %v4693_v38 }
0x2d0b   :  { %v8671_v55 = vpop.f32.mrb[88].mxu0 }
0x2d0c   :  { %v4803_v39 = vpop.f32.mrb[89].mxu0 }
0x2d0d   :  { %v4804_v3 = vadd.f32 %v4803_v39, %v9243_v51  ;;  %v4805_v23 = vpop.f32.mrb[90].mxu0 }
0x2d0e   :  { %v4806_v18 = vpop.f32.mrb[91].mxu0  ;;  %v8681_v23 = vld [vmem:[#allocation10] ss:$0 sm:$0xff] }
0x2d0f   :  { %v4815_v26 = vrot.slane %v4804_v3, %v9244_v9  ;;  %9269 = vst [vmem:[#allocation53_spill] sm:$0xff] %v8681_v23 }
0x2d11   :  { %v4816_v5 = vcombine.high %v4815_v26, %v4815_v26  ;;  %v4823_v29 = vrot.slane %v4815_v26, %v9244_v9 }
0x2d13   :  { %v4830_v62 = vrot.slane %v4816_v5, %v9244_v9  ;;  %v4834_v21 = vrot.slane %v4823_v29, %v9245_v10 }
0x2d15   :  { %v4838_v59 = vrot.slane %v4830_v62, %v9245_v10  ;;  %v4841_v44 = vadd.f32 %v4834_v21, %v9246_v58 }
0x2d17   :  { %v4842_v38 = vadd.f32 %v4838_v59, %v9247_v25  ;;  %6669 = vtanh.f32 %v4841_v44 }
0x2d19   :  { %6671 = vtanh.f32 %v4842_v38 }
0x2d21   :  { %v6670_v39 = vpop.eup %6669 }
0x2d22   :  { %v4845_v18 = vmul.f32 %v8681_v23, %v6670_v39 }
0x2d23   :  { %v6672_v3 = vpop.eup %6671 }
0x2d24   :  { %v4847_v26 = vsel %vm405_vm2, %v4845_v18, 0.0  ;;  %v4846_v5 = vmul.f32 %v8681_v23, %v6672_v3 }
0x2d25   :  { %4848 = vadd.xlane.f32.xlu1 %v4847_v26 }
0x2d26   :  { %v4850_v29 = vsel %vm405_vm2, %v4846_v5, 0.0 }
0x2d29   :  { %4851 = vadd.xlane.f32.xlu1 %v4850_v29 }
0x2d94   :  { %v8687_v62 = vpop.xlane.xlu0 %4694 }
0x2d95   :  { %9270 = vst [vmem:[#allocation49_spill] sm:$0xff] %v8687_v62  ;;  %vm4705_vm6 = vcmp.eq.f32.partialorder %v8667_v32, %v8687_v62 }
0x2d96   :  { %v4706_v21 = vsel %vm4705_vm6, %v9250_v41, 128 }
0x2d97   :  { %v4707_v59 = vsel %vm1573_vm4, %v4706_v21, 2147483647 }
0x2d98   :  { %v4709_v44 = vshra.s32 %v4707_v59, 16  ;;  %v4708_v23 = vand.u32 65535, %v4707_v59 }
0x2d9a   :  { %v4711_v38 = vcvt.s32.f32 %v4709_v44  ;;  %v4710_v62 = vcvt.s32.f32 %v4708_v23 }
0x2d9c   :  { %4712 = vmin.xlane.f32.xlu1 %v4711_v38 }
0x2db2   :  { %v4849_v39 = vpop.xlane.xlu1 %4848 }
0x2db3   :  { %v4858_v3 = vrot.slane %v4849_v39, %v9251_v61 }
0x2db6   :  { %v4852_v18 = vpop.xlane.xlu1 %4851 }
0x2db7   :  { %v4862_v26 = vrot.slane %v4852_v18, %v9251_v61 }
0x2db9   :  { %v4863_v5 = vsel %vm2013_vm12, %v4862_v26, %v4858_v3 }
0x2dba   :  { %v4865_v29 = vsel %vm2016_vm13, %v4863_v5, -inf }
0x2dbb   :  { %4866 = vmax.xlane.f32.xlu0 %v4865_v29 }
0x2e29   :  { %v4713_v32 = vpop.xlane.xlu1 %4712 }
0x2e2a   :  { %vm4714_vm1 = vcmp.eq.f32.partialorder %v4711_v38, %v4713_v32  ;;  %v4719_v59 = vcvt.f32.s32 %v4713_v32 }
0x2e2b   :  { %v4715_v25 = vsel %vm4714_vm1, %v4710_v62, inf }
0x2e2c   :  { %4716 = vmin.xlane.f32.xlu1 %v4715_v25  ;;  %v4720_v38 = vshll.u32 %v4719_v59, 16 }
0x2e48   :  { %v4867_v21 = vpop.xlane.xlu0 %4866 }
0x2e49   :  { %v4872_v44 = vrot.slane %v4867_v21, %v9245_v10  ;;  %v4876_v58 = vrot.slane %v4867_v21, %v9252_v22 }
0x2e4b   :  { %v4879_v9 = vsub.f32 %v4849_v39, %v4872_v44  ;;  %v4880_v51 = vsub.f32 %v4852_v18, %v4876_v58  ;;  %v8722_v58 = vld [vmem:[%s8957_s12 + $0x8] sm:$0xff]  }
0x2e4c   :  { %9273 = vst [vmem:[#allocation56_spill] sm:$0xff] %v8722_v58 }
0x2e4d   :  { %v4881_v14 = vmul.f32 1.442695, %v4879_v9  ;;  %v4883_v36 = vmul.f32 1.442695, %v4880_v51  ;;  %v8710_v51 = vld [vmem:[%s8957_s12] sm:$0xff]  }
0x2e4e   :  { %9272 = vst [vmem:[#allocation54_spill] sm:$0xff] %v8710_v51 }
0x2e4f   :  { %6673 = vpow2.f32 %v4881_v14 }
0x2e50   :  { %6675 = vpow2.f32 %v4883_v36 }
0x2e59   :  { %v6674_v3 = vpop.eup %6673 }
0x2e5a   :  { %v6676_v26 = vpop.eup %6675  ;;  %4888 = vperm.xlu0 %6400, %v6674_v3  }
0x2e5b   :  { %4891 = vperm.xlu1 %6399, %v6676_v26  }
0x2eb9   :  { %v4717_v23 = vpop.xlane.xlu1 %4716 }
0x2eba   :  { %v4718_v62 = vcvt.f32.s32 %v4717_v23 }
0x2ebc   :  { %v4721_v25 = vadd.s32 %v4720_v38, %v4718_v62 }
0x2ebe   :  { %vm4722_vm3 = vcmp.eq.s32.totalorder %v9250_v41, %v4721_v25  ;;  %v5633_v5 = vrot.slane %v4721_v25, %v9251_v61 }
0x2ebf   :  { %vm5829_vm10 = vmpackc.low %vm4722_vm3, %vm4722_vm3 }
0x2ec0   :  { %v8703_v9 = vsel %vm1582_vm7, %v8521_v17, %v5633_v5  ;;  %5830 = vmatmul.mubr.msk.bf16.vlgmr.msra.gmra.mrb[88].mxu1 %vm5829_vm10, %v9254_v50  ;;  %6255 = vmatmul.mubr.msk.bf16.vlgmr.msra.gmra.mrb[92].mxu0 %vm5829_vm10, %v9254_v50 }
0x2ec1   :  { %9271 = vst [vmem:[#allocation28_spill] sm:$0xff] %v8703_v9  ;;  %6259 = vmatpush3.bf16.msra.mxu1 %v8710_v51  ;;  %5167 = vmatpush1.bf16.msra.mxu0 %v8526_v27 }
0x2ec2   :  { %6260 = vmatprep.subr.bf16.mxu1 %v9129_v57  ;;  %5168 = vmatprep.subr.bf16.mxu0 %v8530_v12 }
0x2ec3   :  { %6262 = vmatprep.mubr.msk.bf16.mxu1 %vm7064_vm0, %v9129_v57  ;;  %5198 = vmatprep.mubr.bf16.mxu0 %v9126_v45 }
0x2ec5   :  { %6261 = vmatpush3.bf16.msra.mxu1 %v8722_v58  ;;  %5169 = vmatpush1.bf16.msra.mxu0 %v8537_v40 }
0x2ec6   :  { %5207 = vmatprep.subr.bf16.mxu1 %v8540_v42  ;;  %5424 = vmatprep.subr.bf16.mxu0 %v8543_v47 }
0x2ed9   :  { %v4889_v17 = vpop.permute.xlu0 %4888 }
0x2eda   :  { %v4896_v27 = vrot.slane %v4889_v17, %v9251_v61  ;;  %v4892_v12 = vpop.permute.xlu1 %4891 }
0x2edb   :  { %v4900_v36 = vrot.slane %v4892_v12, %v9251_v61 }
0x2edd   :  { %v4901_v14 = vsel %vm2013_vm12, %v4900_v36, %v4896_v27 }
0x2ede   :  { %v4903_v32 = vsel %vm2016_vm13, %v4901_v14, 0.0 }
0x2edf   :  { %4904 = vadd.xlane.f32.xlu1 %v4903_v32 }
0x2f6c   :  { %v4905_v39 = vpop.xlane.xlu1 %4904 }
0x2f6d   :  { %6677 = vrcp.f32 %v4905_v39 }
0x2f77   :  { %v6678_v18 = vpop.eup %6677 }
0x2f78   :  { %v4911_v40 = vrot.slane %v6678_v18, %v9245_v10  ;;  %v4915_v42 = vrot.slane %v6678_v18, %v9252_v22 }
0x2f7a   :  { %v4918_v29 = vmul.f32 %v6674_v3, %v4911_v40  ;;  %v4919_v47 = vmul.f32 %v6676_v26, %v4915_v42  ;;  %v9274_v42 = vld [vmem:[#allocation40_spill] sm:$0xff] }
0x2f7c   :  { %4922 = vperm.xlu0 %6400, %v4918_v29  }
0x2f80   :  { %4927 = vperm.xlu0 %6400, %v4919_v47  }
0x2f93   :  { %v5018_v21 = vpop.f32.mrb[88].mxu1  ;;  %v5059_v44 = vpop.f32.mrb[92].mxu0 }
0x2f94   :  { %v5020_v59 = vpop.f32.mrb[89].mxu1  ;;  %v6256_v23 = vpop.f32.mrb[93].mxu0 }
0x2f95   :  { %v5022_v38 = vpop.f32.mrb[90].mxu1  ;;  %v5062_v62 = vpop.f32.mrb[94].mxu0  ;;  %v9275_v23 = vld [vmem:[#allocation42_spill] sm:$0xff] }
0x2f96   :  { %v5023_v25 = vpop.f32.mrb[91].mxu1  ;;  %v6257_v5 = vpop.f32.mrb[95].mxu0 }
0x2ffb   :  { %v4923_v17 = vpop.permute.xlu0 %4922 }
0x2ffc   :  { %v4930_v27 = vmul.f32 %v4923_v17, %v9257_v19  ;;  %v4931_v12 = vmul.f32 %v4923_v17, %v9258_v24  ;;  %v4932_v3 = vmul.f32 %v4923_v17, %v9259_v20 }
0x2ffe   :  { %v4936_v36 = vrot.slane %v4930_v27, 4  ;;  %v4942_v14 = vrot.slane %v4931_v12, 4  ;;  %v4948_v32 = vrot.slane %v4932_v3, 4 }
0x2fff   :  { %v4928_v26 = vpop.permute.xlu0 %4927 }
0x3000   :  { %v4937_v39 = vadd.f32 %v4936_v36, %v4930_v27  ;;  %v4943_v18 = vadd.f32 %v4942_v14, %v4931_v12  ;;  %v4949_v40 = vadd.f32 %v4948_v32, %v4932_v3  ;;  %v4933_v29 = vmul.f32 %v4928_v26, %v9260_v15 }
0x3001   :  { %v4934_v47 = vmul.f32 %v4928_v26, %v9274_v42  ;;  %v4935_v38 = vmul.f32 %v4928_v26, %v9275_v23 }
0x3002   :  { %v4938_v62 = vrot.slane %v4937_v39, 2  ;;  %v4944_v25 = vrot.slane %v4943_v18, 2  ;;  %v4950_v5 = vrot.slane %v4949_v40, 2  ;;  %v4954_v19 = vrot.slane %v4933_v29, 4 }
0x3003   :  { %v4960_v24 = vrot.slane %v4934_v47, 4  ;;  %v4966_v58 = vrot.slane %v4935_v38, 4 }
0x3004   :  { %v4939_v17 = vadd.f32 %v4938_v62, %v4937_v39  ;;  %v4955_v20 = vadd.f32 %v4954_v19, %v4933_v29  ;;  %v4945_v51 = vadd.f32 %v4944_v25, %v4943_v18  ;;  %v4951_v50 = vadd.f32 %v4950_v5, %v4949_v40 }
0x3005   :  { %v4961_v9 = vadd.f32 %v4960_v24, %v4934_v47  ;;  %v4967_v27 = vadd.f32 %v4966_v58, %v4935_v38 }
0x3006   :  { %v4956_v12 = vrot.slane %v4955_v20, 2  ;;  %v4940_v14 = vrot.slane %v4939_v17, 1  ;;  %v4946_v42 = vrot.slane %v4945_v51, 1  ;;  %v4952_v15 = vrot.slane %v4951_v50, 1 }
0x3007   :  { %v4962_v3 = vrot.slane %v4961_v9, 2  ;;  %v4968_v36 = vrot.slane %v4967_v27, 2 }
0x3008   :  { %v4957_v32 = vadd.f32 %v4956_v12, %v4955_v20  ;;  %v4941_v10 = vadd.f32 %v4940_v14, %v4939_v17  ;;  %v4947_v39 = vadd.f32 %v4946_v42, %v4945_v51  ;;  %v4953_v19 = vadd.f32 %v4952_v15, %v4951_v50  ;;  %v9284_v14 = vld [vmem:[#allocation35_spill] sm:$0xff] }
0x3009   :  { %v4963_v26 = vadd.f32 %v4962_v3, %v4961_v9  ;;  %v4969_v23 = vadd.f32 %v4968_v36, %v4967_v27  ;;  %v4802_v15 = vadd.f32 %v8671_v55, %v7864_v43  ;;  %v9283_v55 = vld [vmem:[#allocation24_spill] sm:$0xff] }
0x300a   :  { %v4958_v22 = vrot.slane %v4957_v32, 1 }
0x300b   :  { %v4964_v61 = vrot.slane %v4963_v26, 1  ;;  %v4970_v41 = vrot.slane %v4969_v23, 1 }
0x300c   :  { %v4959_v49 = vadd.f32 %v4958_v22, %v4957_v32 }
0x300d   :  { %v4965_v18 = vadd.f32 %v4964_v61, %v4963_v26  ;;  %v4971_v40 = vadd.f32 %v4970_v41, %v4969_v23  ;;  %v9285_v26 = vld [vmem:[#allocation38_spill] sm:$0xff] }
0x300e   :  { %v4978_v24 = vsel %vm2013_vm12, %v4959_v49, %v4941_v10 }
0x300f   :  { %v4979_v58 = vsel %vm2013_vm12, %v4965_v18, %v4947_v39  ;;  %v4980_v29 = vsel %vm2013_vm12, %v4971_v40, %v4953_v19  ;;  %v6331_v20 = vadd.f32 %v7986_v13, %v4978_v24  ;;  %v9286_v18 = vld [vmem:[#allocation53_spill] sm:$0xff] }
0x3010   :  { %v5060_v47 = vadd.f32 %v5059_v44, %v4980_v29  ;;  %v6334_v9 = vadd.f32 %v7990_v37, %v4979_v58 }
0x3011   :  { %v6332_v38 = vadd.f32 %v6331_v20, %v5018_v21 }
0x3012   :  { %v6335_v62 = vadd.f32 %v6334_v9, %v5020_v59  ;;  %v5067_v51 = vadd.f32 %v5060_v47, %v7867_v52  ;;  %v9287_v9 = vld [vmem:[#allocation33_spill] sm:$0xff] }
0x3013   :  { %v5833_v25 = vmul.f32 -1.442695, %v6332_v38 }
0x3014   :  { %v5834_v22 = vmul.f32 -1.442695, %v6335_v62 }
0x3015   :  { %6679 = vpow2.f32 %v5833_v25 }
0x3016   :  { %6681 = vpow2.f32 %v5834_v22 }
0x301f   :  { %v6680_v50 = vpop.eup %6679 }
0x3020   :  { %v5072_v61 = vadd.f32 1.0, %v6680_v50  ;;  %v6682_v41 = vpop.eup %6681 }
0x3021   :  { %v5079_v10 = vadd.f32 1.0, %v6682_v41  ;;  %v9288_v41 = vld [vmem:[#allocation45_spill] sm:$0xff] }
0x3022   :  { %6683 = vrcp.f32 %v5072_v61 }
0x3023   :  { %6685 = vrcp.f32 %v5079_v10 }
0x302c   :  { %v6684_v49 = vpop.eup %6683 }
0x302d   :  { %v5082_v44 = vmul.f32 %v6684_v49, %v4802_v15  ;;  %v6686_v21 = vpop.eup %6685 }
0x302e   :  { %v5085_v59 = vsub.f32 1.0, %v6686_v21  ;;  %v5087_v17 = vmul.f32 %v6686_v21, %v8567_v11  ;;  %v9277_v11 = vld [vmem:[#allocation34_spill] sm:$0xff] }
0x302f   :  { %v5083_v42 = vadd.f32 %v5082_v44, %v5067_v51 }
0x3031   :  { %6687 = vtanh.f32 %v5083_v42 }
0x303b   :  { %v6688_v23 = vpop.eup %6687 }
0x303c   :  { %v5086_v5 = vmul.f32 %v6688_v23, %v5085_v59 }
0x303e   :  { %v8749_v27 = vadd.f32 %v5087_v17, %v5086_v5  ;;  %v9289_v17 = vld [vmem:[#allocation25_spill] sm:$0xff] }
0x3040   :  { %v5089_v12 = vpack.c.bf16 %v8749_v27, %v8749_v27 }
0x3042   :  { %6263 = vmatmul.mubr.msk.bf16.vlgmr.msra.gmra.mrb[92].mxu1 %vm405_vm2, %v5089_v12  ;;  %5837 = vmatmul.mubr.msk.bf16.vlgmr.msra.gmra.mrb[96].mxu0 %vm405_vm2, %v5089_v12 }
0x3043   :  { %5208 = vmatpush1.bf16.msra.mxu1 %v8573_v0  ;;  %5239 = vmatprep.mubr.bf16.mxu1 %v9126_v45  ;;  %v9278_v0 = vld [vmem:[#allocation47_spill] sm:$0xff] }
0x3044   :  { %5209 = vmatprep.subr.bf16.mxu1 %v8577_v4  ;;  %5425 = vmatpush1.bf16.msra.mxu0 %v8580_v30  ;;  %v9279_v4 = vld [vmem:[#allocation48_spill] sm:$0xff]  ;;  %v9280_v30 = vld [vmem:[#allocation27_spill] sm:$0xff] }
0x3045   :  { %5426 = vmatprep.subr.bf16.mxu0 %v8583_v1  ;;  %5456 = vmatprep.mubr.bf16.mxu0 %v9126_v45  ;;  %v9276_v45 = vld [vmem:[#allocation46_spill] sm:$0xff] }
0x3047   :  { %5210 = vmatpush1.bf16.msra.mxu1 %v8587_v2  ;;  %v8798_v2 = vld [vmem:[%s8958_s13] ss:$0 sm:$0xff]  ;;  %s7069_s13 = smov [#allocation17]  }
0x3048   :  { %6266 = vmatprep.subr.bf16.mxu1 %v9129_v57  ;;  %5427 = vmatpush1.bf16.msra.mxu0 %v8591_v6  ;;  %s5656_s26 = sshll.u32 %s7069_s13, 4  ;;  %s5657_s26 = int_to_ptr.vmem [resolvable:$true] %s5656_s26 }
0x3049   :  { %5428 = vmatprep.subr.bf16.mxu0 %v8594_v54  ;;  %s7011_s2 = scalar_lea.vmem %s5657_s26, 256  ;;  %p7016_p3 = scmp.lt.s32.totalorder %s5657_s26, %s5657_s26 }
0x304a   :  { %5838 = vmatmul.mubr.msk.bf16.vlgmr.msra.gmra.mrb[96].mxu1 %vm405_vm2, %v5089_v12  ;;  %p7012_p2 = scmp.ne.s32.totalorder %s5657_s26, %s7011_s2  ;;  %p7017_p4 = scmp.lt.s32.totalorder %s7011_s2, %s7011_s2 }
0x304b   :  { %6267 = vmatpush3.bf16.msra.mxu1 %v8598_v31  ;;  %6282 = vmatprep.mubr.msk.bf16.mxu1 %vm7064_vm0, %v9129_v57 }
0x304c   :  { %6268 = vmatprep.subr.bf16.mxu1 %v9129_v57  ;;  %5429 = vmatpush1.bf16.msra.mxu0 %v8604_v48  ;;  %p7018_p5 = por %p7017_p4, %p7016_p3 }
0x304d   :  { %5430 = vmatprep.subr.bf16.mxu0 %v8607_v63 }
0x304e   :  { %p7019_p6 = pnand %p7018_p5, %p7012_p2 }
0x304f   :  { %6269 = vmatpush3.bf16.msra.mxu1 %v8610_v33 }
0x3050   :  { %6270 = vmatprep.subr.bf16.mxu1 %v9129_v57  ;;  %5431 = vmatpush1.bf16.msra.mxu0 %v8614_v53 }
0x3051   :  { %5432 = vmatprep.subr.bf16.mxu0 %v8617_v16  ;;  %v9281_v16 = vld [vmem:[#allocation43_spill] sm:$0xff] }
0x3053   :  { %6271 = vmatpush3.bf16.msra.mxu1 %v8620_v35 }
0x3054   :  { %6272 = vmatprep.subr.bf16.mxu1 %v9129_v57  ;;  %5433 = vmatpush1.bf16.msra.mxu0 %v8624_v7 }
0x3055   :  { %5434 = vmatprep.subr.bf16.mxu0 %v8627_v60 }
0x3057   :  { %6273 = vmatpush3.bf16.msra.mxu1 %v8630_v34  ;;  %v9282_v34 = vld [vmem:[#allocation26_spill] sm:$0xff] }
0x3058   :  { %6274 = vmatprep.subr.bf16.mxu1 %v9129_v57  ;;  %5435 = vmatpush1.bf16.msra.mxu0 %v8634_v28 }
0x3059   :  { %5436 = vmatprep.subr.bf16.mxu0 %v8637_v46 }
0x305b   :  { %6275 = vmatpush3.bf16.msra.mxu1 %v8640_v8 }
0x305c   :  { %6276 = vmatprep.subr.bf16.mxu1 %v9129_v57  ;;  %5437 = vmatpush1.bf16.msra.mxu0 %v8644_v56 }
0x305d   :  { %5438 = vmatprep.subr.bf16.mxu0 %v9276_v45 }
0x305f   :  { %6277 = vmatpush3.bf16.msra.mxu1 %v9277_v11 }
0x3060   :  { %6278 = vmatprep.subr.bf16.mxu1 %v9129_v57  ;;  %5439 = vmatpush1.bf16.msra.mxu0 %v9278_v0 }
0x3061   :  { %6286 = vmatprep.subr.bf16.mxu0 %v9129_v57 }
0x3063   :  { %6279 = vmatpush3.bf16.msra.mxu1 %v9279_v4 }
0x3064   :  { %6280 = vmatprep.subr.bf16.mxu1 %v9129_v57 }
0x3067   :  { %6281 = vmatpush3.bf16.msra.mxu1 %v9280_v30 }
0x3115   :  { %v5127_v1 = vpop.f32.mrb[92].mxu1 }
0x3116   :  { %v8801_v6 = vadd.f32 %v8798_v2, %v5127_v1  ;;  %v6264_v54 = vpop.f32.mrb[93].mxu1 }
0x3117   :  { %v5130_v31 = vpop.f32.mrb[94].mxu1 }
0x3118   :  { %v6265_v48 = vpop.f32.mrb[95].mxu1  ;;  %v5133_v63 = vsel %vm1573_vm4, %v8801_v6, -inf }
0x3119   :  { %5134 = vmax.xlane.f32.xlu0 %v5133_v63 }
0x311d   :  { %v8805_v33 = vpop.f32.mrb[96].mxu1 }
0x311e   :  { %v5243_v53 = vpop.f32.mrb[97].mxu1 }
0x311f   :  { %v5244_v35 = vadd.f32 %v5243_v53, %v9281_v16  ;;  %v5245_v7 = vpop.f32.mrb[98].mxu1 }
0x3120   :  { %v5246_v60 = vpop.f32.mrb[99].mxu1 }
0x3121   :  { %v5255_v28 = vrot.slane %v5244_v35, %v9282_v34  ;;  %v9290_v35 = vld [vmem:[#allocation28_spill] sm:$0xff]  ;;  %v9291_v60 = vmov 1.0|1.0  }
0x3123   :  { %v5256_v46 = vcombine.high %v5255_v28, %v5255_v28  ;;  %v5263_v8 = vrot.slane %v5255_v28, %v9282_v34  ;;  %v9293_v28 = vld [vmem:[#allocation56_spill] sm:$0xff] }
0x3125   :  { %v5270_v56 = vrot.slane %v5256_v46, %v9282_v34  ;;  %v5274_v3 = vrot.slane %v5263_v8, %v9283_v55  ;;  %v9292_v34 = vld [vmem:[#allocation54_spill] sm:$0xff] }
0x3127   :  { %v5278_v36 = vrot.slane %v5270_v56, %v9283_v55  ;;  %v5281_v32 = vadd.f32 %v5274_v3, %v9284_v14 }
0x3129   :  { %v5282_v39 = vadd.f32 %v5278_v36, %v9285_v26  ;;  %6689 = vtanh.f32 %v5281_v32 }
0x312b   :  { %6691 = vtanh.f32 %v5282_v39 }
0x3133   :  { %v6690_v19 = vpop.eup %6689 }
0x3134   :  { %v5285_v40 = vmul.f32 %v9286_v18, %v6690_v19 }
0x3135   :  { %v6692_v24 = vpop.eup %6691 }
0x3136   :  { %v5287_v58 = vsel %vm405_vm2, %v5285_v40, 0.0  ;;  %v5286_v29 = vmul.f32 %v9286_v18, %v6692_v24 }
0x3137   :  { %5288 = vadd.xlane.f32.xlu1 %v5287_v58 }
0x3138   :  { %v5290_v20 = vsel %vm405_vm2, %v5286_v29, 0.0 }
0x313b   :  { %5291 = vadd.xlane.f32.xlu1 %v5290_v20 }
0x31a6   :  { %v8819_v47 = vpop.xlane.xlu0 %5134 }
0x31a7   :  { %vm5145_vm7 = vcmp.eq.f32.partialorder %v8801_v6, %v8819_v47 }
0x31a8   :  { %v5146_v38 = vsel %vm5145_vm7, %v9287_v9, 128 }
0x31a9   :  { %v5147_v62 = vsel %vm1573_vm4, %v5146_v38, 2147483647 }
0x31aa   :  { %v5149_v25 = vshra.s32 %v5147_v62, 16  ;;  %v5148_v44 = vand.u32 65535, %v5147_v62 }
0x31ac   :  { %v5151_v22 = vcvt.s32.f32 %v5149_v25  ;;  %v5150_v21 = vcvt.s32.f32 %v5148_v44 }
0x31ae   :  { %5152 = vmin.xlane.f32.xlu0 %v5151_v22 }
0x31c4   :  { %v5289_v50 = vpop.xlane.xlu1 %5288 }
0x31c5   :  { %v5298_v10 = vrot.slane %v5289_v50, %v9288_v41 }
0x31c8   :  { %v5292_v61 = vpop.xlane.xlu1 %5291 }
0x31c9   :  { %v5302_v15 = vrot.slane %v5292_v61, %v9288_v41 }
0x31cb   :  { %v5303_v49 = vsel %vm2013_vm12, %v5302_v15, %v5298_v10  ;;  %v9295_v10 = vld [vmem:[#allocation37_spill] sm:$0xff] }
0x31cc   :  { %v5305_v51 = vsel %vm2016_vm13, %v5303_v49, -inf }
0x31cd   :  { %5306 = vmax.xlane.f32.xlu1 %v5305_v51 }
0x323b   :  { %v5153_v42 = vpop.xlane.xlu0 %5152 }
0x323c   :  { %vm5154_vm5 = vcmp.eq.f32.partialorder %v5151_v22, %v5153_v42  ;;  %v5159_v54 = vcvt.f32.s32 %v5153_v42 }
0x323d   :  { %v5155_v59 = vsel %vm5154_vm5, %v5150_v21, inf }
0x323e   :  { %5156 = vmin.xlane.f32.xlu0 %v5155_v59  ;;  %v5160_v48 = vshll.u32 %v5159_v54, 16 }
0x325a   :  { %v5307_v23 = vpop.xlane.xlu1 %5306 }
0x325b   :  { %v5312_v5 = vrot.slane %v5307_v23, %v9283_v55  ;;  %v5316_v12 = vrot.slane %v5307_v23, %v9289_v17 }
0x325d   :  { %v5319_v45 = vsub.f32 %v5289_v50, %v5312_v5  ;;  %v5320_v11 = vsub.f32 %v5292_v61, %v5316_v12  ;;  %v9294_v50 = vld [vmem:[#allocation36_spill] sm:$0xff] }
0x325f   :  { %v5321_v0 = vmul.f32 1.442695, %v5319_v45  ;;  %v5323_v4 = vmul.f32 1.442695, %v5320_v11  ;;  %v9298_v45 = vld [vmem:[#allocation40_spill] sm:$0xff] }
0x3261   :  { %6693 = vpow2.f32 %v5321_v0  ;;  %v9299_v0 = vld [vmem:[#allocation42_spill] sm:$0xff] }
0x3262   :  { %6695 = vpow2.f32 %v5323_v4 }
0x326b   :  { %v6694_v30 = vpop.eup %6693 }
0x326c   :  { %v6696_v1 = vpop.eup %6695  ;;  %5328 = vperm.xlu1 %6399, %v6694_v30  }
0x326d   :  { %5331 = vperm.xlu0 %6400, %v6696_v1  }
0x32cb   :  { %v5157_v31 = vpop.xlane.xlu0 %5156 }
0x32cc   :  { %v5158_v63 = vcvt.f32.s32 %v5157_v31 }
0x32ce   :  { %v5161_v53 = vadd.s32 %v5160_v48, %v5158_v63 }
0x32d0   :  { %vm5162_vm11 = vcmp.eq.s32.totalorder %v9287_v9, %v5161_v53  ;;  %v5637_v16 = vrot.slane %v5161_v53, %v9288_v41 }
0x32d1   :  { %vm5839_vm14 = vmpackc.low %vm5162_vm11, %vm5162_vm11 }
0x32d2   :  { %v8835_v7 = vsel %vm1585_vm8, %v9290_v35, %v5637_v16  ;;  %5840 = vmatmul.mubr.msk.bf16.vlgmr.msra.gmra.mrb[96].mxu0 %vm5839_vm14, %v9291_v60  ;;  %6283 = vmatmul.mubr.msk.bf16.vlgmr.msra.gmra.mrb[100].mxu1 %vm5839_vm14, %v9291_v60 }
0x32d3   :  { %6287 = vmatpush3.bf16.msra.mxu0 %v9292_v34  ;;  %6290 = vmatprep.mubr.msk.bf16.mxu0 %vm7064_vm0, %v9129_v57 }
0x32d4   :  { %6288 = vmatprep.subr.bf16.mxu0 %v9129_v57 }
0x32d7   :  { %6289 = vmatpush3.bf16.msra.mxu0 %v9293_v28 }
0x32eb   :  { %v5329_v46 = vpop.permute.xlu1 %5328 }
0x32ec   :  { %v5332_v8 = vpop.permute.xlu0 %5331  ;;  %v5336_v56 = vrot.slane %v5329_v46, %v9288_v41 }
0x32ed   :  { %v5340_v3 = vrot.slane %v5332_v8, %v9288_v41 }
0x32ef   :  { %v5341_v36 = vsel %vm2013_vm12, %v5340_v3, %v5336_v56 }
0x32f0   :  { %v5343_v14 = vsel %vm2016_vm13, %v5341_v36, 0.0 }
0x32f1   :  { %5344 = vadd.xlane.f32.xlu1 %v5343_v14 }
0x337e   :  { %v5345_v32 = vpop.xlane.xlu1 %5344 }
0x337f   :  { %6697 = vrcp.f32 %v5345_v32 }
0x3389   :  { %v6698_v26 = vpop.eup %6697 }
0x338a   :  { %v5351_v39 = vrot.slane %v6698_v26, %v9283_v55  ;;  %v5355_v57 = vrot.slane %v6698_v26, %v9289_v17  ;;  %v9296_v55 = vld [vmem:[#allocation41_spill] sm:$0xff]  ;;  %v9297_v17 = vld [vmem:[#allocation39_spill] sm:$0xff] }
0x338c   :  { %v5358_v19 = vmul.f32 %v6694_v30, %v5351_v39  ;;  %v5359_v18 = vmul.f32 %v6696_v1, %v5355_v57 }
0x338e   :  { %5362 = vperm.xlu0 %6400, %v5358_v19  }
0x3392   :  { %5367 = vperm.xlu0 %6400, %v5359_v18  }
0x33a5   :  { %v5458_v40 = vpop.f32.mrb[96].mxu0  ;;  %v5499_v24 = vpop.f32.mrb[100].mxu1 }
0x33a6   :  { %v5460_v58 = vpop.f32.mrb[97].mxu0  ;;  %v6284_v29 = vpop.f32.mrb[101].mxu1 }
0x33a7   :  { %v5462_v20 = vpop.f32.mrb[98].mxu0  ;;  %v5502_v38 = vpop.f32.mrb[102].mxu1 }
0x33a8   :  { %v5463_v62 = vpop.f32.mrb[99].mxu0  ;;  %v6285_v25 = vpop.f32.mrb[103].mxu1 }
0x340d   :  { %v5363_v22 = vpop.permute.xlu0 %5362 }
0x340e   :  { %v5370_v61 = vmul.f32 %v5363_v22, %v9294_v50  ;;  %v5371_v15 = vmul.f32 %v5363_v22, %v9295_v10  ;;  %v5372_v49 = vmul.f32 %v5363_v22, %v9296_v55 }
0x3410   :  { %v5376_v51 = vrot.slane %v5370_v61, 4  ;;  %v5382_v44 = vrot.slane %v5371_v15, 4  ;;  %v5388_v42 = vrot.slane %v5372_v49, 4 }
0x3411   :  { %v5368_v21 = vpop.permute.xlu0 %5367 }
0x3412   :  { %v5377_v59 = vadd.f32 %v5376_v51, %v5370_v61  ;;  %v5383_v23 = vadd.f32 %v5382_v44, %v5371_v15  ;;  %v5389_v5 = vadd.f32 %v5388_v42, %v5372_v49  ;;  %v5373_v12 = vmul.f32 %v5368_v21, %v9297_v17 }
0x3413   :  { %v5374_v11 = vmul.f32 %v5368_v21, %v9298_v45  ;;  %v5375_v4 = vmul.f32 %v5368_v21, %v9299_v0 }
0x3414   :  { %v5378_v30 = vrot.slane %v5377_v59, 2  ;;  %v5384_v1 = vrot.slane %v5383_v23, 2  ;;  %v5390_v54 = vrot.slane %v5389_v5, 2  ;;  %v5394_v31 = vrot.slane %v5373_v12, 4 }
0x3415   :  { %v5400_v48 = vrot.slane %v5374_v11, 4  ;;  %v5406_v63 = vrot.slane %v5375_v4, 4 }
0x3416   :  { %v5379_v53 = vadd.f32 %v5378_v30, %v5377_v59  ;;  %v5395_v16 = vadd.f32 %v5394_v31, %v5373_v12  ;;  %v5385_v35 = vadd.f32 %v5384_v1, %v5383_v23  ;;  %v5391_v60 = vadd.f32 %v5390_v54, %v5389_v5  ;;  %v9300_v54 = vld [vmem:[#allocation55_spill] sm:$0xff]  ;;  %v9301_v31 = vld [vmem:[#allocation50_spill] sm:$0xff] }
0x3417   :  { %v5401_v34 = vadd.f32 %v5400_v48, %v5374_v11  ;;  %v5407_v28 = vadd.f32 %v5406_v63, %v5375_v4  ;;  %v5242_v12 = vadd.f32 %v8805_v33, %v7864_v43  ;;  %v8868_v43 = vsub.f32 %v9301_v31, %v9300_v54  ;;  %v9302_v33 = vld [vmem:[#allocation32_spill] sm:$0xff]  ;;  %v9303_v48 = vld [vmem:[#allocation31_spill] sm:$0xff] }
0x3418   :  { %v5396_v46 = vrot.slane %v5395_v16, 2  ;;  %v5380_v3 = vrot.slane %v5379_v53, 1  ;;  %v5386_v14 = vrot.slane %v5385_v35, 1  ;;  %v5392_v32 = vrot.slane %v5391_v60, 1 }
0x3419   :  { %v5402_v8 = vrot.slane %v5401_v34, 2  ;;  %v5408_v56 = vrot.slane %v5407_v28, 2  ;;  %v8873_v63 = vsub.f32 %v9303_v48, %v9302_v33 }
0x341a   :  { %v5397_v36 = vadd.f32 %v5396_v46, %v5395_v16  ;;  %v5381_v29 = vadd.f32 %v5380_v3, %v5379_v53  ;;  %v5387_v38 = vadd.f32 %v5386_v14, %v5385_v35  ;;  %v5393_v62 = vadd.f32 %v5392_v32, %v5391_v60  ;;  %v9305_v32 = vld [vmem:[#allocation51_spill] sm:$0xff] }
0x341b   :  { %v5403_v26 = vadd.f32 %v5402_v8, %v5401_v34  ;;  %v5409_v39 = vadd.f32 %v5408_v56, %v5407_v28  ;;  %v4257_v53 = vmul.f32 1.442695, %v8873_v63 }
0x341c   :  { %v5398_v19 = vrot.slane %v5397_v36, 1 }
0x341d   :  { %v5404_v57 = vrot.slane %v5403_v26, 1  ;;  %v5410_v18 = vrot.slane %v5409_v39, 1 }
0x341e   :  { %v5399_v20 = vadd.f32 %v5398_v19, %v5397_v36  ;;  %v9306_v19 = vld [vmem:[#allocation30_spill] sm:$0xff] }
0x341f   :  { %v5405_v25 = vadd.f32 %v5404_v57, %v5403_v26  ;;  %v5411_v22 = vadd.f32 %v5410_v18, %v5409_v39  ;;  %v9307_v57 = vld [vmem:[#allocation29_spill] sm:$0xff] }
0x3420   :  { %v5418_v50 = vsel %vm2013_vm12, %v5399_v20, %v5381_v29  ;;  %v8893_v18 = vsub.f32 %v9307_v57, %v9306_v19  ;;  %v9308_v29 = vld [vmem:[#allocation60_spill] sm:$0xff]  ;;  %v9309_v20 = vld [vmem:[#allocation59_spill] sm:$0xff] }
0x3421   :  { %v5419_v61 = vsel %vm2013_vm12, %v5405_v25, %v5387_v38  ;;  %v5420_v10 = vsel %vm2013_vm12, %v5411_v22, %v5393_v62  ;;  %v6337_v15 = vadd.f32 %v7986_v13, %v5418_v50  ;;  %v8897_v38 = vsub.f32 %v9309_v20, %v9308_v29  ;;  %v9310_v50 = vld [vmem:[#allocation49_spill] sm:$0xff] }
0x3422   :  { %v5500_v55 = vadd.f32 %v5499_v24, %v5420_v10  ;;  %v6340_v49 = vadd.f32 %v7990_v37, %v5419_v61  ;;  %v2937_v62 = vmul.f32 1.442695, %v8893_v18  ;;  %v9311_v61 = vld [vmem:[#allocation44_spill] sm:$0xff] }
0x3423   :  { %v6338_v51 = vadd.f32 %v6337_v15, %v5458_v40  ;;  %v3817_v22 = vmul.f32 1.442695, %v8897_v38  ;;  %v8903_v10 = vsub.f32 %v9311_v61, %v9310_v50 }
0x3424   :  { %v6341_v44 = vadd.f32 %v6340_v49, %v5460_v58  ;;  %v5507_v13 = vadd.f32 %v5500_v55, %v7867_v52  ;;  %v3377_v52 = vmul.f32 1.442695, %v8868_v43 }
0x3425   :  { %v5843_v42 = vmul.f32 -1.442695, %v6338_v51 }
0x3426   :  { %v5844_v21 = vmul.f32 -1.442695, %v6341_v44  ;;  %v4697_v44 = vmul.f32 1.442695, %v8903_v10 }
0x3427   :  { %6699 = vpow2.f32 %v5843_v42 }
0x3428   :  { %6701 = vpow2.f32 %v5844_v21 }
0x3431   :  { %v6700_v59 = vpop.eup %6699 }
0x3432   :  { %v5512_v23 = vadd.f32 1.0, %v6700_v59  ;;  %v6702_v5 = vpop.eup %6701 }
0x3433   :  { %v5519_v17 = vadd.f32 1.0, %v6702_v5 }
0x3434   :  { %6703 = vrcp.f32 %v5512_v23 }
0x3435   :  { %6705 = vrcp.f32 %v5519_v17 }
0x343e   :  { %v6704_v45 = vpop.eup %6703 }
0x343f   :  { %v5522_v24 = vmul.f32 %v6704_v45, %v5242_v12  ;;  %v6706_v40 = vpop.eup %6705 }
0x3440   :  { %v5525_v58 = vsub.f32 1.0, %v6706_v40  ;;  %v5527_v4 = vmul.f32 %v6706_v40, %v8749_v27  ;;  %v8878_v27 = vsub.f32 %v8801_v6, %v8819_v47 }
0x3441   :  { %v5523_v37 = vadd.f32 %v5522_v24, %v5507_v13 }
0x3442   :  { %v5137_v16 = vmul.f32 1.442695, %v8878_v27 }
0x3443   :  { %6707 = vtanh.f32 %v5523_v37 }
0x3444   :  { %6709 = vpow2.f32 %v3377_v52 }
0x3445   :  { %6711 = vpow2.f32 %v4257_v53 }
0x3446   :  { %6713 = vpow2.f32 %v5137_v16 }
0x344d   :  { %v6708_v11 = vpop.eup %6707 }
0x344e   :  { %v5526_v0 = vmul.f32 %v6708_v11, %v5525_v58  ;;  %v6710_v56 = vpop.eup %6709 }
0x344f   :  { %v3379_v3 = vsel %vm1573_vm4, %v6710_v56, 0.0  ;;  %v6712_v36 = vpop.eup %6711 }
0x3450   :  { %v5528_v30 = vadd.f32 %v5527_v4, %v5526_v0  ;;  %v4259_v6 = vsel %vm1573_vm4, %v6712_v36, 0.0  ;;  %v6714_v47 = vpop.eup %6713 }
0x3451   :  { %v5139_v14 = vsel %vm1573_vm4, %v6714_v47, 0.0 }
0x3452   :  { %v5529_v1 = vpack.c.bf16 %v5528_v30, %v5528_v30 }
0x3454   :  { %6291 = vmatmul.mubr.msk.bf16.vlgmr.msra.gmra.mrb[100].mxu0 %vm405_vm2, %v5529_v1 }
0x3527   :  { %v5567_v35 = vpop.f32.mrb[100].mxu0 }
0x3528   :  { %v5568_v60 = vadd.f32 %v8798_v2, %v5567_v35  ;;  %v6292_v34 = vpop.f32.mrb[101].mxu0  ;;  %v9304_v2 = vld [vmem:[#allocation52_spill] sm:$0xff] }
0x3529   :  { %v5570_v28 = vpop.f32.mrb[102].mxu0  ;;  %v8888_v26 = vsub.f32 %v9305_v32, %v9304_v2 }
0x352a   :  { %v6293_v46 = vpop.f32.mrb[103].mxu0  ;;  %v5573_v8 = vsel %vm1573_vm4, %v5568_v60, -inf }
0x352b   :  { %5574 = vmax.xlane.f32.xlu0 %v5573_v8  ;;  %v2497_v39 = vmul.f32 1.442695, %v8888_v26 }
0x352d   :  { %6715 = vpow2.f32 %v2497_v39 }
0x352e   :  { %6717 = vpow2.f32 %v2937_v62 }
0x352f   :  { %3380 = vadd.xlane.f32.xlu0 %v3379_v3  ;;  %6719 = vpow2.f32 %v3817_v22 }
0x3533   :  { %4260 = vadd.xlane.f32.xlu0 %v4259_v6 }
0x3537   :  { %5140 = vadd.xlane.f32.xlu0 %v5139_v14  ;;  %v6716_v59 = vpop.eup %6715 }
0x3538   :  { %v6718_v17 = vpop.eup %6717 }
0x3539   :  { %v6720_v45 = vpop.eup %6719  ;;  %v2939_v13 = vsel %vm1573_vm4, %v6718_v17, 0.0 }
0x353a   :  { %v3819_v11 = vsel %vm1573_vm4, %v6720_v45, 0.0 }
0x35b8   :  { %v5575_v25 = vpop.xlane.xlu0 %5574 }
0x35b9   :  { %vm5585_vm0 = vcmp.eq.f32.partialorder %v5568_v60, %v5575_v25  ;;  %v8908_v42 = vsub.f32 %v5568_v60, %v5575_v25 }
0x35ba   :  { %v5586_v15 = vsel %vm5585_vm0, %v9287_v9, 128  ;;  %v2499_v9 = vsel %vm1573_vm4, %v6716_v59, 0.0 }
0x35bb   :  { %v5587_v55 = vsel %vm1573_vm4, %v5586_v15, 2147483647  ;;  %v5577_v5 = vmul.f32 1.442695, %v8908_v42 }
0x35bc   :  { %v3381_v49 = vpop.xlane.xlu0 %3380  ;;  %v5589_v51 = vshra.s32 %v5587_v55, 16 }
0x35bd   :  { %6721 = vlog2.f32 %v3381_v49 }
0x35be   :  { %v5591_v21 = vcvt.s32.f32 %v5589_v51 }
0x35c0   :  { %5592 = vmin.xlane.f32.xlu1 %v5591_v21  ;;  %v4261_v23 = vpop.xlane.xlu0 %4260 }
0x35c1   :  { %6723 = vlog2.f32 %v4261_v23 }
0x35c2   :  { %6725 = vpow2.f32 %v4697_v44 }
0x35c4   :  { %2500 = vadd.xlane.f32.xlu1 %v2499_v9  ;;  %v5141_v12 = vpop.xlane.xlu0 %5140 }
0x35c5   :  { %6727 = vlog2.f32 %v5141_v12 }
0x35c6   :  { %6729 = vpow2.f32 %v5577_v5 }
0x35c7   :  { %v6722_v24 = vpop.eup %6721 }
0x35c8   :  { %2940 = vadd.xlane.f32.xlu1 %v2939_v13  ;;  %v3383_v37 = vmul.f32 0.6931472, %v6722_v24 }
0x35ca   :  { %v3384_v58 = vsub.f32 %v8868_v43, %v3383_v37  ;;  %v5588_v43 = vand.u32 65535, %v5587_v55 }
0x35cb   :  { %v6724_v40 = vpop.eup %6723 }
0x35cc   :  { %v6726_v0 = vpop.eup %6725  ;;  %v4263_v4 = vmul.f32 0.6931472, %v6724_v40  ;;  %3820 = vadd.xlane.f32.xlu1 %v3819_v11  ;;  %5604 = vst [vmem:[#allocation17 + $0x4] sm:$0x3] %v3384_v58  ;;  %v5590_v16 = vcvt.s32.f32 %v5588_v43 }
0x35cd   :  { %v4699_v54 = vsel %vm1573_vm4, %v6726_v0, 0.0 }
0x35ce   :  { %v4264_v30 = vsub.f32 %v8873_v63, %v4263_v4 }
0x35cf   :  { %v6728_v1 = vpop.eup %6727 }
0x35d0   :  { %v6730_v31 = vpop.eup %6729  ;;  %5606 = vst [vmem:[#allocation17 + $0x8] sm:$0x3] %v4264_v30  ;;  %v5143_v52 = vmul.f32 0.6931472, %v6728_v1  ;;  %4700 = vadd.xlane.f32.xlu1 %v4699_v54 }
0x35d1   :  { %v5579_v48 = vsel %vm1573_vm4, %v6730_v31, 0.0 }
0x35d2   :  { %v5144_v33 = vsub.f32 %v8878_v27, %v5143_v52 }
0x35d4   :  { %5608 = vst [vmem:[#allocation17 + $0xc] sm:$0x3] %v5144_v33  ;;  %5580 = vadd.xlane.f32.xlu1 %v5579_v48 }
0x364d   :  { %v5593_v53 = vpop.xlane.xlu1 %5592 }
0x364e   :  { %vm5594_vm2 = vcmp.eq.f32.partialorder %v5591_v21, %v5593_v53 }
0x364f   :  { %v5595_v35 = vsel %vm5594_vm2, %v5590_v16, inf }
0x3650   :  { %5596 = vmin.xlane.f32.xlu0 %v5595_v35 }
0x3651   :  { %v2501_v63 = vpop.xlane.xlu1 %2500 }
0x3652   :  { %6731 = vlog2.f32 %v2501_v63 }
0x3655   :  { %v2941_v60 = vpop.xlane.xlu1 %2940 }
0x3656   :  { %6733 = vlog2.f32 %v2941_v60 }
0x3659   :  { %v3821_v34 = vpop.xlane.xlu1 %3820 }
0x365a   :  { %6735 = vlog2.f32 %v3821_v34 }
0x365c   :  { %v6732_v28 = vpop.eup %6731 }
0x365d   :  { %v2503_v46 = vmul.f32 0.6931472, %v6732_v28  ;;  %v4701_v8 = vpop.xlane.xlu1 %4700 }
0x365e   :  { %6737 = vlog2.f32 %v4701_v8 }
0x365f   :  { %v2504_v27 = vsub.f32 %v8888_v26, %v2503_v46 }
0x3660   :  { %v6734_v56 = vpop.eup %6733 }
0x3661   :  { %5602 = vst [vmem:[#allocation17] sm:$0x3] %v2504_v27  ;;  %v2943_v3 = vmul.f32 0.6931472, %v6734_v56  ;;  %v5581_v36 = vpop.xlane.xlu1 %5580 }
0x3662   :  { %6739 = vlog2.f32 %v5581_v36 }
0x3663   :  { %v2944_v6 = vsub.f32 %v8893_v18, %v2943_v3 }
0x3664   :  { %v6736_v47 = vpop.eup %6735 }
0x3665   :  { %5603 = vst [vmem:[#allocation17 + $0x2] sm:$0x3] %v2944_v6  ;;  %v3823_v14 = vmul.f32 0.6931472, %v6736_v47 }
0x3667   :  { %v3824_v2 = vsub.f32 %v8897_v38, %v3823_v14 }
0x3668   :  { %v6738_v32 = vpop.eup %6737 }
0x3669   :  { %5605 = vst [vmem:[#allocation17 + $0x6] sm:$0x3] %v3824_v2  ;;  %v4703_v39 = vmul.f32 0.6931472, %v6738_v32 }
0x366b   :  { %v4704_v19 = vsub.f32 %v8903_v10, %v4703_v39 }
0x366c   :  { %v6740_v57 = vpop.eup %6739 }
0x366d   :  { %5607 = vst [vmem:[#allocation17 + $0xa] sm:$0x3] %v4704_v19  ;;  %v5583_v26 = vmul.f32 0.6931472, %v6740_v57 }
0x366f   :  { %v5584_v29 = vsub.f32 %v8908_v42, %v5583_v26 }
0x3671   :  { %5609 = vst [vmem:[#allocation17 + $0xe] sm:$0x3] %v5584_v29 }
0x3672   :  { %7022 = shalt.err (!%p7019_p6)
}
0x3673   :  { %s7023_s28 = scalar_lea.hbm %s8959_s14, 256 }
0x3674   :  { %p7024_p7 = scmp.ne.s32.totalorder %s8959_s14, %s7023_s28  ;;  %p7027_p8 = scmp.lt.u32.totalorder %s7023_s28, %s8959_s14 }
0x3676   :  { %p7029_p9 = pnand %p7027_p8, %p7024_p7 }
0x3678   :  { %7032 = shalt.err (!%p7029_p9)
}
0x3679   :  { %5662 = dma.vmem_to_hbm [thread:$0]  %s5657_s26, 256, %s8959_s14, [#allocation4], %s7054_s9, %s7054_s9, %s7055_s20   ;;  %v5599_v18 = vcvt.f32.s32 %v5593_v53  ;;  %vm5649_vm4 = vcmask 15360  }
0x367b   :  { %v5600_v38 = vshll.u32 %v5599_v18, 16 }
0x36dd   :  { %v5597_v20 = vpop.xlane.xlu0 %5596 }
0x36de   :  { %v5598_v62 = vcvt.f32.s32 %v5597_v20 }
0x36e0   :  { %v5601_v25 = vadd.s32 %v5600_v38, %v5598_v62 }
0x36e2   :  { %v5641_v22 = vrot.slane %v5601_v25, %v9288_v41 }
0x36e4   :  { %v5648_v50 = vsel %vm1588_vm9, %v8835_v7, %v5641_v22 }
0x36e5   :  { %5650 = vst.msk [vmem:[%s8960_s15] sm:$0xff] %vm5649_vm4, %v5648_v50 }
0x36e6   :  { %7043 = dma.done.wait [#allocation4], 256  }
0x36e7   :  { %7044 = vsyncadd [#allocation4], 4294967040 }
0x36e8   :  { %5670 = vsyncpa [#allocation3], 1 }
0x36e9   :  { %5671 = vsyncpa [#allocation6], 1 }
0x36ea   :  { %5672 = vsyncpa [#allocation9], 1 }
0x36eb   :  { %5673 = vsyncpa [#allocation12], 1 }
0x36ec   :  { %5674 = vsyncpa [#allocation15], 1 }
0x36ed   :  { %5675 = vsyncpa [#allocation4], 1 }

</bundles_post_ra>
